<compile_context>
chip_gen: v7x
topology: tpu7x:2x2x1
jax: 0.10.0
libtpu: 0.0.40
codegen_flags: <defaults>
</compile_context>

<pallas_src>
import functools

import jax
import jax.numpy as jnp
from jax.experimental import pallas as pl
from jax.experimental.pallas import tpu as pltpu

NEG_SLOPE = 0.2
BN_EPS = 1e-5
VMEM_LIMIT = 32 * 1024 * 1024   # safe on v5e/v6e (128 MiB) and v7x (64 MiB)


# ----------------------------------------------------------------------------
# Pallas kernels
# ----------------------------------------------------------------------------
def _matmul_kernel(a_ref, b_ref, o_ref, *, apply_leaky):
    """Single full-K MXU matmul per output tile; optionally fused LeakyReLU."""
    acc = jnp.dot(a_ref[...], b_ref[...], preferred_element_type=jnp.float32)
    if apply_leaky:
        acc = jnp.where(acc >= 0, acc, NEG_SLOPE * acc)
    o_ref[...] = acc.astype(o_ref.dtype)


def _bn_leaky_kernel(x_ref, gamma_ref, beta_ref, o_ref, *, inv_rows):
    """Fused BatchNorm (batch stats, biased var) + LeakyReLU(0.2), one pass."""
    x = x_ref[...]
    mean = jnp.sum(x, axis=0, keepdims=True) * inv_rows
    cen = x - mean
    var = jnp.sum(cen * cen, axis=0, keepdims=True) * inv_rows
    scale = gamma_ref[...] * jax.lax.rsqrt(var + BN_EPS)
    y = cen * scale + beta_ref[...]
    o_ref[...] = jnp.where(y >= 0, y, NEG_SLOPE * y)


def _bn_leaky_head_kernel(x_ref, gamma_ref, beta_ref, w_ref, sel_ref, o_ref,
                          *, inv_rows):
    """Fused BatchNorm + LeakyReLU + final full-window conv (OC=1) reduction.

    x:   (B*HW, C) activations
    w:   (B*HW, C) final-conv weights (tiled over batch)
    sel: (B, B*HW) one-hot batch selector
    out: (B, 1) per-batch scalar
    """
    x = x_ref[...]
    mean = jnp.sum(x, axis=0, keepdims=True) * inv_rows
    cen = x - mean
    var = jnp.sum(cen * cen, axis=0, keepdims=True) * inv_rows
    scale = gamma_ref[...] * jax.lax.rsqrt(var + BN_EPS)
    y = cen * scale + beta_ref[...]
    y = jnp.where(y >= 0, y, NEG_SLOPE * y)
    prod = y * w_ref[...]                                     # (R, C)
    per_batch = jnp.dot(sel_ref[...], prod,
                        preferred_element_type=jnp.float32)   # (B, C)
    o_ref[...] = jnp.sum(per_batch, axis=1, keepdims=True)    # (B, 1)


# ----------------------------------------------------------------------------
# Matmul wrapper (per-layer tile selection, no M/N padding, full-K blocks)
# ----------------------------------------------------------------------------
def _pick_tile_m(m):
    for t in (256, 128, 64, 32, 16, 8):       # prefer 256 (v6e/v7x MXU width)
        if m % t == 0:
            return t
    return m


def _pick_tile_n(n):
    if n % 256 == 0 and n // 256 >= 2:        # 256-wide and >=2 parallel tiles
        return 256
    if n % 128 == 0 and n // 128 >= 2:
        return 128
    return n                                  # full N (== array dim is legal)


def pallas_matmul(a, b, apply_leaky=False):
    """a: (M, K), b: (K, N) -> (M, N) f32.  One K step (K resident in VMEM)."""
    M, K = a.shape
    K2, N = b.shape
    assert K == K2
    m_pad = (-M) % 8                          # not hit by this model's shapes
    if m_pad:
        a = jnp.pad(a, ((0, m_pad), (0, 0)))
    Mp = M + m_pad
    tm = _pick_tile_m(Mp)
    tn = _pick_tile_n(N)
    out = pl.pallas_call(
        functools.partial(_matmul_kernel, apply_leaky=apply_leaky),
        out_shape=jax.ShapeDtypeStruct((Mp, N), jnp.float32),
        grid_spec=pltpu.PrefetchScalarGridSpec(
            num_scalar_prefetch=0,
            grid=(Mp // tm, N // tn),
            in_specs=[pl.BlockSpec((tm, K), lambda i, j: (i, 0)),
                      pl.BlockSpec((K, tn), lambda i, j: (0, j))],
            out_specs=pl.BlockSpec((tm, tn), lambda i, j: (i, j)),
        ),
        compiler_params=pltpu.CompilerParams(
            dimension_semantics=("parallel", "parallel"),
            vmem_limit_bytes=VMEM_LIMIT),
    )(a, b)
    return out[:M] if m_pad else out


# ----------------------------------------------------------------------------
# Conv / BN wrappers
# ----------------------------------------------------------------------------
def conv2d(x_nhwc, w_oihw, stride, pad, apply_leaky=False):
    """Conv2d(bias=False) via patch extraction + one Pallas full-K matmul."""
    OC, C, KH, KW = w_oihw.shape
    N = x_nhwc.shape[0]
    x_bf = x_nhwc.astype(jnp.bfloat16)        # bf16 at the MXU boundary
    patches = jax.lax.conv_general_dilated_patches(
        x_bf, filter_shape=(KH, KW), window_strides=(stride, stride),
        padding=((pad, pad), (pad, pad)),
        dimension_numbers=("NHWC", "HWIO", "NHWC"))
    _, OH, OW, KF = patches.shape
    patches2d = patches.reshape(N * OH * OW, KF)

    # Build the (KF, OC) weight matrix with *exactly* the same feature
    # ordering as the activation patches by running the identical patch
    # extraction over the weights (viewed as an OC-batch of KHxKWxC images).
    w_img = jnp.transpose(w_oihw, (0, 2, 3, 1)).astype(jnp.bfloat16)
    w_pat = jax.lax.conv_general_dilated_patches(
        w_img, filter_shape=(KH, KW), window_strides=(1, 1),
        padding=((0, 0), (0, 0)),
        dimension_numbers=("NHWC", "HWIO", "NHWC"))        # (OC, 1, 1, KF)
    w_mat = w_pat.reshape(OC, KF).T                        # (KF, OC)

    y = pallas_matmul(patches2d, w_mat, apply_leaky=apply_leaky)
    return y.reshape(N, OH, OW, OC)


def batchnorm_leaky(x_nhwc, gamma, beta):
    """Single fused Pallas kernel: batch stats + affine + LeakyReLU."""
    N, H, W, C = x_nhwc.shape
    x2d = x_nhwc.reshape(N * H * W, C).astype(jnp.float32)
    y = pl.pallas_call(
        functools.partial(_bn_leaky_kernel, inv_rows=1.0 / (N * H * W)),
        out_shape=jax.ShapeDtypeStruct(x2d.shape, jnp.float32),
    )(x2d, gamma.reshape(1, C), beta.reshape(1, C))
    return y.reshape(N, H, W, C)


def bn_leaky_conv_head(x_nhwc, gamma, beta, w_oihw):
    """Fused BatchNorm + LeakyReLU + final KxK 'valid' conv (OC must be 1)."""
    N, H, W, C = x_nhwc.shape
    OC, C2, KH, KW = w_oihw.shape
    assert OC == 1 and C2 == C and KH == H and KW == W
    HW = H * W
    x2d = x_nhwc.reshape(N * HW, C).astype(jnp.float32)
    # w_mat[h*W + w, c] = w_oihw[0, c, h, w]  (matches x2d's row/col layout)
    w_mat = jnp.transpose(w_oihw[0], (1, 2, 0)).reshape(HW, C)
    w_tiled = jnp.tile(w_mat, (N, 1)).astype(jnp.float32)          # (N*HW, C)
    sel = (jnp.arange(N)[:, None] ==
           (jnp.arange(N * HW)[None, :] // HW)).astype(jnp.float32)  # (N, N*HW)
    out = pl.pallas_call(
        functools.partial(_bn_leaky_head_kernel, inv_rows=1.0 / (N * HW)),
        out_shape=jax.ShapeDtypeStruct((N, 1), jnp.float32),
    )(x2d, gamma.reshape(1, C), beta.reshape(1, C), w_tiled, sel)
    return out.reshape(-1)


# ----------------------------------------------------------------------------
# Discriminator
# ----------------------------------------------------------------------------
def init_params(key, channels=3):
    conv_shapes = [(64, channels, 4, 4), (128, 64, 4, 4), (256, 128, 4, 4),
                   (512, 256, 4, 4), (1, 512, 4, 4)]
    params = {}
    for i, s in enumerate(conv_shapes):
        key, sub = jax.random.split(key)
        params[f"w{i}"] = (0.02 * jax.random.normal(sub, s)).astype(jnp.float32)
    for idx, c in [(1, 128), (2, 256), (3, 512)]:
        params[f"gamma{idx}"] = jnp.ones((c,), jnp.float32)
        params[f"beta{idx}"] = jnp.zeros((c,), jnp.float32)
    return params


def discriminator_forward(params, x_nchw):
    x = jnp.transpose(x_nchw, (0, 2, 3, 1))                  # NCHW -> NHWC
    x = conv2d(x, params["w0"], stride=2, pad=1, apply_leaky=True)
    x = conv2d(x, params["w1"], stride=2, pad=1)
    x = batchnorm_leaky(x, params["gamma1"], params["beta1"])
    x = conv2d(x, params["w2"], stride=2, pad=1)
    x = batchnorm_leaky(x, params["gamma2"], params["beta2"])
    x = conv2d(x, params["w3"], stride=2, pad=1)
    # Fused: BN3 + LeakyReLU + final 4x4 valid conv (512 -> 1) + flatten.
    # out.view(-1, 1).squeeze(1) -> shape (N,)
    return bn_leaky_conv_head(x, params["gamma3"], params["beta3"],
                              params["w4"])


# ----------------------------------------------------------------------------
# Pure-XLA f32 reference (for a loose-tolerance sanity check)
# ----------------------------------------------------------------------------
def _reference_forward(params, x_nchw):
    def conv(x, w, stride, pad):
        return jax.lax.conv_general_dilated(
            x, w, (stride, stride), ((pad, pad), (pad, pad)),
            dimension_numbers=("NCHW", "OIHW", "NCHW"),
            precision=jax.lax.Precision.HIGHEST)

    def lrelu(x):
        return jnp.where(x >= 0, x, NEG_SLOPE * x)

    def bn(x, gamma, beta):
        mean = jnp.mean(x, axis=(0, 2, 3), keepdims=True)
        var = jnp.mean(jnp.square(x - mean), axis=(0, 2, 3), keepdims=True)
        y = (x - mean) * jax.lax.rsqrt(var + BN_EPS)
        return y * gamma.reshape(1, -1, 1, 1) + beta.reshape(1, -1, 1, 1)

    x = lrelu(conv(x_nchw, params["w0"], 2, 1))
    x = lrelu(bn(conv(x, params["w1"], 2, 1), params["gamma1"], params["beta1"]))
    x = lrelu(bn(conv(x, params["w2"], 2, 1), params["gamma2"], params["beta2"]))
    x = lrelu(bn(conv(x, params["w3"], 2, 1), params["gamma3"], params["beta3"]))
    x = conv(x, params["w4"], 1, 0)
    return x.reshape(-1)


if __name__ == "__main__":
    key = jax.random.PRNGKey(0)
    pkey, xkey = jax.random.split(key)
    params = init_params(pkey, channels=3)
    # 64x64 input so the final 4x4/stride-1 conv yields a 1x1 map, as in DCGAN.
    x = jax.random.normal(xkey, (2, 3, 64, 64), jnp.float32)

    fwd = jax.jit(discriminator_forward)
    out = fwd(params, x)
    jax.block_until_ready(out)
    assert out.shape == (2,) and out.dtype == jnp.float32

    # Loose tolerance: the Pallas path feeds the MXU in bf16, the reference is
    # pure f32, so exact equality is not expected.
    ref = jax.jit(_reference_forward)(params, x)
    jax.block_until_ready(ref)
    assert jnp.allclose(out, ref, rtol=1e-1, atol=2e-1), (out, ref)

    print("KERNEL_OK")
</pallas_src>

<mosaic_0001>
module attributes {stable_mosaic.version = 11 : i64} {
  func.func @_matmul_kernel(%arg0: i32, %arg1: i32, %arg2: memref<256x48xbf16, #tpu.memory_space<vmem>>, %arg3: memref<48x64xbf16, #tpu.memory_space<vmem>>, %arg4: memref<256x64xf32, #tpu.memory_space<vmem>>) attributes {dimension_semantics = [#tpu.dimension_semantics<parallel>, #tpu.dimension_semantics<parallel>], iteration_bounds = array<i64: 8, 1>, scalar_prefetch = 0 : i64, scratch_operands = 0 : i64, tpu.core_type = #tpu.core_type<tc>, window_params = [{transform_indices = @transform_0, window_bounds = array<i64: 256, 48>}, {transform_indices = @transform_1, window_bounds = array<i64: 48, 64>}, {transform_indices = @transform_2, window_bounds = array<i64: 256, 64>}]} {
    %c0 = arith.constant 0 : index
    %c0_0 = arith.constant 0 : index
    %0 = vector.load %arg2[%c0, %c0_0] : memref<256x48xbf16, #tpu.memory_space<vmem>>, vector<256x48xbf16>
    %c0_1 = arith.constant 0 : index
    %c0_2 = arith.constant 0 : index
    %1 = vector.load %arg3[%c0_1, %c0_2] : memref<48x64xbf16, #tpu.memory_space<vmem>>, vector<48x64xbf16>
    %cst = arith.constant dense<0.000000e+00> : vector<256x64xf32>
    %2 = tpu.matmul %0, %1, %cst {dimension_numbers = #tpu.dot_dimension_numbers<[1], [0], [0], [1], [0, 0, 1, 1], [], []>} : vector<256x48xbf16>, vector<48x64xbf16>, vector<256x64xf32> -> vector<256x64xf32>
    %cst_3 = arith.constant 0.000000e+00 : f32
    %3 = vector.broadcast %cst_3 : f32 to vector<256x64xf32>
    %4 = arith.cmpf oge, %2, %3 : vector<256x64xf32>
    %cst_4 = arith.constant 2.000000e-01 : f32
    %5 = vector.broadcast %cst_4 : f32 to vector<256x64xf32>
    %6 = arith.mulf %5, %2 : vector<256x64xf32>
    %7 = arith.select %4, %2, %6 : vector<256x64xi1>, vector<256x64xf32>
    %c0_5 = arith.constant 0 : index
    %c0_6 = arith.constant 0 : index
    %8 = vector.load %arg4[%c0_5, %c0_6] : memref<256x64xf32, #tpu.memory_space<vmem>>, vector<256x64xf32>
    tpu.vector_store %arg4[%c0_5, %c0_6], %7 {strides = array<i32>} : memref<256x64xf32, #tpu.memory_space<vmem>>, vector<256x64xf32>,
    return
  }
  func.func @transform_0(%arg0: i32, %arg1: i32) -> (i32, i32) {
    %c0_i32 = arith.constant 0 : i32
    %c0_i32_0 = arith.constant 0 : i32
    return %arg0, %c0_i32 : i32, i32
  }
  func.func @transform_1(%arg0: i32, %arg1: i32) -> (i32, i32) {
    %c0_i32 = arith.constant 0 : i32
    %c0_i32_0 = arith.constant 0 : i32
    return %c0_i32, %arg1 : i32, i32
  }
  func.func @transform_2(%arg0: i32, %arg1: i32) -> (i32, i32) {
    %c0_i32 = arith.constant 0 : i32
    return %arg0, %arg1 : i32, i32
  }
}

module attributes {stable_mosaic.version = 11 : i64} {
  func.func @_matmul_kernel(%arg0: i32, %arg1: i32, %arg2: memref<256x1024xbf16, #tpu.memory_space<vmem>>, %arg3: memref<1024x128xbf16, #tpu.memory_space<vmem>>, %arg4: memref<256x128xf32, #tpu.memory_space<vmem>>) attributes {dimension_semantics = [#tpu.dimension_semantics<parallel>, #tpu.dimension_semantics<parallel>], iteration_bounds = array<i64: 2, 1>, scalar_prefetch = 0 : i64, scratch_operands = 0 : i64, tpu.core_type = #tpu.core_type<tc>, window_params = [{transform_indices = @transform_0, window_bounds = array<i64: 256, 1024>}, {transform_indices = @transform_1, window_bounds = array<i64: 1024, 128>}, {transform_indices = @transform_2, window_bounds = array<i64: 256, 128>}]} {
    %c0 = arith.constant 0 : index
    %c0_0 = arith.constant 0 : index
    %0 = vector.load %arg2[%c0, %c0_0] : memref<256x1024xbf16, #tpu.memory_space<vmem>>, vector<256x1024xbf16>
    %c0_1 = arith.constant 0 : index
    %c0_2 = arith.constant 0 : index
    %1 = vector.load %arg3[%c0_1, %c0_2] : memref<1024x128xbf16, #tpu.memory_space<vmem>>, vector<1024x128xbf16>
    %cst = arith.constant dense<0.000000e+00> : vector<256x128xf32>
    %2 = tpu.matmul %0, %1, %cst {dimension_numbers = #tpu.dot_dimension_numbers<[1], [0], [0], [1], [0, 0, 1, 1], [], []>} : vector<256x1024xbf16>, vector<1024x128xbf16>, vector<256x128xf32> -> vector<256x128xf32>
    %c0_3 = arith.constant 0 : index
    %c0_4 = arith.constant 0 : index
    %3 = vector.load %arg4[%c0_3, %c0_4] : memref<256x128xf32, #tpu.memory_space<vmem>>, vector<256x128xf32>
    tpu.vector_store %arg4[%c0_3, %c0_4], %2 {strides = array<i32>} : memref<256x128xf32, #tpu.memory_space<vmem>>, vector<256x128xf32>,
    return
  }
  func.func @transform_0(%arg0: i32, %arg1: i32) -> (i32, i32) {
    %c0_i32 = arith.constant 0 : i32
    %c0_i32_0 = arith.constant 0 : i32
    return %arg0, %c0_i32 : i32, i32
  }
  func.func @transform_1(%arg0: i32, %arg1: i32) -> (i32, i32) {
    %c0_i32 = arith.constant 0 : i32
    %c0_i32_0 = arith.constant 0 : i32
    return %c0_i32, %arg1 : i32, i32
  }
  func.func @transform_2(%arg0: i32, %arg1: i32) -> (i32, i32) {
    %c0_i32 = arith.constant 0 : i32
    return %arg0, %arg1 : i32, i32
  }
}

module attributes {stable_mosaic.version = 11 : i64} {
  func.func @_bn_leaky_kernel(%arg0: memref<512x128xf32, #tpu.memory_space<vmem>>, %arg1: memref<1x128xf32, #tpu.memory_space<vmem>>, %arg2: memref<1x128xf32, #tpu.memory_space<vmem>>, %arg3: memref<512x128xf32, #tpu.memory_space<vmem>>) attributes {dimension_semantics = [], scalar_prefetch = 0 : i64, scratch_operands = 0 : i64, tpu.core_type = #tpu.core_type<tc>} {
    %c0 = arith.constant 0 : index
    %c0_0 = arith.constant 0 : index
    %0 = vector.load %arg0[%c0, %c0_0] : memref<512x128xf32, #tpu.memory_space<vmem>>, vector<512x128xf32>
    %cst = arith.constant dense<0.000000e+00> : vector<128xf32>
    %1 = vector.multi_reduction <add>, %0, %cst [0] : vector<512x128xf32> to vector<128xf32>
    %2 = vector.shape_cast %1 : vector<128xf32> to vector<1x128xf32>
    %cst_1 = arith.constant 0.001953125 : f32
    %3 = vector.broadcast %cst_1 : f32 to vector<1x128xf32>
    %4 = arith.mulf %2, %3 : vector<1x128xf32>
    %5 = vector.broadcast %4 : vector<1x128xf32> to vector<512x128xf32>
    %6 = arith.subf %0, %5 : vector<512x128xf32>
    %7 = arith.mulf %6, %6 : vector<512x128xf32>
    %cst_2 = arith.constant dense<0.000000e+00> : vector<128xf32>
    %8 = vector.multi_reduction <add>, %7, %cst_2 [0] : vector<512x128xf32> to vector<128xf32>
    %9 = vector.shape_cast %8 : vector<128xf32> to vector<1x128xf32>
    %cst_3 = arith.constant 0.001953125 : f32
    %10 = vector.broadcast %cst_3 : f32 to vector<1x128xf32>
    %11 = arith.mulf %9, %10 : vector<1x128xf32>
    %c0_4 = arith.constant 0 : index
    %c0_5 = arith.constant 0 : index
    %12 = vector.load %arg1[%c0_4, %c0_5] : memref<1x128xf32, #tpu.memory_space<vmem>>, vector<1x128xf32>
    %cst_6 = arith.constant 9.99999974E-6 : f32
    %13 = vector.broadcast %cst_6 : f32 to vector<1x128xf32>
    %14 = arith.addf %11, %13 : vector<1x128xf32>
    %15 = math.rsqrt %14 : vector<1x128xf32>
    %16 = arith.mulf %12, %15 : vector<1x128xf32>
    %17 = vector.broadcast %16 : vector<1x128xf32> to vector<512x128xf32>
    %18 = arith.mulf %6, %17 : vector<512x128xf32>
    %c0_7 = arith.constant 0 : index
    %c0_8 = arith.constant 0 : index
    %19 = vector.load %arg2[%c0_7, %c0_8] : memref<1x128xf32, #tpu.memory_space<vmem>>, vector<1x128xf32>
    %20 = vector.broadcast %19 : vector<1x128xf32> to vector<512x128xf32>
    %21 = arith.addf %18, %20 : vector<512x128xf32>
    %cst_9 = arith.constant 0.000000e+00 : f32
    %22 = vector.broadcast %cst_9 : f32 to vector<512x128xf32>
    %23 = arith.cmpf oge, %21, %22 : vector<512x128xf32>
    %cst_10 = arith.constant 2.000000e-01 : f32
    %24 = vector.broadcast %cst_10 : f32 to vector<512x128xf32>
    %25 = arith.mulf %24, %21 : vector<512x128xf32>
    %26 = arith.select %23, %21, %25 : vector<512x128xi1>, vector<512x128xf32>
    %c0_11 = arith.constant 0 : index
    %c0_12 = arith.constant 0 : index
    %27 = vector.load %arg3[%c0_11, %c0_12] : memref<512x128xf32, #tpu.memory_space<vmem>>, vector<512x128xf32>
    tpu.vector_store %arg3[%c0_11, %c0_12], %26 {strides = array<i32>} : memref<512x128xf32, #tpu.memory_space<vmem>>, vector<512x128xf32>,
    return
  }
}

module attributes {stable_mosaic.version = 11 : i64} {
  func.func @_matmul_kernel(%arg0: i32, %arg1: i32, %arg2: memref<128x2048xbf16, #tpu.memory_space<vmem>>, %arg3: memref<2048x128xbf16, #tpu.memory_space<vmem>>, %arg4: memref<128x128xf32, #tpu.memory_space<vmem>>) attributes {dimension_semantics = [#tpu.dimension_semantics<parallel>, #tpu.dimension_semantics<parallel>], iteration_bounds = array<i64: 1, 2>, scalar_prefetch = 0 : i64, scratch_operands = 0 : i64, tpu.core_type = #tpu.core_type<tc>, window_params = [{transform_indices = @transform_0, window_bounds = array<i64: 128, 2048>}, {transform_indices = @transform_1, window_bounds = array<i64: 2048, 128>}, {transform_indices = @transform_2, window_bounds = array<i64: 128, 128>}]} {
    %c0 = arith.constant 0 : index
    %c0_0 = arith.constant 0 : index
    %0 = vector.load %arg2[%c0, %c0_0] : memref<128x2048xbf16, #tpu.memory_space<vmem>>, vector<128x2048xbf16>
    %c0_1 = arith.constant 0 : index
    %c0_2 = arith.constant 0 : index
    %1 = vector.load %arg3[%c0_1, %c0_2] : memref<2048x128xbf16, #tpu.memory_space<vmem>>, vector<2048x128xbf16>
    %cst = arith.constant dense<0.000000e+00> : vector<128x128xf32>
    %2 = tpu.matmul %0, %1, %cst {dimension_numbers = #tpu.dot_dimension_numbers<[1], [0], [0], [1], [0, 0, 1, 1], [], []>} : vector<128x2048xbf16>, vector<2048x128xbf16>, vector<128x128xf32> -> vector<128x128xf32>
    %c0_3 = arith.constant 0 : index
    %c0_4 = arith.constant 0 : index
    %3 = vector.load %arg4[%c0_3, %c0_4] : memref<128x128xf32, #tpu.memory_space<vmem>>, vector<128x128xf32>
    tpu.vector_store %arg4[%c0_3, %c0_4], %2 {strides = array<i32>} : memref<128x128xf32, #tpu.memory_space<vmem>>, vector<128x128xf32>,
    return
  }
  func.func @transform_0(%arg0: i32, %arg1: i32) -> (i32, i32) {
    %c0_i32 = arith.constant 0 : i32
    %c0_i32_0 = arith.constant 0 : i32
    return %arg0, %c0_i32 : i32, i32
  }
  func.func @transform_1(%arg0: i32, %arg1: i32) -> (i32, i32) {
    %c0_i32 = arith.constant 0 : i32
    %c0_i32_0 = arith.constant 0 : i32
    return %c0_i32, %arg1 : i32, i32
  }
  func.func @transform_2(%arg0: i32, %arg1: i32) -> (i32, i32) {
    %c0_i32 = arith.constant 0 : i32
    return %arg0, %arg1 : i32, i32
  }
}

module attributes {stable_mosaic.version = 11 : i64} {
  func.func @_bn_leaky_kernel(%arg0: memref<128x256xf32, #tpu.memory_space<vmem>>, %arg1: memref<1x256xf32, #tpu.memory_space<vmem>>, %arg2: memref<1x256xf32, #tpu.memory_space<vmem>>, %arg3: memref<128x256xf32, #tpu.memory_space<vmem>>) attributes {dimension_semantics = [], scalar_prefetch = 0 : i64, scratch_operands = 0 : i64, tpu.core_type = #tpu.core_type<tc>} {
    %c0 = arith.constant 0 : index
    %c0_0 = arith.constant 0 : index
    %0 = vector.load %arg0[%c0, %c0_0] : memref<128x256xf32, #tpu.memory_space<vmem>>, vector<128x256xf32>
    %cst = arith.constant dense<0.000000e+00> : vector<256xf32>
    %1 = vector.multi_reduction <add>, %0, %cst [0] : vector<128x256xf32> to vector<256xf32>
    %2 = vector.shape_cast %1 : vector<256xf32> to vector<1x256xf32>
    %cst_1 = arith.constant 7.812500e-03 : f32
    %3 = vector.broadcast %cst_1 : f32 to vector<1x256xf32>
    %4 = arith.mulf %2, %3 : vector<1x256xf32>
    %5 = vector.broadcast %4 : vector<1x256xf32> to vector<128x256xf32>
    %6 = arith.subf %0, %5 : vector<128x256xf32>
    %7 = arith.mulf %6, %6 : vector<128x256xf32>
    %cst_2 = arith.constant dense<0.000000e+00> : vector<256xf32>
    %8 = vector.multi_reduction <add>, %7, %cst_2 [0] : vector<128x256xf32> to vector<256xf32>
    %9 = vector.shape_cast %8 : vector<256xf32> to vector<1x256xf32>
    %cst_3 = arith.constant 7.812500e-03 : f32
    %10 = vector.broadcast %cst_3 : f32 to vector<1x256xf32>
    %11 = arith.mulf %9, %10 : vector<1x256xf32>
    %c0_4 = arith.constant 0 : index
    %c0_5 = arith.constant 0 : index
    %12 = vector.load %arg1[%c0_4, %c0_5] : memref<1x256xf32, #tpu.memory_space<vmem>>, vector<1x256xf32>
    %cst_6 = arith.constant 9.99999974E-6 : f32
    %13 = vector.broadcast %cst_6 : f32 to vector<1x256xf32>
    %14 = arith.addf %11, %13 : vector<1x256xf32>
    %15 = math.rsqrt %14 : vector<1x256xf32>
    %16 = arith.mulf %12, %15 : vector<1x256xf32>
    %17 = vector.broadcast %16 : vector<1x256xf32> to vector<128x256xf32>
    %18 = arith.mulf %6, %17 : vector<128x256xf32>
    %c0_7 = arith.constant 0 : index
    %c0_8 = arith.constant 0 : index
    %19 = vector.load %arg2[%c0_7, %c0_8] : memref<1x256xf32, #tpu.memory_space<vmem>>, vector<1x256xf32>
    %20 = vector.broadcast %19 : vector<1x256xf32> to vector<128x256xf32>
    %21 = arith.addf %18, %20 : vector<128x256xf32>
    %cst_9 = arith.constant 0.000000e+00 : f32
    %22 = vector.broadcast %cst_9 : f32 to vector<128x256xf32>
    %23 = arith.cmpf oge, %21, %22 : vector<128x256xf32>
    %cst_10 = arith.constant 2.000000e-01 : f32
    %24 = vector.broadcast %cst_10 : f32 to vector<128x256xf32>
    %25 = arith.mulf %24, %21 : vector<128x256xf32>
    %26 = arith.select %23, %21, %25 : vector<128x256xi1>, vector<128x256xf32>
    %c0_11 = arith.constant 0 : index
    %c0_12 = arith.constant 0 : index
    %27 = vector.load %arg3[%c0_11, %c0_12] : memref<128x256xf32, #tpu.memory_space<vmem>>, vector<128x256xf32>
    tpu.vector_store %arg3[%c0_11, %c0_12], %26 {strides = array<i32>} : memref<128x256xf32, #tpu.memory_space<vmem>>, vector<128x256xf32>,
    return
  }
}

module attributes {stable_mosaic.version = 11 : i64} {
  func.func @_matmul_kernel(%arg0: i32, %arg1: i32, %arg2: memref<32x4096xbf16, #tpu.memory_space<vmem>>, %arg3: memref<4096x256xbf16, #tpu.memory_space<vmem>>, %arg4: memref<32x256xf32, #tpu.memory_space<vmem>>) attributes {dimension_semantics = [#tpu.dimension_semantics<parallel>, #tpu.dimension_semantics<parallel>], iteration_bounds = array<i64: 1, 2>, scalar_prefetch = 0 : i64, scratch_operands = 0 : i64, tpu.core_type = #tpu.core_type<tc>, window_params = [{transform_indices = @transform_0, window_bounds = array<i64: 32, 4096>}, {transform_indices = @transform_1, window_bounds = array<i64: 4096, 256>}, {transform_indices = @transform_2, window_bounds = array<i64: 32, 256>}]} {
    %c0 = arith.constant 0 : index
    %c0_0 = arith.constant 0 : index
    %0 = vector.load %arg2[%c0, %c0_0] : memref<32x4096xbf16, #tpu.memory_space<vmem>>, vector<32x4096xbf16>
    %c0_1 = arith.constant 0 : index
    %c0_2 = arith.constant 0 : index
    %1 = vector.load %arg3[%c0_1, %c0_2] : memref<4096x256xbf16, #tpu.memory_space<vmem>>, vector<4096x256xbf16>
    %cst = arith.constant dense<0.000000e+00> : vector<32x256xf32>
    %2 = tpu.matmul %0, %1, %cst {dimension_numbers = #tpu.dot_dimension_numbers<[1], [0], [0], [1], [0, 0, 1, 1], [], []>} : vector<32x4096xbf16>, vector<4096x256xbf16>, vector<32x256xf32> -> vector<32x256xf32>
    %c0_3 = arith.constant 0 : index
    %c0_4 = arith.constant 0 : index
    %3 = vector.load %arg4[%c0_3, %c0_4] : memref<32x256xf32, #tpu.memory_space<vmem>>, vector<32x256xf32>
    tpu.vector_store %arg4[%c0_3, %c0_4], %2 {strides = array<i32>} : memref<32x256xf32, #tpu.memory_space<vmem>>, vector<32x256xf32>,
    return
  }
  func.func @transform_0(%arg0: i32, %arg1: i32) -> (i32, i32) {
    %c0_i32 = arith.constant 0 : i32
    %c0_i32_0 = arith.constant 0 : i32
    return %arg0, %c0_i32 : i32, i32
  }
  func.func @transform_1(%arg0: i32, %arg1: i32) -> (i32, i32) {
    %c0_i32 = arith.constant 0 : i32
    %c0_i32_0 = arith.constant 0 : i32
    return %c0_i32, %arg1 : i32, i32
  }
  func.func @transform_2(%arg0: i32, %arg1: i32) -> (i32, i32) {
    %c0_i32 = arith.constant 0 : i32
    return %arg0, %arg1 : i32, i32
  }
}

module attributes {stable_mosaic.version = 11 : i64} {
  func.func @_bn_leaky_head_kernel(%arg0: memref<32x512xf32, #tpu.memory_space<vmem>>, %arg1: memref<1x512xf32, #tpu.memory_space<vmem>>, %arg2: memref<1x512xf32, #tpu.memory_space<vmem>>, %arg3: memref<32x512xf32, #tpu.memory_space<vmem>>, %arg4: memref<2x32xf32, #tpu.memory_space<vmem>>, %arg5: memref<2x1xf32, #tpu.memory_space<vmem>>) attributes {dimension_semantics = [], scalar_prefetch = 0 : i64, scratch_operands = 0 : i64, tpu.core_type = #tpu.core_type<tc>} {
    %c0 = arith.constant 0 : index
    %c0_0 = arith.constant 0 : index
    %0 = vector.load %arg0[%c0, %c0_0] : memref<32x512xf32, #tpu.memory_space<vmem>>, vector<32x512xf32>
    %cst = arith.constant dense<0.000000e+00> : vector<512xf32>
    %1 = vector.multi_reduction <add>, %0, %cst [0] : vector<32x512xf32> to vector<512xf32>
    %2 = vector.shape_cast %1 : vector<512xf32> to vector<1x512xf32>
    %cst_1 = arith.constant 3.125000e-02 : f32
    %3 = vector.broadcast %cst_1 : f32 to vector<1x512xf32>
    %4 = arith.mulf %2, %3 : vector<1x512xf32>
    %5 = vector.broadcast %4 : vector<1x512xf32> to vector<32x512xf32>
    %6 = arith.subf %0, %5 : vector<32x512xf32>
    %7 = arith.mulf %6, %6 : vector<32x512xf32>
    %cst_2 = arith.constant dense<0.000000e+00> : vector<512xf32>
    %8 = vector.multi_reduction <add>, %7, %cst_2 [0] : vector<32x512xf32> to vector<512xf32>
    %9 = vector.shape_cast %8 : vector<512xf32> to vector<1x512xf32>
    %cst_3 = arith.constant 3.125000e-02 : f32
    %10 = vector.broadcast %cst_3 : f32 to vector<1x512xf32>
    %11 = arith.mulf %9, %10 : vector<1x512xf32>
    %c0_4 = arith.constant 0 : index
    %c0_5 = arith.constant 0 : index
    %12 = vector.load %arg1[%c0_4, %c0_5] : memref<1x512xf32, #tpu.memory_space<vmem>>, vector<1x512xf32>
    %cst_6 = arith.constant 9.99999974E-6 : f32
    %13 = vector.broadcast %cst_6 : f32 to vector<1x512xf32>
    %14 = arith.addf %11, %13 : vector<1x512xf32>
    %15 = math.rsqrt %14 : vector<1x512xf32>
    %16 = arith.mulf %12, %15 : vector<1x512xf32>
    %17 = vector.broadcast %16 : vector<1x512xf32> to vector<32x512xf32>
    %18 = arith.mulf %6, %17 : vector<32x512xf32>
    %c0_7 = arith.constant 0 : index
    %c0_8 = arith.constant 0 : index
    %19 = vector.load %arg2[%c0_7, %c0_8] : memref<1x512xf32, #tpu.memory_space<vmem>>, vector<1x512xf32>
    %20 = vector.broadcast %19 : vector<1x512xf32> to vector<32x512xf32>
    %21 = arith.addf %18, %20 : vector<32x512xf32>
    %cst_9 = arith.constant 0.000000e+00 : f32
    %22 = vector.broadcast %cst_9 : f32 to vector<32x512xf32>
    %23 = arith.cmpf oge, %21, %22 : vector<32x512xf32>
    %cst_10 = arith.constant 2.000000e-01 : f32
    %24 = vector.broadcast %cst_10 : f32 to vector<32x512xf32>
    %25 = arith.mulf %24, %21 : vector<32x512xf32>
    %26 = arith.select %23, %21, %25 : vector<32x512xi1>, vector<32x512xf32>
    %c0_11 = arith.constant 0 : index
    %c0_12 = arith.constant 0 : index
    %27 = vector.load %arg3[%c0_11, %c0_12] : memref<32x512xf32, #tpu.memory_space<vmem>>, vector<32x512xf32>
    %28 = arith.mulf %26, %27 : vector<32x512xf32>
    %c0_13 = arith.constant 0 : index
    %c0_14 = arith.constant 0 : index
    %29 = vector.load %arg4[%c0_13, %c0_14] : memref<2x32xf32, #tpu.memory_space<vmem>>, vector<2x32xf32>
    %cst_15 = arith.constant dense<0.000000e+00> : vector<2x512xf32>
    %30 = tpu.matmul %29, %28, %cst_15 {dimension_numbers = #tpu.dot_dimension_numbers<[1], [0], [0], [1], [0, 0, 1, 1], [], []>} : vector<2x32xf32>, vector<32x512xf32>, vector<2x512xf32> -> vector<2x512xf32>
    %cst_16 = arith.constant dense<0.000000e+00> : vector<2xf32>
    %31 = vector.multi_reduction <add>, %30, %cst_16 [1] : vector<2x512xf32> to vector<2xf32>
    %32 = vector.shape_cast %31 : vector<2xf32> to vector<2x1xf32>
    %c0_17 = arith.constant 0 : index
    %c0_18 = arith.constant 0 : index
    %33 = vector.load %arg5[%c0_17, %c0_18] : memref<2x1xf32, #tpu.memory_space<vmem>>, vector<2x1xf32>
    tpu.vector_store %arg5[%c0_17, %c0_18], %32 {strides = array<i32>} : memref<2x1xf32, #tpu.memory_space<vmem>>, vector<2x1xf32>,
    return
  }
}

</mosaic_0001>

<bundles_post_ra>
// kernel: discriminator_forward.7
= control target key start
LH: loop header
LB: loop body
LE: loop exit
PB: predicated region body
PF: predicated region fallthrough
CT: control target
= control target key end

     0   :  { %s942_s9 = smov 0   ;;  %s944_s10 = smov 0   ;;  %s1088_s0 = inlined_call_operand.vmem [shape: bf16[2048,48], index: 0, kind: input, shape index: {}]   ;;  %s1089_s1 = inlined_call_operand.vmem [shape: bf16[48,64], index: 1, kind: input, shape index: {}]   ;;  %s1090_s2 = inlined_call_operand.vmem [shape: f32[2048,64], index: 2, kind: output, shape index: {}]  }
   0x1   :  { %s946_s11 = smov 0  }
   0x2 LB: > { %s24_s12 = sadd.s32 1, %s921_s10  ;;  %p755_p0 = scmp.ge.s32.totalorder %s925_s11, 1  ;;  %s925_s11 = sphi %s946_s11, %s12_s11   ;;  %s921_s10 = sphi %s944_s10, %s1092_s10   ;;  %s917_s9 = sphi %s942_s9, %s1091_s9  }
   0x3   : > { %p26_p1 = scmp.ge.s32.totalorder %s24_s12, 8  ;;  %p136_p2 = scmp.lt.s32.totalorder %s925_s11, 9 }
   0x5   : > { %s1094_s12 = smov (%p26_p1, %s24_s12), 0  ;;  %p137_p3 = pnand %p755_p0, %p136_p2 }
   0x6   : > { %v884_v0 = vld [vmem:[%s1089_s1] sm:$0xff] (!%p137_p3)   ;;  %s756_s15 = sshll.u32 (!%p137_p3), %s917_s9, 5  ;;  %v885_v1 = vld [vmem:[%s1089_s1 + $0x8] sm:$0xff] (!%p137_p3)   ;;  %v886_v2 = vld [vmem:[%s1089_s1 + $0x10] sm:$0xff] (!%p137_p3)   ;;  %vm321_vm0 = vcmask (!%p137_p3), 392192   ;;  %vm627_vm1 = vcmask (!%p137_p3), 523264  }
   0x7   : > { %140 = sbr.rel (%p137_p3) target bundleno = 265 (0x109), region = 28  ;;  %p166_p4 = scmp.lt.s32.totalorder (!%p137_p3), %s756_s15, 255  ;;  %816 = vmatprep.subr.bf16.mxu0 (!%p137_p3), %v884_v0  ;;  %854 = vmatprep.subr.bf16.mxu1 (!%p137_p3), %v884_v0 }
   0x8   : > { %817 = vmatpush3.bf16.msra.mxu0 (!%p137_p3), %v884_v0  ;;  %857 = vmatpush3.bf16.msra.mxu1 (!%p137_p3), %v884_v0 }
   0x9   : > { %818 = vmatprep.subr.bf16.mxu0 (!%p137_p3), %v885_v1  ;;  %855 = vmatprep.subr.bf16.mxu1 (!%p137_p3), %v885_v1 }
   0xc   : > { %819 = vmatpush3.bf16.msra.mxu0 (!%p137_p3), %v885_v1  ;;  %858 = vmatpush3.bf16.msra.mxu1 (!%p137_p3), %v885_v1 }
   0xd   : > { %820 = vmatprep.subr.bf16.mxu0 (!%p137_p3), %v886_v2  ;;  %856 = vmatprep.subr.bf16.mxu1 (!%p137_p3), %v886_v2 }
   0xe   : > { %s1096_s15 = smov (!%p166_p4, %s756_s15), 255 }
   0xf   : > { %s757_s20 = sshll.u32 %s1096_s15, 2  ;;  %s759_s24 = sshll.u32 %s1096_s15, 3 }
  0x10   : > { %s975_s23 = scalar_lea.vmem %s1088_s0, %s757_s20  ;;  %821 = vmatpush3.bf16.msra.mxu0 %v886_v2  ;;  %859 = vmatpush3.bf16.msra.mxu1 %v886_v2  ;;  %s1013_s27 = scalar_lea.vmem %s1090_s2, %s759_s24 }
  0x11   : > { %v887_v3 = vld [vmem:[%s975_s23] sm:$0xff]   ;;  %v889_v5 = vld [vmem:[%s975_s23 + $0x8] sm:$0xff]   ;;  %v891_v7 = vld [vmem:[%s975_s23 + $0x10] sm:$0xff]  }
  0x12   : > { %v888_v4 = vld [vmem:[%s975_s23 + $0x40] sm:$0xff]   ;;  %822 = vmatprep.mubr.msk.bf16.mxu0 %vm321_vm0, %v887_v3  ;;  %v890_v6 = vld [vmem:[%s975_s23 + $0x48] sm:$0xff]   ;;  %v892_v8 = vld [vmem:[%s975_s23 + $0x50] sm:$0xff]  }
  0x13   : > { %838 = vmatprep.mubr.msk.bf16.mxu1 %vm321_vm0, %v888_v4  ;;  %823 = vmatmul.mubr.msk.bf16.vlgmr.msra.gmra.mrb[0].mxu0 %vm321_vm0, %v889_v5  ;;  %v893_v9 = vld [vmem:[%s975_s23 + $0x18] sm:$0xff]   ;;  %v895_v11 = vld [vmem:[%s975_s23 + $0x20] sm:$0xff]   ;;  %v897_v13 = vld [vmem:[%s975_s23 + $0x28] sm:$0xff]  }
  0x14   : > { %839 = vmatmul.mubr.msk.bf16.vlgmr.msra.gmra.mrb[0].mxu1 %vm321_vm0, %v890_v6  ;;  %826 = vmatprep.mubr.msk.bf16.mxu0 %vm321_vm0, %v891_v7  ;;  %v894_v10 = vld [vmem:[%s975_s23 + $0x58] sm:$0xff]   ;;  %v896_v12 = vld [vmem:[%s975_s23 + $0x60] sm:$0xff]   ;;  %v898_v14 = vld [vmem:[%s975_s23 + $0x68] sm:$0xff]  }
  0x15   : > { %842 = vmatprep.mubr.msk.bf16.mxu1 %vm321_vm0, %v892_v8  ;;  %v899_v15 = vld [vmem:[%s975_s23 + $0x30] sm:$0xff]   ;;  %v901_v17 = vld [vmem:[%s975_s23 + $0x38] sm:$0xff]  }
  0x16   : > { %v900_v16 = vld [vmem:[%s975_s23 + $0x70] sm:$0xff]   ;;  %v902_v18 = vld [vmem:[%s975_s23 + $0x78] sm:$0xff]  }
  0x1b   : > { %827 = vmatmul.mubr.msk.bf16.gmra.mrb[4].mxu0 %vm321_vm0, %v893_v9 }
  0x1c   : > { %843 = vmatmul.mubr.msk.bf16.gmra.mrb[4].mxu1 %vm321_vm0, %v894_v10  ;;  %830 = vmatprep.mubr.msk.bf16.mxu0 %vm321_vm0, %v895_v11 }
  0x1d   : > { %846 = vmatprep.mubr.msk.bf16.mxu1 %vm321_vm0, %v896_v12 }
  0x23   : > { %831 = vmatmul.mubr.msk.bf16.gmra.mrb[8].mxu0 %vm321_vm0, %v897_v13 }
  0x24   : > { %847 = vmatmul.mubr.msk.bf16.gmra.mrb[8].mxu1 %vm321_vm0, %v898_v14  ;;  %834 = vmatprep.mubr.msk.bf16.mxu0 %vm321_vm0, %v899_v15 }
  0x25   : > { %850 = vmatprep.mubr.msk.bf16.mxu1 %vm321_vm0, %v900_v16 }
  0x2b   : > { %835 = vmatmul.mubr.msk.bf16.gmra.mrb[12].mxu0 %vm321_vm0, %v901_v17 }
  0x2c   : > { %851 = vmatmul.mubr.msk.bf16.gmra.mrb[12].mxu1 %vm321_vm0, %v902_v18 }
  0xe6   : > { %v824_v19 = vpop.f32.mrb[0].mxu0 }
  0xe7   : > { %v840_v20 = vpop.f32.mrb[0].mxu1  ;;  %vm533_vm2 = vcmp.ge.f32.partialorder %v824_v19, 0.0  ;;  %v565_v21 = vmul.f32 0.2, %v824_v19  ;;  %v404_v23 = vpop.f32.mrb[1].mxu0 }
  0xe8   : > { %vm549_vm3 = vcmp.ge.f32.partialorder %v840_v20, 0.0  ;;  %v581_v22 = vmul.f32 0.2, %v840_v20  ;;  %v468_v24 = vpop.f32.mrb[1].mxu1  ;;  %vm531_vm4 = vcmp.ge.f32.partialorder %v404_v23, 0.0  ;;  %v825_v28 = vpop.f32.mrb[2].mxu0 }
  0xe9   : > { %v597_v25 = vsel %vm533_vm2, %v824_v19, %v565_v21  ;;  %v563_v27 = vmul.f32 0.2, %v404_v23  ;;  %v841_v29 = vpop.f32.mrb[2].mxu1  ;;  %vm547_vm5 = vcmp.ge.f32.partialorder %v468_v24, 0.0  ;;  %v579_v30 = vmul.f32 0.2, %v468_v24 }
  0xea   : > { %v613_v26 = vsel %vm549_vm3, %v840_v20, %v581_v22  ;;  %630 = vst.msk [vmem:[%s1013_s27 + $0x10] sm:$0xff] %vm627_vm1, %v597_v25  ;;  %vm534_vm6 = vcmp.ge.f32.partialorder %v825_v28, 0.0  ;;  %v566_v31 = vmul.f32 0.2, %v825_v28  ;;  %vm550_vm7 = vcmp.ge.f32.partialorder %v841_v29, 0.0  ;;  %v407_v34 = vpop.f32.mrb[3].mxu0 }
  0xeb   : > { %646 = vst.msk [vmem:[%s1013_s27 + $0x90] sm:$0xff] %vm627_vm1, %v613_v26  ;;  %v595_v32 = vsel %vm531_vm4, %v404_v23, %v563_v27  ;;  %v582_v33 = vmul.f32 0.2, %v841_v29  ;;  %v471_v35 = vpop.f32.mrb[3].mxu1  ;;  %v611_v36 = vsel %vm547_vm5, %v468_v24, %v579_v30  ;;  %vm532_vm8 = vcmp.ge.f32.partialorder %v407_v34, 0.0 }
  0xec   : > { %628 = vst.msk [vmem:[%s1013_s27] sm:$0xff] %vm627_vm1, %v595_v32  ;;  %v598_v37 = vsel %vm534_vm6, %v825_v28, %v566_v31  ;;  %v564_v38 = vmul.f32 0.2, %v407_v34  ;;  %644 = vst.msk [vmem:[%s1013_s27 + $0x80] sm:$0xff] %vm627_vm1, %v611_v36  ;;  %vm548_vm9 = vcmp.ge.f32.partialorder %v471_v35, 0.0 }
  0xed   : > { %631 = vst.msk [vmem:[%s1013_s27 + $0x18] sm:$0xff] %vm627_vm1, %v598_v37  ;;  %v614_v39 = vsel %vm550_vm7, %v841_v29, %v582_v33  ;;  %v580_v40 = vmul.f32 0.2, %v471_v35 }
  0xee   : > { %647 = vst.msk [vmem:[%s1013_s27 + $0x98] sm:$0xff] %vm627_vm1, %v614_v39  ;;  %v596_v41 = vsel %vm532_vm8, %v407_v34, %v564_v38  ;;  %v828_v42 = vpop.f32.mrb[4].mxu0 }
  0xef   : > { %v844_v43 = vpop.f32.mrb[4].mxu1  ;;  %629 = vst.msk [vmem:[%s1013_s27 + $0x8] sm:$0xff] %vm627_vm1, %v596_v41  ;;  %v612_v44 = vsel %vm548_vm9, %v471_v35, %v580_v40  ;;  %vm537_vm10 = vcmp.ge.f32.partialorder %v828_v42, 0.0  ;;  %v569_v45 = vmul.f32 0.2, %v828_v42  ;;  %v420_v46 = vpop.f32.mrb[5].mxu0 }
  0xf0   : > { %vm553_vm11 = vcmp.ge.f32.partialorder %v844_v43, 0.0  ;;  %v484_v47 = vpop.f32.mrb[5].mxu1  ;;  %645 = vst.msk [vmem:[%s1013_s27 + $0x88] sm:$0xff] %vm627_vm1, %v612_v44  ;;  %v585_v48 = vmul.f32 0.2, %v844_v43  ;;  %vm535_vm12 = vcmp.ge.f32.partialorder %v420_v46, 0.0 }
  0xf1   : > { %v567_v49 = vmul.f32 0.2, %v420_v46  ;;  %vm551_vm13 = vcmp.ge.f32.partialorder %v484_v47, 0.0  ;;  %v601_v50 = vsel %vm537_vm10, %v828_v42, %v569_v45  ;;  %v583_v51 = vmul.f32 0.2, %v484_v47  ;;  %v829_v52 = vpop.f32.mrb[6].mxu0 }
  0xf2   : > { %v845_v53 = vpop.f32.mrb[6].mxu1  ;;  %634 = vst.msk [vmem:[%s1013_s27 + $0x30] sm:$0xff] %vm627_vm1, %v601_v50  ;;  %v617_v54 = vsel %vm553_vm11, %v844_v43, %v585_v48  ;;  %vm538_vm14 = vcmp.ge.f32.partialorder %v829_v52, 0.0  ;;  %v570_v56 = vmul.f32 0.2, %v829_v52  ;;  %v423_v57 = vpop.f32.mrb[7].mxu0 }
  0xf3   : > { %v599_v55 = vsel %vm535_vm12, %v420_v46, %v567_v49  ;;  %v487_v58 = vpop.f32.mrb[7].mxu1  ;;  %650 = vst.msk [vmem:[%s1013_s27 + $0xb0] sm:$0xff] %vm627_vm1, %v617_v54  ;;  %v615_v59 = vsel %vm551_vm13, %v484_v47, %v583_v51  ;;  %vm554_vm15 = vcmp.ge.f32.partialorder %v845_v53, 0.0  ;;  %v586_v60 = vmul.f32 0.2, %v845_v53 }
  0xf4   : > { %632 = vst.msk [vmem:[%s1013_s27 + $0x20] sm:$0xff] %vm627_vm1, %v599_v55  ;;  %vm536_vm0 = vcmp.ge.f32.partialorder %v423_v57, 0.0  ;;  %648 = vst.msk [vmem:[%s1013_s27 + $0xa0] sm:$0xff] %vm627_vm1, %v615_v59  ;;  %v602_v61 = vsel %vm538_vm14, %v829_v52, %v570_v56  ;;  %v568_v62 = vmul.f32 0.2, %v423_v57  ;;  %vm552_vm2 = vcmp.ge.f32.partialorder %v487_v58, 0.0 }
  0xf5   : > { %v584_v63 = vmul.f32 0.2, %v487_v58  ;;  %635 = vst.msk [vmem:[%s1013_s27 + $0x38] sm:$0xff] %vm627_vm1, %v602_v61  ;;  %v618_v0 = vsel %vm554_vm15, %v845_v53, %v586_v60 }
  0xf6   : > { %651 = vst.msk [vmem:[%s1013_s27 + $0xb8] sm:$0xff] %vm627_vm1, %v618_v0  ;;  %v600_v1 = vsel %vm536_vm0, %v423_v57, %v568_v62  ;;  %v832_v3 = vpop.f32.mrb[8].mxu0 }
  0xf7   : > { %v616_v2 = vsel %vm552_vm2, %v487_v58, %v584_v63  ;;  %v848_v4 = vpop.f32.mrb[8].mxu1  ;;  %633 = vst.msk [vmem:[%s1013_s27 + $0x28] sm:$0xff] %vm627_vm1, %v600_v1  ;;  %vm541_vm3 = vcmp.ge.f32.partialorder %v832_v3, 0.0  ;;  %v573_v5 = vmul.f32 0.2, %v832_v3  ;;  %v436_v7 = vpop.f32.mrb[9].mxu0 }
  0xf8   : > { %649 = vst.msk [vmem:[%s1013_s27 + $0xa8] sm:$0xff] %vm627_vm1, %v616_v2  ;;  %vm557_vm4 = vcmp.ge.f32.partialorder %v848_v4, 0.0  ;;  %v589_v6 = vmul.f32 0.2, %v848_v4  ;;  %v500_v8 = vpop.f32.mrb[9].mxu1  ;;  %vm539_vm5 = vcmp.ge.f32.partialorder %v436_v7, 0.0 }
  0xf9   : > { %v605_v9 = vsel %vm541_vm3, %v832_v3, %v573_v5  ;;  %v571_v11 = vmul.f32 0.2, %v436_v7  ;;  %v833_v12 = vpop.f32.mrb[10].mxu0  ;;  %v849_v13 = vpop.f32.mrb[10].mxu1  ;;  %vm555_vm6 = vcmp.ge.f32.partialorder %v500_v8, 0.0 }
  0xfa   : > { %v621_v10 = vsel %vm557_vm4, %v848_v4, %v589_v6  ;;  %638 = vst.msk [vmem:[%s1013_s27 + $0x50] sm:$0xff] %vm627_vm1, %v605_v9  ;;  %v587_v14 = vmul.f32 0.2, %v500_v8  ;;  %vm542_vm7 = vcmp.ge.f32.partialorder %v833_v12, 0.0  ;;  %v574_v15 = vmul.f32 0.2, %v833_v12 }
  0xfb   : > { %654 = vst.msk [vmem:[%s1013_s27 + $0xd0] sm:$0xff] %vm627_vm1, %v621_v10  ;;  %v603_v16 = vsel %vm539_vm5, %v436_v7, %v571_v11  ;;  %vm558_vm8 = vcmp.ge.f32.partialorder %v849_v13, 0.0  ;;  %v590_v17 = vmul.f32 0.2, %v849_v13  ;;  %v439_v18 = vpop.f32.mrb[11].mxu0  ;;  %v503_v19 = vpop.f32.mrb[11].mxu1 }
  0xfc   : > { %636 = vst.msk [vmem:[%s1013_s27 + $0x40] sm:$0xff] %vm627_vm1, %v603_v16  ;;  %v619_v20 = vsel %vm555_vm6, %v500_v8, %v587_v14  ;;  %v606_v21 = vsel %vm542_vm7, %v833_v12, %v574_v15  ;;  %vm540_vm9 = vcmp.ge.f32.partialorder %v439_v18, 0.0  ;;  %v572_v22 = vmul.f32 0.2, %v439_v18 }
  0xfd   : > { %652 = vst.msk [vmem:[%s1013_s27 + $0xc0] sm:$0xff] %vm627_vm1, %v619_v20  ;;  %639 = vst.msk [vmem:[%s1013_s27 + $0x58] sm:$0xff] %vm627_vm1, %v606_v21  ;;  %v622_v23 = vsel %vm558_vm8, %v849_v13, %v590_v17  ;;  %vm556_vm10 = vcmp.ge.f32.partialorder %v503_v19, 0.0  ;;  %v588_v24 = vmul.f32 0.2, %v503_v19 }
  0xfe   : > { %655 = vst.msk [vmem:[%s1013_s27 + $0xd8] sm:$0xff] %vm627_vm1, %v622_v23  ;;  %v604_v25 = vsel %vm540_vm9, %v439_v18, %v572_v22  ;;  %v836_v26 = vpop.f32.mrb[12].mxu0 }
  0xff   : > { %v852_v27 = vpop.f32.mrb[12].mxu1  ;;  %637 = vst.msk [vmem:[%s1013_s27 + $0x48] sm:$0xff] %vm627_vm1, %v604_v25  ;;  %v620_v28 = vsel %vm556_vm10, %v503_v19, %v588_v24  ;;  %vm545_vm11 = vcmp.ge.f32.partialorder %v836_v26, 0.0  ;;  %v577_v29 = vmul.f32 0.2, %v836_v26  ;;  %v452_v30 = vpop.f32.mrb[13].mxu0 }
 0x100   : > { %vm561_vm12 = vcmp.ge.f32.partialorder %v852_v27, 0.0  ;;  %v516_v31 = vpop.f32.mrb[13].mxu1  ;;  %653 = vst.msk [vmem:[%s1013_s27 + $0xc8] sm:$0xff] %vm627_vm1, %v620_v28  ;;  %v593_v32 = vmul.f32 0.2, %v852_v27  ;;  %vm543_vm13 = vcmp.ge.f32.partialorder %v452_v30, 0.0 }
 0x101   : > { %v575_v33 = vmul.f32 0.2, %v452_v30  ;;  %vm559_vm14 = vcmp.ge.f32.partialorder %v516_v31, 0.0  ;;  %v609_v34 = vsel %vm545_vm11, %v836_v26, %v577_v29  ;;  %v591_v35 = vmul.f32 0.2, %v516_v31  ;;  %v837_v36 = vpop.f32.mrb[14].mxu0 }
 0x102   : > { %v853_v37 = vpop.f32.mrb[14].mxu1  ;;  %642 = vst.msk [vmem:[%s1013_s27 + $0x70] sm:$0xff] %vm627_vm1, %v609_v34  ;;  %v625_v38 = vsel %vm561_vm12, %v852_v27, %v593_v32  ;;  %vm546_vm15 = vcmp.ge.f32.partialorder %v837_v36, 0.0  ;;  %v578_v40 = vmul.f32 0.2, %v837_v36  ;;  %v455_v41 = vpop.f32.mrb[15].mxu0 }
 0x103   : > { %v607_v39 = vsel %vm543_vm13, %v452_v30, %v575_v33  ;;  %v519_v42 = vpop.f32.mrb[15].mxu1  ;;  %658 = vst.msk [vmem:[%s1013_s27 + $0xf0] sm:$0xff] %vm627_vm1, %v625_v38  ;;  %v623_v43 = vsel %vm559_vm14, %v516_v31, %v591_v35  ;;  %vm562_vm0 = vcmp.ge.f32.partialorder %v853_v37, 0.0  ;;  %v594_v44 = vmul.f32 0.2, %v853_v37 }
 0x104   : > { %640 = vst.msk [vmem:[%s1013_s27 + $0x60] sm:$0xff] %vm627_vm1, %v607_v39  ;;  %vm544_vm2 = vcmp.ge.f32.partialorder %v455_v41, 0.0  ;;  %656 = vst.msk [vmem:[%s1013_s27 + $0xe0] sm:$0xff] %vm627_vm1, %v623_v43  ;;  %v610_v45 = vsel %vm546_vm15, %v837_v36, %v578_v40  ;;  %v576_v46 = vmul.f32 0.2, %v455_v41  ;;  %vm560_vm3 = vcmp.ge.f32.partialorder %v519_v42, 0.0 }
 0x105   : > { %v592_v47 = vmul.f32 0.2, %v519_v42  ;;  %643 = vst.msk [vmem:[%s1013_s27 + $0x78] sm:$0xff] %vm627_vm1, %v610_v45  ;;  %v626_v48 = vsel %vm562_vm0, %v853_v37, %v594_v44 }
 0x106   : > { %659 = vst.msk [vmem:[%s1013_s27 + $0xf8] sm:$0xff] %vm627_vm1, %v626_v48  ;;  %v608_v49 = vsel %vm544_vm2, %v455_v41, %v576_v46 }
 0x107   : > { %v624_v50 = vsel %vm560_vm3, %v519_v42, %v592_v47  ;;  %641 = vst.msk [vmem:[%s1013_s27 + $0x68] sm:$0xff] %vm627_vm1, %v608_v49 }
 0x108   : > { %657 = vst.msk [vmem:[%s1013_s27 + $0xe8] sm:$0xff] %vm627_vm1, %v624_v50 }
 0x109 PF: > { %s12_s11 = sadd.s32 1, %s925_s11   ;;  %s1091_s9 = smov %s921_s10 }
 0x10a   : > { %p9_p5 = scmp.ge.s32.totalorder %s12_s11, 10   ;;  %s1092_s10 = smov %s1094_s12 }
 0x10c   :  { %11 = sbr.rel (!%p9_p5) target bundleno = 2 (0x2), region = 61 }

// kernel: discriminator_forward.8
= control target key start
LH: loop header
LB: loop body
LE: loop exit
PB: predicated region body
PF: predicated region fallthrough
CT: control target
= control target key end

     0   :  { %s3015_s9 = smov 0   ;;  %s3017_s10 = smov 0   ;;  %s3507_s0 = inlined_call_operand.vmem [shape: bf16[512,1024], index: 0, kind: input, shape index: {}]   ;;  %s3508_s1 = inlined_call_operand.vmem [shape: bf16[1024,128], index: 1, kind: input, shape index: {}]   ;;  %s3509_s2 = inlined_call_operand.vmem [shape: f32[512,128], index: 2, kind: output, shape index: {}]  }
   0x1   :  { %s3019_s11 = smov 0  }
   0x2 LB: > { %s24_s12 = sadd.s32 1, %s2994_s10  ;;  %p2239_p0 = scmp.ge.s32.totalorder %s2998_s11, 1  ;;  %s2998_s11 = sphi %s3019_s11, %s12_s11   ;;  %s2994_s10 = sphi %s3017_s10, %s3511_s10   ;;  %s2990_s9 = sphi %s3015_s9, %s3510_s9  }
   0x3   : > { %p26_p1 = scmp.ge.s32.totalorder %s24_s12, 2  ;;  %p137_p2 = scmp.lt.s32.totalorder %s2998_s11, 3 }
   0x5   : > { %s3513_s12 = smov (%p26_p1, %s24_s12), 0  ;;  %p138_p3 = pnand %p2239_p0, %p137_p2 }
   0x6   : > { %v2912_v0 = vld [vmem:[%s3508_s1 + $0x40] sm:$0xff] (!%p138_p3)   ;;  %v2916_v4 = vld [vmem:[%s3508_s1 + $0x48] sm:$0xff] (!%p138_p3)   ;;  %v2920_v8 = vld [vmem:[%s3508_s1 + $0x50] sm:$0xff] (!%p138_p3)   ;;  %s2240_s21 = sshll.u32 (!%p138_p3), %s2990_s9, 5 }
   0x7   : > { %141 = sbr.rel (%p138_p3) target bundleno = 510 (0x1fe), region = 28  ;;  %v2913_v1 = vld [vmem:[%s3508_s1 + $0xc0] sm:$0xff] (!%p138_p3)   ;;  %2440 = vmatprep.subr.bf16.mxu0 (!%p138_p3), %v2912_v0  ;;  %v2917_v5 = vld [vmem:[%s3508_s1 + $0xc8] sm:$0xff] (!%p138_p3)   ;;  %v2921_v9 = vld [vmem:[%s3508_s1 + $0xd0] sm:$0xff] (!%p138_p3)   ;;  %p168_p4 = scmp.lt.s32.totalorder (!%p138_p3), %s2240_s21, 63 }
   0x8   : > { %v2914_v2 = vld [vmem:[%s3508_s1] sm:$0xff] (!%p138_p3)   ;;  %2552 = vmatprep.subr.bf16.mxu1 (!%p138_p3), %v2913_v1  ;;  %v2918_v6 = vld [vmem:[%s3508_s1 + $0x8] sm:$0xff] (!%p138_p3)   ;;  %v2922_v10 = vld [vmem:[%s3508_s1 + $0x10] sm:$0xff] (!%p138_p3)  }
   0x9   : > { %v2915_v3 = vld [vmem:[%s3508_s1 + $0x80] sm:$0xff] (!%p138_p3)   ;;  %2441 = vmatpush3.bf16.msra.mxu0 (!%p138_p3), %v2914_v2  ;;  %v2919_v7 = vld [vmem:[%s3508_s1 + $0x88] sm:$0xff] (!%p138_p3)   ;;  %v2923_v11 = vld [vmem:[%s3508_s1 + $0x90] sm:$0xff] (!%p138_p3)  }
   0xa   : > { %2553 = vmatpush3.bf16.msra.mxu1 (!%p138_p3), %v2915_v3  ;;  %2442 = vmatprep.subr.bf16.mxu0 (!%p138_p3), %v2916_v4  ;;  %v2924_v12 = vld [vmem:[%s3508_s1 + $0x58] sm:$0xff] (!%p138_p3)   ;;  %v2928_v16 = vld [vmem:[%s3508_s1 + $0x60] sm:$0xff] (!%p138_p3)   ;;  %v2932_v20 = vld [vmem:[%s3508_s1 + $0x68] sm:$0xff] (!%p138_p3)  }
   0xb   : > { %2554 = vmatprep.subr.bf16.mxu1 (!%p138_p3), %v2917_v5  ;;  %v2925_v13 = vld [vmem:[%s3508_s1 + $0xd8] sm:$0xff] (!%p138_p3)   ;;  %v2929_v17 = vld [vmem:[%s3508_s1 + $0xe0] sm:$0xff] (!%p138_p3)   ;;  %v2933_v21 = vld [vmem:[%s3508_s1 + $0xe8] sm:$0xff] (!%p138_p3)  }
   0xc   : > { %v2926_v14 = vld [vmem:[%s3508_s1 + $0x18] sm:$0xff] (!%p138_p3)   ;;  %v2930_v18 = vld [vmem:[%s3508_s1 + $0x20] sm:$0xff] (!%p138_p3)   ;;  %v2934_v22 = vld [vmem:[%s3508_s1 + $0x28] sm:$0xff] (!%p138_p3)  }
   0xd   : > { %2443 = vmatpush3.bf16.msra.mxu0 (!%p138_p3), %v2918_v6  ;;  %v2927_v15 = vld [vmem:[%s3508_s1 + $0x98] sm:$0xff] (!%p138_p3)   ;;  %v2931_v19 = vld [vmem:[%s3508_s1 + $0xa0] sm:$0xff] (!%p138_p3)   ;;  %v2935_v23 = vld [vmem:[%s3508_s1 + $0xa8] sm:$0xff] (!%p138_p3)  }
   0xe   : > { %2555 = vmatpush3.bf16.msra.mxu1 %v2919_v7  ;;  %2444 = vmatprep.subr.bf16.mxu0 %v2920_v8  ;;  %s3515_s21 = smov (!%p168_p4, %s2240_s21), 63  ;;  %v2936_v24 = vld [vmem:[%s3508_s1 + $0x70] sm:$0xff]   ;;  %v2940_v28 = vld [vmem:[%s3508_s1 + $0x78] sm:$0xff]   ;;  %v2944_v40 = vld [vmem:[%s3508_s1 + $0x140] sm:$0xff]  }
   0xf   : > { %2556 = vmatprep.subr.bf16.mxu1 %v2921_v9  ;;  %v2937_v25 = vld [vmem:[%s3508_s1 + $0xf0] sm:$0xff]   ;;  %s2439_s19 = sshll.u32 %s3515_s21, 5  ;;  %v2941_v29 = vld [vmem:[%s3508_s1 + $0xf8] sm:$0xff]   ;;  %v2945_v41 = vld [vmem:[%s3508_s1 + $0x100] sm:$0xff]  }
  0x10   : > { %v2938_v26 = vld [vmem:[%s3508_s1 + $0x30] sm:$0xff]   ;;  %s3132_s29 = scalar_lea.vmem %s3507_s0, %s2439_s19  ;;  %v2942_v30 = vld [vmem:[%s3508_s1 + $0x38] sm:$0xff]   ;;  %v2946_v42 = vld [vmem:[%s3508_s1 + $0x1c0] sm:$0xff]  }
  0x11   : > { %2445 = vmatpush3.bf16.msra.mxu0 %v2922_v10  ;;  %v2939_v27 = vld [vmem:[%s3508_s1 + $0xb0] sm:$0xff]   ;;  %v2943_v31 = vld [vmem:[%s3508_s1 + $0xb8] sm:$0xff]   ;;  %v188_v32 = vld [vmem:[%s3132_s29] sm:$0xff] }
  0x12   : > { %2557 = vmatpush3.bf16.msra.mxu1 %v2923_v11  ;;  %2446 = vmatprep.subr.bf16.mxu0 %v2924_v12  ;;  %v192_v33 = vld [vmem:[%s3132_s29 + $0x20] sm:$0xff]  ;;  %v189_v34 = vld [vmem:[%s3132_s29 + $0x8] sm:$0xff]  ;;  %v2952_v2 = vld [vmem:[%s3508_s1 + $0x150] sm:$0xff]  }
  0x13   : > { %2558 = vmatprep.subr.bf16.mxu1 %v2925_v13  ;;  %v2245_v35 = vcombine.low %v188_v32, %v192_v33  ;;  %v2246_v36 = vcombine.high %v188_v32, %v192_v33  ;;  %v193_v37 = vld [vmem:[%s3132_s29 + $0x28] sm:$0xff]  ;;  %v2947_v43 = vld [vmem:[%s3508_s1 + $0x180] sm:$0xff]   ;;  %v2953_v4 = vld [vmem:[%s3508_s1 + $0x110] sm:$0xff]  }
  0x14   : > { %v2247_v38 = vcombine.low %v189_v34, %v193_v37  ;;  %v2248_v39 = vcombine.high %v189_v34, %v193_v37  ;;  %v196_v44 = vld [vmem:[%s3132_s29 + $0x40] sm:$0xff]  ;;  %v197_v47 = vld [vmem:[%s3132_s29 + $0x48] sm:$0xff]  ;;  %v2954_v7 = vld [vmem:[%s3508_s1 + $0x1d0] sm:$0xff]  }
  0x15   : > { %2447 = vmatpush3.bf16.msra.mxu0 %v2926_v14  ;;  %1500 = vmatprep.mubr.bf16.mxu0 %v2246_v36  ;;  %v200_v45 = vld [vmem:[%s3132_s29 + $0x60] sm:$0xff]  ;;  %v201_v48 = vld [vmem:[%s3132_s29 + $0x68] sm:$0xff]  ;;  %v2955_v9 = vld [vmem:[%s3508_s1 + $0x190] sm:$0xff]  }
  0x16   : > { %2559 = vmatpush3.bf16.msra.mxu1 %v2927_v15  ;;  %2448 = vmatprep.subr.bf16.mxu0 %v2928_v16  ;;  %v2254_v46 = vcombine.high %v196_v44, %v200_v45  ;;  %v204_v49 = vld [vmem:[%s3132_s29 + $0x80] sm:$0xff]  ;;  %v2256_v50 = vcombine.high %v197_v47, %v201_v48  ;;  %v205_v52 = vld [vmem:[%s3132_s29 + $0x88] sm:$0xff]  ;;  %v2253_v54 = vcombine.low %v196_v44, %v200_v45  ;;  %v2956_v14 = vld [vmem:[%s3508_s1 + $0x158] sm:$0xff]  }
  0x17   : > { %2560 = vmatprep.subr.bf16.mxu1 %v2929_v17  ;;  %1661 = vmatprep.mubr.bf16.mxu1 %v2248_v39  ;;  %v208_v51 = vld [vmem:[%s3132_s29 + $0xa0] sm:$0xff]  ;;  %v209_v53 = vld [vmem:[%s3132_s29 + $0xa8] sm:$0xff]  ;;  %v2255_v56 = vcombine.low %v197_v47, %v201_v48  ;;  %v2957_v15 = vld [vmem:[%s3508_s1 + $0x118] sm:$0xff]  }
  0x18   : > { %v2948_v55 = vld [vmem:[%s3508_s1 + $0x148] sm:$0xff]   ;;  %v2262_v57 = vcombine.high %v204_v49, %v208_v51  ;;  %v2264_v59 = vcombine.high %v205_v52, %v209_v53  ;;  %v212_v62 = vld [vmem:[%s3132_s29 + $0xc0] sm:$0xff]  ;;  %v2261_v3 = vcombine.low %v204_v49, %v208_v51  ;;  %v2263_v5 = vcombine.low %v205_v52, %v209_v53  ;;  %v2958_v17 = vld [vmem:[%s3508_s1 + $0x1d8] sm:$0xff]  }
  0x19   : > { %2449 = vmatpush3.bf16.msra.mxu0 %v2930_v18  ;;  %v2949_v58 = vld [vmem:[%s3508_s1 + $0x108] sm:$0xff]   ;;  %v216_v63 = vld [vmem:[%s3132_s29 + $0xe0] sm:$0xff]  ;;  %v2969_v47 = vld [vmem:[%s3508_s1 + $0x130] sm:$0xff]  }
  0x1a   : > { %2561 = vmatpush3.bf16.msra.mxu1 %v2931_v19  ;;  %2450 = vmatprep.subr.bf16.mxu0 %v2932_v20  ;;  %v2950_v60 = vld [vmem:[%s3508_s1 + $0x1c8] sm:$0xff]   ;;  %v2270_v6 = vcombine.high %v212_v62, %v216_v63  ;;  %v220_v10 = vld [vmem:[%s3132_s29 + $0x100] sm:$0xff]  ;;  %v2269_v16 = vcombine.low %v212_v62, %v216_v63  ;;  %v2959_v20 = vld [vmem:[%s3508_s1 + $0x198] sm:$0xff]  }
  0x1b   : > { %2562 = vmatprep.subr.bf16.mxu1 %v2933_v21  ;;  %v2951_v61 = vld [vmem:[%s3508_s1 + $0x188] sm:$0xff]   ;;  %v224_v11 = vld [vmem:[%s3132_s29 + $0x120] sm:$0xff]  ;;  %v2970_v48 = vld [vmem:[%s3508_s1 + $0x1f0] sm:$0xff]  }
  0x1c   : > { %v213_v0 = vld [vmem:[%s3132_s29 + $0xc8] sm:$0xff]  ;;  %v2278_v19 = vcombine.high %v220_v10, %v224_v11  ;;  %v2971_v49 = vld [vmem:[%s3508_s1 + $0x1b0] sm:$0xff]   ;;  %v248_v51 = vld [vmem:[%s3132_s29 + $0x1e0] sm:$0xff] }
  0x1d   : > { %2451 = vmatpush3.bf16.msra.mxu0 %v2934_v22  ;;  %v217_v1 = vld [vmem:[%s3132_s29 + $0xe8] sm:$0xff]  ;;  %v228_v22 = vld [vmem:[%s3132_s29 + $0x140] sm:$0xff] }
  0x1e   : > { %2563 = vmatpush3.bf16.msra.mxu1 %v2935_v23  ;;  %2452 = vmatprep.subr.bf16.mxu0 %v2936_v24  ;;  %v2272_v8 = vcombine.high %v213_v0, %v217_v1  ;;  %v221_v12 = vld [vmem:[%s3132_s29 + $0x108] sm:$0xff]  ;;  %v2271_v18 = vcombine.low %v213_v0, %v217_v1  ;;  %v232_v23 = vld [vmem:[%s3132_s29 + $0x160] sm:$0xff] }
  0x1f   : > { %2564 = vmatprep.subr.bf16.mxu1 %v2937_v25  ;;  %v225_v13 = vld [vmem:[%s3132_s29 + $0x128] sm:$0xff]  ;;  %v2960_v24 = vld [vmem:[%s3508_s1 + $0x160] sm:$0xff]   ;;  %v2286_v32 = vcombine.high %v228_v22, %v232_v23 }
  0x20   : > { %v2280_v21 = vcombine.high %v221_v12, %v225_v13  ;;  %v229_v25 = vld [vmem:[%s3132_s29 + $0x148] sm:$0xff]  ;;  %v252_v62 = vld [vmem:[%s3132_s29 + $0x200] sm:$0xff] }
  0x21   : > { %2453 = vmatpush3.bf16.msra.mxu0 %v2938_v26  ;;  %v233_v26 = vld [vmem:[%s3132_s29 + $0x168] sm:$0xff]  ;;  %v256_v63 = vld [vmem:[%s3132_s29 + $0x220] sm:$0xff] }
  0x22   : > { %2565 = vmatpush3.bf16.msra.mxu1 %v2939_v27  ;;  %2454 = vmatprep.subr.bf16.mxu0 %v2940_v28  ;;  %v2961_v27 = vld [vmem:[%s3508_s1 + $0x120] sm:$0xff]   ;;  %v2288_v33 = vcombine.high %v229_v25, %v233_v26  ;;  %v2964_v34 = vld [vmem:[%s3508_s1 + $0x168] sm:$0xff]  }
  0x23   : > { %2566 = vmatprep.subr.bf16.mxu1 %v2941_v29  ;;  %v2962_v28 = vld [vmem:[%s3508_s1 + $0x1e0] sm:$0xff]   ;;  %v2965_v36 = vld [vmem:[%s3508_s1 + $0x128] sm:$0xff]  }
  0x24   : > { %v2963_v29 = vld [vmem:[%s3508_s1 + $0x1a0] sm:$0xff]   ;;  %v2966_v37 = vld [vmem:[%s3508_s1 + $0x1e8] sm:$0xff]  }
  0x25   : > { %2455 = vmatpush3.bf16.msra.mxu0 %v2942_v30  ;;  %v2277_v30 = vcombine.low %v220_v10, %v224_v11  ;;  %v2967_v39 = vld [vmem:[%s3508_s1 + $0x1a8] sm:$0xff]   ;;  %v2309_v10 = vcombine.low %v252_v62, %v256_v63 }
  0x26   : > { %2567 = vmatpush3.bf16.msra.mxu1 %v2943_v31  ;;  %2664 = vmatprep.subr.bf16.mxu0 %v2944_v40  ;;  %v2279_v31 = vcombine.low %v221_v12, %v225_v13  ;;  %v237_v40 = vld [vmem:[%s3132_s29 + $0x188] sm:$0xff] }
  0x27   : > { %2776 = vmatprep.subr.bf16.mxu1 %v2946_v42  ;;  %v2285_v42 = vcombine.low %v228_v22, %v232_v23  ;;  %v245_v52 = vld [vmem:[%s3132_s29 + $0x1c8] sm:$0xff]  ;;  %v276_v22 = vld [vmem:[%s3132_s29 + $0x2c0] sm:$0xff] }
  0x28   : > { %1501 = vmatmul.mubr.bf16.vlgmr.msra.gmra.mrb[0].mxu0 %v2245_v35  ;;  %v236_v35 = vld [vmem:[%s3132_s29 + $0x180] sm:$0xff]  ;;  %v249_v53 = vld [vmem:[%s3132_s29 + $0x1e8] sm:$0xff] }
  0x29   : > { %1662 = vmatmul.mubr.bf16.vlgmr.msra.gmra.mrb[0].mxu1 %v2247_v38  ;;  %2665 = vmatpush3.bf16.msra.mxu0 %v2945_v41  ;;  %v240_v38 = vld [vmem:[%s3132_s29 + $0x1a0] sm:$0xff]  ;;  %v241_v41 = vld [vmem:[%s3132_s29 + $0x1a8] sm:$0xff] }
  0x2a   : > { %2777 = vmatpush3.bf16.msra.mxu1 %v2947_v43  ;;  %1508 = vmatprep.mubr.bf16.mxu0 %v2254_v46  ;;  %v2287_v43 = vcombine.low %v229_v25, %v233_v26  ;;  %v2294_v44 = vcombine.high %v236_v35, %v240_v38  ;;  %v2296_v45 = vcombine.high %v237_v40, %v241_v41  ;;  %v2968_v46 = vld [vmem:[%s3508_s1 + $0x170] sm:$0xff]   ;;  %v253_v0 = vld [vmem:[%s3132_s29 + $0x208] sm:$0xff]  ;;  %v280_v23 = vld [vmem:[%s3132_s29 + $0x2e0] sm:$0xff] }
  0x2b   : > { %1669 = vmatprep.mubr.bf16.mxu1 %v2256_v50  ;;  %2666 = vmatprep.subr.bf16.mxu0 %v2948_v55  ;;  %v244_v50 = vld [vmem:[%s3132_s29 + $0x1c0] sm:$0xff]  ;;  %v2972_v55 = vld [vmem:[%s3508_s1 + $0x178] sm:$0xff]   ;;  %v257_v1 = vld [vmem:[%s3132_s29 + $0x228] sm:$0xff] }
  0x2c   : > { %2778 = vmatprep.subr.bf16.mxu1 %v2950_v60  ;;  %v2974_v60 = vld [vmem:[%s3508_s1 + $0x1f8] sm:$0xff]   ;;  %v2311_v11 = vcombine.low %v253_v0, %v257_v1  ;;  %v281_v25 = vld [vmem:[%s3132_s29 + $0x2e8] sm:$0xff] }
  0x2d   : > { %2667 = vmatpush3.bf16.msra.mxu0 %v2949_v58  ;;  %v2973_v58 = vld [vmem:[%s3508_s1 + $0x138] sm:$0xff]  }
  0x2e   : > { %2779 = vmatpush3.bf16.msra.mxu1 %v2951_v61  ;;  %2668 = vmatprep.subr.bf16.mxu0 %v2952_v2  ;;  %v2975_v61 = vld [vmem:[%s3508_s1 + $0x1b8] sm:$0xff]   ;;  %v2301_v2 = vcombine.low %v244_v50, %v248_v51 }
  0x2f   : > { %2780 = vmatprep.subr.bf16.mxu1 %v2954_v7  ;;  %v264_v7 = vld [vmem:[%s3132_s29 + $0x260] sm:$0xff] }
  0x30   : > { %1509 = vmatmul.mubr.bf16.gmra.mrb[4].mxu0 %v2253_v54  ;;  %v2293_v54 = vcombine.low %v236_v35, %v240_v38  ;;  %v292_v38 = vld [vmem:[%s3132_s29 + $0x340] sm:$0xff] }
  0x31   : > { %1670 = vmatmul.mubr.bf16.gmra.mrb[4].mxu1 %v2255_v56  ;;  %1516 = vmatprep.mubr.bf16.mxu0 %v2262_v57  ;;  %v2295_v56 = vcombine.low %v237_v40, %v241_v41  ;;  %v2302_v57 = vcombine.high %v244_v50, %v248_v51  ;;  %v293_v40 = vld [vmem:[%s3132_s29 + $0x348] sm:$0xff] }
  0x32   : > { %1677 = vmatprep.mubr.bf16.mxu1 %v2264_v59  ;;  %2669 = vmatpush3.bf16.msra.mxu0 %v2953_v4  ;;  %v2304_v59 = vcombine.high %v245_v52, %v249_v53  ;;  %v2310_v4 = vcombine.high %v252_v62, %v256_v63  ;;  %v297_v41 = vld [vmem:[%s3132_s29 + $0x368] sm:$0xff]  ;;  %v190_v62 = vld [vmem:[%s3132_s29 + $0x10] sm:$0xff] }
  0x33   : > { %2781 = vmatpush3.bf16.msra.mxu1 %v2955_v9  ;;  %2670 = vmatprep.subr.bf16.mxu0 %v2956_v14  ;;  %v265_v9 = vld [vmem:[%s3132_s29 + $0x268] sm:$0xff]  ;;  %v268_v14 = vld [vmem:[%s3132_s29 + $0x280] sm:$0xff]  ;;  %v2351_v51 = vcombine.low %v293_v40, %v297_v41  ;;  %v194_v63 = vld [vmem:[%s3132_s29 + $0x30] sm:$0xff] }
  0x34   : > { %2782 = vmatprep.subr.bf16.mxu1 %v2958_v17  ;;  %v273_v17 = vld [vmem:[%s3132_s29 + $0x2a8] sm:$0xff] }
  0x36   : > { %2671 = vmatpush3.bf16.msra.mxu0 %v2957_v15  ;;  %v272_v15 = vld [vmem:[%s3132_s29 + $0x2a0] sm:$0xff] }
  0x37   : > { %2783 = vmatpush3.bf16.msra.mxu1 %v2959_v20  ;;  %2672 = vmatprep.subr.bf16.mxu0 %v2960_v24  ;;  %v2326_v20 = vcombine.high %v268_v14, %v272_v15  ;;  %v277_v24 = vld [vmem:[%s3132_s29 + $0x2c8] sm:$0xff]  ;;  %v2325_v26 = vcombine.low %v268_v14, %v272_v15  ;;  %v206_v14 = vld [vmem:[%s3132_s29 + $0x90] sm:$0xff] }
  0x38   : > { %1517 = vmatmul.mubr.bf16.gmra.mrb[8].mxu0 %v2261_v3  ;;  %2784 = vmatprep.subr.bf16.mxu1 %v2962_v28  ;;  %v2303_v3 = vcombine.low %v245_v52, %v249_v53  ;;  %v2334_v28 = vcombine.high %v276_v22, %v280_v23  ;;  %v2335_v35 = vcombine.low %v277_v24, %v281_v25  ;;  %v210_v15 = vld [vmem:[%s3132_s29 + $0xb0] sm:$0xff] }
  0x39   : > { %1678 = vmatmul.mubr.bf16.gmra.mrb[8].mxu1 %v2263_v5  ;;  %1524 = vmatprep.mubr.bf16.mxu0 %v2270_v6  ;;  %v2312_v5 = vcombine.high %v253_v0, %v257_v1  ;;  %v260_v6 = vld [vmem:[%s3132_s29 + $0x240] sm:$0xff]  ;;  %v191_v0 = vld [vmem:[%s3132_s29 + $0x18] sm:$0xff] }
  0x3a   : > { %1685 = vmatprep.mubr.bf16.mxu1 %v2272_v8  ;;  %2673 = vmatpush3.bf16.msra.mxu0 %v2961_v27  ;;  %v261_v8 = vld [vmem:[%s3132_s29 + $0x248] sm:$0xff]  ;;  %v2318_v12 = vcombine.high %v260_v6, %v264_v7  ;;  %v195_v1 = vld [vmem:[%s3132_s29 + $0x38] sm:$0xff] }
  0x3b   : > { %2785 = vmatpush3.bf16.msra.mxu1 %v2963_v29  ;;  %2674 = vmatprep.subr.bf16.mxu0 %v2964_v34  ;;  %v2320_v13 = vcombine.high %v261_v8, %v265_v9  ;;  %v2336_v29 = vcombine.high %v277_v24, %v281_v25  ;;  %v2333_v34 = vcombine.low %v276_v22, %v280_v23  ;;  %v214_v22 = vld [vmem:[%s3132_s29 + $0xd0] sm:$0xff]  ;;  %v215_v24 = vld [vmem:[%s3132_s29 + $0xd8] sm:$0xff] }
  0x3c   : > { %2786 = vmatprep.subr.bf16.mxu1 %v2966_v37  ;;  %v218_v23 = vld [vmem:[%s3132_s29 + $0xf0] sm:$0xff]  ;;  %v219_v25 = vld [vmem:[%s3132_s29 + $0xf8] sm:$0xff] }
  0x3e   : > { %2675 = vmatpush3.bf16.msra.mxu0 %v2965_v36 }
  0x3f   : > { %2787 = vmatpush3.bf16.msra.mxu1 %v2967_v39  ;;  %2676 = vmatprep.subr.bf16.mxu0 %v2968_v46  ;;  %v296_v39 = vld [vmem:[%s3132_s29 + $0x360] sm:$0xff] }
  0x40   : > { %1525 = vmatmul.mubr.bf16.gmra.mrb[12].mxu0 %v2269_v16  ;;  %2788 = vmatprep.subr.bf16.mxu1 %v2970_v48  ;;  %v269_v16 = vld [vmem:[%s3132_s29 + $0x288] sm:$0xff]  ;;  %v300_v46 = vld [vmem:[%s3132_s29 + $0x380] sm:$0xff]  ;;  %v2349_v50 = vcombine.low %v292_v38, %v296_v39 }
  0x41   : > { %1686 = vmatmul.mubr.bf16.gmra.mrb[12].mxu1 %v2271_v18  ;;  %1532 = vmatprep.mubr.bf16.mxu0 %v2278_v19  ;;  %v2317_v18 = vcombine.low %v260_v6, %v264_v7  ;;  %v2319_v19 = vcombine.low %v261_v8, %v265_v9  ;;  %v2327_v27 = vcombine.low %v269_v16, %v273_v17  ;;  %v301_v48 = vld [vmem:[%s3132_s29 + $0x388] sm:$0xff]  ;;  %v198_v6 = vld [vmem:[%s3132_s29 + $0x50] sm:$0xff]  ;;  %v199_v8 = vld [vmem:[%s3132_s29 + $0x58] sm:$0xff] }
  0x42   : > { %1693 = vmatprep.mubr.bf16.mxu1 %v2280_v21  ;;  %2677 = vmatpush3.bf16.msra.mxu0 %v2969_v47  ;;  %v2328_v21 = vcombine.high %v269_v16, %v273_v17  ;;  %v304_v47 = vld [vmem:[%s3132_s29 + $0x3a0] sm:$0xff]  ;;  %v202_v7 = vld [vmem:[%s3132_s29 + $0x70] sm:$0xff]  ;;  %v203_v9 = vld [vmem:[%s3132_s29 + $0x78] sm:$0xff] }
  0x43   : > { %2789 = vmatpush3.bf16.msra.mxu1 %v2971_v49  ;;  %2678 = vmatprep.subr.bf16.mxu0 %v2972_v55  ;;  %v305_v49 = vld [vmem:[%s3132_s29 + $0x3a8] sm:$0xff]  ;;  %v2358_v52 = vcombine.high %v300_v46, %v304_v47  ;;  %v312_v55 = vld [vmem:[%s3132_s29 + $0x3e0] sm:$0xff]  ;;  %v207_v16 = vld [vmem:[%s3132_s29 + $0x98] sm:$0xff] }
  0x44   : > { %2790 = vmatprep.subr.bf16.mxu1 %v2974_v60  ;;  %v2360_v53 = vcombine.high %v301_v48, %v305_v49  ;;  %v211_v17 = vld [vmem:[%s3132_s29 + $0xb8] sm:$0xff] }
  0x46   : > { %2679 = vmatpush3.bf16.msra.mxu0 %v2973_v58  ;;  %v2357_v58 = vcombine.low %v300_v46, %v304_v47  ;;  %v238_v46 = vld [vmem:[%s3132_s29 + $0x190] sm:$0xff] }
  0x47   : > { %2791 = vmatpush3.bf16.msra.mxu1 %v2975_v61  ;;  %v242_v47 = vld [vmem:[%s3132_s29 + $0x1b0] sm:$0xff] }
  0x48   : > { %1533 = vmatmul.mubr.bf16.gmra.mrb[16].mxu0 %v2277_v30  ;;  %v284_v30 = vld [vmem:[%s3132_s29 + $0x300] sm:$0xff] }
  0x49   : > { %1694 = vmatmul.mubr.bf16.gmra.mrb[16].mxu1 %v2279_v31  ;;  %1540 = vmatprep.mubr.bf16.mxu0 %v2286_v32  ;;  %v288_v31 = vld [vmem:[%s3132_s29 + $0x320] sm:$0xff]  ;;  %v285_v32 = vld [vmem:[%s3132_s29 + $0x308] sm:$0xff] }
  0x4a   : > { %1701 = vmatprep.mubr.bf16.mxu1 %v2288_v33  ;;  %v289_v33 = vld [vmem:[%s3132_s29 + $0x328] sm:$0xff]  ;;  %v2342_v36 = vcombine.high %v284_v30, %v288_v31 }
  0x4b   : > { %v2344_v37 = vcombine.high %v285_v32, %v289_v33 }
  0x50   : > { %1541 = vmatmul.mubr.bf16.gmra.mrb[20].mxu0 %v2285_v42  ;;  %v2341_v42 = vcombine.low %v284_v30, %v288_v31  ;;  %v222_v30 = vld [vmem:[%s3132_s29 + $0x110] sm:$0xff] }
  0x51   : > { %1702 = vmatmul.mubr.bf16.gmra.mrb[20].mxu1 %v2287_v43  ;;  %1548 = vmatprep.mubr.bf16.mxu0 %v2294_v44  ;;  %v2343_v43 = vcombine.low %v285_v32, %v289_v33  ;;  %v2350_v44 = vcombine.high %v292_v38, %v296_v39  ;;  %v226_v31 = vld [vmem:[%s3132_s29 + $0x130] sm:$0xff]  ;;  %v223_v32 = vld [vmem:[%s3132_s29 + $0x118] sm:$0xff] }
  0x52   : > { %1709 = vmatprep.mubr.bf16.mxu1 %v2296_v45  ;;  %v2352_v45 = vcombine.high %v293_v40, %v297_v41  ;;  %v227_v33 = vld [vmem:[%s3132_s29 + $0x138] sm:$0xff]  ;;  %v230_v38 = vld [vmem:[%s3132_s29 + $0x150] sm:$0xff] }
  0x53   : > { %v234_v39 = vld [vmem:[%s3132_s29 + $0x170] sm:$0xff]  ;;  %v231_v40 = vld [vmem:[%s3132_s29 + $0x158] sm:$0xff] }
  0x54   : > { %v235_v41 = vld [vmem:[%s3132_s29 + $0x178] sm:$0xff] }
  0x58   : > { %1549 = vmatmul.mubr.bf16.gmra.mrb[24].mxu0 %v2293_v54  ;;  %v308_v54 = vld [vmem:[%s3132_s29 + $0x3c0] sm:$0xff] }
  0x59   : > { %1710 = vmatmul.mubr.bf16.gmra.mrb[24].mxu1 %v2295_v56  ;;  %1556 = vmatprep.mubr.bf16.mxu0 %v2302_v57  ;;  %v309_v56 = vld [vmem:[%s3132_s29 + $0x3c8] sm:$0xff]  ;;  %v2366_v60 = vcombine.high %v308_v54, %v312_v55 }
  0x5a   : > { %1717 = vmatprep.mubr.bf16.mxu1 %v2304_v59  ;;  %v313_v57 = vld [vmem:[%s3132_s29 + $0x3e8] sm:$0xff]  ;;  %v2359_v59 = vcombine.low %v301_v48, %v305_v49  ;;  %v239_v48 = vld [vmem:[%s3132_s29 + $0x198] sm:$0xff] }
  0x5b   : > { %v2368_v61 = vcombine.high %v309_v56, %v313_v57  ;;  %v243_v49 = vld [vmem:[%s3132_s29 + $0x1b8] sm:$0xff] }
  0x60   : > { %1557 = vmatmul.mubr.bf16.gmra.mrb[28].mxu0 %v2301_v2  ;;  %v2365_v2 = vcombine.low %v308_v54, %v312_v55  ;;  %v246_v54 = vld [vmem:[%s3132_s29 + $0x1d0] sm:$0xff] }
  0x61   : > { %1718 = vmatmul.mubr.bf16.gmra.mrb[28].mxu1 %v2303_v3  ;;  %1564 = vmatprep.mubr.bf16.mxu0 %v2310_v4  ;;  %v2367_v3 = vcombine.low %v309_v56, %v313_v57  ;;  %v2250_v4 = vcombine.high %v190_v62, %v194_v63  ;;  %v250_v55 = vld [vmem:[%s3132_s29 + $0x1f0] sm:$0xff]  ;;  %v247_v56 = vld [vmem:[%s3132_s29 + $0x1d8] sm:$0xff] }
  0x62   : > { %1725 = vmatprep.mubr.bf16.mxu1 %v2312_v5  ;;  %v2252_v5 = vcombine.high %v191_v0, %v195_v1  ;;  %v251_v57 = vld [vmem:[%s3132_s29 + $0x1f8] sm:$0xff] }
  0x68   : > { %1565 = vmatmul.mubr.bf16.gmra.mrb[32].mxu0 %v2309_v10  ;;  %v2249_v10 = vcombine.low %v190_v62, %v194_v63  ;;  %v254_v62 = vld [vmem:[%s3132_s29 + $0x210] sm:$0xff] }
  0x69   : > { %1726 = vmatmul.mubr.bf16.gmra.mrb[32].mxu1 %v2311_v11  ;;  %1572 = vmatprep.mubr.bf16.mxu0 %v2318_v12  ;;  %v2251_v11 = vcombine.low %v191_v0, %v195_v1  ;;  %v2258_v12 = vcombine.high %v198_v6, %v202_v7  ;;  %v258_v63 = vld [vmem:[%s3132_s29 + $0x230] sm:$0xff]  ;;  %v255_v0 = vld [vmem:[%s3132_s29 + $0x218] sm:$0xff] }
  0x6a   : > { %1733 = vmatprep.mubr.bf16.mxu1 %v2320_v13  ;;  %v2260_v13 = vcombine.high %v199_v8, %v203_v9  ;;  %v259_v1 = vld [vmem:[%s3132_s29 + $0x238] sm:$0xff] }
  0x70   : > { %1573 = vmatmul.mubr.bf16.gmra.mrb[36].mxu0 %v2317_v18  ;;  %v2257_v18 = vcombine.low %v198_v6, %v202_v7  ;;  %v262_v6 = vld [vmem:[%s3132_s29 + $0x250] sm:$0xff] }
  0x71   : > { %1734 = vmatmul.mubr.bf16.gmra.mrb[36].mxu1 %v2319_v19  ;;  %1580 = vmatprep.mubr.bf16.mxu0 %v2326_v20  ;;  %v2259_v19 = vcombine.low %v199_v8, %v203_v9  ;;  %v2266_v20 = vcombine.high %v206_v14, %v210_v15  ;;  %v266_v7 = vld [vmem:[%s3132_s29 + $0x270] sm:$0xff]  ;;  %v263_v8 = vld [vmem:[%s3132_s29 + $0x258] sm:$0xff] }
  0x72   : > { %1741 = vmatprep.mubr.bf16.mxu1 %v2328_v21  ;;  %v2268_v21 = vcombine.high %v207_v16, %v211_v17  ;;  %v267_v9 = vld [vmem:[%s3132_s29 + $0x278] sm:$0xff] }
  0x78   : > { %1581 = vmatmul.mubr.bf16.gmra.mrb[40].mxu0 %v2325_v26  ;;  %v2265_v26 = vcombine.low %v206_v14, %v210_v15  ;;  %v270_v14 = vld [vmem:[%s3132_s29 + $0x290] sm:$0xff] }
  0x79   : > { %1742 = vmatmul.mubr.bf16.gmra.mrb[40].mxu1 %v2327_v27  ;;  %1588 = vmatprep.mubr.bf16.mxu0 %v2334_v28  ;;  %v2267_v27 = vcombine.low %v207_v16, %v211_v17  ;;  %v2274_v28 = vcombine.high %v214_v22, %v218_v23  ;;  %v274_v15 = vld [vmem:[%s3132_s29 + $0x2b0] sm:$0xff]  ;;  %v271_v16 = vld [vmem:[%s3132_s29 + $0x298] sm:$0xff] }
  0x7a   : > { %1749 = vmatprep.mubr.bf16.mxu1 %v2336_v29  ;;  %v2276_v29 = vcombine.high %v215_v24, %v219_v25  ;;  %v275_v17 = vld [vmem:[%s3132_s29 + $0x2b8] sm:$0xff] }
  0x80   : > { %1589 = vmatmul.mubr.bf16.gmra.mrb[44].mxu0 %v2333_v34  ;;  %v2273_v34 = vcombine.low %v214_v22, %v218_v23  ;;  %v278_v22 = vld [vmem:[%s3132_s29 + $0x2d0] sm:$0xff] }
  0x81   : > { %1750 = vmatmul.mubr.bf16.gmra.mrb[44].mxu1 %v2335_v35  ;;  %1596 = vmatprep.mubr.bf16.mxu0 %v2342_v36  ;;  %v2275_v35 = vcombine.low %v215_v24, %v219_v25  ;;  %v2282_v36 = vcombine.high %v222_v30, %v226_v31  ;;  %v282_v23 = vld [vmem:[%s3132_s29 + $0x2f0] sm:$0xff]  ;;  %v279_v24 = vld [vmem:[%s3132_s29 + $0x2d8] sm:$0xff] }
  0x82   : > { %1757 = vmatprep.mubr.bf16.mxu1 %v2344_v37  ;;  %v2284_v37 = vcombine.high %v223_v32, %v227_v33  ;;  %v283_v25 = vld [vmem:[%s3132_s29 + $0x2f8] sm:$0xff] }
  0x88   : > { %1597 = vmatmul.mubr.bf16.gmra.mrb[48].mxu0 %v2341_v42  ;;  %v2281_v42 = vcombine.low %v222_v30, %v226_v31  ;;  %v286_v30 = vld [vmem:[%s3132_s29 + $0x310] sm:$0xff] }
  0x89   : > { %1758 = vmatmul.mubr.bf16.gmra.mrb[48].mxu1 %v2343_v43  ;;  %1604 = vmatprep.mubr.bf16.mxu0 %v2350_v44  ;;  %v2283_v43 = vcombine.low %v223_v32, %v227_v33  ;;  %v2290_v44 = vcombine.high %v230_v38, %v234_v39  ;;  %v290_v31 = vld [vmem:[%s3132_s29 + $0x330] sm:$0xff]  ;;  %v287_v33 = vld [vmem:[%s3132_s29 + $0x318] sm:$0xff] }
  0x8a   : > { %1765 = vmatprep.mubr.bf16.mxu1 %v2352_v45  ;;  %v2292_v45 = vcombine.high %v231_v40, %v235_v41 }
  0x90   : > { %1605 = vmatmul.mubr.bf16.gmra.mrb[52].mxu0 %v2349_v50  ;;  %v2289_v50 = vcombine.low %v230_v38, %v234_v39 }
  0x91   : > { %1766 = vmatmul.mubr.bf16.gmra.mrb[52].mxu1 %v2351_v51  ;;  %1612 = vmatprep.mubr.bf16.mxu0 %v2358_v52  ;;  %v2291_v51 = vcombine.low %v231_v40, %v235_v41  ;;  %v2298_v52 = vcombine.high %v238_v46, %v242_v47  ;;  %v2339_v41 = vcombine.low %v279_v24, %v283_v25 }
  0x92   : > { %1773 = vmatprep.mubr.bf16.mxu1 %v2360_v53  ;;  %v2300_v53 = vcombine.high %v239_v48, %v243_v49 }
  0x98   : > { %1613 = vmatmul.mubr.bf16.gmra.mrb[56].mxu0 %v2357_v58  ;;  %v2297_v58 = vcombine.low %v238_v46, %v242_v47 }
  0x99   : > { %1774 = vmatmul.mubr.bf16.gmra.mrb[56].mxu1 %v2359_v59  ;;  %1620 = vmatprep.mubr.bf16.mxu0 %v2366_v60  ;;  %v2299_v59 = vcombine.low %v239_v48, %v243_v49  ;;  %v2306_v60 = vcombine.high %v246_v54, %v250_v55 }
  0x9a   : > { %1781 = vmatprep.mubr.bf16.mxu1 %v2368_v61  ;;  %v2308_v61 = vcombine.high %v247_v56, %v251_v57 }
  0xa0   : > { %1621 = vmatmul.mubr.bf16.gmra.mrb[60].mxu0 %v2365_v2  ;;  %v2305_v2 = vcombine.low %v246_v54, %v250_v55  ;;  %v295_v55 = vld [vmem:[%s3132_s29 + $0x358] sm:$0xff] }
  0xa1   : > { %1782 = vmatmul.mubr.bf16.gmra.mrb[60].mxu1 %v2367_v3  ;;  %1822 = vmatprep.mubr.bf16.mxu0 %v2250_v4  ;;  %v2307_v3 = vcombine.low %v247_v56, %v251_v57  ;;  %v2314_v4 = vcombine.high %v254_v62, %v258_v63  ;;  %v299_v56 = vld [vmem:[%s3132_s29 + $0x378] sm:$0xff] }
  0xa2   : > { %1983 = vmatprep.mubr.bf16.mxu1 %v2252_v5  ;;  %v2316_v5 = vcombine.high %v255_v0, %v259_v1 }
  0xa8   : > { %1823 = vmatmul.mubr.bf16.vlgmr.msra.gmra.mrb[64].mxu0 %v2249_v10  ;;  %v2313_v10 = vcombine.low %v254_v62, %v258_v63 }
  0xa9   : > { %1984 = vmatmul.mubr.bf16.vlgmr.msra.gmra.mrb[64].mxu1 %v2251_v11  ;;  %1830 = vmatprep.mubr.bf16.mxu0 %v2258_v12  ;;  %v2315_v11 = vcombine.low %v255_v0, %v259_v1  ;;  %v2322_v12 = vcombine.high %v262_v6, %v266_v7 }
  0xaa   : > { %1991 = vmatprep.mubr.bf16.mxu1 %v2260_v13  ;;  %v2324_v13 = vcombine.high %v263_v8, %v267_v9 }
  0xb0   : > { %1831 = vmatmul.mubr.bf16.gmra.mrb[68].mxu0 %v2257_v18  ;;  %v2321_v18 = vcombine.low %v262_v6, %v266_v7 }
  0xb1   : > { %1992 = vmatmul.mubr.bf16.gmra.mrb[68].mxu1 %v2259_v19  ;;  %1838 = vmatprep.mubr.bf16.mxu0 %v2266_v20  ;;  %v2323_v19 = vcombine.low %v263_v8, %v267_v9  ;;  %v2330_v20 = vcombine.high %v270_v14, %v274_v15 }
  0xb2   : > { %1999 = vmatprep.mubr.bf16.mxu1 %v2268_v21  ;;  %v2332_v21 = vcombine.high %v271_v16, %v275_v17 }
  0xb8   : > { %1839 = vmatmul.mubr.bf16.gmra.mrb[72].mxu0 %v2265_v26  ;;  %v2329_v26 = vcombine.low %v270_v14, %v274_v15  ;;  %v307_v14 = vld [vmem:[%s3132_s29 + $0x3b8] sm:$0xff] }
  0xb9   : > { %2000 = vmatmul.mubr.bf16.gmra.mrb[72].mxu1 %v2267_v27  ;;  %1846 = vmatprep.mubr.bf16.mxu0 %v2274_v28  ;;  %v2331_v27 = vcombine.low %v271_v16, %v275_v17  ;;  %v2338_v28 = vcombine.high %v278_v22, %v282_v23 }
  0xba   : > { %2007 = vmatprep.mubr.bf16.mxu1 %v2276_v29  ;;  %v2340_v29 = vcombine.high %v279_v24, %v283_v25 }
  0xc0   : > { %1847 = vmatmul.mubr.bf16.gmra.mrb[76].mxu0 %v2273_v34  ;;  %v291_v34 = vld [vmem:[%s3132_s29 + $0x338] sm:$0xff] }
  0xc1   : > { %2008 = vmatmul.mubr.bf16.gmra.mrb[76].mxu1 %v2275_v35  ;;  %1854 = vmatprep.mubr.bf16.mxu0 %v2282_v36  ;;  %v2348_v46 = vcombine.high %v287_v33, %v291_v34  ;;  %v2347_v63 = vcombine.low %v287_v33, %v291_v34  ;;  %v314_v33 = vld [vmem:[%s3132_s29 + $0x3f0] sm:$0xff] }
  0xc2   : > { %2015 = vmatprep.mubr.bf16.mxu1 %v2284_v37  ;;  %v2337_v37 = vcombine.low %v278_v22, %v282_v23 }
  0xc8   : > { %1855 = vmatmul.mubr.bf16.gmra.mrb[80].mxu0 %v2281_v42  ;;  %v2346_v42 = vcombine.high %v286_v30, %v290_v31 }
  0xc9   : > { %2016 = vmatmul.mubr.bf16.gmra.mrb[80].mxu1 %v2283_v43  ;;  %1862 = vmatprep.mubr.bf16.mxu0 %v2290_v44 }
  0xca   : > { %2023 = vmatprep.mubr.bf16.mxu1 %v2292_v45 }
  0xd0   : > { %1863 = vmatmul.mubr.bf16.gmra.mrb[84].mxu0 %v2289_v50 }
  0xd1   : > { %2024 = vmatmul.mubr.bf16.gmra.mrb[84].mxu1 %v2291_v51  ;;  %1870 = vmatprep.mubr.bf16.mxu0 %v2298_v52  ;;  %v294_v52 = vld [vmem:[%s3132_s29 + $0x350] sm:$0xff] }
  0xd2   : > { %2031 = vmatprep.mubr.bf16.mxu1 %v2300_v53  ;;  %v298_v53 = vld [vmem:[%s3132_s29 + $0x370] sm:$0xff] }
  0xd3   : > { %v2354_v0 = vcombine.high %v294_v52, %v298_v53  ;;  %v2353_v17 = vcombine.low %v294_v52, %v298_v53 }
  0xd8   : > { %1871 = vmatmul.mubr.bf16.gmra.mrb[88].mxu0 %v2297_v58 }
  0xd9   : > { %2032 = vmatmul.mubr.bf16.gmra.mrb[88].mxu1 %v2299_v59  ;;  %1878 = vmatprep.mubr.bf16.mxu0 %v2306_v60  ;;  %v2345_v59 = vcombine.low %v286_v30, %v290_v31 }
  0xda   : > { %2039 = vmatprep.mubr.bf16.mxu1 %v2308_v61 }
  0xe0   : > { %1879 = vmatmul.mubr.bf16.gmra.mrb[92].mxu0 %v2305_v2 }
  0xe1   : > { %2040 = vmatmul.mubr.bf16.gmra.mrb[92].mxu1 %v2307_v3  ;;  %1886 = vmatprep.mubr.bf16.mxu0 %v2314_v4  ;;  %v2356_v4 = vcombine.high %v295_v55, %v299_v56 }
  0xe2   : > { %2047 = vmatprep.mubr.bf16.mxu1 %v2316_v5 }
  0xe8   : > { %1887 = vmatmul.mubr.bf16.gmra.mrb[96].mxu0 %v2313_v10  ;;  %v302_v10 = vld [vmem:[%s3132_s29 + $0x390] sm:$0xff] }
  0xe9   : > { %2048 = vmatmul.mubr.bf16.gmra.mrb[96].mxu1 %v2315_v11  ;;  %1894 = vmatprep.mubr.bf16.mxu0 %v2322_v12  ;;  %v306_v11 = vld [vmem:[%s3132_s29 + $0x3b0] sm:$0xff] }
  0xea   : > { %2055 = vmatprep.mubr.bf16.mxu1 %v2324_v13  ;;  %v303_v13 = vld [vmem:[%s3132_s29 + $0x398] sm:$0xff]  ;;  %v2362_v22 = vcombine.high %v302_v10, %v306_v11 }
  0xf0   : > { %1895 = vmatmul.mubr.bf16.gmra.mrb[100].mxu0 %v2321_v18 }
  0xf1   : > { %2056 = vmatmul.mubr.bf16.gmra.mrb[100].mxu1 %v2323_v19  ;;  %1902 = vmatprep.mubr.bf16.mxu0 %v2330_v20 }
  0xf2   : > { %2063 = vmatprep.mubr.bf16.mxu1 %v2332_v21  ;;  %v2355_v21 = vcombine.low %v295_v55, %v299_v56 }
  0xf8   : > { %1903 = vmatmul.mubr.bf16.gmra.mrb[104].mxu0 %v2329_v26  ;;  %v2364_v26 = vcombine.high %v303_v13, %v307_v14 }
  0xf9   : > { %2064 = vmatmul.mubr.bf16.gmra.mrb[104].mxu1 %v2331_v27  ;;  %1910 = vmatprep.mubr.bf16.mxu0 %v2338_v28 }
  0xfa   : > { %2071 = vmatprep.mubr.bf16.mxu1 %v2340_v29 }
  0xfb   : > { %v2456_v32 = vpop.f32.mrb[0].mxu0 }
  0xfc   : > { %v2568_v35 = vpop.f32.mrb[0].mxu1  ;;  %v2457_v36 = vpop.f32.mrb[1].mxu0 }
  0xfd   : > { %v2458_v38 = vadd.f32 %v2457_v36, %v2456_v32  ;;  %v2569_v39 = vpop.f32.mrb[1].mxu1  ;;  %v2459_v40 = vpop.f32.mrb[2].mxu0  ;;  %v310_v32 = vld [vmem:[%s3132_s29 + $0x3d0] sm:$0xff]  ;;  %v315_v36 = vld [vmem:[%s3132_s29 + $0x3f8] sm:$0xff] }
  0xfe   : > { %v2570_v43 = vadd.f32 %v2569_v39, %v2568_v35  ;;  %v2571_v44 = vpop.f32.mrb[2].mxu1  ;;  %v2460_v45 = vpop.f32.mrb[3].mxu0  ;;  %v311_v35 = vld [vmem:[%s3132_s29 + $0x3d8] sm:$0xff]  ;;  %v2361_v39 = vcombine.low %v302_v10, %v306_v11  ;;  %s2244_s29 = sshll.u32 %s3515_s21, 3 }
  0xff   : > { %v2461_v47 = vadd.f32 %v2460_v45, %v2459_v40  ;;  %v2572_v48 = vpop.f32.mrb[3].mxu1  ;;  %s3433_s30 = scalar_lea.vmem %s3509_s2, %s2244_s29 }
 0x100   : > { %v3352_v49 = vadd.f32 %v2570_v43, %v2458_v38  ;;  %v2573_v50 = vadd.f32 %v2572_v48, %v2571_v44  ;;  %1911 = vmatmul.mubr.bf16.gmra.mrb[108].mxu0 %v2337_v37  ;;  %v2363_v43 = vcombine.low %v303_v13, %v307_v14  ;;  %v2370_v44 = vcombine.high %v310_v32, %v314_v33 }
 0x101   : > { %2072 = vmatmul.mubr.bf16.gmra.mrb[108].mxu1 %v2339_v41  ;;  %1918 = vmatprep.mubr.bf16.mxu0 %v2346_v42  ;;  %v2372_v48 = vcombine.high %v311_v35, %v315_v36 }
 0x102   : > { %v3354_v51 = vadd.f32 %v2573_v50, %v2461_v47  ;;  %2079 = vmatprep.mubr.bf16.mxu1 %v2348_v46 }
 0x103   : > { %v2462_v54 = vpop.f32.mrb[4].mxu0 }
 0x104   : > { %v2574_v57 = vpop.f32.mrb[4].mxu1  ;;  %v2463_v58 = vpop.f32.mrb[5].mxu0 }
 0x105   : > { %v2464_v60 = vadd.f32 %v2463_v58, %v2462_v54  ;;  %v2575_v61 = vpop.f32.mrb[5].mxu1  ;;  %v2465_v62 = vpop.f32.mrb[6].mxu0 }
 0x106   : > { %v2576_v1 = vadd.f32 %v2575_v61, %v2574_v57  ;;  %v2577_v2 = vpop.f32.mrb[6].mxu1  ;;  %v2466_v3 = vpop.f32.mrb[7].mxu0 }
 0x107   : > { %v2467_v5 = vadd.f32 %v2466_v3, %v2465_v62  ;;  %v2578_v6 = vpop.f32.mrb[7].mxu1 }
 0x108   : > { %v3360_v7 = vadd.f32 %v2576_v1, %v2464_v60  ;;  %v2579_v8 = vadd.f32 %v2578_v6, %v2577_v2  ;;  %1919 = vmatmul.mubr.bf16.gmra.mrb[112].mxu0 %v2345_v59  ;;  %v2369_v59 = vcombine.low %v310_v32, %v314_v33 }
 0x109   : > { %2080 = vmatmul.mubr.bf16.gmra.mrb[112].mxu1 %v2347_v63  ;;  %1926 = vmatprep.mubr.bf16.mxu0 %v2354_v0  ;;  %v2371_v63 = vcombine.low %v311_v35, %v315_v36 }
 0x10a   : > { %v3362_v9 = vadd.f32 %v2579_v8, %v2467_v5  ;;  %2087 = vmatprep.mubr.bf16.mxu1 %v2356_v4 }
 0x10b   : > { %v2468_v12 = vpop.f32.mrb[8].mxu0 }
 0x10c   : > { %v2580_v15 = vpop.f32.mrb[8].mxu1  ;;  %v2469_v16 = vpop.f32.mrb[9].mxu0 }
 0x10d   : > { %v2470_v18 = vadd.f32 %v2469_v16, %v2468_v12  ;;  %v2581_v19 = vpop.f32.mrb[9].mxu1  ;;  %v2471_v20 = vpop.f32.mrb[10].mxu0 }
 0x10e   : > { %v2582_v23 = vadd.f32 %v2581_v19, %v2580_v15  ;;  %v2583_v24 = vpop.f32.mrb[10].mxu1  ;;  %v2472_v25 = vpop.f32.mrb[11].mxu0 }
 0x10f   : > { %v2473_v27 = vadd.f32 %v2472_v25, %v2471_v20  ;;  %v2584_v28 = vpop.f32.mrb[11].mxu1 }
 0x110   : > { %v3368_v29 = vadd.f32 %v2582_v23, %v2470_v18  ;;  %v2585_v30 = vadd.f32 %v2584_v28, %v2583_v24  ;;  %1927 = vmatmul.mubr.bf16.gmra.mrb[116].mxu0 %v2353_v17 }
 0x111   : > { %2088 = vmatmul.mubr.bf16.gmra.mrb[116].mxu1 %v2355_v21  ;;  %1934 = vmatprep.mubr.bf16.mxu0 %v2362_v22 }
 0x112   : > { %v3370_v31 = vadd.f32 %v2585_v30, %v2473_v27  ;;  %2095 = vmatprep.mubr.bf16.mxu1 %v2364_v26 }
 0x113   : > { %v2474_v34 = vpop.f32.mrb[12].mxu0 }
 0x114   : > { %v2586_v37 = vpop.f32.mrb[12].mxu1  ;;  %v2475_v38 = vpop.f32.mrb[13].mxu0 }
 0x115   : > { %v2476_v40 = vadd.f32 %v2475_v38, %v2474_v34  ;;  %v2587_v41 = vpop.f32.mrb[13].mxu1  ;;  %v2477_v42 = vpop.f32.mrb[14].mxu0 }
 0x116   : > { %v2588_v45 = vadd.f32 %v2587_v41, %v2586_v37  ;;  %v2589_v46 = vpop.f32.mrb[14].mxu1  ;;  %v2478_v47 = vpop.f32.mrb[15].mxu0 }
 0x117   : > { %v2479_v50 = vadd.f32 %v2478_v47, %v2477_v42  ;;  %v2590_v52 = vpop.f32.mrb[15].mxu1 }
 0x118   : > { %v3376_v53 = vadd.f32 %v2588_v45, %v2476_v40  ;;  %v2591_v54 = vadd.f32 %v2590_v52, %v2589_v46  ;;  %1935 = vmatmul.mubr.bf16.gmra.mrb[120].mxu0 %v2361_v39 }
 0x119   : > { %2096 = vmatmul.mubr.bf16.gmra.mrb[120].mxu1 %v2363_v43  ;;  %1942 = vmatprep.mubr.bf16.mxu0 %v2370_v44 }
 0x11a   : > { %v3378_v55 = vadd.f32 %v2591_v54, %v2479_v50  ;;  %2103 = vmatprep.mubr.bf16.mxu1 %v2372_v48 }
 0x11b   : > { %v2480_v56 = vpop.f32.mrb[16].mxu0 }
 0x11c   : > { %v2592_v57 = vpop.f32.mrb[16].mxu1  ;;  %v2481_v58 = vpop.f32.mrb[17].mxu0 }
 0x11d   : > { %v2482_v60 = vadd.f32 %v2481_v58, %v2480_v56  ;;  %v2593_v61 = vpop.f32.mrb[17].mxu1  ;;  %v2483_v62 = vpop.f32.mrb[18].mxu0 }
 0x11e   : > { %v2594_v0 = vadd.f32 %v2593_v61, %v2592_v57  ;;  %v2595_v1 = vpop.f32.mrb[18].mxu1  ;;  %v2484_v2 = vpop.f32.mrb[19].mxu0 }
 0x11f   : > { %v2485_v3 = vadd.f32 %v2484_v2, %v2483_v62  ;;  %v2596_v4 = vpop.f32.mrb[19].mxu1 }
 0x120   : > { %v3380_v5 = vadd.f32 %v2594_v0, %v2482_v60  ;;  %v2597_v6 = vadd.f32 %v2596_v4, %v2595_v1  ;;  %1943 = vmatmul.mubr.bf16.gmra.mrb[124].mxu0 %v2369_v59 }
 0x121   : > { %2104 = vmatmul.mubr.bf16.gmra.mrb[124].mxu1 %v2371_v63 }
 0x122   : > { %v3382_v8 = vadd.f32 %v2597_v6, %v2485_v3 }
 0x123   : > { %v2486_v10 = vpop.f32.mrb[20].mxu0 }
 0x124   : > { %v2598_v11 = vpop.f32.mrb[20].mxu1  ;;  %v2487_v12 = vpop.f32.mrb[21].mxu0 }
 0x125   : > { %v2488_v13 = vadd.f32 %v2487_v12, %v2486_v10  ;;  %v2599_v14 = vpop.f32.mrb[21].mxu1  ;;  %v2489_v15 = vpop.f32.mrb[22].mxu0 }
 0x126   : > { %v2600_v16 = vadd.f32 %v2599_v14, %v2598_v11  ;;  %v2601_v17 = vpop.f32.mrb[22].mxu1  ;;  %v2490_v18 = vpop.f32.mrb[23].mxu0 }
 0x127   : > { %v2491_v19 = vadd.f32 %v2490_v18, %v2489_v15  ;;  %v2602_v20 = vpop.f32.mrb[23].mxu1 }
 0x128   : > { %v3384_v21 = vadd.f32 %v2600_v16, %v2488_v13  ;;  %v2603_v22 = vadd.f32 %v2602_v20, %v2601_v17 }
 0x12a   : > { %v3386_v23 = vadd.f32 %v2603_v22, %v2491_v19 }
 0x12b   : > { %v2492_v24 = vpop.f32.mrb[24].mxu0 }
 0x12c   : > { %v2604_v25 = vpop.f32.mrb[24].mxu1  ;;  %v2493_v26 = vpop.f32.mrb[25].mxu0 }
 0x12d   : > { %v2494_v27 = vadd.f32 %v2493_v26, %v2492_v24  ;;  %v2605_v28 = vpop.f32.mrb[25].mxu1  ;;  %v2495_v30 = vpop.f32.mrb[26].mxu0 }
 0x12e   : > { %v2606_v32 = vadd.f32 %v2605_v28, %v2604_v25  ;;  %v2607_v33 = vpop.f32.mrb[26].mxu1  ;;  %v2496_v34 = vpop.f32.mrb[27].mxu0 }
 0x12f   : > { %v2497_v35 = vadd.f32 %v2496_v34, %v2495_v30  ;;  %v2608_v36 = vpop.f32.mrb[27].mxu1 }
 0x130   : > { %v3388_v37 = vadd.f32 %v2606_v32, %v2494_v27  ;;  %v2609_v38 = vadd.f32 %v2608_v36, %v2607_v33 }
 0x132   : > { %v3390_v39 = vadd.f32 %v2609_v38, %v2497_v35 }
 0x133   : > { %v2498_v40 = vpop.f32.mrb[28].mxu0 }
 0x134   : > { %v2610_v41 = vpop.f32.mrb[28].mxu1  ;;  %v2499_v42 = vpop.f32.mrb[29].mxu0 }
 0x135   : > { %v2500_v43 = vadd.f32 %v2499_v42, %v2498_v40  ;;  %v2611_v44 = vpop.f32.mrb[29].mxu1  ;;  %v2501_v45 = vpop.f32.mrb[30].mxu0 }
 0x136   : > { %v2612_v46 = vadd.f32 %v2611_v44, %v2610_v41  ;;  %v2613_v47 = vpop.f32.mrb[30].mxu1  ;;  %v2502_v48 = vpop.f32.mrb[31].mxu0 }
 0x137   : > { %v2503_v50 = vadd.f32 %v2502_v48, %v2501_v45  ;;  %v2614_v52 = vpop.f32.mrb[31].mxu1 }
 0x138   : > { %v3392_v54 = vadd.f32 %v2612_v46, %v2500_v43  ;;  %v2615_v56 = vadd.f32 %v2614_v52, %v2613_v47 }
 0x13a   : > { %v3394_v57 = vadd.f32 %v2615_v56, %v2503_v50 }
 0x13b   : > { %v2504_v58 = vpop.f32.mrb[32].mxu0 }
 0x13c   : > { %v2616_v59 = vpop.f32.mrb[32].mxu1  ;;  %v2505_v60 = vpop.f32.mrb[33].mxu0 }
 0x13d   : > { %v2506_v61 = vadd.f32 %v2505_v60, %v2504_v58  ;;  %v2617_v62 = vpop.f32.mrb[33].mxu1  ;;  %v2507_v63 = vpop.f32.mrb[34].mxu0 }
 0x13e   : > { %v2618_v0 = vadd.f32 %v2617_v62, %v2616_v59  ;;  %v2619_v1 = vpop.f32.mrb[34].mxu1  ;;  %v2508_v2 = vpop.f32.mrb[35].mxu0 }
 0x13f   : > { %v2509_v3 = vadd.f32 %v2508_v2, %v2507_v63  ;;  %v2620_v4 = vpop.f32.mrb[35].mxu1 }
 0x140   : > { %v3396_v6 = vadd.f32 %v2618_v0, %v2506_v61  ;;  %v2621_v10 = vadd.f32 %v2620_v4, %v2619_v1 }
 0x142   : > { %v3398_v11 = vadd.f32 %v2621_v10, %v2509_v3 }
 0x143   : > { %v2510_v12 = vpop.f32.mrb[36].mxu0 }
 0x144   : > { %v2622_v13 = vpop.f32.mrb[36].mxu1  ;;  %v2511_v14 = vpop.f32.mrb[37].mxu0 }
 0x145   : > { %v2512_v15 = vadd.f32 %v2511_v14, %v2510_v12  ;;  %v2623_v16 = vpop.f32.mrb[37].mxu1  ;;  %v2513_v17 = vpop.f32.mrb[38].mxu0 }
 0x146   : > { %v2624_v18 = vadd.f32 %v2623_v16, %v2622_v13  ;;  %v2625_v19 = vpop.f32.mrb[38].mxu1  ;;  %v2514_v20 = vpop.f32.mrb[39].mxu0 }
 0x147   : > { %v2515_v22 = vadd.f32 %v2514_v20, %v2513_v17  ;;  %v2626_v24 = vpop.f32.mrb[39].mxu1 }
 0x148   : > { %v3400_v25 = vadd.f32 %v2624_v18, %v2512_v15  ;;  %v2627_v26 = vadd.f32 %v2626_v24, %v2625_v19 }
 0x14a   : > { %v3402_v27 = vadd.f32 %v2627_v26, %v2515_v22 }
 0x14b   : > { %v2516_v28 = vpop.f32.mrb[40].mxu0 }
 0x14c   : > { %v2628_v30 = vpop.f32.mrb[40].mxu1  ;;  %v2517_v32 = vpop.f32.mrb[41].mxu0 }
 0x14d   : > { %v2518_v33 = vadd.f32 %v2517_v32, %v2516_v28  ;;  %v2629_v34 = vpop.f32.mrb[41].mxu1  ;;  %v2519_v35 = vpop.f32.mrb[42].mxu0 }
 0x14e   : > { %v2630_v36 = vadd.f32 %v2629_v34, %v2628_v30  ;;  %v2631_v38 = vpop.f32.mrb[42].mxu1  ;;  %v2520_v40 = vpop.f32.mrb[43].mxu0 }
 0x14f   : > { %v2521_v41 = vadd.f32 %v2520_v40, %v2519_v35  ;;  %v2632_v42 = vpop.f32.mrb[43].mxu1 }
 0x150   : > { %v3404_v43 = vadd.f32 %v2630_v36, %v2518_v33  ;;  %v2633_v44 = vadd.f32 %v2632_v42, %v2631_v38 }
 0x152   : > { %v3406_v45 = vadd.f32 %v2633_v44, %v2521_v41 }
 0x153   : > { %v2522_v46 = vpop.f32.mrb[44].mxu0 }
 0x154   : > { %v2634_v47 = vpop.f32.mrb[44].mxu1  ;;  %v2523_v48 = vpop.f32.mrb[45].mxu0 }
 0x155   : > { %v2524_v50 = vadd.f32 %v2523_v48, %v2522_v46  ;;  %v2635_v52 = vpop.f32.mrb[45].mxu1  ;;  %v2525_v56 = vpop.f32.mrb[46].mxu0 }
 0x156   : > { %v2636_v58 = vadd.f32 %v2635_v52, %v2634_v47  ;;  %v2637_v59 = vpop.f32.mrb[46].mxu1  ;;  %v2526_v60 = vpop.f32.mrb[47].mxu0 }
 0x157   : > { %v2527_v61 = vadd.f32 %v2526_v60, %v2525_v56  ;;  %v2638_v62 = vpop.f32.mrb[47].mxu1 }
 0x158   : > { %v3408_v63 = vadd.f32 %v2636_v58, %v2524_v50  ;;  %v2639_v0 = vadd.f32 %v2638_v62, %v2637_v59 }
 0x15a   : > { %v3410_v1 = vadd.f32 %v2639_v0, %v2527_v61 }
 0x15b   : > { %v2528_v2 = vpop.f32.mrb[48].mxu0 }
 0x15c   : > { %v2640_v3 = vpop.f32.mrb[48].mxu1  ;;  %v2529_v4 = vpop.f32.mrb[49].mxu0 }
 0x15d   : > { %v2530_v10 = vadd.f32 %v2529_v4, %v2528_v2  ;;  %v2641_v12 = vpop.f32.mrb[49].mxu1  ;;  %v2531_v13 = vpop.f32.mrb[50].mxu0 }
 0x15e   : > { %v2642_v14 = vadd.f32 %v2641_v12, %v2640_v3  ;;  %v2643_v15 = vpop.f32.mrb[50].mxu1  ;;  %v2532_v16 = vpop.f32.mrb[51].mxu0 }
 0x15f   : > { %v2533_v17 = vadd.f32 %v2532_v16, %v2531_v13  ;;  %v2644_v18 = vpop.f32.mrb[51].mxu1 }
 0x160   : > { %v3412_v19 = vadd.f32 %v2642_v14, %v2530_v10  ;;  %v2645_v20 = vadd.f32 %v2644_v18, %v2643_v15 }
 0x162   : > { %v3414_v22 = vadd.f32 %v2645_v20, %v2533_v17 }
 0x163   : > { %v2534_v24 = vpop.f32.mrb[52].mxu0 }
 0x164   : > { %v2646_v26 = vpop.f32.mrb[52].mxu1  ;;  %v2535_v28 = vpop.f32.mrb[53].mxu0 }
 0x165   : > { %v2536_v30 = vadd.f32 %v2535_v28, %v2534_v24  ;;  %v2647_v32 = vpop.f32.mrb[53].mxu1  ;;  %v2537_v33 = vpop.f32.mrb[54].mxu0 }
 0x166   : > { %v2648_v34 = vadd.f32 %v2647_v32, %v2646_v26  ;;  %v2649_v35 = vpop.f32.mrb[54].mxu1  ;;  %v2538_v36 = vpop.f32.mrb[55].mxu0 }
 0x167   : > { %v2539_v38 = vadd.f32 %v2538_v36, %v2537_v33  ;;  %v2650_v40 = vpop.f32.mrb[55].mxu1 }
 0x168   : > { %v3416_v41 = vadd.f32 %v2648_v34, %v2536_v30  ;;  %v2651_v42 = vadd.f32 %v2650_v40, %v2649_v35 }
 0x16a   : > { %v3418_v44 = vadd.f32 %v2651_v42, %v2539_v38 }
 0x16b   : > { %v2540_v46 = vpop.f32.mrb[56].mxu0 }
 0x16c   : > { %v2652_v47 = vpop.f32.mrb[56].mxu1  ;;  %v2541_v48 = vpop.f32.mrb[57].mxu0 }
 0x16d   : > { %v2542_v50 = vadd.f32 %v2541_v48, %v2540_v46  ;;  %v2653_v52 = vpop.f32.mrb[57].mxu1  ;;  %v2543_v56 = vpop.f32.mrb[58].mxu0 }
 0x16e   : > { %v2654_v58 = vadd.f32 %v2653_v52, %v2652_v47  ;;  %v2655_v59 = vpop.f32.mrb[58].mxu1  ;;  %v2544_v60 = vpop.f32.mrb[59].mxu0 }
 0x16f   : > { %v2545_v61 = vadd.f32 %v2544_v60, %v2543_v56  ;;  %v2656_v62 = vpop.f32.mrb[59].mxu1 }
 0x170   : > { %v3420_v0 = vadd.f32 %v2654_v58, %v2542_v50  ;;  %v2657_v2 = vadd.f32 %v2656_v62, %v2655_v59 }
 0x172   : > { %v3422_v3 = vadd.f32 %v2657_v2, %v2545_v61 }
 0x173   : > { %v2546_v4 = vpop.f32.mrb[60].mxu0 }
 0x174   : > { %v2658_v10 = vpop.f32.mrb[60].mxu1  ;;  %v2547_v12 = vpop.f32.mrb[61].mxu0 }
 0x175   : > { %v2548_v13 = vadd.f32 %v2547_v12, %v2546_v4  ;;  %v2659_v14 = vpop.f32.mrb[61].mxu1  ;;  %v2549_v15 = vpop.f32.mrb[62].mxu0 }
 0x176   : > { %v2660_v16 = vadd.f32 %v2659_v14, %v2658_v10  ;;  %v2661_v17 = vpop.f32.mrb[62].mxu1  ;;  %v2550_v18 = vpop.f32.mrb[63].mxu0 }
 0x177   : > { %v2551_v20 = vadd.f32 %v2550_v18, %v2549_v15  ;;  %v2662_v24 = vpop.f32.mrb[63].mxu1 }
 0x178   : > { %v3424_v26 = vadd.f32 %v2660_v16, %v2548_v13  ;;  %v2663_v28 = vadd.f32 %v2662_v24, %v2661_v17 }
 0x17a   : > { %v3426_v30 = vadd.f32 %v2663_v28, %v2551_v20 }
 0x17b   : > { %v2680_v32 = vpop.f32.mrb[64].mxu0 }
 0x17c   : > { %v2792_v33 = vpop.f32.mrb[64].mxu1  ;;  %v2681_v34 = vpop.f32.mrb[65].mxu0 }
 0x17d   : > { %v2682_v35 = vadd.f32 %v2681_v34, %v2680_v32  ;;  %v2793_v36 = vpop.f32.mrb[65].mxu1  ;;  %v2683_v38 = vpop.f32.mrb[66].mxu0 }
 0x17e   : > { %v2794_v40 = vadd.f32 %v2793_v36, %v2792_v33  ;;  %v2795_v42 = vpop.f32.mrb[66].mxu1  ;;  %v2684_v46 = vpop.f32.mrb[67].mxu0 }
 0x17f   : > { %v1825_v47 = vadd.f32 %v2682_v35, %v3352_v49  ;;  %v2685_v48 = vadd.f32 %v2684_v46, %v2683_v38  ;;  %v2796_v50 = vpop.f32.mrb[67].mxu1 }
 0x180   : > { %v2797_v52 = vadd.f32 %v2796_v50, %v2795_v42 }
 0x181   : > { %v1986_v56 = vadd.f32 %v2794_v40, %v1825_v47  ;;  %v1828_v58 = vadd.f32 %v2685_v48, %v3354_v51 }
 0x183   : > { %2112 = vst [vmem:[%s3433_s30] sm:$0xff] %v1986_v56  ;;  %v1989_v59 = vadd.f32 %v2797_v52, %v1828_v58  ;;  %v2686_v60 = vpop.f32.mrb[68].mxu0 }
 0x184   : > { %v2798_v61 = vpop.f32.mrb[68].mxu1  ;;  %v2687_v62 = vpop.f32.mrb[69].mxu0 }
 0x185   : > { %2113 = vst [vmem:[%s3433_s30 + $0x8] sm:$0xff] %v1989_v59  ;;  %v2688_v49 = vadd.f32 %v2687_v62, %v2686_v60  ;;  %v2799_v2 = vpop.f32.mrb[69].mxu1  ;;  %v2689_v4 = vpop.f32.mrb[70].mxu0 }
 0x186   : > { %v2800_v10 = vadd.f32 %v2799_v2, %v2798_v61  ;;  %v2801_v12 = vpop.f32.mrb[70].mxu1  ;;  %v2690_v13 = vpop.f32.mrb[71].mxu0 }
 0x187   : > { %v1833_v14 = vadd.f32 %v2688_v49, %v3360_v7  ;;  %v2691_v15 = vadd.f32 %v2690_v13, %v2689_v4  ;;  %v2802_v16 = vpop.f32.mrb[71].mxu1 }
 0x188   : > { %v2803_v17 = vadd.f32 %v2802_v16, %v2801_v12 }
 0x189   : > { %v1994_v51 = vadd.f32 %v2800_v10, %v1833_v14  ;;  %v1836_v18 = vadd.f32 %v2691_v15, %v3362_v9 }
 0x18b   : > { %2114 = vst [vmem:[%s3433_s30 + $0x10] sm:$0xff] %v1994_v51  ;;  %v1997_v20 = vadd.f32 %v2803_v17, %v1836_v18  ;;  %v2692_v24 = vpop.f32.mrb[72].mxu0 }
 0x18c   : > { %v2804_v28 = vpop.f32.mrb[72].mxu1  ;;  %v2693_v32 = vpop.f32.mrb[73].mxu0 }
 0x18d   : > { %2115 = vst [vmem:[%s3433_s30 + $0x18] sm:$0xff] %v1997_v20  ;;  %v2694_v33 = vadd.f32 %v2693_v32, %v2692_v24  ;;  %v2805_v34 = vpop.f32.mrb[73].mxu1  ;;  %v2695_v35 = vpop.f32.mrb[74].mxu0 }
 0x18e   : > { %v2806_v36 = vadd.f32 %v2805_v34, %v2804_v28  ;;  %v2807_v38 = vpop.f32.mrb[74].mxu1  ;;  %v2696_v7 = vpop.f32.mrb[75].mxu0 }
 0x18f   : > { %v1841_v40 = vadd.f32 %v2694_v33, %v3368_v29  ;;  %v2697_v42 = vadd.f32 %v2696_v7, %v2695_v35  ;;  %v2808_v46 = vpop.f32.mrb[75].mxu1 }
 0x190   : > { %v2809_v47 = vadd.f32 %v2808_v46, %v2807_v38 }
 0x191   : > { %v2002_v9 = vadd.f32 %v2806_v36, %v1841_v40  ;;  %v1844_v48 = vadd.f32 %v2697_v42, %v3370_v31 }
 0x193   : > { %2116 = vst [vmem:[%s3433_s30 + $0x20] sm:$0xff] %v2002_v9  ;;  %v2005_v50 = vadd.f32 %v2809_v47, %v1844_v48  ;;  %v2698_v52 = vpop.f32.mrb[76].mxu0 }
 0x194   : > { %v2810_v56 = vpop.f32.mrb[76].mxu1  ;;  %v2699_v58 = vpop.f32.mrb[77].mxu0 }
 0x195   : > { %2117 = vst [vmem:[%s3433_s30 + $0x28] sm:$0xff] %v2005_v50  ;;  %v2700_v59 = vadd.f32 %v2699_v58, %v2698_v52  ;;  %v2811_v60 = vpop.f32.mrb[77].mxu1  ;;  %v2701_v61 = vpop.f32.mrb[78].mxu0 }
 0x196   : > { %v2812_v62 = vadd.f32 %v2811_v60, %v2810_v56  ;;  %v2813_v49 = vpop.f32.mrb[78].mxu1  ;;  %v2702_v29 = vpop.f32.mrb[79].mxu0 }
 0x197   : > { %v1849_v2 = vadd.f32 %v2700_v59, %v3376_v53  ;;  %v2703_v4 = vadd.f32 %v2702_v29, %v2701_v61  ;;  %v2814_v10 = vpop.f32.mrb[79].mxu1 }
 0x198   : > { %v2815_v12 = vadd.f32 %v2814_v10, %v2813_v49 }
 0x199   : > { %v2010_v31 = vadd.f32 %v2812_v62, %v1849_v2  ;;  %v1852_v13 = vadd.f32 %v2703_v4, %v3378_v55 }
 0x19b   : > { %2118 = vst [vmem:[%s3433_s30 + $0x30] sm:$0xff] %v2010_v31  ;;  %v2013_v14 = vadd.f32 %v2815_v12, %v1852_v13  ;;  %v2704_v15 = vpop.f32.mrb[80].mxu0 }
 0x19c   : > { %v2816_v16 = vpop.f32.mrb[80].mxu1  ;;  %v2705_v17 = vpop.f32.mrb[81].mxu0 }
 0x19d   : > { %2119 = vst [vmem:[%s3433_s30 + $0x38] sm:$0xff] %v2013_v14  ;;  %v2706_v51 = vadd.f32 %v2705_v17, %v2704_v15  ;;  %v2817_v18 = vpop.f32.mrb[81].mxu1  ;;  %v2707_v20 = vpop.f32.mrb[82].mxu0 }
 0x19e   : > { %v2818_v24 = vadd.f32 %v2817_v18, %v2816_v16  ;;  %v2819_v28 = vpop.f32.mrb[82].mxu1  ;;  %v2708_v53 = vpop.f32.mrb[83].mxu0 }
 0x19f   : > { %v1857_v32 = vadd.f32 %v2706_v51, %v3380_v5  ;;  %v2709_v33 = vadd.f32 %v2708_v53, %v2707_v20  ;;  %v2820_v34 = vpop.f32.mrb[83].mxu1 }
 0x1a0   : > { %v2821_v35 = vadd.f32 %v2820_v34, %v2819_v28 }
 0x1a1   : > { %v2018_v55 = vadd.f32 %v2818_v24, %v1857_v32  ;;  %v1860_v36 = vadd.f32 %v2709_v33, %v3382_v8 }
 0x1a3   : > { %2120 = vst [vmem:[%s3433_s30 + $0x40] sm:$0xff] %v2018_v55  ;;  %v2021_v38 = vadd.f32 %v2821_v35, %v1860_v36  ;;  %v2710_v7 = vpop.f32.mrb[84].mxu0 }
 0x1a4   : > { %v2822_v40 = vpop.f32.mrb[84].mxu1  ;;  %v2711_v42 = vpop.f32.mrb[85].mxu0 }
 0x1a5   : > { %2121 = vst [vmem:[%s3433_s30 + $0x48] sm:$0xff] %v2021_v38  ;;  %v2712_v46 = vadd.f32 %v2711_v42, %v2710_v7  ;;  %v2823_v47 = vpop.f32.mrb[85].mxu1  ;;  %v2713_v9 = vpop.f32.mrb[86].mxu0 }
 0x1a6   : > { %v2824_v48 = vadd.f32 %v2823_v47, %v2822_v40  ;;  %v2825_v50 = vpop.f32.mrb[86].mxu1  ;;  %v2714_v5 = vpop.f32.mrb[87].mxu0 }
 0x1a7   : > { %v1865_v52 = vadd.f32 %v2712_v46, %v3384_v21  ;;  %v2715_v56 = vadd.f32 %v2714_v5, %v2713_v9  ;;  %v2826_v58 = vpop.f32.mrb[87].mxu1 }
 0x1a8   : > { %v2827_v59 = vadd.f32 %v2826_v58, %v2825_v50 }
 0x1a9   : > { %v2026_v8 = vadd.f32 %v2824_v48, %v1865_v52  ;;  %v1868_v60 = vadd.f32 %v2715_v56, %v3386_v23 }
 0x1ab   : > { %2122 = vst [vmem:[%s3433_s30 + $0x50] sm:$0xff] %v2026_v8  ;;  %v2029_v61 = vadd.f32 %v2827_v59, %v1868_v60  ;;  %v2716_v62 = vpop.f32.mrb[88].mxu0 }
 0x1ac   : > { %v2828_v49 = vpop.f32.mrb[88].mxu1  ;;  %v2717_v29 = vpop.f32.mrb[89].mxu0 }
 0x1ad   : > { %2123 = vst [vmem:[%s3433_s30 + $0x58] sm:$0xff] %v2029_v61  ;;  %v2718_v2 = vadd.f32 %v2717_v29, %v2716_v62  ;;  %v2829_v4 = vpop.f32.mrb[89].mxu1  ;;  %v2719_v10 = vpop.f32.mrb[90].mxu0 }
 0x1ae   : > { %v2830_v12 = vadd.f32 %v2829_v4, %v2828_v49  ;;  %v2831_v31 = vpop.f32.mrb[90].mxu1  ;;  %v2720_v21 = vpop.f32.mrb[91].mxu0 }
 0x1af   : > { %v1873_v13 = vadd.f32 %v2718_v2, %v3388_v37  ;;  %v2721_v14 = vadd.f32 %v2720_v21, %v2719_v10  ;;  %v2832_v15 = vpop.f32.mrb[91].mxu1 }
 0x1b0   : > { %v2833_v16 = vadd.f32 %v2832_v15, %v2831_v31 }
 0x1b1   : > { %v2034_v23 = vadd.f32 %v2830_v12, %v1873_v13  ;;  %v1876_v17 = vadd.f32 %v2721_v14, %v3390_v39 }
 0x1b3   : > { %2124 = vst [vmem:[%s3433_s30 + $0x60] sm:$0xff] %v2034_v23  ;;  %v2037_v51 = vadd.f32 %v2833_v16, %v1876_v17  ;;  %v2722_v18 = vpop.f32.mrb[92].mxu0 }
 0x1b4   : > { %v2834_v20 = vpop.f32.mrb[92].mxu1  ;;  %v2723_v24 = vpop.f32.mrb[93].mxu0 }
 0x1b5   : > { %2125 = vst [vmem:[%s3433_s30 + $0x68] sm:$0xff] %v2037_v51  ;;  %v2724_v28 = vadd.f32 %v2723_v24, %v2722_v18  ;;  %v2835_v53 = vpop.f32.mrb[93].mxu1  ;;  %v2725_v32 = vpop.f32.mrb[94].mxu0 }
 0x1b6   : > { %v2836_v33 = vadd.f32 %v2835_v53, %v2834_v20  ;;  %v2837_v34 = vpop.f32.mrb[94].mxu1  ;;  %v2726_v37 = vpop.f32.mrb[95].mxu0 }
 0x1b7   : > { %v1881_v35 = vadd.f32 %v2724_v28, %v3392_v54  ;;  %v2727_v55 = vadd.f32 %v2726_v37, %v2725_v32  ;;  %v2838_v36 = vpop.f32.mrb[95].mxu1 }
 0x1b8   : > { %v2839_v38 = vadd.f32 %v2838_v36, %v2837_v34 }
 0x1b9   : > { %v2042_v39 = vadd.f32 %v2836_v33, %v1881_v35  ;;  %v1884_v7 = vadd.f32 %v2727_v55, %v3394_v57 }
 0x1bb   : > { %2126 = vst [vmem:[%s3433_s30 + $0x70] sm:$0xff] %v2042_v39  ;;  %v2045_v40 = vadd.f32 %v2839_v38, %v1884_v7  ;;  %v2728_v42 = vpop.f32.mrb[96].mxu0 }
 0x1bc   : > { %v2840_v46 = vpop.f32.mrb[96].mxu1  ;;  %v2729_v47 = vpop.f32.mrb[97].mxu0 }
 0x1bd   : > { %2127 = vst [vmem:[%s3433_s30 + $0x78] sm:$0xff] %v2045_v40  ;;  %v2730_v9 = vadd.f32 %v2729_v47, %v2728_v42  ;;  %v2841_v48 = vpop.f32.mrb[97].mxu1  ;;  %v2731_v50 = vpop.f32.mrb[98].mxu0 }
 0x1be   : > { %v2842_v5 = vadd.f32 %v2841_v48, %v2840_v46  ;;  %v2843_v52 = vpop.f32.mrb[98].mxu1  ;;  %v2732_v54 = vpop.f32.mrb[99].mxu0 }
 0x1bf   : > { %v1889_v56 = vadd.f32 %v2730_v9, %v3396_v6  ;;  %v2733_v58 = vadd.f32 %v2732_v54, %v2731_v50  ;;  %v2844_v59 = vpop.f32.mrb[99].mxu1 }
 0x1c0   : > { %v2845_v8 = vadd.f32 %v2844_v59, %v2843_v52 }
 0x1c1   : > { %v2050_v57 = vadd.f32 %v2842_v5, %v1889_v56  ;;  %v1892_v60 = vadd.f32 %v2733_v58, %v3398_v11 }
 0x1c3   : > { %2128 = vst [vmem:[%s3433_s30 + $0x80] sm:$0xff] %v2050_v57  ;;  %v2053_v61 = vadd.f32 %v2845_v8, %v1892_v60  ;;  %v2734_v62 = vpop.f32.mrb[100].mxu0 }
 0x1c4   : > { %v2846_v49 = vpop.f32.mrb[100].mxu1  ;;  %v2735_v29 = vpop.f32.mrb[101].mxu0 }
 0x1c5   : > { %2129 = vst [vmem:[%s3433_s30 + $0x88] sm:$0xff] %v2053_v61  ;;  %v2736_v2 = vadd.f32 %v2735_v29, %v2734_v62  ;;  %v2847_v4 = vpop.f32.mrb[101].mxu1  ;;  %v2737_v10 = vpop.f32.mrb[102].mxu0 }
 0x1c6   : > { %v2848_v12 = vadd.f32 %v2847_v4, %v2846_v49  ;;  %v2849_v31 = vpop.f32.mrb[102].mxu1  ;;  %v2738_v6 = vpop.f32.mrb[103].mxu0 }
 0x1c7   : > { %v1897_v21 = vadd.f32 %v2736_v2, %v3400_v25  ;;  %v2739_v13 = vadd.f32 %v2738_v6, %v2737_v10  ;;  %v2850_v14 = vpop.f32.mrb[103].mxu1 }
 0x1c8   : > { %v2851_v15 = vadd.f32 %v2850_v14, %v2849_v31 }
 0x1c9   : > { %v2058_v11 = vadd.f32 %v2848_v12, %v1897_v21  ;;  %v1900_v16 = vadd.f32 %v2739_v13, %v3402_v27 }
 0x1cb   : > { %2130 = vst [vmem:[%s3433_s30 + $0x90] sm:$0xff] %v2058_v11  ;;  %v2061_v23 = vadd.f32 %v2851_v15, %v1900_v16  ;;  %v2740_v17 = vpop.f32.mrb[104].mxu0 }
 0x1cc   : > { %v2852_v51 = vpop.f32.mrb[104].mxu1  ;;  %v2741_v18 = vpop.f32.mrb[105].mxu0 }
 0x1cd   : > { %2131 = vst [vmem:[%s3433_s30 + $0x98] sm:$0xff] %v2061_v23  ;;  %v2742_v20 = vadd.f32 %v2741_v18, %v2740_v17  ;;  %v2853_v24 = vpop.f32.mrb[105].mxu1  ;;  %v2743_v28 = vpop.f32.mrb[106].mxu0 }
 0x1ce   : > { %v2854_v53 = vadd.f32 %v2853_v24, %v2852_v51  ;;  %v2855_v32 = vpop.f32.mrb[106].mxu1  ;;  %v2744_v25 = vpop.f32.mrb[107].mxu0 }
 0x1cf   : > { %v1905_v33 = vadd.f32 %v2742_v20, %v3404_v43  ;;  %v2745_v34 = vadd.f32 %v2744_v25, %v2743_v28  ;;  %v2856_v37 = vpop.f32.mrb[107].mxu1 }
 0x1d0   : > { %v2857_v35 = vadd.f32 %v2856_v37, %v2855_v32 }
 0x1d1   : > { %v2066_v27 = vadd.f32 %v2854_v53, %v1905_v33  ;;  %v1908_v55 = vadd.f32 %v2745_v34, %v3406_v45 }
 0x1d3   : > { %2132 = vst [vmem:[%s3433_s30 + $0xa0] sm:$0xff] %v2066_v27  ;;  %v2069_v36 = vadd.f32 %v2857_v35, %v1908_v55  ;;  %v2746_v38 = vpop.f32.mrb[108].mxu0 }
 0x1d4   : > { %v2858_v39 = vpop.f32.mrb[108].mxu1  ;;  %v2747_v7 = vpop.f32.mrb[109].mxu0 }
 0x1d5   : > { %2133 = vst [vmem:[%s3433_s30 + $0xa8] sm:$0xff] %v2069_v36  ;;  %v2748_v40 = vadd.f32 %v2747_v7, %v2746_v38  ;;  %v2859_v42 = vpop.f32.mrb[109].mxu1  ;;  %v2749_v46 = vpop.f32.mrb[110].mxu0 }
 0x1d6   : > { %v2860_v47 = vadd.f32 %v2859_v42, %v2858_v39  ;;  %v2861_v9 = vpop.f32.mrb[110].mxu1  ;;  %v2750_v43 = vpop.f32.mrb[111].mxu0 }
 0x1d7   : > { %v1913_v48 = vadd.f32 %v2748_v40, %v3408_v63  ;;  %v2751_v50 = vadd.f32 %v2750_v43, %v2749_v46  ;;  %v2862_v5 = vpop.f32.mrb[111].mxu1 }
 0x1d8   : > { %v2863_v52 = vadd.f32 %v2862_v5, %v2861_v9 }
 0x1d9   : > { %v2074_v45 = vadd.f32 %v2860_v47, %v1913_v48  ;;  %v1916_v54 = vadd.f32 %v2751_v50, %v3410_v1 }
 0x1db   : > { %2134 = vst [vmem:[%s3433_s30 + $0xb0] sm:$0xff] %v2074_v45  ;;  %v2077_v56 = vadd.f32 %v2863_v52, %v1916_v54  ;;  %v2752_v58 = vpop.f32.mrb[112].mxu0 }
 0x1dc   : > { %v2864_v59 = vpop.f32.mrb[112].mxu1  ;;  %v2753_v8 = vpop.f32.mrb[113].mxu0 }
 0x1dd   : > { %2135 = vst [vmem:[%s3433_s30 + $0xb8] sm:$0xff] %v2077_v56  ;;  %v2754_v57 = vadd.f32 %v2753_v8, %v2752_v58  ;;  %v2865_v60 = vpop.f32.mrb[113].mxu1  ;;  %v2755_v61 = vpop.f32.mrb[114].mxu0 }
 0x1de   : > { %v2866_v62 = vadd.f32 %v2865_v60, %v2864_v59  ;;  %v2867_v49 = vpop.f32.mrb[114].mxu1  ;;  %v2756_v63 = vpop.f32.mrb[115].mxu0 }
 0x1df   : > { %v1921_v29 = vadd.f32 %v2754_v57, %v3412_v19  ;;  %v2757_v2 = vadd.f32 %v2756_v63, %v2755_v61  ;;  %v2868_v4 = vpop.f32.mrb[115].mxu1 }
 0x1e0   : > { %v2869_v10 = vadd.f32 %v2868_v4, %v2867_v49 }
 0x1e1   : > { %v2082_v1 = vadd.f32 %v2866_v62, %v1921_v29  ;;  %v1924_v12 = vadd.f32 %v2757_v2, %v3414_v22 }
 0x1e3   : > { %2136 = vst [vmem:[%s3433_s30 + $0xc0] sm:$0xff] %v2082_v1  ;;  %v2085_v31 = vadd.f32 %v2869_v10, %v1924_v12  ;;  %v2758_v6 = vpop.f32.mrb[116].mxu0 }
 0x1e4   : > { %v2870_v21 = vpop.f32.mrb[116].mxu1  ;;  %v2759_v13 = vpop.f32.mrb[117].mxu0 }
 0x1e5   : > { %2137 = vst [vmem:[%s3433_s30 + $0xc8] sm:$0xff] %v2085_v31  ;;  %v2760_v14 = vadd.f32 %v2759_v13, %v2758_v6  ;;  %v2871_v15 = vpop.f32.mrb[117].mxu1  ;;  %v2761_v11 = vpop.f32.mrb[118].mxu0 }
 0x1e6   : > { %v2872_v16 = vadd.f32 %v2871_v15, %v2870_v21  ;;  %v2873_v23 = vpop.f32.mrb[118].mxu1  ;;  %v2762_v19 = vpop.f32.mrb[119].mxu0 }
 0x1e7   : > { %v1929_v17 = vadd.f32 %v2760_v14, %v3416_v41  ;;  %v2763_v51 = vadd.f32 %v2762_v19, %v2761_v11  ;;  %v2874_v18 = vpop.f32.mrb[119].mxu1 }
 0x1e8   : > { %v2875_v20 = vadd.f32 %v2874_v18, %v2873_v23 }
 0x1e9   : > { %v2090_v22 = vadd.f32 %v2872_v16, %v1929_v17  ;;  %v1932_v24 = vadd.f32 %v2763_v51, %v3418_v44 }
 0x1eb   : > { %2138 = vst [vmem:[%s3433_s30 + $0xd0] sm:$0xff] %v2090_v22  ;;  %v2093_v28 = vadd.f32 %v2875_v20, %v1932_v24  ;;  %v2764_v53 = vpop.f32.mrb[120].mxu0 }
 0x1ec   : > { %v2876_v32 = vpop.f32.mrb[120].mxu1  ;;  %v2765_v25 = vpop.f32.mrb[121].mxu0 }
 0x1ed   : > { %2139 = vst [vmem:[%s3433_s30 + $0xd8] sm:$0xff] %v2093_v28  ;;  %v2766_v33 = vadd.f32 %v2765_v25, %v2764_v53  ;;  %v2877_v34 = vpop.f32.mrb[121].mxu1  ;;  %v2767_v37 = vpop.f32.mrb[122].mxu0 }
 0x1ee   : > { %v2878_v35 = vadd.f32 %v2877_v34, %v2876_v32  ;;  %v2879_v27 = vpop.f32.mrb[122].mxu1  ;;  %v2768_v41 = vpop.f32.mrb[123].mxu0 }
 0x1ef   : > { %v1937_v55 = vadd.f32 %v2766_v33, %v3420_v0  ;;  %v2769_v36 = vadd.f32 %v2768_v41, %v2767_v37  ;;  %v2880_v38 = vpop.f32.mrb[123].mxu1 }
 0x1f0   : > { %v2881_v39 = vadd.f32 %v2880_v38, %v2879_v27 }
 0x1f1   : > { %v2098_v44 = vadd.f32 %v2878_v35, %v1937_v55  ;;  %v1940_v7 = vadd.f32 %v2769_v36, %v3422_v3 }
 0x1f3   : > { %2140 = vst [vmem:[%s3433_s30 + $0xe0] sm:$0xff] %v2098_v44  ;;  %v2101_v40 = vadd.f32 %v2881_v39, %v1940_v7  ;;  %v2770_v42 = vpop.f32.mrb[124].mxu0 }
 0x1f4   : > { %v2882_v46 = vpop.f32.mrb[124].mxu1  ;;  %v2771_v47 = vpop.f32.mrb[125].mxu0 }
 0x1f5   : > { %2141 = vst [vmem:[%s3433_s30 + $0xe8] sm:$0xff] %v2101_v40  ;;  %v2772_v9 = vadd.f32 %v2771_v47, %v2770_v42  ;;  %v2883_v43 = vpop.f32.mrb[125].mxu1  ;;  %v2773_v48 = vpop.f32.mrb[126].mxu0 }
 0x1f6   : > { %v2884_v50 = vadd.f32 %v2883_v43, %v2882_v46  ;;  %v2885_v5 = vpop.f32.mrb[126].mxu1  ;;  %v2774_v0 = vpop.f32.mrb[127].mxu0 }
 0x1f7   : > { %v1945_v52 = vadd.f32 %v2772_v9, %v3424_v26  ;;  %v2775_v45 = vadd.f32 %v2774_v0, %v2773_v48  ;;  %v2886_v54 = vpop.f32.mrb[127].mxu1 }
 0x1f8   : > { %v2887_v56 = vadd.f32 %v2886_v54, %v2885_v5 }
 0x1f9   : > { %v2106_v3 = vadd.f32 %v2884_v50, %v1945_v52  ;;  %v1948_v58 = vadd.f32 %v2775_v45, %v3426_v30 }
 0x1fb   : > { %2142 = vst [vmem:[%s3433_s30 + $0xf0] sm:$0xff] %v2106_v3  ;;  %v2109_v59 = vadd.f32 %v2887_v56, %v1948_v58 }
 0x1fd   : > { %2143 = vst [vmem:[%s3433_s30 + $0xf8] sm:$0xff] %v2109_v59 }
 0x1fe PF: > { %s12_s11 = sadd.s32 1, %s2998_s11   ;;  %s3510_s9 = smov %s2994_s10 }
 0x1ff   : > { %p9_p5 = scmp.ge.s32.totalorder %s12_s11, 4   ;;  %s3511_s10 = smov %s3513_s12 }
 0x201   :  { %11 = sbr.rel (!%p9_p5) target bundleno = 2 (0x2), region = 61 }

// kernel: discriminator_forward.9
= control target key start
LH: loop header
LB: loop body
LE: loop exit
PB: predicated region body
PF: predicated region fallthrough
CT: control target
= control target key end

     0   :  { %s1862_s0 = inlined_call_operand.vmem [shape: f32[512,128], index: 0, kind: input, shape index: {}]   ;;  %s1863_s1 = inlined_call_operand.vmem [shape: f32[1,128], index: 1, kind: input, shape index: {}]   ;;  %s1864_s2 = inlined_call_operand.vmem [shape: f32[1,128], index: 2, kind: input, shape index: {}]   ;;  %s1865_s3 = inlined_call_operand.vmem [shape: f32[512,128], index: 3, kind: output, shape index: {}]  }
   0x1   :  { %v777_v0 = vld [vmem:[%s1862_s0] sm:$0xff]  ;;  %v782_v1 = vld [vmem:[%s1862_s0 + $0x8] sm:$0xff]  ;;  %v787_v2 = vld [vmem:[%s1862_s0 + $0x10] sm:$0xff] }
   0x2   :  { %v78_v3 = vadd.f32 %v782_v1, %v777_v0  ;;  %v794_v4 = vld [vmem:[%s1862_s0 + $0x18] sm:$0xff]  ;;  %v800_v6 = vld [vmem:[%s1862_s0 + $0x20] sm:$0xff]  ;;  %v806_v8 = vld [vmem:[%s1862_s0 + $0x28] sm:$0xff] }
   0x3   :  { %v812_v10 = vld [vmem:[%s1862_s0 + $0x30] sm:$0xff]  ;;  %v818_v12 = vld [vmem:[%s1862_s0 + $0x38] sm:$0xff]  ;;  %v824_v14 = vld [vmem:[%s1862_s0 + $0x40] sm:$0xff] }
   0x4   :  { %v79_v5 = vadd.f32 %v78_v3, %v787_v2  ;;  %v830_v16 = vld [vmem:[%s1862_s0 + $0x48] sm:$0xff]  ;;  %v836_v18 = vld [vmem:[%s1862_s0 + $0x50] sm:$0xff]  ;;  %v842_v20 = vld [vmem:[%s1862_s0 + $0x58] sm:$0xff] }
   0x5   :  { %v848_v22 = vld [vmem:[%s1862_s0 + $0x60] sm:$0xff]  ;;  %v854_v24 = vld [vmem:[%s1862_s0 + $0x68] sm:$0xff]  ;;  %v860_v26 = vld [vmem:[%s1862_s0 + $0x70] sm:$0xff] }
   0x6   :  { %v80_v7 = vadd.f32 %v79_v5, %v794_v4  ;;  %v866_v28 = vld [vmem:[%s1862_s0 + $0x78] sm:$0xff]  ;;  %v872_v30 = vld [vmem:[%s1862_s0 + $0x80] sm:$0xff]  ;;  %v878_v32 = vld [vmem:[%s1862_s0 + $0x88] sm:$0xff] }
   0x7   :  { %v884_v34 = vld [vmem:[%s1862_s0 + $0x90] sm:$0xff]  ;;  %v890_v36 = vld [vmem:[%s1862_s0 + $0x98] sm:$0xff]  ;;  %v896_v38 = vld [vmem:[%s1862_s0 + $0xa0] sm:$0xff] }
   0x8   :  { %v81_v9 = vadd.f32 %v80_v7, %v800_v6  ;;  %v902_v40 = vld [vmem:[%s1862_s0 + $0xa8] sm:$0xff]  ;;  %v908_v42 = vld [vmem:[%s1862_s0 + $0xb0] sm:$0xff]  ;;  %v914_v44 = vld [vmem:[%s1862_s0 + $0xb8] sm:$0xff] }
   0x9   :  { %v920_v46 = vld [vmem:[%s1862_s0 + $0xc0] sm:$0xff]  ;;  %v926_v48 = vld [vmem:[%s1862_s0 + $0xc8] sm:$0xff]  ;;  %v932_v50 = vld [vmem:[%s1862_s0 + $0xd0] sm:$0xff] }
   0xa   :  { %v82_v11 = vadd.f32 %v81_v9, %v806_v8  ;;  %v938_v52 = vld [vmem:[%s1862_s0 + $0xd8] sm:$0xff]  ;;  %v944_v54 = vld [vmem:[%s1862_s0 + $0xe0] sm:$0xff]  ;;  %v950_v56 = vld [vmem:[%s1862_s0 + $0xe8] sm:$0xff] }
   0xb   :  { %v956_v58 = vld [vmem:[%s1862_s0 + $0xf0] sm:$0xff]  ;;  %v962_v60 = vld [vmem:[%s1862_s0 + $0xf8] sm:$0xff]  ;;  %v968_v62 = vld [vmem:[%s1862_s0 + $0x100] sm:$0xff] }
   0xc   :  { %v83_v13 = vadd.f32 %v82_v11, %v812_v10  ;;  %1899 = vst [vmem:[#allocation2_spill] sm:$0xff] %v968_v62  ;;  %v974_v3 = vld [vmem:[%s1862_s0 + $0x108] sm:$0xff]  ;;  %v980_v7 = vld [vmem:[%s1862_s0 + $0x110] sm:$0xff]  ;;  %v986_v11 = vld [vmem:[%s1862_s0 + $0x118] sm:$0xff] }
   0xd   :  { %1900 = vst [vmem:[#allocation3_spill] sm:$0xff] %v974_v3  ;;  %1901 = vst [vmem:[#allocation4_spill] sm:$0xff] %v980_v7 }
   0xe   :  { %v84_v15 = vadd.f32 %v83_v13, %v818_v12  ;;  %1902 = vst [vmem:[#allocation5_spill] sm:$0xff] %v986_v11 }
  0x10   :  { %v85_v17 = vadd.f32 %v84_v15, %v824_v14  ;;  %v992_v15 = vld [vmem:[%s1862_s0 + $0x120] sm:$0xff] }
  0x11   :  { %1903 = vst [vmem:[#allocation6_spill] sm:$0xff] %v992_v15 }
  0x12   :  { %v86_v19 = vadd.f32 %v85_v17, %v830_v16 }
  0x14   :  { %v87_v21 = vadd.f32 %v86_v19, %v836_v18  ;;  %v998_v19 = vld [vmem:[%s1862_s0 + $0x128] sm:$0xff] }
  0x15   :  { %1904 = vst [vmem:[#allocation7_spill] sm:$0xff] %v998_v19 }
  0x16   :  { %v88_v23 = vadd.f32 %v87_v21, %v842_v20 }
  0x18   :  { %v89_v25 = vadd.f32 %v88_v23, %v848_v22  ;;  %v1004_v23 = vld [vmem:[%s1862_s0 + $0x130] sm:$0xff] }
  0x19   :  { %1905 = vst [vmem:[#allocation8_spill] sm:$0xff] %v1004_v23 }
  0x1a   :  { %v90_v27 = vadd.f32 %v89_v25, %v854_v24 }
  0x1c   :  { %v91_v29 = vadd.f32 %v90_v27, %v860_v26  ;;  %v1010_v27 = vld [vmem:[%s1862_s0 + $0x138] sm:$0xff] }
  0x1d   :  { %1906 = vst [vmem:[#allocation9_spill] sm:$0xff] %v1010_v27 }
  0x1e   :  { %v92_v31 = vadd.f32 %v91_v29, %v866_v28 }
  0x20   :  { %v93_v33 = vadd.f32 %v92_v31, %v872_v30  ;;  %v1016_v31 = vld [vmem:[%s1862_s0 + $0x140] sm:$0xff] }
  0x21   :  { %1907 = vst [vmem:[#allocation10_spill] sm:$0xff] %v1016_v31 }
  0x22   :  { %v94_v35 = vadd.f32 %v93_v33, %v878_v32 }
  0x24   :  { %v95_v37 = vadd.f32 %v94_v35, %v884_v34  ;;  %v1022_v35 = vld [vmem:[%s1862_s0 + $0x148] sm:$0xff] }
  0x25   :  { %1908 = vst [vmem:[#allocation11_spill] sm:$0xff] %v1022_v35 }
  0x26   :  { %v96_v39 = vadd.f32 %v95_v37, %v890_v36 }
  0x28   :  { %v97_v41 = vadd.f32 %v96_v39, %v896_v38  ;;  %v1028_v39 = vld [vmem:[%s1862_s0 + $0x150] sm:$0xff] }
  0x29   :  { %1909 = vst [vmem:[#allocation12_spill] sm:$0xff] %v1028_v39 }
  0x2a   :  { %v98_v43 = vadd.f32 %v97_v41, %v902_v40 }
  0x2c   :  { %v99_v45 = vadd.f32 %v98_v43, %v908_v42  ;;  %v1034_v43 = vld [vmem:[%s1862_s0 + $0x158] sm:$0xff] }
  0x2d   :  { %1910 = vst [vmem:[#allocation13_spill] sm:$0xff] %v1034_v43 }
  0x2e   :  { %v100_v47 = vadd.f32 %v99_v45, %v914_v44 }
  0x30   :  { %v101_v49 = vadd.f32 %v100_v47, %v920_v46  ;;  %v1040_v47 = vld [vmem:[%s1862_s0 + $0x160] sm:$0xff] }
  0x31   :  { %1911 = vst [vmem:[#allocation14_spill] sm:$0xff] %v1040_v47 }
  0x32   :  { %v102_v51 = vadd.f32 %v101_v49, %v926_v48 }
  0x34   :  { %v103_v53 = vadd.f32 %v102_v51, %v932_v50  ;;  %v59_v51 = vld [vmem:[%s1862_s0 + $0x168] sm:$0xff] }
  0x36   :  { %v104_v55 = vadd.f32 %v103_v53, %v938_v52 }
  0x38   :  { %v105_v57 = vadd.f32 %v104_v55, %v944_v54  ;;  %v60_v55 = vld [vmem:[%s1862_s0 + $0x170] sm:$0xff] }
  0x3a   :  { %v106_v59 = vadd.f32 %v105_v57, %v950_v56 }
  0x3c   :  { %v107_v61 = vadd.f32 %v106_v59, %v956_v58  ;;  %v61_v59 = vld [vmem:[%s1862_s0 + $0x178] sm:$0xff] }
  0x3e   :  { %v108_v63 = vadd.f32 %v107_v61, %v962_v60 }
  0x40   :  { %v109_v5 = vadd.f32 %v108_v63, %v968_v62  ;;  %v62_v63 = vld [vmem:[%s1862_s0 + $0x180] sm:$0xff] }
  0x42   :  { %v110_v9 = vadd.f32 %v109_v5, %v974_v3 }
  0x44   :  { %v111_v13 = vadd.f32 %v110_v9, %v980_v7  ;;  %v63_v9 = vld [vmem:[%s1862_s0 + $0x188] sm:$0xff] }
  0x46   :  { %v112_v17 = vadd.f32 %v111_v13, %v986_v11 }
  0x48   :  { %v113_v21 = vadd.f32 %v112_v17, %v992_v15  ;;  %v64_v17 = vld [vmem:[%s1862_s0 + $0x190] sm:$0xff] }
  0x4a   :  { %v114_v25 = vadd.f32 %v113_v21, %v998_v19 }
  0x4c   :  { %v115_v29 = vadd.f32 %v114_v25, %v1004_v23  ;;  %v65_v25 = vld [vmem:[%s1862_s0 + $0x198] sm:$0xff] }
  0x4e   :  { %v116_v33 = vadd.f32 %v115_v29, %v1010_v27 }
  0x50   :  { %v117_v37 = vadd.f32 %v116_v33, %v1016_v31  ;;  %v66_v33 = vld [vmem:[%s1862_s0 + $0x1a0] sm:$0xff]  ;;  %v77_v31 = vld [vmem:[%s1862_s0 + $0x1f8] sm:$0xff] }
  0x52   :  { %v118_v41 = vadd.f32 %v117_v37, %v1022_v35  ;;  %v76_v35 = vld [vmem:[%s1862_s0 + $0x1f0] sm:$0xff] }
  0x54   :  { %v119_v45 = vadd.f32 %v118_v41, %v1028_v39  ;;  %v67_v41 = vld [vmem:[%s1862_s0 + $0x1a8] sm:$0xff] }
  0x55   :  { %v75_v39 = vld [vmem:[%s1862_s0 + $0x1e8] sm:$0xff] }
  0x56   :  { %v120_v49 = vadd.f32 %v119_v45, %v1034_v43  ;;  %v74_v43 = vld [vmem:[%s1862_s0 + $0x1e0] sm:$0xff] }
  0x58   :  { %v121_v53 = vadd.f32 %v120_v49, %v1040_v47  ;;  %v68_v49 = vld [vmem:[%s1862_s0 + $0x1b0] sm:$0xff]  ;;  %v73_v47 = vld [vmem:[%s1862_s0 + $0x1d8] sm:$0xff] }
  0x5a   :  { %v122_v57 = vadd.f32 %v121_v53, %v59_v51 }
  0x5c   :  { %v123_v61 = vadd.f32 %v122_v57, %v60_v55  ;;  %v69_v57 = vld [vmem:[%s1862_s0 + $0x1b8] sm:$0xff] }
  0x5e   :  { %v124_v5 = vadd.f32 %v123_v61, %v61_v59 }
  0x60   :  { %v125_v13 = vadd.f32 %v124_v5, %v62_v63  ;;  %v70_v5 = vld [vmem:[%s1862_s0 + $0x1c0] sm:$0xff] }
  0x62   :  { %v126_v21 = vadd.f32 %v125_v13, %v63_v9 }
  0x64   :  { %v127_v29 = vadd.f32 %v126_v21, %v64_v17  ;;  %v71_v21 = vld [vmem:[%s1862_s0 + $0x1c8] sm:$0xff] }
  0x66   :  { %v128_v37 = vadd.f32 %v127_v29, %v65_v25 }
  0x68   :  { %v129_v45 = vadd.f32 %v128_v37, %v66_v33  ;;  %v72_v37 = vld [vmem:[%s1862_s0 + $0x1d0] sm:$0xff] }
  0x6a   :  { %v130_v53 = vadd.f32 %v129_v45, %v67_v41 }
  0x6c   :  { %v131_v61 = vadd.f32 %v130_v53, %v68_v49 }
  0x6e   :  { %v132_v13 = vadd.f32 %v131_v61, %v69_v57 }
  0x70   :  { %v133_v29 = vadd.f32 %v132_v13, %v70_v5 }
  0x72   :  { %v134_v45 = vadd.f32 %v133_v29, %v71_v21 }
  0x74   :  { %v135_v53 = vadd.f32 %v134_v45, %v72_v37 }
  0x76   :  { %v136_v61 = vadd.f32 %v135_v53, %v73_v47 }
  0x78   :  { %v137_v13 = vadd.f32 %v136_v61, %v74_v43 }
  0x7a   :  { %v138_v29 = vadd.f32 %v137_v13, %v75_v39 }
  0x7c   :  { %v139_v45 = vadd.f32 %v138_v29, %v76_v35 }
  0x7e   :  { %v140_v27 = vadd.f32 %v139_v45, %v77_v31 }
  0x80   :  { %v141_v23 = vrot.slane %v140_v27, 4 }
  0x82   :  { %v142_v19 = vadd.f32 %v141_v23, %v140_v27 }
  0x84   :  { %v143_v15 = vrot.slane %v142_v19, 2 }
  0x86   :  { %v144_v53 = vadd.f32 %v143_v15, %v142_v19 }
  0x88   :  { %v145_v11 = vrot.slane %v144_v53, 1 }
  0x8a   :  { %v146_v7 = vadd.f32 %v145_v11, %v144_v53 }
  0x8c   :  { %v1101_v3 = vmul.f32 0.001953125, %v146_v7 }
  0x8e   :  { %v1104_v61 = vsub.f32 %v59_v51, %v1101_v3  ;;  %v1107_v62 = vsub.f32 %v60_v55, %v1101_v3  ;;  %v1110_v13 = vsub.f32 %v61_v59, %v1101_v3  ;;  %v1113_v29 = vsub.f32 %v62_v63, %v1101_v3 }
  0x8f   :  { %v1116_v23 = vsub.f32 %v63_v9, %v1101_v3  ;;  %v1119_v15 = vsub.f32 %v64_v17, %v1101_v3  ;;  %v1122_v7 = vsub.f32 %v65_v25, %v1101_v3  ;;  %v1125_v11 = vsub.f32 %v66_v33, %v1101_v3 }
  0x90   :  { %v1128_v19 = vsub.f32 %v67_v41, %v1101_v3  ;;  %v1131_v27 = vsub.f32 %v68_v49, %v1101_v3  ;;  %v1134_v51 = vsub.f32 %v69_v57, %v1101_v3  ;;  %v1137_v55 = vsub.f32 %v70_v5, %v1101_v3 }
  0x91   :  { %v1140_v59 = vsub.f32 %v71_v21, %v1101_v3  ;;  %v1143_v63 = vsub.f32 %v72_v37, %v1101_v3  ;;  %v1146_v9 = vsub.f32 %v73_v47, %v1101_v3  ;;  %v1149_v17 = vsub.f32 %v74_v43, %v1101_v3 }
  0x92   :  { %1912 = vst [vmem:[#allocation15_spill] sm:$0xff] %v1137_v55  ;;  %v1152_v25 = vsub.f32 %v75_v39, %v1101_v3  ;;  %v1155_v33 = vsub.f32 %v76_v35, %v1101_v3  ;;  %v1158_v41 = vsub.f32 %v77_v31, %v1101_v3  ;;  %v1162_v49 = vsub.f32 %v777_v0, %v1101_v3 }
  0x93   :  { %1913 = vst [vmem:[#allocation16_spill] sm:$0xff] %v1140_v59  ;;  %1914 = vst [vmem:[#allocation17_spill] sm:$0xff] %v1143_v63  ;;  %v1166_v47 = vsub.f32 %v782_v1, %v1101_v3  ;;  %v1170_v43 = vsub.f32 %v787_v2, %v1101_v3  ;;  %v1174_v39 = vsub.f32 %v794_v4, %v1101_v3 }
  0x94   :  { %1915 = vst [vmem:[#allocation18_spill] sm:$0xff] %v1146_v9  ;;  %1916 = vst [vmem:[#allocation19_spill] sm:$0xff] %v1149_v17  ;;  %v212_v31 = vmul.f32 %v1162_v49, %v1162_v49  ;;  %v1182_v0 = vsub.f32 %v800_v6, %v1101_v3  ;;  %v1188_v2 = vsub.f32 %v806_v8, %v1101_v3 }
  0x95   :  { %1917 = vst [vmem:[#allocation20_spill] sm:$0xff] %v1158_v41  ;;  %v213_v35 = vmul.f32 %v1166_v47, %v1166_v47  ;;  %v214_v1 = vmul.f32 %v1170_v43, %v1170_v43  ;;  %v215_v4 = vmul.f32 %v1174_v39, %v1174_v39  ;;  %v1194_v5 = vsub.f32 %v812_v10, %v1101_v3 }
  0x96   :  { %v216_v21 = vmul.f32 %v1182_v0, %v1182_v0  ;;  %v1200_v37 = vsub.f32 %v818_v12, %v1101_v3  ;;  %v217_v8 = vmul.f32 %v1188_v2, %v1188_v2  ;;  %v1206_v53 = vsub.f32 %v824_v14, %v1101_v3 }
  0x97   :  { %v276_v57 = vadd.f32 %v213_v35, %v212_v31  ;;  %v218_v10 = vmul.f32 %v1194_v5, %v1194_v5  ;;  %v1212_v35 = vsub.f32 %v830_v16, %v1101_v3 }
  0x98   :  { %v219_v12 = vmul.f32 %v1200_v37, %v1200_v37  ;;  %v220_v14 = vmul.f32 %v1206_v53, %v1206_v53 }
  0x99   :  { %v277_v6 = vadd.f32 %v276_v57, %v214_v1  ;;  %v1218_v57 = vsub.f32 %v836_v18, %v1101_v3  ;;  %v221_v16 = vmul.f32 %v1212_v35, %v1212_v35 }
  0x9b   :  { %v278_v45 = vadd.f32 %v277_v6, %v215_v4  ;;  %v1224_v6 = vsub.f32 %v842_v20, %v1101_v3  ;;  %v222_v18 = vmul.f32 %v1218_v57, %v1218_v57 }
  0x9d   :  { %v279_v31 = vadd.f32 %v278_v45, %v216_v21  ;;  %v1230_v45 = vsub.f32 %v848_v22, %v1101_v3  ;;  %v223_v20 = vmul.f32 %v1224_v6, %v1224_v6 }
  0x9f   :  { %v280_v1 = vadd.f32 %v279_v31, %v217_v8  ;;  %v1236_v31 = vsub.f32 %v854_v24, %v1101_v3  ;;  %v224_v22 = vmul.f32 %v1230_v45, %v1230_v45 }
  0xa1   :  { %v281_v4 = vadd.f32 %v280_v1, %v218_v10  ;;  %v1242_v1 = vsub.f32 %v860_v26, %v1101_v3  ;;  %v225_v24 = vmul.f32 %v1236_v31, %v1236_v31 }
  0xa3   :  { %v282_v21 = vadd.f32 %v281_v4, %v219_v12  ;;  %v1248_v4 = vsub.f32 %v866_v28, %v1101_v3  ;;  %v226_v26 = vmul.f32 %v1242_v1, %v1242_v1 }
  0xa5   :  { %v283_v8 = vadd.f32 %v282_v21, %v220_v14  ;;  %v1254_v21 = vsub.f32 %v872_v30, %v1101_v3  ;;  %v227_v28 = vmul.f32 %v1248_v4, %v1248_v4 }
  0xa7   :  { %v284_v10 = vadd.f32 %v283_v8, %v221_v16  ;;  %v1260_v8 = vsub.f32 %v878_v32, %v1101_v3  ;;  %v228_v30 = vmul.f32 %v1254_v21, %v1254_v21 }
  0xa9   :  { %v285_v12 = vadd.f32 %v284_v10, %v222_v18  ;;  %v1266_v10 = vsub.f32 %v884_v34, %v1101_v3  ;;  %v229_v32 = vmul.f32 %v1260_v8, %v1260_v8 }
  0xab   :  { %v286_v14 = vadd.f32 %v285_v12, %v223_v20  ;;  %v1272_v12 = vsub.f32 %v890_v36, %v1101_v3  ;;  %v230_v34 = vmul.f32 %v1266_v10, %v1266_v10 }
  0xad   :  { %v287_v16 = vadd.f32 %v286_v14, %v224_v22  ;;  %v1278_v14 = vsub.f32 %v896_v38, %v1101_v3  ;;  %v231_v36 = vmul.f32 %v1272_v12, %v1272_v12 }
  0xaf   :  { %v288_v18 = vadd.f32 %v287_v16, %v225_v24  ;;  %v1284_v16 = vsub.f32 %v902_v40, %v1101_v3  ;;  %v232_v38 = vmul.f32 %v1278_v14, %v1278_v14 }
  0xb1   :  { %v289_v20 = vadd.f32 %v288_v18, %v226_v26  ;;  %v1290_v18 = vsub.f32 %v908_v42, %v1101_v3  ;;  %v233_v40 = vmul.f32 %v1284_v16, %v1284_v16 }
  0xb3   :  { %v290_v22 = vadd.f32 %v289_v20, %v227_v28  ;;  %v1296_v20 = vsub.f32 %v914_v44, %v1101_v3  ;;  %v234_v42 = vmul.f32 %v1290_v18, %v1290_v18 }
  0xb5   :  { %v291_v24 = vadd.f32 %v290_v22, %v228_v30  ;;  %v1302_v22 = vsub.f32 %v920_v46, %v1101_v3  ;;  %v235_v44 = vmul.f32 %v1296_v20, %v1296_v20 }
  0xb7   :  { %v292_v26 = vadd.f32 %v291_v24, %v229_v32  ;;  %v1308_v24 = vsub.f32 %v926_v48, %v1101_v3  ;;  %v236_v46 = vmul.f32 %v1302_v22, %v1302_v22 }
  0xb9   :  { %v293_v28 = vadd.f32 %v292_v26, %v230_v34  ;;  %v1314_v26 = vsub.f32 %v932_v50, %v1101_v3  ;;  %v237_v48 = vmul.f32 %v1308_v24, %v1308_v24 }
  0xbb   :  { %v294_v30 = vadd.f32 %v293_v28, %v231_v36  ;;  %v1320_v28 = vsub.f32 %v938_v52, %v1101_v3  ;;  %v238_v50 = vmul.f32 %v1314_v26, %v1314_v26 }
  0xbd   :  { %v295_v32 = vadd.f32 %v294_v30, %v232_v38  ;;  %1918 = vst [vmem:[#allocation21_spill] sm:$0xff] %v1320_v28  ;;  %v1326_v30 = vsub.f32 %v944_v54, %v1101_v3  ;;  %v239_v52 = vmul.f32 %v1320_v28, %v1320_v28 }
  0xbf   :  { %v296_v34 = vadd.f32 %v295_v32, %v233_v40  ;;  %1919 = vst [vmem:[#allocation22_spill] sm:$0xff] %v1326_v30  ;;  %v1332_v32 = vsub.f32 %v950_v56, %v1101_v3  ;;  %v240_v54 = vmul.f32 %v1326_v30, %v1326_v30 }
  0xc1   :  { %v297_v36 = vadd.f32 %v296_v34, %v234_v42  ;;  %1920 = vst [vmem:[#allocation23_spill] sm:$0xff] %v1332_v32  ;;  %v1338_v34 = vsub.f32 %v956_v58, %v1101_v3  ;;  %v241_v56 = vmul.f32 %v1332_v32, %v1332_v32 }
  0xc3   :  { %v298_v38 = vadd.f32 %v297_v36, %v235_v44  ;;  %1921 = vst [vmem:[#allocation24_spill] sm:$0xff] %v1338_v34  ;;  %v1344_v36 = vsub.f32 %v962_v60, %v1101_v3  ;;  %v242_v58 = vmul.f32 %v1338_v34, %v1338_v34 }
  0xc5   :  { %v299_v40 = vadd.f32 %v298_v38, %v236_v46  ;;  %1922 = vst [vmem:[#allocation25_spill] sm:$0xff] %v1344_v36  ;;  %v1923_v38 = vld [vmem:[#allocation2_spill] sm:$0xff]  ;;  %v243_v60 = vmul.f32 %v1344_v36, %v1344_v36 }
  0xc6   :  { %v1350_v28 = vsub.f32 %v1923_v38, %v1101_v3  ;;  %v1929_v38 = vld [vmem:[#allocation5_spill] sm:$0xff] }
  0xc7   :  { %v300_v42 = vadd.f32 %v299_v40, %v237_v48  ;;  %v1925_v40 = vld [vmem:[#allocation3_spill] sm:$0xff]  ;;  %v1368_v34 = vsub.f32 %v1929_v38, %v1101_v3  ;;  %v1935_v38 = vld [vmem:[#allocation8_spill] sm:$0xff] }
  0xc8   :  { %1924 = vst [vmem:[#allocation2_spill] sm:$0xff] %v1350_v28  ;;  %v1356_v30 = vsub.f32 %v1925_v40, %v1101_v3  ;;  %v1931_v40 = vld [vmem:[#allocation6_spill] sm:$0xff] }
  0xc9   :  { %v301_v44 = vadd.f32 %v300_v42, %v238_v50  ;;  %v1927_v42 = vld [vmem:[#allocation4_spill] sm:$0xff]  ;;  %1930 = vst [vmem:[#allocation5_spill] sm:$0xff] %v1368_v34  ;;  %v1374_v36 = vsub.f32 %v1931_v40, %v1101_v3  ;;  %v1937_v40 = vld [vmem:[#allocation9_spill] sm:$0xff] }
  0xca   :  { %1926 = vst [vmem:[#allocation3_spill] sm:$0xff] %v1356_v30  ;;  %v1362_v32 = vsub.f32 %v1927_v42, %v1101_v3  ;;  %v1933_v42 = vld [vmem:[#allocation7_spill] sm:$0xff] }
  0xcb   :  { %v302_v46 = vadd.f32 %v301_v44, %v239_v52  ;;  %v244_v52 = vmul.f32 %v1350_v28, %v1350_v28  ;;  %1932 = vst [vmem:[#allocation6_spill] sm:$0xff] %v1374_v36  ;;  %v1380_v28 = vsub.f32 %v1933_v42, %v1101_v3  ;;  %v1939_v42 = vld [vmem:[#allocation10_spill] sm:$0xff] }
  0xcc   :  { %1928 = vst [vmem:[#allocation4_spill] sm:$0xff] %v1362_v32 }
  0xcd   :  { %v303_v48 = vadd.f32 %v302_v46, %v240_v54  ;;  %v245_v54 = vmul.f32 %v1356_v30, %v1356_v30  ;;  %1934 = vst [vmem:[#allocation7_spill] sm:$0xff] %v1380_v28  ;;  %v1386_v30 = vsub.f32 %v1935_v38, %v1101_v3  ;;  %v1940_v38 = vld [vmem:[#allocation11_spill] sm:$0xff] }
  0xcf   :  { %v304_v50 = vadd.f32 %v303_v48, %v241_v56  ;;  %v246_v56 = vmul.f32 %v1362_v32, %v1362_v32  ;;  %1936 = vst [vmem:[#allocation8_spill] sm:$0xff] %v1386_v30  ;;  %v1392_v32 = vsub.f32 %v1937_v40, %v1101_v3  ;;  %v1942_v40 = vld [vmem:[#allocation12_spill] sm:$0xff] }
  0xd1   :  { %v305_v44 = vadd.f32 %v304_v50, %v242_v58  ;;  %v247_v58 = vmul.f32 %v1368_v34, %v1368_v34  ;;  %1938 = vst [vmem:[#allocation9_spill] sm:$0xff] %v1392_v32  ;;  %v1398_v34 = vsub.f32 %v1939_v42, %v1101_v3  ;;  %v1943_v42 = vld [vmem:[#allocation13_spill] sm:$0xff] }
  0xd3   :  { %v306_v46 = vadd.f32 %v305_v44, %v243_v60  ;;  %v248_v60 = vmul.f32 %v1374_v36, %v1374_v36  ;;  %v1404_v36 = vsub.f32 %v1940_v38, %v1101_v3  ;;  %v1944_v38 = vld [vmem:[#allocation14_spill] sm:$0xff] }
  0xd5   :  { %v307_v48 = vadd.f32 %v306_v46, %v244_v52  ;;  %v249_v52 = vmul.f32 %v1380_v28, %v1380_v28  ;;  %1941 = vst [vmem:[#allocation10_spill] sm:$0xff] %v1404_v36  ;;  %v1410_v28 = vsub.f32 %v1942_v40, %v1101_v3 }
  0xd7   :  { %v308_v50 = vadd.f32 %v307_v48, %v245_v54  ;;  %v250_v54 = vmul.f32 %v1386_v30, %v1386_v30  ;;  %v1416_v30 = vsub.f32 %v1943_v42, %v1101_v3 }
  0xd9   :  { %v309_v44 = vadd.f32 %v308_v50, %v246_v56  ;;  %v251_v56 = vmul.f32 %v1392_v32, %v1392_v32  ;;  %v1422_v32 = vsub.f32 %v1944_v38, %v1101_v3  ;;  %v255_v40 = vmul.f32 %v1416_v30, %v1416_v30 }
  0xda   :  { %v258_v3 = vmul.f32 %v1107_v62, %v1107_v62  ;;  %v259_v38 = vmul.f32 %v1110_v13, %v1110_v13 }
  0xdb   :  { %v310_v46 = vadd.f32 %v309_v44, %v247_v58  ;;  %v252_v58 = vmul.f32 %v1398_v34, %v1398_v34 }
  0xdd   :  { %v311_v48 = vadd.f32 %v310_v46, %v248_v60  ;;  %v253_v60 = vmul.f32 %v1404_v36, %v1404_v36  ;;  %v257_v36 = vmul.f32 %v1104_v61, %v1104_v61 }
  0xdf   :  { %v312_v50 = vadd.f32 %v311_v48, %v249_v52  ;;  %v254_v52 = vmul.f32 %v1410_v28, %v1410_v28 }
  0xe1   :  { %v313_v44 = vadd.f32 %v312_v50, %v250_v54  ;;  %v256_v50 = vmul.f32 %v1422_v32, %v1422_v32 }
  0xe3   :  { %v314_v46 = vadd.f32 %v313_v44, %v251_v56 }
  0xe5   :  { %v315_v48 = vadd.f32 %v314_v46, %v252_v58  ;;  %v260_v46 = vmul.f32 %v1113_v29, %v1113_v29 }
  0xe7   :  { %v316_v54 = vadd.f32 %v315_v48, %v253_v60  ;;  %v261_v48 = vmul.f32 %v1116_v23, %v1116_v23 }
  0xe9   :  { %v317_v42 = vadd.f32 %v316_v54, %v254_v52  ;;  %v262_v54 = vmul.f32 %v1119_v15, %v1119_v15 }
  0xeb   :  { %v318_v56 = vadd.f32 %v317_v42, %v255_v40  ;;  %v263_v42 = vmul.f32 %v1122_v7, %v1122_v7 }
  0xed   :  { %v319_v44 = vadd.f32 %v318_v56, %v256_v50  ;;  %v264_v56 = vmul.f32 %v1125_v11, %v1125_v11 }
  0xef   :  { %v320_v58 = vadd.f32 %v319_v44, %v257_v36  ;;  %v265_v44 = vmul.f32 %v1128_v19, %v1128_v19 }
  0xf1   :  { %v321_v60 = vadd.f32 %v320_v58, %v258_v3  ;;  %v266_v58 = vmul.f32 %v1131_v27, %v1131_v27 }
  0xf3   :  { %v322_v52 = vadd.f32 %v321_v60, %v259_v38  ;;  %v267_v60 = vmul.f32 %v1134_v51, %v1134_v51 }
  0xf5   :  { %v323_v40 = vadd.f32 %v322_v52, %v260_v46  ;;  %v268_v52 = vmul.f32 %v1137_v55, %v1137_v55 }
  0xf7   :  { %v324_v50 = vadd.f32 %v323_v40, %v261_v48  ;;  %v269_v40 = vmul.f32 %v1140_v59, %v1140_v59 }
  0xf9   :  { %v325_v36 = vadd.f32 %v324_v50, %v262_v54  ;;  %v270_v50 = vmul.f32 %v1143_v63, %v1143_v63 }
  0xfb   :  { %v326_v3 = vadd.f32 %v325_v36, %v263_v42  ;;  %v271_v36 = vmul.f32 %v1146_v9, %v1146_v9 }
  0xfd   :  { %v327_v38 = vadd.f32 %v326_v3, %v264_v56  ;;  %v272_v3 = vmul.f32 %v1149_v17, %v1149_v17 }
  0xff   :  { %v328_v46 = vadd.f32 %v327_v38, %v265_v44  ;;  %v273_v38 = vmul.f32 %v1152_v25, %v1152_v25 }
 0x101   :  { %v329_v48 = vadd.f32 %v328_v46, %v266_v58  ;;  %v274_v46 = vmul.f32 %v1155_v33, %v1155_v33 }
 0x103   :  { %v330_v54 = vadd.f32 %v329_v48, %v267_v60  ;;  %v275_v48 = vmul.f32 %v1158_v41, %v1158_v41 }
 0x105   :  { %v331_v42 = vadd.f32 %v330_v54, %v268_v52 }
 0x107   :  { %v332_v56 = vadd.f32 %v331_v42, %v269_v40 }
 0x109   :  { %v333_v44 = vadd.f32 %v332_v56, %v270_v50 }
 0x10b   :  { %v334_v58 = vadd.f32 %v333_v44, %v271_v36  ;;  %v351_v36 = vlaneseq }
 0x10d   :  { %v335_v60 = vadd.f32 %v334_v58, %v272_v3  ;;  %v352_v44 = vshrl.u32 %v351_v36, 7  ;;  %v346_v3 = vld [vmem:[%s1863_s1] sm:$0x1] }
 0x10f   :  { %v336_v52 = vadd.f32 %v335_v60, %v273_v38  ;;  %v353_v58 = vsub.s32 0, %v352_v44 }
 0x111   :  { %v337_v54 = vadd.f32 %v336_v52, %v274_v46 }
 0x113   :  { %v338_v63 = vadd.f32 %v337_v54, %v275_v48 }
 0x115   :  { %v339_v9 = vrot.slane %v338_v63, 4 }
 0x117   :  { %v340_v40 = vadd.f32 %v339_v9, %v338_v63  ;;  %v1476_v63 = vld [vmem:[%s1864_s2] ss:$0 sm:$0xff] }
 0x119   :  { %v341_v42 = vrot.slane %v340_v40, 2 }
 0x11b   :  { %v342_v59 = vadd.f32 %v341_v42, %v340_v40 }
 0x11d   :  { %v343_v17 = vrot.slane %v342_v59, 1 }
 0x11f   :  { %v344_v50 = vadd.f32 %v343_v17, %v342_v59 }
 0x121   :  { %v345_v56 = vmul.f32 0.001953125, %v344_v50 }
 0x123   :  { %v347_v55 = vadd.f32 1e-05, %v345_v56 }
 0x125   :  { %752 = vrsqrt.f32 %v347_v55 }
 0x12f   :  { %v753_v41 = vpop.eup %752 }
 0x130   :  { %v349_v38 = vmul.f32 %v753_v41, %v346_v3 }
 0x132   :  { %v1471_v46 = vrot.slane %v349_v38, %v353_v58 }
 0x134   :  { %v356_v59 = vmul.f32 %v1471_v46, %v1162_v49  ;;  %v357_v55 = vmul.f32 %v1471_v46, %v1166_v47  ;;  %v358_v9 = vmul.f32 %v1471_v46, %v1170_v43  ;;  %v359_v17 = vmul.f32 %v1471_v46, %v1174_v39 }
 0x135   :  { %v360_v41 = vmul.f32 %v1471_v46, %v1182_v0  ;;  %v361_v60 = vmul.f32 %v1471_v46, %v1188_v2  ;;  %v362_v48 = vmul.f32 %v1471_v46, %v1194_v5  ;;  %v363_v49 = vmul.f32 %v1471_v46, %v1200_v37 }
 0x136   :  { %v427_v47 = vadd.f32 %v1476_v63, %v356_v59  ;;  %v428_v52 = vadd.f32 %v1476_v63, %v357_v55  ;;  %v429_v43 = vadd.f32 %v1476_v63, %v358_v9  ;;  %v430_v39 = vadd.f32 %v1476_v63, %v359_v17 }
 0x137   :  { %v431_v54 = vadd.f32 %v1476_v63, %v360_v41  ;;  %v432_v0 = vadd.f32 %v1476_v63, %v361_v60  ;;  %v433_v2 = vadd.f32 %v1476_v63, %v362_v48  ;;  %v434_v40 = vadd.f32 %v1476_v63, %v363_v49 }
 0x138   :  { %vm491_vm0 = vcmp.ge.f32.partialorder %v427_v47, 0.0  ;;  %v555_v5 = vmul.f32 0.2, %v427_v47  ;;  %vm492_vm1 = vcmp.ge.f32.partialorder %v428_v52, 0.0  ;;  %v556_v37 = vmul.f32 0.2, %v428_v52 }
 0x139   :  { %vm493_vm2 = vcmp.ge.f32.partialorder %v429_v43, 0.0  ;;  %v557_v42 = vmul.f32 0.2, %v429_v43  ;;  %vm494_vm3 = vcmp.ge.f32.partialorder %v430_v39, 0.0  ;;  %v558_v50 = vmul.f32 0.2, %v430_v39 }
 0x13a   :  { %v619_v56 = vsel %vm491_vm0, %v427_v47, %v555_v5  ;;  %v620_v36 = vsel %vm492_vm1, %v428_v52, %v556_v37  ;;  %vm495_vm4 = vcmp.ge.f32.partialorder %v431_v54, 0.0  ;;  %v559_v44 = vmul.f32 0.2, %v431_v54 }
 0x13b   :  { %683 = vst [vmem:[%s1865_s3] sm:$0xff] %v619_v56  ;;  %684 = vst [vmem:[%s1865_s3 + $0x8] sm:$0xff] %v620_v36  ;;  %v621_v3 = vsel %vm493_vm2, %v429_v43, %v557_v42  ;;  %v622_v58 = vsel %vm494_vm3, %v430_v39, %v558_v50  ;;  %vm496_vm5 = vcmp.ge.f32.partialorder %v432_v0, 0.0  ;;  %v560_v38 = vmul.f32 0.2, %v432_v0 }
 0x13c   :  { %685 = vst [vmem:[%s1865_s3 + $0x10] sm:$0xff] %v621_v3  ;;  %686 = vst [vmem:[%s1865_s3 + $0x18] sm:$0xff] %v622_v58  ;;  %v623_v59 = vsel %vm495_vm4, %v431_v54, %v559_v44  ;;  %vm497_vm6 = vcmp.ge.f32.partialorder %v433_v2, 0.0  ;;  %v561_v55 = vmul.f32 0.2, %v433_v2  ;;  %vm498_vm7 = vcmp.ge.f32.partialorder %v434_v40, 0.0 }
 0x13d   :  { %687 = vst [vmem:[%s1865_s3 + $0x20] sm:$0xff] %v623_v59  ;;  %v624_v9 = vsel %vm496_vm5, %v432_v0, %v560_v38  ;;  %v562_v17 = vmul.f32 0.2, %v434_v40  ;;  %v364_v41 = vmul.f32 %v1471_v46, %v1206_v53  ;;  %v365_v60 = vmul.f32 %v1471_v46, %v1212_v35 }
 0x13e   :  { %688 = vst [vmem:[%s1865_s3 + $0x28] sm:$0xff] %v624_v9  ;;  %v625_v48 = vsel %vm497_vm6, %v433_v2, %v561_v55  ;;  %v366_v49 = vmul.f32 %v1471_v46, %v1218_v57  ;;  %v367_v47 = vmul.f32 %v1471_v46, %v1224_v6  ;;  %v368_v52 = vmul.f32 %v1471_v46, %v1230_v45 }
 0x13f   :  { %689 = vst [vmem:[%s1865_s3 + $0x30] sm:$0xff] %v625_v48  ;;  %v626_v53 = vsel %vm498_vm7, %v434_v40, %v562_v17  ;;  %v435_v35 = vadd.f32 %v1476_v63, %v364_v41  ;;  %v436_v43 = vadd.f32 %v1476_v63, %v365_v60  ;;  %v369_v39 = vmul.f32 %v1471_v46, %v1236_v31 }
 0x140   :  { %690 = vst [vmem:[%s1865_s3 + $0x38] sm:$0xff] %v626_v53  ;;  %v437_v57 = vadd.f32 %v1476_v63, %v366_v49  ;;  %v438_v6 = vadd.f32 %v1476_v63, %v367_v47  ;;  %v439_v45 = vadd.f32 %v1476_v63, %v368_v52  ;;  %v370_v54 = vmul.f32 %v1471_v46, %v1242_v1 }
 0x141   :  { %vm499_vm8 = vcmp.ge.f32.partialorder %v435_v35, 0.0  ;;  %v563_v0 = vmul.f32 0.2, %v435_v35  ;;  %vm500_vm9 = vcmp.ge.f32.partialorder %v436_v43, 0.0  ;;  %v564_v2 = vmul.f32 0.2, %v436_v43 }
 0x142   :  { %vm501_vm10 = vcmp.ge.f32.partialorder %v437_v57, 0.0  ;;  %v565_v40 = vmul.f32 0.2, %v437_v57  ;;  %vm502_vm11 = vcmp.ge.f32.partialorder %v438_v6, 0.0  ;;  %v566_v31 = vmul.f32 0.2, %v438_v6 }
 0x143   :  { %v627_v5 = vsel %vm499_vm8, %v435_v35, %v563_v0  ;;  %v628_v37 = vsel %vm500_vm9, %v436_v43, %v564_v2  ;;  %vm503_vm12 = vcmp.ge.f32.partialorder %v439_v45, 0.0  ;;  %v567_v42 = vmul.f32 0.2, %v439_v45 }
 0x144   :  { %691 = vst [vmem:[%s1865_s3 + $0x40] sm:$0xff] %v627_v5  ;;  %692 = vst [vmem:[%s1865_s3 + $0x48] sm:$0xff] %v628_v37  ;;  %v629_v1 = vsel %vm501_vm10, %v437_v57, %v565_v40  ;;  %v630_v50 = vsel %vm502_vm11, %v438_v6, %v566_v31  ;;  %v440_v56 = vadd.f32 %v1476_v63, %v369_v39 }
 0x145   :  { %v441_v36 = vadd.f32 %v1476_v63, %v370_v54  ;;  %693 = vst [vmem:[%s1865_s3 + $0x50] sm:$0xff] %v629_v1  ;;  %694 = vst [vmem:[%s1865_s3 + $0x58] sm:$0xff] %v630_v50  ;;  %v631_v44 = vsel %vm503_vm12, %v439_v45, %v567_v42  ;;  %v371_v3 = vmul.f32 %v1471_v46, %v1248_v4 }
 0x146   :  { %v372_v58 = vmul.f32 %v1471_v46, %v1254_v21  ;;  %v373_v38 = vmul.f32 %v1471_v46, %v1260_v8  ;;  %695 = vst [vmem:[%s1865_s3 + $0x60] sm:$0xff] %v631_v44  ;;  %vm504_vm13 = vcmp.ge.f32.partialorder %v440_v56, 0.0  ;;  %v568_v59 = vmul.f32 0.2, %v440_v56  ;;  %v1946_v44 = vld [vmem:[#allocation22_spill] sm:$0xff] }
 0x147   :  { %vm505_vm14 = vcmp.ge.f32.partialorder %v441_v36, 0.0  ;;  %v569_v55 = vmul.f32 0.2, %v441_v36  ;;  %v442_v9 = vadd.f32 %v1476_v63, %v371_v3  ;;  %v374_v21 = vmul.f32 %v1471_v46, %v1266_v10 }
 0x148   :  { %v443_v17 = vadd.f32 %v1476_v63, %v372_v58  ;;  %v444_v4 = vadd.f32 %v1476_v63, %v373_v38  ;;  %v632_v41 = vsel %vm504_vm13, %v440_v56, %v568_v59  ;;  %v375_v8 = vmul.f32 %v1471_v46, %v1272_v12  ;;  %v1945_v56 = vld [vmem:[#allocation21_spill] sm:$0xff] }
 0x149   :  { %v633_v60 = vsel %vm505_vm14, %v441_v36, %v569_v55  ;;  %v376_v48 = vmul.f32 %v1471_v46, %v1278_v14  ;;  %696 = vst [vmem:[%s1865_s3 + $0x68] sm:$0xff] %v632_v41  ;;  %vm506_vm15 = vcmp.ge.f32.partialorder %v442_v9, 0.0  ;;  %v570_v49 = vmul.f32 0.2, %v442_v9 }
 0x14a   :  { %697 = vst [vmem:[%s1865_s3 + $0x70] sm:$0xff] %v633_v60  ;;  %vm507_vm0 = vcmp.ge.f32.partialorder %v443_v17, 0.0  ;;  %v571_v10 = vmul.f32 0.2, %v443_v17  ;;  %vm508_vm1 = vcmp.ge.f32.partialorder %v444_v4, 0.0  ;;  %v445_v52 = vadd.f32 %v1476_v63, %v374_v21 }
 0x14b   :  { %v572_v47 = vmul.f32 0.2, %v444_v4  ;;  %v446_v12 = vadd.f32 %v1476_v63, %v375_v8  ;;  %v634_v53 = vsel %vm506_vm15, %v442_v9, %v570_v49  ;;  %v447_v35 = vadd.f32 %v1476_v63, %v376_v48 }
 0x14c   :  { %v635_v14 = vsel %vm507_vm0, %v443_v17, %v571_v10  ;;  %v377_v43 = vmul.f32 %v1471_v46, %v1284_v16  ;;  %698 = vst [vmem:[%s1865_s3 + $0x78] sm:$0xff] %v634_v53  ;;  %vm509_vm2 = vcmp.ge.f32.partialorder %v445_v52, 0.0  ;;  %v573_v57 = vmul.f32 0.2, %v445_v52  ;;  %v1947_v10 = vld [vmem:[#allocation23_spill] sm:$0xff] }
 0x14d   :  { %699 = vst [vmem:[%s1865_s3 + $0x80] sm:$0xff] %v635_v14  ;;  %v636_v39 = vsel %vm508_vm1, %v444_v4, %v572_v47  ;;  %vm510_vm3 = vcmp.ge.f32.partialorder %v446_v12, 0.0  ;;  %v574_v6 = vmul.f32 0.2, %v446_v12  ;;  %vm511_vm4 = vcmp.ge.f32.partialorder %v447_v35, 0.0 }
 0x14e   :  { %700 = vst [vmem:[%s1865_s3 + $0x88] sm:$0xff] %v636_v39  ;;  %v575_v45 = vmul.f32 0.2, %v447_v35  ;;  %v448_v16 = vadd.f32 %v1476_v63, %v377_v43  ;;  %v637_v54 = vsel %vm509_vm2, %v445_v52, %v573_v57  ;;  %v378_v0 = vmul.f32 %v1471_v46, %v1290_v18  ;;  %v1948_v52 = vld [vmem:[#allocation24_spill] sm:$0xff]  ;;  %v1950_v39 = vld [vmem:[#allocation2_spill] sm:$0xff] }
 0x14f   :  { %v379_v2 = vmul.f32 %v1471_v46, %v1296_v20  ;;  %v380_v40 = vmul.f32 %v1471_v46, %v1302_v22  ;;  %701 = vst [vmem:[%s1865_s3 + $0x90] sm:$0xff] %v637_v54  ;;  %v638_v31 = vsel %vm510_vm3, %v446_v12, %v574_v6  ;;  %v381_v42 = vmul.f32 %v1471_v46, %v1308_v24  ;;  %v1951_v54 = vld [vmem:[#allocation3_spill] sm:$0xff] }
 0x150   :  { %v639_v5 = vsel %vm511_vm4, %v447_v35, %v575_v45  ;;  %vm512_vm5 = vcmp.ge.f32.partialorder %v448_v16, 0.0  ;;  %v576_v37 = vmul.f32 0.2, %v448_v16  ;;  %702 = vst [vmem:[%s1865_s3 + $0x98] sm:$0xff] %v638_v31  ;;  %v449_v18 = vadd.f32 %v1476_v63, %v378_v0  ;;  %v1949_v35 = vld [vmem:[#allocation25_spill] sm:$0xff]  ;;  %v1952_v31 = vld [vmem:[#allocation4_spill] sm:$0xff] }
 0x151   :  { %703 = vst [vmem:[%s1865_s3 + $0xa0] sm:$0xff] %v639_v5  ;;  %v450_v20 = vadd.f32 %v1476_v63, %v379_v2  ;;  %v451_v22 = vadd.f32 %v1476_v63, %v380_v40  ;;  %v382_v50 = vmul.f32 %v1471_v46, %v1314_v26  ;;  %v383_v36 = vmul.f32 %v1471_v46, %v1945_v56 }
 0x152   :  { %v640_v1 = vsel %vm512_vm5, %v448_v16, %v576_v37  ;;  %v384_v3 = vmul.f32 %v1471_v46, %v1946_v44  ;;  %vm513_vm6 = vcmp.ge.f32.partialorder %v449_v18, 0.0  ;;  %v577_v58 = vmul.f32 0.2, %v449_v18  ;;  %v1953_v37 = vld [vmem:[#allocation5_spill] sm:$0xff] }
 0x153   :  { %704 = vst [vmem:[%s1865_s3 + $0xa8] sm:$0xff] %v640_v1  ;;  %vm514_vm7 = vcmp.ge.f32.partialorder %v450_v20, 0.0  ;;  %v578_v38 = vmul.f32 0.2, %v450_v20  ;;  %vm515_vm8 = vcmp.ge.f32.partialorder %v451_v22, 0.0  ;;  %v452_v59 = vadd.f32 %v1476_v63, %v381_v42 }
 0x154   :  { %v579_v24 = vmul.f32 0.2, %v451_v22  ;;  %v453_v26 = vadd.f32 %v1476_v63, %v382_v50  ;;  %v641_v55 = vsel %vm513_vm6, %v449_v18, %v577_v58  ;;  %v454_v17 = vadd.f32 %v1476_v63, %v383_v36 }
 0x155   :  { %v642_v9 = vsel %vm514_vm7, %v450_v20, %v578_v38  ;;  %v455_v4 = vadd.f32 %v1476_v63, %v384_v3  ;;  %705 = vst [vmem:[%s1865_s3 + $0xb0] sm:$0xff] %v641_v55  ;;  %vm516_vm9 = vcmp.ge.f32.partialorder %v452_v59, 0.0  ;;  %v580_v41 = vmul.f32 0.2, %v452_v59 }
 0x156   :  { %706 = vst [vmem:[%s1865_s3 + $0xb8] sm:$0xff] %v642_v9  ;;  %v643_v21 = vsel %vm515_vm8, %v451_v22, %v579_v24  ;;  %vm517_vm10 = vcmp.ge.f32.partialorder %v453_v26, 0.0  ;;  %v581_v60 = vmul.f32 0.2, %v453_v26  ;;  %vm518_vm11 = vcmp.ge.f32.partialorder %v454_v17, 0.0  ;;  %v1954_v24 = vld [vmem:[#allocation6_spill] sm:$0xff] }
 0x157   :  { %707 = vst [vmem:[%s1865_s3 + $0xc0] sm:$0xff] %v643_v21  ;;  %v582_v8 = vmul.f32 0.2, %v454_v17  ;;  %vm519_vm12 = vcmp.ge.f32.partialorder %v455_v4, 0.0  ;;  %v644_v48 = vsel %vm516_vm9, %v452_v59, %v580_v41  ;;  %v583_v49 = vmul.f32 0.2, %v455_v4 }
 0x158   :  { %v385_v47 = vmul.f32 %v1471_v46, %v1947_v10  ;;  %v386_v12 = vmul.f32 %v1471_v46, %v1948_v52  ;;  %708 = vst [vmem:[%s1865_s3 + $0xc8] sm:$0xff] %v644_v48  ;;  %v645_v53 = vsel %vm517_vm10, %v453_v26, %v581_v60  ;;  %v387_v43 = vmul.f32 %v1471_v46, %v1949_v35 }
 0x159   :  { %v646_v14 = vsel %vm518_vm11, %v454_v17, %v582_v8  ;;  %v388_v57 = vmul.f32 %v1471_v46, %v1950_v39  ;;  %709 = vst [vmem:[%s1865_s3 + $0xd0] sm:$0xff] %v645_v53  ;;  %v647_v6 = vsel %vm519_vm12, %v455_v4, %v583_v49  ;;  %v389_v0 = vmul.f32 %v1471_v46, %v1951_v54  ;;  %v1955_v4 = vld [vmem:[#allocation7_spill] sm:$0xff]  ;;  %v1956_v8 = vld [vmem:[#allocation8_spill] sm:$0xff]  ;;  %v1957_v49 = vld [vmem:[#allocation9_spill] sm:$0xff] }
 0x15a   :  { %710 = vst [vmem:[%s1865_s3 + $0xd8] sm:$0xff] %v646_v14  ;;  %v456_v45 = vadd.f32 %v1476_v63, %v385_v47  ;;  %v457_v16 = vadd.f32 %v1476_v63, %v386_v12  ;;  %711 = vst [vmem:[%s1865_s3 + $0xe0] sm:$0xff] %v647_v6  ;;  %v458_v2 = vadd.f32 %v1476_v63, %v387_v43  ;;  %v1958_v43 = vld [vmem:[#allocation10_spill] sm:$0xff] }
 0x15b   :  { %v459_v40 = vadd.f32 %v1476_v63, %v388_v57  ;;  %v390_v5 = vmul.f32 %v1471_v46, %v1952_v31  ;;  %v391_v18 = vmul.f32 %v1471_v46, %v1953_v37  ;;  %v460_v36 = vadd.f32 %v1476_v63, %v389_v0 }
 0x15c   :  { %vm520_vm13 = vcmp.ge.f32.partialorder %v456_v45, 0.0  ;;  %v584_v20 = vmul.f32 0.2, %v456_v45  ;;  %vm521_vm14 = vcmp.ge.f32.partialorder %v457_v16, 0.0  ;;  %v585_v22 = vmul.f32 0.2, %v457_v16 }
 0x15d   :  { %vm522_vm15 = vcmp.ge.f32.partialorder %v458_v2, 0.0  ;;  %v586_v42 = vmul.f32 0.2, %v458_v2  ;;  %vm523_vm0 = vcmp.ge.f32.partialorder %v459_v40, 0.0  ;;  %v587_v1 = vmul.f32 0.2, %v459_v40 }
 0x15e   :  { %v648_v50 = vsel %vm520_vm13, %v456_v45, %v584_v20  ;;  %v649_v56 = vsel %vm521_vm14, %v457_v16, %v585_v22  ;;  %v461_v44 = vadd.f32 %v1476_v63, %v390_v5  ;;  %v462_v38 = vadd.f32 %v1476_v63, %v391_v18 }
 0x15f   :  { %712 = vst [vmem:[%s1865_s3 + $0xe8] sm:$0xff] %v648_v50  ;;  %713 = vst [vmem:[%s1865_s3 + $0xf0] sm:$0xff] %v649_v56  ;;  %v650_v3 = vsel %vm522_vm15, %v458_v2, %v586_v42  ;;  %v651_v58 = vsel %vm523_vm0, %v459_v40, %v587_v1  ;;  %v392_v59 = vmul.f32 %v1471_v46, %v1954_v24  ;;  %vm524_vm1 = vcmp.ge.f32.partialorder %v460_v36, 0.0 }
 0x160   :  { %714 = vst [vmem:[%s1865_s3 + $0xf8] sm:$0xff] %v650_v3  ;;  %715 = vst [vmem:[%s1865_s3 + $0x100] sm:$0xff] %v651_v58  ;;  %v588_v26 = vmul.f32 0.2, %v460_v36  ;;  %vm525_vm2 = vcmp.ge.f32.partialorder %v461_v44, 0.0  ;;  %vm526_vm3 = vcmp.ge.f32.partialorder %v462_v38, 0.0  ;;  %v393_v21 = vmul.f32 %v1471_v46, %v1955_v4 }
 0x161   :  { %v589_v55 = vmul.f32 0.2, %v461_v44  ;;  %v590_v9 = vmul.f32 0.2, %v462_v38  ;;  %v463_v17 = vadd.f32 %v1476_v63, %v392_v59  ;;  %v394_v48 = vmul.f32 %v1471_v46, %v1956_v8 }
 0x162   :  { %v652_v41 = vsel %vm524_vm1, %v460_v36, %v588_v26  ;;  %v395_v10 = vmul.f32 %v1471_v46, %v1957_v49  ;;  %v464_v12 = vadd.f32 %v1476_v63, %v393_v21  ;;  %v396_v35 = vmul.f32 %v1471_v46, %v1398_v34 }
 0x163   :  { %v653_v60 = vsel %vm525_vm2, %v461_v44, %v589_v55  ;;  %716 = vst [vmem:[%s1865_s3 + $0x108] sm:$0xff] %v652_v41  ;;  %v654_v47 = vsel %vm526_vm3, %v462_v38, %v590_v9  ;;  %vm527_vm4 = vcmp.ge.f32.partialorder %v463_v17, 0.0  ;;  %v591_v52 = vmul.f32 0.2, %v463_v17 }
 0x164   :  { %717 = vst [vmem:[%s1865_s3 + $0x110] sm:$0xff] %v653_v60  ;;  %718 = vst [vmem:[%s1865_s3 + $0x118] sm:$0xff] %v654_v47  ;;  %v465_v53 = vadd.f32 %v1476_v63, %v394_v48  ;;  %v466_v14 = vadd.f32 %v1476_v63, %v395_v10  ;;  %v397_v39 = vmul.f32 %v1471_v46, %v1958_v43  ;;  %vm528_vm5 = vcmp.ge.f32.partialorder %v464_v12, 0.0 }
 0x165   :  { %v655_v57 = vsel %vm527_vm4, %v463_v17, %v591_v52  ;;  %v592_v6 = vmul.f32 0.2, %v464_v12  ;;  %v398_v45 = vmul.f32 %v1471_v46, %v1410_v28  ;;  %v467_v34 = vadd.f32 %v1476_v63, %v396_v35 }
 0x166   :  { %719 = vst [vmem:[%s1865_s3 + $0x120] sm:$0xff] %v655_v57  ;;  %vm529_vm6 = vcmp.ge.f32.partialorder %v465_v53, 0.0  ;;  %v593_v16 = vmul.f32 0.2, %v465_v53  ;;  %vm530_vm7 = vcmp.ge.f32.partialorder %v466_v14, 0.0  ;;  %v468_v2 = vadd.f32 %v1476_v63, %v397_v39 }
 0x167   :  { %v594_v54 = vmul.f32 0.2, %v466_v14  ;;  %v656_v0 = vsel %vm528_vm5, %v464_v12, %v592_v6  ;;  %v469_v40 = vadd.f32 %v1476_v63, %v398_v45  ;;  %v399_v5 = vmul.f32 %v1471_v46, %v1416_v30  ;;  %v1959_v45 = vld [vmem:[#allocation15_spill] sm:$0xff] }
 0x168   :  { %720 = vst [vmem:[%s1865_s3 + $0x128] sm:$0xff] %v656_v0  ;;  %v657_v28 = vsel %vm529_vm6, %v465_v53, %v593_v16  ;;  %v400_v37 = vmul.f32 %v1471_v46, %v1422_v32  ;;  %vm531_vm8 = vcmp.ge.f32.partialorder %v467_v34, 0.0  ;;  %v595_v18 = vmul.f32 0.2, %v467_v34 }
 0x169   :  { %v658_v31 = vsel %vm530_vm7, %v466_v14, %v594_v54  ;;  %721 = vst [vmem:[%s1865_s3 + $0x130] sm:$0xff] %v657_v28  ;;  %vm532_vm9 = vcmp.ge.f32.partialorder %v468_v2, 0.0  ;;  %v596_v20 = vmul.f32 0.2, %v468_v2  ;;  %vm533_vm10 = vcmp.ge.f32.partialorder %v469_v40, 0.0  ;;  %v1960_v54 = vld [vmem:[#allocation16_spill] sm:$0xff] }
 0x16a   :  { %722 = vst [vmem:[%s1865_s3 + $0x138] sm:$0xff] %v658_v31  ;;  %v597_v22 = vmul.f32 0.2, %v469_v40  ;;  %v470_v42 = vadd.f32 %v1476_v63, %v399_v5  ;;  %v471_v30 = vadd.f32 %v1476_v63, %v400_v37  ;;  %v659_v1 = vsel %vm531_vm8, %v467_v34, %v595_v18  ;;  %v1961_v34 = vld [vmem:[#allocation17_spill] sm:$0xff] }
 0x16b   :  { %v660_v32 = vsel %vm532_vm9, %v468_v2, %v596_v20  ;;  %v401_v50 = vmul.f32 %v1471_v46, %v1104_v61  ;;  %v402_v56 = vmul.f32 %v1471_v46, %v1107_v62  ;;  %723 = vst [vmem:[%s1865_s3 + $0x140] sm:$0xff] %v659_v1  ;;  %v403_v58 = vmul.f32 %v1471_v46, %v1110_v13 }
 0x16c   :  { %724 = vst [vmem:[%s1865_s3 + $0x148] sm:$0xff] %v660_v32  ;;  %v661_v36 = vsel %vm533_vm10, %v469_v40, %v597_v22  ;;  %vm534_vm11 = vcmp.ge.f32.partialorder %v470_v42, 0.0  ;;  %v598_v44 = vmul.f32 0.2, %v470_v42  ;;  %vm535_vm12 = vcmp.ge.f32.partialorder %v471_v30, 0.0  ;;  %v1962_v22 = vld [vmem:[#allocation18_spill] sm:$0xff] }
 0x16d   :  { %725 = vst [vmem:[%s1865_s3 + $0x150] sm:$0xff] %v661_v36  ;;  %v599_v61 = vmul.f32 0.2, %v471_v30  ;;  %v472_v3 = vadd.f32 %v1476_v63, %v401_v50  ;;  %v473_v62 = vadd.f32 %v1476_v63, %v402_v56  ;;  %v404_v24 = vmul.f32 %v1471_v46, %v1113_v29 }
 0x16e   :  { %v662_v38 = vsel %vm534_vm11, %v470_v42, %v598_v44  ;;  %v405_v59 = vmul.f32 %v1471_v46, %v1116_v23  ;;  %v406_v26 = vmul.f32 %v1471_v46, %v1119_v15  ;;  %v474_v29 = vadd.f32 %v1476_v63, %v403_v58 }
 0x16f   :  { %726 = vst [vmem:[%s1865_s3 + $0x158] sm:$0xff] %v662_v38  ;;  %v663_v55 = vsel %vm535_vm12, %v471_v30, %v599_v61  ;;  %vm536_vm13 = vcmp.ge.f32.partialorder %v472_v3, 0.0  ;;  %v600_v9 = vmul.f32 0.2, %v472_v3  ;;  %vm537_vm14 = vcmp.ge.f32.partialorder %v473_v62, 0.0  ;;  %v1963_v30 = vld [vmem:[#allocation19_spill] sm:$0xff] }
 0x170   :  { %727 = vst [vmem:[%s1865_s3 + $0x160] sm:$0xff] %v663_v55  ;;  %v601_v13 = vmul.f32 0.2, %v473_v62  ;;  %v475_v23 = vadd.f32 %v1476_v63, %v404_v24  ;;  %v476_v17 = vadd.f32 %v1476_v63, %v405_v59  ;;  %v477_v4 = vadd.f32 %v1476_v63, %v406_v26 }
 0x171   :  { %v664_v15 = vsel %vm536_vm13, %v472_v3, %v600_v9  ;;  %v407_v21 = vmul.f32 %v1471_v46, %v1122_v7  ;;  %v408_v41 = vmul.f32 %v1471_v46, %v1125_v11  ;;  %vm538_vm15 = vcmp.ge.f32.partialorder %v474_v29, 0.0 }
 0x172   :  { %728 = vst [vmem:[%s1865_s3 + $0x168] sm:$0xff] %v664_v15  ;;  %v665_v60 = vsel %vm537_vm14, %v473_v62, %v601_v13  ;;  %v602_v8 = vmul.f32 0.2, %v474_v29  ;;  %vm539_vm0 = vcmp.ge.f32.partialorder %v475_v23, 0.0  ;;  %v603_v48 = vmul.f32 0.2, %v475_v23 }
 0x173   :  { %729 = vst [vmem:[%s1865_s3 + $0x170] sm:$0xff] %v665_v60  ;;  %vm540_vm1 = vcmp.ge.f32.partialorder %v476_v17, 0.0  ;;  %v604_v49 = vmul.f32 0.2, %v476_v17  ;;  %vm541_vm2 = vcmp.ge.f32.partialorder %v477_v4, 0.0  ;;  %v478_v11 = vadd.f32 %v1476_v63, %v407_v21  ;;  %v1964_v13 = vld [vmem:[#allocation20_spill] sm:$0xff] }
 0x174   :  { %v666_v7 = vsel %vm538_vm15, %v474_v29, %v602_v8  ;;  %v605_v10 = vmul.f32 0.2, %v477_v4  ;;  %v479_v47 = vadd.f32 %v1476_v63, %v408_v41  ;;  %v667_v52 = vsel %vm539_vm0, %v475_v23, %v603_v48 }
 0x175   :  { %730 = vst [vmem:[%s1865_s3 + $0x178] sm:$0xff] %v666_v7  ;;  %v668_v12 = vsel %vm540_vm1, %v476_v17, %v604_v49  ;;  %v409_v53 = vmul.f32 %v1471_v46, %v1128_v19  ;;  %v410_v14 = vmul.f32 %v1471_v46, %v1131_v27  ;;  %731 = vst [vmem:[%s1865_s3 + $0x180] sm:$0xff] %v667_v52  ;;  %vm542_vm3 = vcmp.ge.f32.partialorder %v478_v11, 0.0 }
 0x176   :  { %732 = vst [vmem:[%s1865_s3 + $0x188] sm:$0xff] %v668_v12  ;;  %v669_v35 = vsel %vm541_vm2, %v477_v4, %v605_v10  ;;  %v606_v43 = vmul.f32 0.2, %v478_v11  ;;  %vm543_vm4 = vcmp.ge.f32.partialorder %v479_v47, 0.0  ;;  %v607_v19 = vmul.f32 0.2, %v479_v47 }
 0x177   :  { %733 = vst [vmem:[%s1865_s3 + $0x190] sm:$0xff] %v669_v35  ;;  %v480_v39 = vadd.f32 %v1476_v63, %v409_v53  ;;  %v481_v27 = vadd.f32 %v1476_v63, %v410_v14  ;;  %v411_v57 = vmul.f32 %v1471_v46, %v1134_v51  ;;  %v412_v16 = vmul.f32 %v1471_v46, %v1959_v45 }
 0x178   :  { %v670_v6 = vsel %vm542_vm3, %v478_v11, %v606_v43  ;;  %v413_v0 = vmul.f32 %v1471_v46, %v1960_v54  ;;  %v414_v2 = vmul.f32 %v1471_v46, %v1961_v34  ;;  %v671_v40 = vsel %vm543_vm4, %v479_v47, %v607_v19 }
 0x179   :  { %734 = vst [vmem:[%s1865_s3 + $0x198] sm:$0xff] %v670_v6  ;;  %vm544_vm5 = vcmp.ge.f32.partialorder %v480_v39, 0.0  ;;  %v608_v28 = vmul.f32 0.2, %v480_v39  ;;  %vm545_vm6 = vcmp.ge.f32.partialorder %v481_v27, 0.0  ;;  %735 = vst [vmem:[%s1865_s3 + $0x1a0] sm:$0xff] %v671_v40  ;;  %v482_v31 = vadd.f32 %v1476_v63, %v411_v57 }
 0x17a   :  { %v609_v51 = vmul.f32 0.2, %v481_v27  ;;  %v483_v5 = vadd.f32 %v1476_v63, %v412_v16  ;;  %v484_v37 = vadd.f32 %v1476_v63, %v413_v0  ;;  %v485_v20 = vadd.f32 %v1476_v63, %v414_v2 }
 0x17b   :  { %v672_v18 = vsel %vm544_vm5, %v480_v39, %v608_v28  ;;  %v415_v42 = vmul.f32 %v1471_v46, %v1962_v22  ;;  %v416_v1 = vmul.f32 %v1471_v46, %v1963_v30  ;;  %vm546_vm7 = vcmp.ge.f32.partialorder %v482_v31, 0.0 }
 0x17c   :  { %736 = vst [vmem:[%s1865_s3 + $0x1a8] sm:$0xff] %v672_v18  ;;  %v673_v32 = vsel %vm545_vm6, %v481_v27, %v609_v51  ;;  %v610_v50 = vmul.f32 0.2, %v482_v31  ;;  %vm547_vm8 = vcmp.ge.f32.partialorder %v483_v5, 0.0  ;;  %v611_v56 = vmul.f32 0.2, %v483_v5 }
 0x17d   :  { %737 = vst [vmem:[%s1865_s3 + $0x1b0] sm:$0xff] %v673_v32  ;;  %vm548_vm9 = vcmp.ge.f32.partialorder %v484_v37, 0.0  ;;  %v612_v36 = vmul.f32 0.2, %v484_v37  ;;  %vm549_vm10 = vcmp.ge.f32.partialorder %v485_v20, 0.0  ;;  %v486_v3 = vadd.f32 %v1476_v63, %v415_v42 }
 0x17e   :  { %v674_v44 = vsel %vm546_vm7, %v482_v31, %v610_v50  ;;  %v613_v61 = vmul.f32 0.2, %v485_v20  ;;  %v487_v62 = vadd.f32 %v1476_v63, %v416_v1  ;;  %v675_v58 = vsel %vm547_vm8, %v483_v5, %v611_v56 }
 0x17f   :  { %738 = vst [vmem:[%s1865_s3 + $0x1b8] sm:$0xff] %v674_v44  ;;  %v676_v38 = vsel %vm548_vm9, %v484_v37, %v612_v36  ;;  %v417_v24 = vmul.f32 %v1471_v46, %v1152_v25  ;;  %v418_v59 = vmul.f32 %v1471_v46, %v1155_v33  ;;  %739 = vst [vmem:[%s1865_s3 + $0x1c0] sm:$0xff] %v675_v58  ;;  %vm550_vm11 = vcmp.ge.f32.partialorder %v486_v3, 0.0 }
 0x180   :  { %740 = vst [vmem:[%s1865_s3 + $0x1c8] sm:$0xff] %v676_v38  ;;  %v677_v26 = vsel %vm549_vm10, %v485_v20, %v613_v61  ;;  %v614_v55 = vmul.f32 0.2, %v486_v3  ;;  %vm551_vm12 = vcmp.ge.f32.partialorder %v487_v62, 0.0  ;;  %v615_v25 = vmul.f32 0.2, %v487_v62 }
 0x181   :  { %741 = vst [vmem:[%s1865_s3 + $0x1d0] sm:$0xff] %v677_v26  ;;  %v488_v9 = vadd.f32 %v1476_v63, %v417_v24  ;;  %v489_v33 = vadd.f32 %v1476_v63, %v418_v59  ;;  %v419_v29 = vmul.f32 %v1471_v46, %v1964_v13 }
 0x182   :  { %v678_v23 = vsel %vm550_vm11, %v486_v3, %v614_v55  ;;  %v679_v17 = vsel %vm551_vm12, %v487_v62, %v615_v25 }
 0x183   :  { %742 = vst [vmem:[%s1865_s3 + $0x1d8] sm:$0xff] %v678_v23  ;;  %vm552_vm13 = vcmp.ge.f32.partialorder %v488_v9, 0.0  ;;  %v616_v15 = vmul.f32 0.2, %v488_v9  ;;  %vm553_vm14 = vcmp.ge.f32.partialorder %v489_v33, 0.0  ;;  %743 = vst [vmem:[%s1865_s3 + $0x1e0] sm:$0xff] %v679_v17  ;;  %v490_v21 = vadd.f32 %v1476_v63, %v419_v29 }
 0x184   :  { %v617_v4 = vmul.f32 0.2, %v489_v33 }
 0x185   :  { %v680_v41 = vsel %vm552_vm13, %v488_v9, %v616_v15  ;;  %vm554_vm15 = vcmp.ge.f32.partialorder %v490_v21, 0.0  ;;  %v618_v60 = vmul.f32 0.2, %v490_v21 }
 0x186   :  { %744 = vst [vmem:[%s1865_s3 + $0x1e8] sm:$0xff] %v680_v41  ;;  %v681_v46 = vsel %vm553_vm14, %v489_v33, %v617_v4 }
 0x187   :  { %745 = vst [vmem:[%s1865_s3 + $0x1f0] sm:$0xff] %v681_v46  ;;  %v682_v8 = vsel %vm554_vm15, %v490_v21, %v618_v60 }
 0x188   :  { %746 = vst [vmem:[%s1865_s3 + $0x1f8] sm:$0xff] %v682_v8 }

// kernel: discriminator_forward.10
= control target key start
LH: loop header
LB: loop body
LE: loop exit
PB: predicated region body
PF: predicated region fallthrough
CT: control target
= control target key end

     0   :  { %s5015_s9 = smov 0   ;;  %s5017_s10 = smov 0   ;;  %s6315_s0 = inlined_call_operand.vmem [shape: bf16[128,2048], index: 0, kind: input, shape index: {}]   ;;  %s6316_s1 = inlined_call_operand.vmem [shape: bf16[2048,256], index: 1, kind: input, shape index: {}]   ;;  %s6317_s2 = inlined_call_operand.vmem [shape: f32[128,256], index: 2, kind: output, shape index: {}]  }
   0x1   :  { %s5019_s11 = smov 0   ;;  %s5021_s12 = smov 0  }
   0x2   :  { %s5023_s13 = smov 0  }
   0x3 LB: > { %s21_s14 = sadd.s32 1, %s4994_s12  ;;  %s4010_s15 = sadd.s32 4294967295, %s4998_s13   ;;  %s4998_s13 = sphi %s5023_s13, %s12_s13   ;;  %s4994_s12 = sphi %s5021_s12, %s6322_s12   ;;  %s4990_s11 = sphi %s5019_s11, %s6321_s11   ;;  %s4986_s10 = sphi %s5017_s10, %s6320_s10   ;;  %s4982_s9 = sphi %s5015_s9, %s6319_s9  }
   0x4   : > { %p22_p0 = scmp.ge.s32.totalorder %s21_s14, 2  ;;  %p64_p1 = scmp.ne.s32.totalorder %s4986_s10, %s4982_s9 }
   0x5   : > { %p65_p2 = scmp.eq.s32.totalorder %s4998_s13, 0  ;;  %p96_p4 = scmp.eq.s32.totalorder %s4010_s15, 1 }
   0x6   : > { %s6324_s14 = smov (%p22_p0, %s21_s14), 0  ;;  %s57_s17 = sadd.s32 1, %s4986_s10 }
   0x7   : > { %p66_p3 = por %p65_p2, %p64_p1  ;;  %s54_s16 = ssub.s32 %s4994_s12, %s6324_s14 }
   0x8   : > { %p55_p5 = scmp.eq.s32.totalorder %s54_s16, 0  ;;  %p5050_p6 = por %p96_p4, %p64_p1 }
   0x9   : > { %p4014_p7 = scmp.ge.s32.totalorder %s4998_s13, 2 }
   0xa   : > { %s5055_s19 = scalar_select %p55_p5, %s4986_s10, %s57_s17  }
   0xb   : > { %128 = sbr.rel (%p4014_p7) target bundleno = 192 (0xc0), region = 20 }
  0x12   : > { %131 = sbr.rel (!%p66_p3) target bundleno = 192 (0xc0), region = 24  ;;  %s133_s20 = sand.u32 (%p66_p3), 1, %s4986_s10  }
  0x13   : > { %s4016_s21 = sshll.u32 (%p66_p3), %s4994_s12, 2  ;;  %s4015_s22 = sshll.u32 (%p66_p3), %s133_s20, 10 }
  0x14   : > { %s5063_s25 = scalar_lea.vmem (%p66_p3), %s6316_s1, %s4016_s21  ;;  %s5067_s26 = scalar_lea.vmem (%p66_p3), [#allocation2], %s4015_s22 }
  0x15   : > { %v153_v0 = vld [vmem:[%s5063_s25] sm:$0xf] (%p66_p3)  ;;  %v155_v1 = vld [vmem:[%s5063_s25 + $0x8] sm:$0xf] (%p66_p3)  ;;  %v157_v2 = vld [vmem:[%s5063_s25 + $0x10] sm:$0xf] (%p66_p3) }
  0x16   : > { %154 = vst [vmem:[%s5067_s26] sm:$0xf] (%p66_p3), %v153_v0  ;;  %156 = vst [vmem:[%s5067_s26 + $0x4] sm:$0xf] (%p66_p3), %v155_v1  ;;  %v159_v3 = vld [vmem:[%s5063_s25 + $0x18] sm:$0xf] (%p66_p3) }
  0x17   : > { %v161_v4 = vld [vmem:[%s5063_s25 + $0x20] sm:$0xf] (%p66_p3)  ;;  %158 = vst [vmem:[%s5067_s26 + $0x8] sm:$0xf] (%p66_p3), %v157_v2  ;;  %160 = vst [vmem:[%s5067_s26 + $0xc] sm:$0xf] (%p66_p3), %v159_v3 }
  0x18   : > { %162 = vst [vmem:[%s5067_s26 + $0x10] sm:$0xf] (%p66_p3), %v161_v4  ;;  %v163_v5 = vld [vmem:[%s5063_s25 + $0x28] sm:$0xf] (%p66_p3)  ;;  %v165_v6 = vld [vmem:[%s5063_s25 + $0x30] sm:$0xf] (%p66_p3) }
  0x19   : > { %v167_v7 = vld [vmem:[%s5063_s25 + $0x38] sm:$0xf]  ;;  %164 = vst [vmem:[%s5067_s26 + $0x14] sm:$0xf] %v163_v5  ;;  %166 = vst [vmem:[%s5067_s26 + $0x18] sm:$0xf] %v165_v6 }
  0x1a   : > { %168 = vst [vmem:[%s5067_s26 + $0x1c] sm:$0xf] %v167_v7  ;;  %v169_v8 = vld [vmem:[%s5063_s25 + $0x40] sm:$0xf]  ;;  %v171_v9 = vld [vmem:[%s5063_s25 + $0x48] sm:$0xf] }
  0x1b   : > { %v173_v10 = vld [vmem:[%s5063_s25 + $0x50] sm:$0xf]  ;;  %170 = vst [vmem:[%s5067_s26 + $0x20] sm:$0xf] %v169_v8  ;;  %172 = vst [vmem:[%s5067_s26 + $0x24] sm:$0xf] %v171_v9 }
  0x1c   : > { %174 = vst [vmem:[%s5067_s26 + $0x28] sm:$0xf] %v173_v10  ;;  %v175_v11 = vld [vmem:[%s5063_s25 + $0x58] sm:$0xf]  ;;  %v177_v12 = vld [vmem:[%s5063_s25 + $0x60] sm:$0xf] }
  0x1d   : > { %v179_v13 = vld [vmem:[%s5063_s25 + $0x68] sm:$0xf]  ;;  %176 = vst [vmem:[%s5067_s26 + $0x2c] sm:$0xf] %v175_v11  ;;  %178 = vst [vmem:[%s5067_s26 + $0x30] sm:$0xf] %v177_v12 }
  0x1e   : > { %180 = vst [vmem:[%s5067_s26 + $0x34] sm:$0xf] %v179_v13  ;;  %v181_v14 = vld [vmem:[%s5063_s25 + $0x70] sm:$0xf]  ;;  %v183_v15 = vld [vmem:[%s5063_s25 + $0x78] sm:$0xf] }
  0x1f   : > { %v185_v16 = vld [vmem:[%s5063_s25 + $0x80] sm:$0xf]  ;;  %182 = vst [vmem:[%s5067_s26 + $0x38] sm:$0xf] %v181_v14  ;;  %184 = vst [vmem:[%s5067_s26 + $0x3c] sm:$0xf] %v183_v15 }
  0x20   : > { %186 = vst [vmem:[%s5067_s26 + $0x40] sm:$0xf] %v185_v16  ;;  %v187_v17 = vld [vmem:[%s5063_s25 + $0x88] sm:$0xf]  ;;  %v189_v18 = vld [vmem:[%s5063_s25 + $0x90] sm:$0xf] }
  0x21   : > { %v191_v19 = vld [vmem:[%s5063_s25 + $0x98] sm:$0xf]  ;;  %188 = vst [vmem:[%s5067_s26 + $0x44] sm:$0xf] %v187_v17  ;;  %190 = vst [vmem:[%s5067_s26 + $0x48] sm:$0xf] %v189_v18 }
  0x22   : > { %192 = vst [vmem:[%s5067_s26 + $0x4c] sm:$0xf] %v191_v19  ;;  %v193_v20 = vld [vmem:[%s5063_s25 + $0xa0] sm:$0xf]  ;;  %v195_v21 = vld [vmem:[%s5063_s25 + $0xa8] sm:$0xf] }
  0x23   : > { %v197_v22 = vld [vmem:[%s5063_s25 + $0xb0] sm:$0xf]  ;;  %194 = vst [vmem:[%s5067_s26 + $0x50] sm:$0xf] %v193_v20  ;;  %196 = vst [vmem:[%s5067_s26 + $0x54] sm:$0xf] %v195_v21 }
  0x24   : > { %198 = vst [vmem:[%s5067_s26 + $0x58] sm:$0xf] %v197_v22  ;;  %v199_v23 = vld [vmem:[%s5063_s25 + $0xb8] sm:$0xf]  ;;  %v201_v24 = vld [vmem:[%s5063_s25 + $0xc0] sm:$0xf] }
  0x25   : > { %v203_v25 = vld [vmem:[%s5063_s25 + $0xc8] sm:$0xf]  ;;  %200 = vst [vmem:[%s5067_s26 + $0x5c] sm:$0xf] %v199_v23  ;;  %202 = vst [vmem:[%s5067_s26 + $0x60] sm:$0xf] %v201_v24 }
  0x26   : > { %204 = vst [vmem:[%s5067_s26 + $0x64] sm:$0xf] %v203_v25  ;;  %v205_v26 = vld [vmem:[%s5063_s25 + $0xd0] sm:$0xf]  ;;  %v207_v27 = vld [vmem:[%s5063_s25 + $0xd8] sm:$0xf] }
  0x27   : > { %v209_v28 = vld [vmem:[%s5063_s25 + $0xe0] sm:$0xf]  ;;  %206 = vst [vmem:[%s5067_s26 + $0x68] sm:$0xf] %v205_v26  ;;  %208 = vst [vmem:[%s5067_s26 + $0x6c] sm:$0xf] %v207_v27 }
  0x28   : > { %210 = vst [vmem:[%s5067_s26 + $0x70] sm:$0xf] %v209_v28  ;;  %v211_v29 = vld [vmem:[%s5063_s25 + $0xe8] sm:$0xf]  ;;  %v213_v30 = vld [vmem:[%s5063_s25 + $0xf0] sm:$0xf] }
  0x29   : > { %v215_v31 = vld [vmem:[%s5063_s25 + $0xf8] sm:$0xf]  ;;  %212 = vst [vmem:[%s5067_s26 + $0x74] sm:$0xf] %v211_v29  ;;  %214 = vst [vmem:[%s5067_s26 + $0x78] sm:$0xf] %v213_v30 }
  0x2a   : > { %216 = vst [vmem:[%s5067_s26 + $0x7c] sm:$0xf] %v215_v31  ;;  %v217_v32 = vld [vmem:[%s5063_s25 + $0x100] sm:$0xf]  ;;  %v219_v33 = vld [vmem:[%s5063_s25 + $0x108] sm:$0xf] }
  0x2b   : > { %v221_v34 = vld [vmem:[%s5063_s25 + $0x110] sm:$0xf]  ;;  %218 = vst [vmem:[%s5067_s26 + $0x80] sm:$0xf] %v217_v32  ;;  %220 = vst [vmem:[%s5067_s26 + $0x84] sm:$0xf] %v219_v33 }
  0x2c   : > { %222 = vst [vmem:[%s5067_s26 + $0x88] sm:$0xf] %v221_v34  ;;  %v223_v35 = vld [vmem:[%s5063_s25 + $0x118] sm:$0xf]  ;;  %v225_v36 = vld [vmem:[%s5063_s25 + $0x120] sm:$0xf] }
  0x2d   : > { %v227_v37 = vld [vmem:[%s5063_s25 + $0x128] sm:$0xf]  ;;  %224 = vst [vmem:[%s5067_s26 + $0x8c] sm:$0xf] %v223_v35  ;;  %226 = vst [vmem:[%s5067_s26 + $0x90] sm:$0xf] %v225_v36 }
  0x2e   : > { %228 = vst [vmem:[%s5067_s26 + $0x94] sm:$0xf] %v227_v37  ;;  %v229_v38 = vld [vmem:[%s5063_s25 + $0x130] sm:$0xf]  ;;  %v231_v39 = vld [vmem:[%s5063_s25 + $0x138] sm:$0xf] }
  0x2f   : > { %v233_v40 = vld [vmem:[%s5063_s25 + $0x140] sm:$0xf]  ;;  %230 = vst [vmem:[%s5067_s26 + $0x98] sm:$0xf] %v229_v38  ;;  %232 = vst [vmem:[%s5067_s26 + $0x9c] sm:$0xf] %v231_v39 }
  0x30   : > { %234 = vst [vmem:[%s5067_s26 + $0xa0] sm:$0xf] %v233_v40  ;;  %v235_v41 = vld [vmem:[%s5063_s25 + $0x148] sm:$0xf]  ;;  %v237_v42 = vld [vmem:[%s5063_s25 + $0x150] sm:$0xf] }
  0x31   : > { %v239_v43 = vld [vmem:[%s5063_s25 + $0x158] sm:$0xf]  ;;  %236 = vst [vmem:[%s5067_s26 + $0xa4] sm:$0xf] %v235_v41  ;;  %238 = vst [vmem:[%s5067_s26 + $0xa8] sm:$0xf] %v237_v42 }
  0x32   : > { %240 = vst [vmem:[%s5067_s26 + $0xac] sm:$0xf] %v239_v43  ;;  %v241_v44 = vld [vmem:[%s5063_s25 + $0x160] sm:$0xf]  ;;  %v243_v45 = vld [vmem:[%s5063_s25 + $0x168] sm:$0xf] }
  0x33   : > { %v245_v46 = vld [vmem:[%s5063_s25 + $0x170] sm:$0xf]  ;;  %242 = vst [vmem:[%s5067_s26 + $0xb0] sm:$0xf] %v241_v44  ;;  %244 = vst [vmem:[%s5067_s26 + $0xb4] sm:$0xf] %v243_v45 }
  0x34   : > { %246 = vst [vmem:[%s5067_s26 + $0xb8] sm:$0xf] %v245_v46  ;;  %v247_v47 = vld [vmem:[%s5063_s25 + $0x178] sm:$0xf]  ;;  %v249_v48 = vld [vmem:[%s5063_s25 + $0x180] sm:$0xf] }
  0x35   : > { %v251_v49 = vld [vmem:[%s5063_s25 + $0x188] sm:$0xf]  ;;  %248 = vst [vmem:[%s5067_s26 + $0xbc] sm:$0xf] %v247_v47  ;;  %250 = vst [vmem:[%s5067_s26 + $0xc0] sm:$0xf] %v249_v48 }
  0x36   : > { %252 = vst [vmem:[%s5067_s26 + $0xc4] sm:$0xf] %v251_v49  ;;  %v253_v50 = vld [vmem:[%s5063_s25 + $0x190] sm:$0xf]  ;;  %v255_v51 = vld [vmem:[%s5063_s25 + $0x198] sm:$0xf] }
  0x37   : > { %v257_v52 = vld [vmem:[%s5063_s25 + $0x1a0] sm:$0xf]  ;;  %254 = vst [vmem:[%s5067_s26 + $0xc8] sm:$0xf] %v253_v50  ;;  %256 = vst [vmem:[%s5067_s26 + $0xcc] sm:$0xf] %v255_v51 }
  0x38   : > { %258 = vst [vmem:[%s5067_s26 + $0xd0] sm:$0xf] %v257_v52  ;;  %v259_v53 = vld [vmem:[%s5063_s25 + $0x1a8] sm:$0xf]  ;;  %v261_v54 = vld [vmem:[%s5063_s25 + $0x1b0] sm:$0xf] }
  0x39   : > { %v263_v55 = vld [vmem:[%s5063_s25 + $0x1b8] sm:$0xf]  ;;  %260 = vst [vmem:[%s5067_s26 + $0xd4] sm:$0xf] %v259_v53  ;;  %262 = vst [vmem:[%s5067_s26 + $0xd8] sm:$0xf] %v261_v54 }
  0x3a   : > { %264 = vst [vmem:[%s5067_s26 + $0xdc] sm:$0xf] %v263_v55  ;;  %v265_v56 = vld [vmem:[%s5063_s25 + $0x1c0] sm:$0xf]  ;;  %v267_v57 = vld [vmem:[%s5063_s25 + $0x1c8] sm:$0xf] }
  0x3b   : > { %v269_v58 = vld [vmem:[%s5063_s25 + $0x1d0] sm:$0xf]  ;;  %266 = vst [vmem:[%s5067_s26 + $0xe0] sm:$0xf] %v265_v56  ;;  %268 = vst [vmem:[%s5067_s26 + $0xe4] sm:$0xf] %v267_v57 }
  0x3c   : > { %270 = vst [vmem:[%s5067_s26 + $0xe8] sm:$0xf] %v269_v58  ;;  %v271_v59 = vld [vmem:[%s5063_s25 + $0x1d8] sm:$0xf]  ;;  %v273_v60 = vld [vmem:[%s5063_s25 + $0x1e0] sm:$0xf] }
  0x3d   : > { %v275_v61 = vld [vmem:[%s5063_s25 + $0x1e8] sm:$0xf]  ;;  %272 = vst [vmem:[%s5067_s26 + $0xec] sm:$0xf] %v271_v59  ;;  %274 = vst [vmem:[%s5067_s26 + $0xf0] sm:$0xf] %v273_v60 }
  0x3e   : > { %276 = vst [vmem:[%s5067_s26 + $0xf4] sm:$0xf] %v275_v61  ;;  %v277_v62 = vld [vmem:[%s5063_s25 + $0x1f0] sm:$0xf]  ;;  %v279_v63 = vld [vmem:[%s5063_s25 + $0x1f8] sm:$0xf] }
  0x3f   : > { %v281_v0 = vld [vmem:[%s5063_s25 + $0x200] sm:$0xf]  ;;  %278 = vst [vmem:[%s5067_s26 + $0xf8] sm:$0xf] %v277_v62  ;;  %280 = vst [vmem:[%s5067_s26 + $0xfc] sm:$0xf] %v279_v63 }
  0x40   : > { %282 = vst [vmem:[%s5067_s26 + $0x100] sm:$0xf] %v281_v0  ;;  %v283_v1 = vld [vmem:[%s5063_s25 + $0x208] sm:$0xf]  ;;  %v285_v2 = vld [vmem:[%s5063_s25 + $0x210] sm:$0xf] }
  0x41   : > { %v287_v3 = vld [vmem:[%s5063_s25 + $0x218] sm:$0xf]  ;;  %284 = vst [vmem:[%s5067_s26 + $0x104] sm:$0xf] %v283_v1  ;;  %286 = vst [vmem:[%s5067_s26 + $0x108] sm:$0xf] %v285_v2 }
  0x42   : > { %288 = vst [vmem:[%s5067_s26 + $0x10c] sm:$0xf] %v287_v3  ;;  %v289_v4 = vld [vmem:[%s5063_s25 + $0x220] sm:$0xf]  ;;  %v291_v5 = vld [vmem:[%s5063_s25 + $0x228] sm:$0xf] }
  0x43   : > { %v293_v6 = vld [vmem:[%s5063_s25 + $0x230] sm:$0xf]  ;;  %290 = vst [vmem:[%s5067_s26 + $0x110] sm:$0xf] %v289_v4  ;;  %292 = vst [vmem:[%s5067_s26 + $0x114] sm:$0xf] %v291_v5 }
  0x44   : > { %294 = vst [vmem:[%s5067_s26 + $0x118] sm:$0xf] %v293_v6  ;;  %v295_v7 = vld [vmem:[%s5063_s25 + $0x238] sm:$0xf]  ;;  %v297_v8 = vld [vmem:[%s5063_s25 + $0x240] sm:$0xf] }
  0x45   : > { %v299_v9 = vld [vmem:[%s5063_s25 + $0x248] sm:$0xf]  ;;  %296 = vst [vmem:[%s5067_s26 + $0x11c] sm:$0xf] %v295_v7  ;;  %298 = vst [vmem:[%s5067_s26 + $0x120] sm:$0xf] %v297_v8 }
  0x46   : > { %300 = vst [vmem:[%s5067_s26 + $0x124] sm:$0xf] %v299_v9  ;;  %v301_v10 = vld [vmem:[%s5063_s25 + $0x250] sm:$0xf]  ;;  %v303_v11 = vld [vmem:[%s5063_s25 + $0x258] sm:$0xf] }
  0x47   : > { %v305_v12 = vld [vmem:[%s5063_s25 + $0x260] sm:$0xf]  ;;  %302 = vst [vmem:[%s5067_s26 + $0x128] sm:$0xf] %v301_v10  ;;  %304 = vst [vmem:[%s5067_s26 + $0x12c] sm:$0xf] %v303_v11 }
  0x48   : > { %306 = vst [vmem:[%s5067_s26 + $0x130] sm:$0xf] %v305_v12  ;;  %v307_v13 = vld [vmem:[%s5063_s25 + $0x268] sm:$0xf]  ;;  %v309_v14 = vld [vmem:[%s5063_s25 + $0x270] sm:$0xf] }
  0x49   : > { %v311_v15 = vld [vmem:[%s5063_s25 + $0x278] sm:$0xf]  ;;  %308 = vst [vmem:[%s5067_s26 + $0x134] sm:$0xf] %v307_v13  ;;  %310 = vst [vmem:[%s5067_s26 + $0x138] sm:$0xf] %v309_v14 }
  0x4a   : > { %312 = vst [vmem:[%s5067_s26 + $0x13c] sm:$0xf] %v311_v15  ;;  %v313_v16 = vld [vmem:[%s5063_s25 + $0x280] sm:$0xf]  ;;  %v315_v17 = vld [vmem:[%s5063_s25 + $0x288] sm:$0xf] }
  0x4b   : > { %v317_v18 = vld [vmem:[%s5063_s25 + $0x290] sm:$0xf]  ;;  %314 = vst [vmem:[%s5067_s26 + $0x140] sm:$0xf] %v313_v16  ;;  %316 = vst [vmem:[%s5067_s26 + $0x144] sm:$0xf] %v315_v17 }
  0x4c   : > { %318 = vst [vmem:[%s5067_s26 + $0x148] sm:$0xf] %v317_v18  ;;  %v319_v19 = vld [vmem:[%s5063_s25 + $0x298] sm:$0xf]  ;;  %v321_v20 = vld [vmem:[%s5063_s25 + $0x2a0] sm:$0xf] }
  0x4d   : > { %v323_v21 = vld [vmem:[%s5063_s25 + $0x2a8] sm:$0xf]  ;;  %320 = vst [vmem:[%s5067_s26 + $0x14c] sm:$0xf] %v319_v19  ;;  %322 = vst [vmem:[%s5067_s26 + $0x150] sm:$0xf] %v321_v20 }
  0x4e   : > { %324 = vst [vmem:[%s5067_s26 + $0x154] sm:$0xf] %v323_v21  ;;  %v325_v22 = vld [vmem:[%s5063_s25 + $0x2b0] sm:$0xf]  ;;  %v327_v23 = vld [vmem:[%s5063_s25 + $0x2b8] sm:$0xf] }
  0x4f   : > { %v329_v24 = vld [vmem:[%s5063_s25 + $0x2c0] sm:$0xf]  ;;  %326 = vst [vmem:[%s5067_s26 + $0x158] sm:$0xf] %v325_v22  ;;  %328 = vst [vmem:[%s5067_s26 + $0x15c] sm:$0xf] %v327_v23 }
  0x50   : > { %330 = vst [vmem:[%s5067_s26 + $0x160] sm:$0xf] %v329_v24  ;;  %v331_v25 = vld [vmem:[%s5063_s25 + $0x2c8] sm:$0xf]  ;;  %v333_v26 = vld [vmem:[%s5063_s25 + $0x2d0] sm:$0xf] }
  0x51   : > { %v335_v27 = vld [vmem:[%s5063_s25 + $0x2d8] sm:$0xf]  ;;  %332 = vst [vmem:[%s5067_s26 + $0x164] sm:$0xf] %v331_v25  ;;  %334 = vst [vmem:[%s5067_s26 + $0x168] sm:$0xf] %v333_v26 }
  0x52   : > { %336 = vst [vmem:[%s5067_s26 + $0x16c] sm:$0xf] %v335_v27  ;;  %v337_v28 = vld [vmem:[%s5063_s25 + $0x2e0] sm:$0xf]  ;;  %v339_v29 = vld [vmem:[%s5063_s25 + $0x2e8] sm:$0xf] }
  0x53   : > { %v341_v30 = vld [vmem:[%s5063_s25 + $0x2f0] sm:$0xf]  ;;  %338 = vst [vmem:[%s5067_s26 + $0x170] sm:$0xf] %v337_v28  ;;  %340 = vst [vmem:[%s5067_s26 + $0x174] sm:$0xf] %v339_v29 }
  0x54   : > { %342 = vst [vmem:[%s5067_s26 + $0x178] sm:$0xf] %v341_v30  ;;  %v343_v31 = vld [vmem:[%s5063_s25 + $0x2f8] sm:$0xf]  ;;  %v345_v32 = vld [vmem:[%s5063_s25 + $0x300] sm:$0xf] }
  0x55   : > { %v347_v33 = vld [vmem:[%s5063_s25 + $0x308] sm:$0xf]  ;;  %344 = vst [vmem:[%s5067_s26 + $0x17c] sm:$0xf] %v343_v31  ;;  %346 = vst [vmem:[%s5067_s26 + $0x180] sm:$0xf] %v345_v32 }
  0x56   : > { %348 = vst [vmem:[%s5067_s26 + $0x184] sm:$0xf] %v347_v33  ;;  %v349_v34 = vld [vmem:[%s5063_s25 + $0x310] sm:$0xf]  ;;  %v351_v35 = vld [vmem:[%s5063_s25 + $0x318] sm:$0xf] }
  0x57   : > { %v353_v36 = vld [vmem:[%s5063_s25 + $0x320] sm:$0xf]  ;;  %350 = vst [vmem:[%s5067_s26 + $0x188] sm:$0xf] %v349_v34  ;;  %352 = vst [vmem:[%s5067_s26 + $0x18c] sm:$0xf] %v351_v35 }
  0x58   : > { %354 = vst [vmem:[%s5067_s26 + $0x190] sm:$0xf] %v353_v36  ;;  %v355_v37 = vld [vmem:[%s5063_s25 + $0x328] sm:$0xf]  ;;  %v357_v38 = vld [vmem:[%s5063_s25 + $0x330] sm:$0xf] }
  0x59   : > { %v359_v39 = vld [vmem:[%s5063_s25 + $0x338] sm:$0xf]  ;;  %356 = vst [vmem:[%s5067_s26 + $0x194] sm:$0xf] %v355_v37  ;;  %358 = vst [vmem:[%s5067_s26 + $0x198] sm:$0xf] %v357_v38 }
  0x5a   : > { %360 = vst [vmem:[%s5067_s26 + $0x19c] sm:$0xf] %v359_v39  ;;  %v361_v40 = vld [vmem:[%s5063_s25 + $0x340] sm:$0xf]  ;;  %v363_v41 = vld [vmem:[%s5063_s25 + $0x348] sm:$0xf] }
  0x5b   : > { %v365_v42 = vld [vmem:[%s5063_s25 + $0x350] sm:$0xf]  ;;  %362 = vst [vmem:[%s5067_s26 + $0x1a0] sm:$0xf] %v361_v40  ;;  %364 = vst [vmem:[%s5067_s26 + $0x1a4] sm:$0xf] %v363_v41 }
  0x5c   : > { %366 = vst [vmem:[%s5067_s26 + $0x1a8] sm:$0xf] %v365_v42  ;;  %v367_v43 = vld [vmem:[%s5063_s25 + $0x358] sm:$0xf]  ;;  %v369_v44 = vld [vmem:[%s5063_s25 + $0x360] sm:$0xf] }
  0x5d   : > { %v371_v45 = vld [vmem:[%s5063_s25 + $0x368] sm:$0xf]  ;;  %368 = vst [vmem:[%s5067_s26 + $0x1ac] sm:$0xf] %v367_v43  ;;  %370 = vst [vmem:[%s5067_s26 + $0x1b0] sm:$0xf] %v369_v44 }
  0x5e   : > { %372 = vst [vmem:[%s5067_s26 + $0x1b4] sm:$0xf] %v371_v45  ;;  %v373_v46 = vld [vmem:[%s5063_s25 + $0x370] sm:$0xf]  ;;  %v375_v47 = vld [vmem:[%s5063_s25 + $0x378] sm:$0xf] }
  0x5f   : > { %v377_v48 = vld [vmem:[%s5063_s25 + $0x380] sm:$0xf]  ;;  %374 = vst [vmem:[%s5067_s26 + $0x1b8] sm:$0xf] %v373_v46  ;;  %376 = vst [vmem:[%s5067_s26 + $0x1bc] sm:$0xf] %v375_v47 }
  0x60   : > { %378 = vst [vmem:[%s5067_s26 + $0x1c0] sm:$0xf] %v377_v48  ;;  %v379_v49 = vld [vmem:[%s5063_s25 + $0x388] sm:$0xf]  ;;  %v381_v50 = vld [vmem:[%s5063_s25 + $0x390] sm:$0xf] }
  0x61   : > { %v383_v51 = vld [vmem:[%s5063_s25 + $0x398] sm:$0xf]  ;;  %380 = vst [vmem:[%s5067_s26 + $0x1c4] sm:$0xf] %v379_v49  ;;  %382 = vst [vmem:[%s5067_s26 + $0x1c8] sm:$0xf] %v381_v50 }
  0x62   : > { %384 = vst [vmem:[%s5067_s26 + $0x1cc] sm:$0xf] %v383_v51  ;;  %v385_v52 = vld [vmem:[%s5063_s25 + $0x3a0] sm:$0xf]  ;;  %v387_v53 = vld [vmem:[%s5063_s25 + $0x3a8] sm:$0xf] }
  0x63   : > { %v389_v54 = vld [vmem:[%s5063_s25 + $0x3b0] sm:$0xf]  ;;  %386 = vst [vmem:[%s5067_s26 + $0x1d0] sm:$0xf] %v385_v52  ;;  %388 = vst [vmem:[%s5067_s26 + $0x1d4] sm:$0xf] %v387_v53 }
  0x64   : > { %390 = vst [vmem:[%s5067_s26 + $0x1d8] sm:$0xf] %v389_v54  ;;  %v391_v55 = vld [vmem:[%s5063_s25 + $0x3b8] sm:$0xf]  ;;  %v393_v56 = vld [vmem:[%s5063_s25 + $0x3c0] sm:$0xf] }
  0x65   : > { %v395_v57 = vld [vmem:[%s5063_s25 + $0x3c8] sm:$0xf]  ;;  %392 = vst [vmem:[%s5067_s26 + $0x1dc] sm:$0xf] %v391_v55  ;;  %394 = vst [vmem:[%s5067_s26 + $0x1e0] sm:$0xf] %v393_v56 }
  0x66   : > { %396 = vst [vmem:[%s5067_s26 + $0x1e4] sm:$0xf] %v395_v57  ;;  %v397_v58 = vld [vmem:[%s5063_s25 + $0x3d0] sm:$0xf]  ;;  %v399_v59 = vld [vmem:[%s5063_s25 + $0x3d8] sm:$0xf] }
  0x67   : > { %v401_v60 = vld [vmem:[%s5063_s25 + $0x3e0] sm:$0xf]  ;;  %398 = vst [vmem:[%s5067_s26 + $0x1e8] sm:$0xf] %v397_v58  ;;  %400 = vst [vmem:[%s5067_s26 + $0x1ec] sm:$0xf] %v399_v59 }
  0x68   : > { %402 = vst [vmem:[%s5067_s26 + $0x1f0] sm:$0xf] %v401_v60  ;;  %v403_v61 = vld [vmem:[%s5063_s25 + $0x3e8] sm:$0xf]  ;;  %v405_v62 = vld [vmem:[%s5063_s25 + $0x3f0] sm:$0xf] }
  0x69   : > { %v407_v63 = vld [vmem:[%s5063_s25 + $0x3f8] sm:$0xf]  ;;  %404 = vst [vmem:[%s5067_s26 + $0x1f4] sm:$0xf] %v403_v61  ;;  %406 = vst [vmem:[%s5067_s26 + $0x1f8] sm:$0xf] %v405_v62 }
  0x6a   : > { %408 = vst [vmem:[%s5067_s26 + $0x1fc] sm:$0xf] %v407_v63  ;;  %v409_v0 = vld [vmem:[%s5063_s25 + $0x400] sm:$0xf]  ;;  %v411_v1 = vld [vmem:[%s5063_s25 + $0x408] sm:$0xf] }
  0x6b   : > { %v413_v2 = vld [vmem:[%s5063_s25 + $0x410] sm:$0xf]  ;;  %410 = vst [vmem:[%s5067_s26 + $0x200] sm:$0xf] %v409_v0  ;;  %412 = vst [vmem:[%s5067_s26 + $0x204] sm:$0xf] %v411_v1 }
  0x6c   : > { %414 = vst [vmem:[%s5067_s26 + $0x208] sm:$0xf] %v413_v2  ;;  %v415_v3 = vld [vmem:[%s5063_s25 + $0x418] sm:$0xf]  ;;  %v417_v4 = vld [vmem:[%s5063_s25 + $0x420] sm:$0xf] }
  0x6d   : > { %v419_v5 = vld [vmem:[%s5063_s25 + $0x428] sm:$0xf]  ;;  %416 = vst [vmem:[%s5067_s26 + $0x20c] sm:$0xf] %v415_v3  ;;  %418 = vst [vmem:[%s5067_s26 + $0x210] sm:$0xf] %v417_v4 }
  0x6e   : > { %420 = vst [vmem:[%s5067_s26 + $0x214] sm:$0xf] %v419_v5  ;;  %v421_v6 = vld [vmem:[%s5063_s25 + $0x430] sm:$0xf]  ;;  %v423_v7 = vld [vmem:[%s5063_s25 + $0x438] sm:$0xf] }
  0x6f   : > { %v425_v8 = vld [vmem:[%s5063_s25 + $0x440] sm:$0xf]  ;;  %422 = vst [vmem:[%s5067_s26 + $0x218] sm:$0xf] %v421_v6  ;;  %424 = vst [vmem:[%s5067_s26 + $0x21c] sm:$0xf] %v423_v7 }
  0x70   : > { %426 = vst [vmem:[%s5067_s26 + $0x220] sm:$0xf] %v425_v8  ;;  %v427_v9 = vld [vmem:[%s5063_s25 + $0x448] sm:$0xf]  ;;  %v429_v10 = vld [vmem:[%s5063_s25 + $0x450] sm:$0xf] }
  0x71   : > { %v431_v11 = vld [vmem:[%s5063_s25 + $0x458] sm:$0xf]  ;;  %428 = vst [vmem:[%s5067_s26 + $0x224] sm:$0xf] %v427_v9  ;;  %430 = vst [vmem:[%s5067_s26 + $0x228] sm:$0xf] %v429_v10 }
  0x72   : > { %432 = vst [vmem:[%s5067_s26 + $0x22c] sm:$0xf] %v431_v11  ;;  %v433_v12 = vld [vmem:[%s5063_s25 + $0x460] sm:$0xf]  ;;  %v435_v13 = vld [vmem:[%s5063_s25 + $0x468] sm:$0xf] }
  0x73   : > { %v437_v14 = vld [vmem:[%s5063_s25 + $0x470] sm:$0xf]  ;;  %434 = vst [vmem:[%s5067_s26 + $0x230] sm:$0xf] %v433_v12  ;;  %436 = vst [vmem:[%s5067_s26 + $0x234] sm:$0xf] %v435_v13 }
  0x74   : > { %438 = vst [vmem:[%s5067_s26 + $0x238] sm:$0xf] %v437_v14  ;;  %v439_v15 = vld [vmem:[%s5063_s25 + $0x478] sm:$0xf]  ;;  %v441_v16 = vld [vmem:[%s5063_s25 + $0x480] sm:$0xf] }
  0x75   : > { %v443_v17 = vld [vmem:[%s5063_s25 + $0x488] sm:$0xf]  ;;  %440 = vst [vmem:[%s5067_s26 + $0x23c] sm:$0xf] %v439_v15  ;;  %442 = vst [vmem:[%s5067_s26 + $0x240] sm:$0xf] %v441_v16 }
  0x76   : > { %444 = vst [vmem:[%s5067_s26 + $0x244] sm:$0xf] %v443_v17  ;;  %v445_v18 = vld [vmem:[%s5063_s25 + $0x490] sm:$0xf]  ;;  %v447_v19 = vld [vmem:[%s5063_s25 + $0x498] sm:$0xf] }
  0x77   : > { %v449_v20 = vld [vmem:[%s5063_s25 + $0x4a0] sm:$0xf]  ;;  %446 = vst [vmem:[%s5067_s26 + $0x248] sm:$0xf] %v445_v18  ;;  %448 = vst [vmem:[%s5067_s26 + $0x24c] sm:$0xf] %v447_v19 }
  0x78   : > { %450 = vst [vmem:[%s5067_s26 + $0x250] sm:$0xf] %v449_v20  ;;  %v451_v21 = vld [vmem:[%s5063_s25 + $0x4a8] sm:$0xf]  ;;  %v453_v22 = vld [vmem:[%s5063_s25 + $0x4b0] sm:$0xf] }
  0x79   : > { %v455_v23 = vld [vmem:[%s5063_s25 + $0x4b8] sm:$0xf]  ;;  %452 = vst [vmem:[%s5067_s26 + $0x254] sm:$0xf] %v451_v21  ;;  %454 = vst [vmem:[%s5067_s26 + $0x258] sm:$0xf] %v453_v22 }
  0x7a   : > { %456 = vst [vmem:[%s5067_s26 + $0x25c] sm:$0xf] %v455_v23  ;;  %v457_v24 = vld [vmem:[%s5063_s25 + $0x4c0] sm:$0xf]  ;;  %v459_v25 = vld [vmem:[%s5063_s25 + $0x4c8] sm:$0xf] }
  0x7b   : > { %v461_v26 = vld [vmem:[%s5063_s25 + $0x4d0] sm:$0xf]  ;;  %458 = vst [vmem:[%s5067_s26 + $0x260] sm:$0xf] %v457_v24  ;;  %460 = vst [vmem:[%s5067_s26 + $0x264] sm:$0xf] %v459_v25 }
  0x7c   : > { %462 = vst [vmem:[%s5067_s26 + $0x268] sm:$0xf] %v461_v26  ;;  %v463_v27 = vld [vmem:[%s5063_s25 + $0x4d8] sm:$0xf]  ;;  %v465_v28 = vld [vmem:[%s5063_s25 + $0x4e0] sm:$0xf] }
  0x7d   : > { %v467_v29 = vld [vmem:[%s5063_s25 + $0x4e8] sm:$0xf]  ;;  %464 = vst [vmem:[%s5067_s26 + $0x26c] sm:$0xf] %v463_v27  ;;  %466 = vst [vmem:[%s5067_s26 + $0x270] sm:$0xf] %v465_v28 }
  0x7e   : > { %468 = vst [vmem:[%s5067_s26 + $0x274] sm:$0xf] %v467_v29  ;;  %v469_v30 = vld [vmem:[%s5063_s25 + $0x4f0] sm:$0xf]  ;;  %v471_v31 = vld [vmem:[%s5063_s25 + $0x4f8] sm:$0xf] }
  0x7f   : > { %v473_v32 = vld [vmem:[%s5063_s25 + $0x500] sm:$0xf]  ;;  %470 = vst [vmem:[%s5067_s26 + $0x278] sm:$0xf] %v469_v30  ;;  %472 = vst [vmem:[%s5067_s26 + $0x27c] sm:$0xf] %v471_v31 }
  0x80   : > { %474 = vst [vmem:[%s5067_s26 + $0x280] sm:$0xf] %v473_v32  ;;  %v475_v33 = vld [vmem:[%s5063_s25 + $0x508] sm:$0xf]  ;;  %v477_v34 = vld [vmem:[%s5063_s25 + $0x510] sm:$0xf] }
  0x81   : > { %v479_v35 = vld [vmem:[%s5063_s25 + $0x518] sm:$0xf]  ;;  %476 = vst [vmem:[%s5067_s26 + $0x284] sm:$0xf] %v475_v33  ;;  %478 = vst [vmem:[%s5067_s26 + $0x288] sm:$0xf] %v477_v34 }
  0x82   : > { %480 = vst [vmem:[%s5067_s26 + $0x28c] sm:$0xf] %v479_v35  ;;  %v481_v36 = vld [vmem:[%s5063_s25 + $0x520] sm:$0xf]  ;;  %v483_v37 = vld [vmem:[%s5063_s25 + $0x528] sm:$0xf] }
  0x83   : > { %v485_v38 = vld [vmem:[%s5063_s25 + $0x530] sm:$0xf]  ;;  %482 = vst [vmem:[%s5067_s26 + $0x290] sm:$0xf] %v481_v36  ;;  %484 = vst [vmem:[%s5067_s26 + $0x294] sm:$0xf] %v483_v37 }
  0x84   : > { %486 = vst [vmem:[%s5067_s26 + $0x298] sm:$0xf] %v485_v38  ;;  %v487_v39 = vld [vmem:[%s5063_s25 + $0x538] sm:$0xf]  ;;  %v489_v40 = vld [vmem:[%s5063_s25 + $0x540] sm:$0xf] }
  0x85   : > { %v491_v41 = vld [vmem:[%s5063_s25 + $0x548] sm:$0xf]  ;;  %488 = vst [vmem:[%s5067_s26 + $0x29c] sm:$0xf] %v487_v39  ;;  %490 = vst [vmem:[%s5067_s26 + $0x2a0] sm:$0xf] %v489_v40 }
  0x86   : > { %492 = vst [vmem:[%s5067_s26 + $0x2a4] sm:$0xf] %v491_v41  ;;  %v493_v42 = vld [vmem:[%s5063_s25 + $0x550] sm:$0xf]  ;;  %v495_v43 = vld [vmem:[%s5063_s25 + $0x558] sm:$0xf] }
  0x87   : > { %v497_v44 = vld [vmem:[%s5063_s25 + $0x560] sm:$0xf]  ;;  %494 = vst [vmem:[%s5067_s26 + $0x2a8] sm:$0xf] %v493_v42  ;;  %496 = vst [vmem:[%s5067_s26 + $0x2ac] sm:$0xf] %v495_v43 }
  0x88   : > { %498 = vst [vmem:[%s5067_s26 + $0x2b0] sm:$0xf] %v497_v44  ;;  %v499_v45 = vld [vmem:[%s5063_s25 + $0x568] sm:$0xf]  ;;  %v501_v46 = vld [vmem:[%s5063_s25 + $0x570] sm:$0xf] }
  0x89   : > { %v503_v47 = vld [vmem:[%s5063_s25 + $0x578] sm:$0xf]  ;;  %500 = vst [vmem:[%s5067_s26 + $0x2b4] sm:$0xf] %v499_v45  ;;  %502 = vst [vmem:[%s5067_s26 + $0x2b8] sm:$0xf] %v501_v46 }
  0x8a   : > { %504 = vst [vmem:[%s5067_s26 + $0x2bc] sm:$0xf] %v503_v47  ;;  %v505_v48 = vld [vmem:[%s5063_s25 + $0x580] sm:$0xf]  ;;  %v507_v49 = vld [vmem:[%s5063_s25 + $0x588] sm:$0xf] }
  0x8b   : > { %v509_v50 = vld [vmem:[%s5063_s25 + $0x590] sm:$0xf]  ;;  %506 = vst [vmem:[%s5067_s26 + $0x2c0] sm:$0xf] %v505_v48  ;;  %508 = vst [vmem:[%s5067_s26 + $0x2c4] sm:$0xf] %v507_v49 }
  0x8c   : > { %510 = vst [vmem:[%s5067_s26 + $0x2c8] sm:$0xf] %v509_v50  ;;  %v511_v51 = vld [vmem:[%s5063_s25 + $0x598] sm:$0xf]  ;;  %v513_v52 = vld [vmem:[%s5063_s25 + $0x5a0] sm:$0xf] }
  0x8d   : > { %v515_v53 = vld [vmem:[%s5063_s25 + $0x5a8] sm:$0xf]  ;;  %512 = vst [vmem:[%s5067_s26 + $0x2cc] sm:$0xf] %v511_v51  ;;  %514 = vst [vmem:[%s5067_s26 + $0x2d0] sm:$0xf] %v513_v52 }
  0x8e   : > { %516 = vst [vmem:[%s5067_s26 + $0x2d4] sm:$0xf] %v515_v53  ;;  %v517_v54 = vld [vmem:[%s5063_s25 + $0x5b0] sm:$0xf]  ;;  %v519_v55 = vld [vmem:[%s5063_s25 + $0x5b8] sm:$0xf] }
  0x8f   : > { %v521_v56 = vld [vmem:[%s5063_s25 + $0x5c0] sm:$0xf]  ;;  %518 = vst [vmem:[%s5067_s26 + $0x2d8] sm:$0xf] %v517_v54  ;;  %520 = vst [vmem:[%s5067_s26 + $0x2dc] sm:$0xf] %v519_v55 }
  0x90   : > { %522 = vst [vmem:[%s5067_s26 + $0x2e0] sm:$0xf] %v521_v56  ;;  %v523_v57 = vld [vmem:[%s5063_s25 + $0x5c8] sm:$0xf]  ;;  %v525_v58 = vld [vmem:[%s5063_s25 + $0x5d0] sm:$0xf] }
  0x91   : > { %v527_v59 = vld [vmem:[%s5063_s25 + $0x5d8] sm:$0xf]  ;;  %524 = vst [vmem:[%s5067_s26 + $0x2e4] sm:$0xf] %v523_v57  ;;  %526 = vst [vmem:[%s5067_s26 + $0x2e8] sm:$0xf] %v525_v58 }
  0x92   : > { %528 = vst [vmem:[%s5067_s26 + $0x2ec] sm:$0xf] %v527_v59  ;;  %v529_v60 = vld [vmem:[%s5063_s25 + $0x5e0] sm:$0xf]  ;;  %v531_v61 = vld [vmem:[%s5063_s25 + $0x5e8] sm:$0xf] }
  0x93   : > { %v533_v62 = vld [vmem:[%s5063_s25 + $0x5f0] sm:$0xf]  ;;  %530 = vst [vmem:[%s5067_s26 + $0x2f0] sm:$0xf] %v529_v60  ;;  %532 = vst [vmem:[%s5067_s26 + $0x2f4] sm:$0xf] %v531_v61 }
  0x94   : > { %534 = vst [vmem:[%s5067_s26 + $0x2f8] sm:$0xf] %v533_v62  ;;  %v535_v63 = vld [vmem:[%s5063_s25 + $0x5f8] sm:$0xf]  ;;  %v537_v0 = vld [vmem:[%s5063_s25 + $0x600] sm:$0xf] }
  0x95   : > { %v539_v1 = vld [vmem:[%s5063_s25 + $0x608] sm:$0xf]  ;;  %536 = vst [vmem:[%s5067_s26 + $0x2fc] sm:$0xf] %v535_v63  ;;  %538 = vst [vmem:[%s5067_s26 + $0x300] sm:$0xf] %v537_v0 }
  0x96   : > { %540 = vst [vmem:[%s5067_s26 + $0x304] sm:$0xf] %v539_v1  ;;  %v541_v2 = vld [vmem:[%s5063_s25 + $0x610] sm:$0xf]  ;;  %v543_v3 = vld [vmem:[%s5063_s25 + $0x618] sm:$0xf] }
  0x97   : > { %v545_v4 = vld [vmem:[%s5063_s25 + $0x620] sm:$0xf]  ;;  %542 = vst [vmem:[%s5067_s26 + $0x308] sm:$0xf] %v541_v2  ;;  %544 = vst [vmem:[%s5067_s26 + $0x30c] sm:$0xf] %v543_v3 }
  0x98   : > { %546 = vst [vmem:[%s5067_s26 + $0x310] sm:$0xf] %v545_v4  ;;  %v547_v5 = vld [vmem:[%s5063_s25 + $0x628] sm:$0xf]  ;;  %v549_v6 = vld [vmem:[%s5063_s25 + $0x630] sm:$0xf] }
  0x99   : > { %v551_v7 = vld [vmem:[%s5063_s25 + $0x638] sm:$0xf]  ;;  %548 = vst [vmem:[%s5067_s26 + $0x314] sm:$0xf] %v547_v5  ;;  %550 = vst [vmem:[%s5067_s26 + $0x318] sm:$0xf] %v549_v6 }
  0x9a   : > { %552 = vst [vmem:[%s5067_s26 + $0x31c] sm:$0xf] %v551_v7  ;;  %v553_v8 = vld [vmem:[%s5063_s25 + $0x640] sm:$0xf]  ;;  %v555_v9 = vld [vmem:[%s5063_s25 + $0x648] sm:$0xf] }
  0x9b   : > { %v557_v10 = vld [vmem:[%s5063_s25 + $0x650] sm:$0xf]  ;;  %554 = vst [vmem:[%s5067_s26 + $0x320] sm:$0xf] %v553_v8  ;;  %556 = vst [vmem:[%s5067_s26 + $0x324] sm:$0xf] %v555_v9 }
  0x9c   : > { %558 = vst [vmem:[%s5067_s26 + $0x328] sm:$0xf] %v557_v10  ;;  %v559_v11 = vld [vmem:[%s5063_s25 + $0x658] sm:$0xf]  ;;  %v561_v12 = vld [vmem:[%s5063_s25 + $0x660] sm:$0xf] }
  0x9d   : > { %v563_v13 = vld [vmem:[%s5063_s25 + $0x668] sm:$0xf]  ;;  %560 = vst [vmem:[%s5067_s26 + $0x32c] sm:$0xf] %v559_v11  ;;  %562 = vst [vmem:[%s5067_s26 + $0x330] sm:$0xf] %v561_v12 }
  0x9e   : > { %564 = vst [vmem:[%s5067_s26 + $0x334] sm:$0xf] %v563_v13  ;;  %v565_v14 = vld [vmem:[%s5063_s25 + $0x670] sm:$0xf]  ;;  %v567_v15 = vld [vmem:[%s5063_s25 + $0x678] sm:$0xf] }
  0x9f   : > { %v569_v16 = vld [vmem:[%s5063_s25 + $0x680] sm:$0xf]  ;;  %566 = vst [vmem:[%s5067_s26 + $0x338] sm:$0xf] %v565_v14  ;;  %568 = vst [vmem:[%s5067_s26 + $0x33c] sm:$0xf] %v567_v15 }
  0xa0   : > { %570 = vst [vmem:[%s5067_s26 + $0x340] sm:$0xf] %v569_v16  ;;  %v571_v17 = vld [vmem:[%s5063_s25 + $0x688] sm:$0xf]  ;;  %v573_v18 = vld [vmem:[%s5063_s25 + $0x690] sm:$0xf] }
  0xa1   : > { %v575_v19 = vld [vmem:[%s5063_s25 + $0x698] sm:$0xf]  ;;  %572 = vst [vmem:[%s5067_s26 + $0x344] sm:$0xf] %v571_v17  ;;  %574 = vst [vmem:[%s5067_s26 + $0x348] sm:$0xf] %v573_v18 }
  0xa2   : > { %576 = vst [vmem:[%s5067_s26 + $0x34c] sm:$0xf] %v575_v19  ;;  %v577_v20 = vld [vmem:[%s5063_s25 + $0x6a0] sm:$0xf]  ;;  %v579_v21 = vld [vmem:[%s5063_s25 + $0x6a8] sm:$0xf] }
  0xa3   : > { %v581_v22 = vld [vmem:[%s5063_s25 + $0x6b0] sm:$0xf]  ;;  %578 = vst [vmem:[%s5067_s26 + $0x350] sm:$0xf] %v577_v20  ;;  %580 = vst [vmem:[%s5067_s26 + $0x354] sm:$0xf] %v579_v21 }
  0xa4   : > { %582 = vst [vmem:[%s5067_s26 + $0x358] sm:$0xf] %v581_v22  ;;  %v583_v23 = vld [vmem:[%s5063_s25 + $0x6b8] sm:$0xf]  ;;  %v585_v24 = vld [vmem:[%s5063_s25 + $0x6c0] sm:$0xf] }
  0xa5   : > { %v587_v25 = vld [vmem:[%s5063_s25 + $0x6c8] sm:$0xf]  ;;  %584 = vst [vmem:[%s5067_s26 + $0x35c] sm:$0xf] %v583_v23  ;;  %586 = vst [vmem:[%s5067_s26 + $0x360] sm:$0xf] %v585_v24 }
  0xa6   : > { %588 = vst [vmem:[%s5067_s26 + $0x364] sm:$0xf] %v587_v25  ;;  %v589_v26 = vld [vmem:[%s5063_s25 + $0x6d0] sm:$0xf]  ;;  %v591_v27 = vld [vmem:[%s5063_s25 + $0x6d8] sm:$0xf] }
  0xa7   : > { %v593_v28 = vld [vmem:[%s5063_s25 + $0x6e0] sm:$0xf]  ;;  %590 = vst [vmem:[%s5067_s26 + $0x368] sm:$0xf] %v589_v26  ;;  %592 = vst [vmem:[%s5067_s26 + $0x36c] sm:$0xf] %v591_v27 }
  0xa8   : > { %594 = vst [vmem:[%s5067_s26 + $0x370] sm:$0xf] %v593_v28  ;;  %v595_v29 = vld [vmem:[%s5063_s25 + $0x6e8] sm:$0xf]  ;;  %v597_v30 = vld [vmem:[%s5063_s25 + $0x6f0] sm:$0xf] }
  0xa9   : > { %v599_v31 = vld [vmem:[%s5063_s25 + $0x6f8] sm:$0xf]  ;;  %596 = vst [vmem:[%s5067_s26 + $0x374] sm:$0xf] %v595_v29  ;;  %598 = vst [vmem:[%s5067_s26 + $0x378] sm:$0xf] %v597_v30 }
  0xaa   : > { %600 = vst [vmem:[%s5067_s26 + $0x37c] sm:$0xf] %v599_v31  ;;  %v601_v32 = vld [vmem:[%s5063_s25 + $0x700] sm:$0xf]  ;;  %v603_v33 = vld [vmem:[%s5063_s25 + $0x708] sm:$0xf] }
  0xab   : > { %v605_v34 = vld [vmem:[%s5063_s25 + $0x710] sm:$0xf]  ;;  %602 = vst [vmem:[%s5067_s26 + $0x380] sm:$0xf] %v601_v32  ;;  %604 = vst [vmem:[%s5067_s26 + $0x384] sm:$0xf] %v603_v33 }
  0xac   : > { %606 = vst [vmem:[%s5067_s26 + $0x388] sm:$0xf] %v605_v34  ;;  %v607_v35 = vld [vmem:[%s5063_s25 + $0x718] sm:$0xf]  ;;  %v609_v36 = vld [vmem:[%s5063_s25 + $0x720] sm:$0xf] }
  0xad   : > { %v611_v37 = vld [vmem:[%s5063_s25 + $0x728] sm:$0xf]  ;;  %608 = vst [vmem:[%s5067_s26 + $0x38c] sm:$0xf] %v607_v35  ;;  %610 = vst [vmem:[%s5067_s26 + $0x390] sm:$0xf] %v609_v36 }
  0xae   : > { %612 = vst [vmem:[%s5067_s26 + $0x394] sm:$0xf] %v611_v37  ;;  %v613_v38 = vld [vmem:[%s5063_s25 + $0x730] sm:$0xf]  ;;  %v615_v39 = vld [vmem:[%s5063_s25 + $0x738] sm:$0xf] }
  0xaf   : > { %v617_v40 = vld [vmem:[%s5063_s25 + $0x740] sm:$0xf]  ;;  %614 = vst [vmem:[%s5067_s26 + $0x398] sm:$0xf] %v613_v38  ;;  %616 = vst [vmem:[%s5067_s26 + $0x39c] sm:$0xf] %v615_v39 }
  0xb0   : > { %618 = vst [vmem:[%s5067_s26 + $0x3a0] sm:$0xf] %v617_v40  ;;  %v619_v41 = vld [vmem:[%s5063_s25 + $0x748] sm:$0xf]  ;;  %v621_v42 = vld [vmem:[%s5063_s25 + $0x750] sm:$0xf] }
  0xb1   : > { %v623_v43 = vld [vmem:[%s5063_s25 + $0x758] sm:$0xf]  ;;  %620 = vst [vmem:[%s5067_s26 + $0x3a4] sm:$0xf] %v619_v41  ;;  %622 = vst [vmem:[%s5067_s26 + $0x3a8] sm:$0xf] %v621_v42 }
  0xb2   : > { %624 = vst [vmem:[%s5067_s26 + $0x3ac] sm:$0xf] %v623_v43  ;;  %v625_v44 = vld [vmem:[%s5063_s25 + $0x760] sm:$0xf]  ;;  %v627_v45 = vld [vmem:[%s5063_s25 + $0x768] sm:$0xf] }
  0xb3   : > { %v629_v46 = vld [vmem:[%s5063_s25 + $0x770] sm:$0xf]  ;;  %626 = vst [vmem:[%s5067_s26 + $0x3b0] sm:$0xf] %v625_v44  ;;  %628 = vst [vmem:[%s5067_s26 + $0x3b4] sm:$0xf] %v627_v45 }
  0xb4   : > { %630 = vst [vmem:[%s5067_s26 + $0x3b8] sm:$0xf] %v629_v46  ;;  %v631_v47 = vld [vmem:[%s5063_s25 + $0x778] sm:$0xf]  ;;  %v633_v48 = vld [vmem:[%s5063_s25 + $0x780] sm:$0xf] }
  0xb5   : > { %v635_v49 = vld [vmem:[%s5063_s25 + $0x788] sm:$0xf]  ;;  %632 = vst [vmem:[%s5067_s26 + $0x3bc] sm:$0xf] %v631_v47  ;;  %634 = vst [vmem:[%s5067_s26 + $0x3c0] sm:$0xf] %v633_v48 }
  0xb6   : > { %636 = vst [vmem:[%s5067_s26 + $0x3c4] sm:$0xf] %v635_v49  ;;  %v637_v50 = vld [vmem:[%s5063_s25 + $0x790] sm:$0xf]  ;;  %v639_v51 = vld [vmem:[%s5063_s25 + $0x798] sm:$0xf] }
  0xb7   : > { %v641_v52 = vld [vmem:[%s5063_s25 + $0x7a0] sm:$0xf]  ;;  %638 = vst [vmem:[%s5067_s26 + $0x3c8] sm:$0xf] %v637_v50  ;;  %640 = vst [vmem:[%s5067_s26 + $0x3cc] sm:$0xf] %v639_v51 }
  0xb8   : > { %642 = vst [vmem:[%s5067_s26 + $0x3d0] sm:$0xf] %v641_v52  ;;  %v643_v53 = vld [vmem:[%s5063_s25 + $0x7a8] sm:$0xf]  ;;  %v645_v54 = vld [vmem:[%s5063_s25 + $0x7b0] sm:$0xf] }
  0xb9   : > { %v647_v55 = vld [vmem:[%s5063_s25 + $0x7b8] sm:$0xf]  ;;  %644 = vst [vmem:[%s5067_s26 + $0x3d4] sm:$0xf] %v643_v53  ;;  %646 = vst [vmem:[%s5067_s26 + $0x3d8] sm:$0xf] %v645_v54 }
  0xba   : > { %648 = vst [vmem:[%s5067_s26 + $0x3dc] sm:$0xf] %v647_v55  ;;  %v649_v56 = vld [vmem:[%s5063_s25 + $0x7c0] sm:$0xf]  ;;  %v651_v57 = vld [vmem:[%s5063_s25 + $0x7c8] sm:$0xf] }
  0xbb   : > { %v653_v58 = vld [vmem:[%s5063_s25 + $0x7d0] sm:$0xf]  ;;  %650 = vst [vmem:[%s5067_s26 + $0x3e0] sm:$0xf] %v649_v56  ;;  %652 = vst [vmem:[%s5067_s26 + $0x3e4] sm:$0xf] %v651_v57 }
  0xbc   : > { %654 = vst [vmem:[%s5067_s26 + $0x3e8] sm:$0xf] %v653_v58  ;;  %v655_v59 = vld [vmem:[%s5063_s25 + $0x7d8] sm:$0xf]  ;;  %v657_v60 = vld [vmem:[%s5063_s25 + $0x7e0] sm:$0xf] }
  0xbd   : > { %v659_v61 = vld [vmem:[%s5063_s25 + $0x7e8] sm:$0xf]  ;;  %656 = vst [vmem:[%s5067_s26 + $0x3ec] sm:$0xf] %v655_v59  ;;  %658 = vst [vmem:[%s5067_s26 + $0x3f0] sm:$0xf] %v657_v60 }
  0xbe   : > { %660 = vst [vmem:[%s5067_s26 + $0x3f4] sm:$0xf] %v659_v61  ;;  %v661_v62 = vld [vmem:[%s5063_s25 + $0x7f0] sm:$0xf]  ;;  %v663_v63 = vld [vmem:[%s5063_s25 + $0x7f8] sm:$0xf] }
  0xbf   : > { %662 = vst [vmem:[%s5067_s26 + $0x3f8] sm:$0xf] %v661_v62  ;;  %664 = vst [vmem:[%s5067_s26 + $0x3fc] sm:$0xf] %v663_v63 }
  0xc0 PF: > { %p4017_p8 = scmp.ge.s32.totalorder %s4998_s13, 1  ;;  %p1198_p9 = scmp.lt.s32.totalorder %s4998_s13, 3 }
  0xc2   : > { %p1199_p10 = pnand %p4017_p8, %p1198_p9 }
  0xc3   : > { %s1205_s27 = sand.u32 (!%p1199_p10), 1, %s4982_s9   ;;  %v5585_v0 = vld [vmem:[%s6315_s0] sm:$0xff] (!%p1199_p10)  ;;  %v5595_v2 = vld [vmem:[%s6315_s0 + $0x8] sm:$0xff] (!%p1199_p10) }
  0xc4   : > { %1202 = sbr.rel (%p1199_p10) target bundleno = 710 (0x2c6), region = 65  ;;  %v5590_v1 = vld [vmem:[%s6315_s0 + $0x40] sm:$0xff] (!%p1199_p10)  ;;  %s4018_s6 = sshll.u32 (!%p1199_p10), %s1205_s27, 10  ;;  %v5604_v4 = vld [vmem:[%s6315_s0 + $0x48] sm:$0xff] (!%p1199_p10) }
  0xc5   : > { %v4021_v3 = vcombine.high (!%p1199_p10), %v5585_v0, %v5590_v1  ;;  %v4023_v5 = vcombine.high (!%p1199_p10), %v5595_v2, %v5604_v4  ;;  %s5608_s15 = scalar_lea.vmem (!%p1199_p10), [#allocation2], %s4018_s6  ;;  %v1256_v35 = vld [vmem:[%s6315_s0 + $0x80] sm:$0xff] (!%p1199_p10)  ;;  %v1257_v38 = vld [vmem:[%s6315_s0 + $0x88] sm:$0xff] (!%p1199_p10)  ;;  %v4020_v42 = vcombine.low (!%p1199_p10), %v5585_v0, %v5590_v1  ;;  %v4022_v43 = vcombine.low (!%p1199_p10), %v5595_v2, %v5604_v4 }
  0xc6   : > { %v4832_v6 = vld [vmem:[%s5608_s15 + $0x40] sm:$0xff] (!%p1199_p10)   ;;  %v4836_v10 = vld [vmem:[%s5608_s15 + $0x48] sm:$0xff] (!%p1199_p10)   ;;  %v4840_v14 = vld [vmem:[%s5608_s15 + $0x50] sm:$0xff] (!%p1199_p10)  }
  0xc7   : > { %3064 = vmatprep.mubr.bf16.mxu0 (!%p1199_p10), %v4021_v3  ;;  %v4833_v7 = vld [vmem:[%s5608_s15 + $0xc0] sm:$0xff] (!%p1199_p10)   ;;  %3161 = vmatprep.mubr.bf16.mxu1 (!%p1199_p10), %v4023_v5  ;;  %v4837_v11 = vld [vmem:[%s5608_s15 + $0xc8] sm:$0xff] (!%p1199_p10)   ;;  %v4841_v15 = vld [vmem:[%s5608_s15 + $0xd0] sm:$0xff] (!%p1199_p10)  }
  0xc8   : > { %4280 = vmatprep.subr.bf16.mxu0 (!%p1199_p10), %v4832_v6  ;;  %v4834_v8 = vld [vmem:[%s5608_s15] sm:$0xff] (!%p1199_p10)   ;;  %4344 = vmatprep.subr.bf16.mxu1 (!%p1199_p10), %v4833_v7  ;;  %v4838_v12 = vld [vmem:[%s5608_s15 + $0x8] sm:$0xff] (!%p1199_p10)   ;;  %v4842_v16 = vld [vmem:[%s5608_s15 + $0x10] sm:$0xff] (!%p1199_p10)  }
  0xc9   : > { %v4835_v9 = vld [vmem:[%s5608_s15 + $0x80] sm:$0xff] (!%p1199_p10)   ;;  %4281 = vmatpush3.bf16.msra.mxu0 (!%p1199_p10), %v4834_v8  ;;  %v4839_v13 = vld [vmem:[%s5608_s15 + $0x88] sm:$0xff] (!%p1199_p10)   ;;  %v4843_v17 = vld [vmem:[%s5608_s15 + $0x90] sm:$0xff] (!%p1199_p10)  }
  0xca   : > { %4345 = vmatpush3.bf16.msra.mxu1 (!%p1199_p10), %v4835_v9  ;;  %4282 = vmatprep.subr.bf16.mxu0 (!%p1199_p10), %v4836_v10  ;;  %v4844_v18 = vld [vmem:[%s5608_s15 + $0x58] sm:$0xff] (!%p1199_p10)   ;;  %v4848_v22 = vld [vmem:[%s5608_s15 + $0x60] sm:$0xff] (!%p1199_p10)   ;;  %v4852_v26 = vld [vmem:[%s5608_s15 + $0x68] sm:$0xff] (!%p1199_p10)  }
  0xcb   : > { %4346 = vmatprep.subr.bf16.mxu1 %v4837_v11  ;;  %v4845_v19 = vld [vmem:[%s5608_s15 + $0xd8] sm:$0xff]   ;;  %v4849_v23 = vld [vmem:[%s5608_s15 + $0xe0] sm:$0xff]   ;;  %v4853_v27 = vld [vmem:[%s5608_s15 + $0xe8] sm:$0xff]   ;;  %s4277_s9 = sshll.u32 (%p5050_p6), %s4990_s11, 3 }
  0xcc   : > { %v4846_v20 = vld [vmem:[%s5608_s15 + $0x18] sm:$0xff]   ;;  %v4850_v24 = vld [vmem:[%s5608_s15 + $0x20] sm:$0xff]   ;;  %v4854_v28 = vld [vmem:[%s5608_s15 + $0x28] sm:$0xff]   ;;  %s3835_s3 = scalar_lea.vmem (%p5050_p6), %s6317_s2, %s4277_s9 }
  0xcd   : > { %4283 = vmatpush3.bf16.msra.mxu0 %v4838_v12  ;;  %v4847_v21 = vld [vmem:[%s5608_s15 + $0x98] sm:$0xff]   ;;  %v4851_v25 = vld [vmem:[%s5608_s15 + $0xa0] sm:$0xff]   ;;  %v4855_v29 = vld [vmem:[%s5608_s15 + $0xa8] sm:$0xff]  }
  0xce   : > { %4347 = vmatpush3.bf16.msra.mxu1 %v4839_v13  ;;  %4284 = vmatprep.subr.bf16.mxu0 %v4840_v14  ;;  %v4856_v30 = vld [vmem:[%s5608_s15 + $0x70] sm:$0xff]   ;;  %v4860_v34 = vld [vmem:[%s5608_s15 + $0x78] sm:$0xff]   ;;  %v1264_v36 = vld [vmem:[%s6315_s0 + $0xc0] sm:$0xff] }
  0xcf   : > { %4348 = vmatprep.subr.bf16.mxu1 %v4841_v15  ;;  %v4857_v31 = vld [vmem:[%s5608_s15 + $0xf0] sm:$0xff]   ;;  %v4861_v37 = vld [vmem:[%s5608_s15 + $0xf8] sm:$0xff]   ;;  %v1265_v39 = vld [vmem:[%s6315_s0 + $0xc8] sm:$0xff]  ;;  %v4037_v46 = vcombine.high %v1256_v35, %v1264_v36  ;;  %v4036_v54 = vcombine.low %v1256_v35, %v1264_v36 }
  0xd0   : > { %v4858_v32 = vld [vmem:[%s5608_s15 + $0x30] sm:$0xff]   ;;  %v4862_v40 = vld [vmem:[%s5608_s15 + $0x38] sm:$0xff]   ;;  %v4864_v44 = vld [vmem:[%s5608_s15 + $0x140] sm:$0xff]   ;;  %v4039_v48 = vcombine.high %v1257_v38, %v1265_v39  ;;  %v4038_v56 = vcombine.low %v1257_v38, %v1265_v39 }
  0xd1   : > { %4285 = vmatpush3.bf16.msra.mxu0 %v4842_v16  ;;  %v4859_v33 = vld [vmem:[%s5608_s15 + $0xb0] sm:$0xff]   ;;  %v4863_v41 = vld [vmem:[%s5608_s15 + $0xb8] sm:$0xff]   ;;  %v4865_v45 = vld [vmem:[%s5608_s15 + $0x100] sm:$0xff]  }
  0xd2   : > { %4349 = vmatpush3.bf16.msra.mxu1 %v4843_v17  ;;  %4286 = vmatprep.subr.bf16.mxu0 %v4844_v18  ;;  %v4866_v47 = vld [vmem:[%s5608_s15 + $0x1c0] sm:$0xff]   ;;  %v4868_v50 = vld [vmem:[%s5608_s15 + $0x148] sm:$0xff]   ;;  %v4872_v62 = vld [vmem:[%s5608_s15 + $0x150] sm:$0xff]  }
  0xd3   : > { %4350 = vmatprep.subr.bf16.mxu1 %v4845_v19  ;;  %v4867_v49 = vld [vmem:[%s5608_s15 + $0x180] sm:$0xff]   ;;  %v4869_v52 = vld [vmem:[%s5608_s15 + $0x108] sm:$0xff]   ;;  %v4873_v63 = vld [vmem:[%s5608_s15 + $0x110] sm:$0xff]  }
  0xd4   : > { %v1272_v51 = vld [vmem:[%s6315_s0 + $0x100] sm:$0xff]  ;;  %v4870_v53 = vld [vmem:[%s5608_s15 + $0x1c8] sm:$0xff]   ;;  %v4874_v0 = vld [vmem:[%s5608_s15 + $0x1d0] sm:$0xff]  }
  0xd5   : > { %4287 = vmatpush3.bf16.msra.mxu0 %v4846_v20  ;;  %v4871_v55 = vld [vmem:[%s5608_s15 + $0x188] sm:$0xff]   ;;  %v1280_v57 = vld [vmem:[%s6315_s0 + $0x140] sm:$0xff]  ;;  %v4875_v1 = vld [vmem:[%s5608_s15 + $0x190] sm:$0xff]  }
  0xd6   : > { %4351 = vmatpush3.bf16.msra.mxu1 %v4847_v21  ;;  %4288 = vmatprep.subr.bf16.mxu0 %v4848_v22  ;;  %v1273_v58 = vld [vmem:[%s6315_s0 + $0x108] sm:$0xff]  ;;  %v4053_v60 = vcombine.high %v1272_v51, %v1280_v57  ;;  %v1288_v2 = vld [vmem:[%s6315_s0 + $0x180] sm:$0xff]  ;;  %v4052_v6 = vcombine.low %v1272_v51, %v1280_v57  ;;  %v4876_v7 = vld [vmem:[%s5608_s15 + $0x158] sm:$0xff]  }
  0xd7   : > { %4352 = vmatprep.subr.bf16.mxu1 %v4849_v23  ;;  %v1281_v59 = vld [vmem:[%s6315_s0 + $0x148] sm:$0xff]  ;;  %v1296_v3 = vld [vmem:[%s6315_s0 + $0x1c0] sm:$0xff]  ;;  %v4877_v10 = vld [vmem:[%s5608_s15 + $0x118] sm:$0xff]  }
  0xd8   : > { %v4055_v61 = vcombine.high %v1273_v58, %v1281_v59  ;;  %v1289_v4 = vld [vmem:[%s6315_s0 + $0x188] sm:$0xff]  ;;  %v4054_v8 = vcombine.low %v1273_v58, %v1281_v59  ;;  %v4069_v9 = vcombine.high %v1288_v2, %v1296_v3  ;;  %v4878_v12 = vld [vmem:[%s5608_s15 + $0x1d8] sm:$0xff]   ;;  %v1304_v14 = vld [vmem:[%s6315_s0 + $0x200] sm:$0xff]  ;;  %v4068_v21 = vcombine.low %v1288_v2, %v1296_v3 }
  0xd9   : > { %4289 = vmatpush3.bf16.msra.mxu0 %v4850_v24  ;;  %v1297_v5 = vld [vmem:[%s6315_s0 + $0x1c8] sm:$0xff]  ;;  %v4879_v13 = vld [vmem:[%s5608_s15 + $0x198] sm:$0xff]   ;;  %v1312_v15 = vld [vmem:[%s6315_s0 + $0x240] sm:$0xff] }
  0xda   : > { %4353 = vmatpush3.bf16.msra.mxu1 %v4851_v25  ;;  %4290 = vmatprep.subr.bf16.mxu0 %v4852_v26  ;;  %v4071_v11 = vcombine.high %v1289_v4, %v1297_v5  ;;  %v1305_v16 = vld [vmem:[%s6315_s0 + $0x208] sm:$0xff]  ;;  %v4880_v18 = vld [vmem:[%s5608_s15 + $0x160] sm:$0xff]   ;;  %v4070_v23 = vcombine.low %v1289_v4, %v1297_v5  ;;  %v4085_v24 = vcombine.high %v1304_v14, %v1312_v15  ;;  %v4888_v35 = vld [vmem:[%s5608_s15 + $0x170] sm:$0xff]  }
  0xdb   : > { %4354 = vmatprep.subr.bf16.mxu1 %v4853_v27  ;;  %v1313_v17 = vld [vmem:[%s6315_s0 + $0x248] sm:$0xff]  ;;  %v4881_v19 = vld [vmem:[%s5608_s15 + $0x120] sm:$0xff]   ;;  %v4889_v38 = vld [vmem:[%s5608_s15 + $0x130] sm:$0xff]  }
  0xdc   : > { %v4882_v20 = vld [vmem:[%s5608_s15 + $0x1e0] sm:$0xff]   ;;  %v4087_v25 = vcombine.high %v1305_v16, %v1313_v17  ;;  %v4884_v26 = vld [vmem:[%s5608_s15 + $0x168] sm:$0xff]   ;;  %v4086_v36 = vcombine.low %v1305_v16, %v1313_v17  ;;  %v1243_v2 = vld [vmem:[%s6315_s0 + $0x18] sm:$0xff] }
  0xdd   : > { %4291 = vmatpush3.bf16.msra.mxu0 %v4854_v28  ;;  %v4883_v22 = vld [vmem:[%s5608_s15 + $0x1a0] sm:$0xff]   ;;  %v4885_v27 = vld [vmem:[%s5608_s15 + $0x128] sm:$0xff]   ;;  %v1251_v3 = vld [vmem:[%s6315_s0 + $0x58] sm:$0xff] }
  0xde   : > { %4355 = vmatpush3.bf16.msra.mxu1 %v4855_v29  ;;  %4292 = vmatprep.subr.bf16.mxu0 %v4856_v30  ;;  %v4886_v28 = vld [vmem:[%s5608_s15 + $0x1e8] sm:$0xff]   ;;  %v1320_v30 = vld [vmem:[%s6315_s0 + $0x280] sm:$0xff] }
  0xdf   : > { %4356 = vmatprep.subr.bf16.mxu1 %v4857_v31  ;;  %v4887_v29 = vld [vmem:[%s5608_s15 + $0x1a8] sm:$0xff]   ;;  %v1328_v31 = vld [vmem:[%s6315_s0 + $0x2c0] sm:$0xff] }
  0xe0   : > { %v1360_v57 = vld [vmem:[%s6315_s0 + $0x3c0] sm:$0xff]  ;;  %v1353_v58 = vld [vmem:[%s6315_s0 + $0x388] sm:$0xff] }
  0xe1   : > { %4293 = vmatpush3.bf16.msra.mxu0 %v4858_v32  ;;  %v1321_v32 = vld [vmem:[%s6315_s0 + $0x288] sm:$0xff] }
  0xe2   : > { %4357 = vmatpush3.bf16.msra.mxu1 %v4859_v33  ;;  %4294 = vmatprep.subr.bf16.mxu0 %v4860_v34  ;;  %v1329_v33 = vld [vmem:[%s6315_s0 + $0x2c8] sm:$0xff]  ;;  %v4084_v34 = vcombine.low %v1304_v14, %v1312_v15  ;;  %v4897_v14 = vld [vmem:[%s5608_s15 + $0x200] sm:$0xff]  }
  0xe3   : > { %4358 = vmatprep.subr.bf16.mxu1 %v4861_v37  ;;  %v4101_v37 = vcombine.high %v1320_v30, %v1328_v31  ;;  %v4103_v39 = vcombine.high %v1321_v32, %v1329_v33  ;;  %v4102_v51 = vcombine.low %v1321_v32, %v1329_v33  ;;  %v1361_v59 = vld [vmem:[%s6315_s0 + $0x3c8] sm:$0xff]  ;;  %v4899_v15 = vld [vmem:[%s5608_s15 + $0x280] sm:$0xff]   ;;  %v4907_v33 = vld [vmem:[%s5608_s15 + $0x290] sm:$0xff]  }
  0xe4   : > { %v4134_v5 = vcombine.low %v1353_v58, %v1361_v59 }
  0xe5   : > { %4295 = vmatpush3.bf16.msra.mxu0 %v4862_v40  ;;  %v4890_v40 = vld [vmem:[%s5608_s15 + $0x1f0] sm:$0xff]  }
  0xe6   : > { %4359 = vmatpush3.bf16.msra.mxu1 %v4863_v41  ;;  %4408 = vmatprep.subr.bf16.mxu0 %v4864_v44  ;;  %v4891_v41 = vld [vmem:[%s5608_s15 + $0x1b0] sm:$0xff]   ;;  %v1337_v44 = vld [vmem:[%s6315_s0 + $0x308] sm:$0xff] }
  0xe7   : > { %4472 = vmatprep.subr.bf16.mxu1 %v4866_v47  ;;  %v4893_v47 = vld [vmem:[%s5608_s15 + $0x138] sm:$0xff]  }
  0xe8   : > { %3065 = vmatmul.mubr.bf16.vlgmr.msra.gmra.mrb[0].mxu0 %v4020_v42  ;;  %v1336_v42 = vld [vmem:[%s6315_s0 + $0x300] sm:$0xff] }
  0xe9   : > { %3162 = vmatmul.mubr.bf16.vlgmr.msra.gmra.mrb[0].mxu1 %v4022_v43  ;;  %4409 = vmatpush3.bf16.msra.mxu0 %v4865_v45  ;;  %v1344_v43 = vld [vmem:[%s6315_s0 + $0x340] sm:$0xff]  ;;  %v1345_v45 = vld [vmem:[%s6315_s0 + $0x348] sm:$0xff] }
  0xea   : > { %3072 = vmatprep.mubr.bf16.mxu0 %v4037_v46  ;;  %4473 = vmatpush3.bf16.msra.mxu1 %v4867_v49  ;;  %v4892_v46 = vld [vmem:[%s5608_s15 + $0x178] sm:$0xff]   ;;  %v4100_v49 = vcombine.low %v1320_v30, %v1328_v31  ;;  %v4905_v31 = vld [vmem:[%s5608_s15 + $0x210] sm:$0xff]  }
  0xeb   : > { %3169 = vmatprep.mubr.bf16.mxu1 %v4039_v48  ;;  %4410 = vmatprep.subr.bf16.mxu0 %v4868_v50  ;;  %v4894_v48 = vld [vmem:[%s5608_s15 + $0x1f8] sm:$0xff]  }
  0xec   : > { %4474 = vmatprep.subr.bf16.mxu1 %v4870_v53  ;;  %v4895_v50 = vld [vmem:[%s5608_s15 + $0x1b8] sm:$0xff]   ;;  %v4119_v53 = vcombine.high %v1337_v44, %v1345_v45 }
  0xed   : > { %4411 = vmatpush3.bf16.msra.mxu0 %v4869_v52  ;;  %v4117_v52 = vcombine.high %v1336_v42, %v1344_v43 }
  0xee   : > { %4475 = vmatpush3.bf16.msra.mxu1 %v4871_v55  ;;  %4412 = vmatprep.subr.bf16.mxu0 %v4872_v62  ;;  %v4898_v55 = vld [vmem:[%s5608_s15 + $0x2c0] sm:$0xff]  }
  0xef   : > { %4476 = vmatprep.subr.bf16.mxu1 %v4874_v0  ;;  %v1242_v0 = vld [vmem:[%s6315_s0 + $0x10] sm:$0xff] }
  0xf0   : > { %3073 = vmatmul.mubr.bf16.gmra.mrb[4].mxu0 %v4036_v54  ;;  %v4896_v54 = vld [vmem:[%s5608_s15 + $0x240] sm:$0xff]  }
  0xf1   : > { %3170 = vmatmul.mubr.bf16.gmra.mrb[4].mxu1 %v4038_v56  ;;  %3080 = vmatprep.mubr.bf16.mxu0 %v4053_v60  ;;  %v1352_v56 = vld [vmem:[%s6315_s0 + $0x380] sm:$0xff]  ;;  %v4116_v60 = vcombine.low %v1336_v42, %v1344_v43 }
  0xf2   : > { %3177 = vmatprep.mubr.bf16.mxu1 %v4055_v61  ;;  %4413 = vmatpush3.bf16.msra.mxu0 %v4873_v63  ;;  %v4118_v61 = vcombine.low %v1337_v44, %v1345_v45  ;;  %v4133_v62 = vcombine.high %v1352_v56, %v1360_v57  ;;  %v4135_v63 = vcombine.high %v1353_v58, %v1361_v59  ;;  %v4912_v42 = vld [vmem:[%s5608_s15 + $0x260] sm:$0xff]   ;;  %v4920_v58 = vld [vmem:[%s5608_s15 + $0x270] sm:$0xff]  }
  0xf3   : > { %4477 = vmatpush3.bf16.msra.mxu1 %v4875_v1  ;;  %4414 = vmatprep.subr.bf16.mxu0 %v4876_v7  ;;  %v1250_v1 = vld [vmem:[%s6315_s0 + $0x50] sm:$0xff]  ;;  %v4132_v4 = vcombine.low %v1352_v56, %v1360_v57  ;;  %v4027_v7 = vcombine.high %v1243_v2, %v1251_v3  ;;  %v4914_v44 = vld [vmem:[%s5608_s15 + $0x2e0] sm:$0xff]   ;;  %v4917_v56 = vld [vmem:[%s5608_s15 + $0x228] sm:$0xff]  }
  0xf4   : > { %4478 = vmatprep.subr.bf16.mxu1 %v4878_v12  ;;  %v1267_v12 = vld [vmem:[%s6315_s0 + $0xd8] sm:$0xff]  ;;  %v4919_v57 = vld [vmem:[%s5608_s15 + $0x2a8] sm:$0xff]  }
  0xf6   : > { %4415 = vmatpush3.bf16.msra.mxu0 %v4877_v10  ;;  %v1259_v10 = vld [vmem:[%s6315_s0 + $0x98] sm:$0xff] }
  0xf7   : > { %4479 = vmatpush3.bf16.msra.mxu1 %v4879_v13  ;;  %4416 = vmatprep.subr.bf16.mxu0 %v4880_v18  ;;  %v4026_v13 = vcombine.low %v1243_v2, %v1251_v3  ;;  %v4043_v17 = vcombine.high %v1259_v10, %v1267_v12  ;;  %v4900_v18 = vld [vmem:[%s5608_s15 + $0x248] sm:$0xff]   ;;  %v4924_v2 = vld [vmem:[%s5608_s15 + $0x278] sm:$0xff]   ;;  %v1322_v3 = vld [vmem:[%s6315_s0 + $0x290] sm:$0xff] }
  0xf8   : > { %3081 = vmatmul.mubr.bf16.gmra.mrb[8].mxu0 %v4052_v6  ;;  %4480 = vmatprep.subr.bf16.mxu1 %v4882_v20  ;;  %v4025_v6 = vcombine.high %v1242_v0, %v1250_v1  ;;  %v4902_v20 = vld [vmem:[%s5608_s15 + $0x2c8] sm:$0xff]  }
  0xf9   : > { %3178 = vmatmul.mubr.bf16.gmra.mrb[8].mxu1 %v4054_v8  ;;  %3088 = vmatprep.mubr.bf16.mxu0 %v4069_v9  ;;  %v1258_v8 = vld [vmem:[%s6315_s0 + $0x90] sm:$0xff] }
  0xfa   : > { %3185 = vmatprep.mubr.bf16.mxu1 %v4071_v11  ;;  %4417 = vmatpush3.bf16.msra.mxu0 %v4881_v19  ;;  %v1266_v9 = vld [vmem:[%s6315_s0 + $0xd0] sm:$0xff]  ;;  %v4024_v11 = vcombine.low %v1242_v0, %v1250_v1  ;;  %v4901_v19 = vld [vmem:[%s5608_s15 + $0x208] sm:$0xff]  }
  0xfb   : > { %4481 = vmatpush3.bf16.msra.mxu1 %v4883_v22  ;;  %4418 = vmatprep.subr.bf16.mxu0 %v4884_v26  ;;  %v4041_v16 = vcombine.high %v1258_v8, %v1266_v9  ;;  %v1274_v22 = vld [vmem:[%s6315_s0 + $0x110] sm:$0xff] }
  0xfc   : > { %4482 = vmatprep.subr.bf16.mxu1 %v4886_v28  ;;  %v4904_v26 = vld [vmem:[%s5608_s15 + $0x250] sm:$0xff]   ;;  %v4040_v28 = vcombine.low %v1258_v8, %v1266_v9  ;;  %v4925_v8 = vld [vmem:[%s5608_s15 + $0x238] sm:$0xff]  }
  0xfd   : > { %v4923_v1 = vld [vmem:[%s5608_s15 + $0x2b0] sm:$0xff]   ;;  %v4927_v9 = vld [vmem:[%s5608_s15 + $0x2b8] sm:$0xff]  }
  0xfe   : > { %4419 = vmatpush3.bf16.msra.mxu0 %v4885_v27  ;;  %v4906_v27 = vld [vmem:[%s5608_s15 + $0x2d0] sm:$0xff]  }
  0xff   : > { %4483 = vmatpush3.bf16.msra.mxu1 %v4887_v29  ;;  %4420 = vmatprep.subr.bf16.mxu0 %v4888_v35  ;;  %v4042_v29 = vcombine.low %v1259_v10, %v1267_v12  ;;  %v1290_v35 = vld [vmem:[%s6315_s0 + $0x190] sm:$0xff]  ;;  %v4928_v10 = vld [vmem:[%s5608_s15 + $0x340] sm:$0xff]  }
 0x100   : > { %3089 = vmatmul.mubr.bf16.gmra.mrb[12].mxu0 %v4068_v21  ;;  %4484 = vmatprep.subr.bf16.mxu1 %v4890_v40  ;;  %v4903_v21 = vld [vmem:[%s5608_s15 + $0x288] sm:$0xff]   ;;  %v4909_v40 = vld [vmem:[%s5608_s15 + $0x218] sm:$0xff]   ;;  %v4930_v12 = vld [vmem:[%s5608_s15 + $0x3c0] sm:$0xff]  }
 0x101   : > { %3186 = vmatmul.mubr.bf16.gmra.mrb[12].mxu1 %v4070_v23  ;;  %3096 = vmatprep.mubr.bf16.mxu0 %v4085_v24  ;;  %v1282_v23 = vld [vmem:[%s6315_s0 + $0x150] sm:$0xff]  ;;  %v1275_v24 = vld [vmem:[%s6315_s0 + $0x118] sm:$0xff] }
 0x102   : > { %3193 = vmatprep.mubr.bf16.mxu1 %v4087_v25  ;;  %4421 = vmatpush3.bf16.msra.mxu0 %v4889_v38  ;;  %v1283_v25 = vld [vmem:[%s6315_s0 + $0x158] sm:$0xff]  ;;  %v4057_v30 = vcombine.high %v1274_v22, %v1282_v23  ;;  %v4056_v43 = vcombine.low %v1274_v22, %v1282_v23 }
 0x103   : > { %4485 = vmatpush3.bf16.msra.mxu1 %v4891_v41  ;;  %4422 = vmatprep.subr.bf16.mxu0 %v4892_v46  ;;  %v4059_v32 = vcombine.high %v1275_v24, %v1283_v25  ;;  %v1291_v38 = vld [vmem:[%s6315_s0 + $0x198] sm:$0xff]  ;;  %v4058_v45 = vcombine.low %v1275_v24, %v1283_v25  ;;  %v1354_v24 = vld [vmem:[%s6315_s0 + $0x390] sm:$0xff] }
 0x104   : > { %4486 = vmatprep.subr.bf16.mxu1 %v4894_v48  ;;  %v4911_v41 = vld [vmem:[%s5608_s15 + $0x298] sm:$0xff]   ;;  %v4913_v48 = vld [vmem:[%s5608_s15 + $0x220] sm:$0xff]   ;;  %v1362_v25 = vld [vmem:[%s6315_s0 + $0x3d0] sm:$0xff] }
 0x106   : > { %4423 = vmatpush3.bf16.msra.mxu0 %v4893_v47 }
 0x107   : > { %4487 = vmatpush3.bf16.msra.mxu1 %v4895_v50  ;;  %4536 = vmatprep.subr.bf16.mxu0 %v4896_v54  ;;  %v4916_v50 = vld [vmem:[%s5608_s15 + $0x268] sm:$0xff]   ;;  %v1307_v54 = vld [vmem:[%s6315_s0 + $0x218] sm:$0xff] }
 0x108   : > { %3097 = vmatmul.mubr.bf16.gmra.mrb[16].mxu0 %v4084_v34  ;;  %4600 = vmatprep.subr.bf16.mxu1 %v4898_v55  ;;  %v4908_v34 = vld [vmem:[%s5608_s15 + $0x258] sm:$0xff]  }
 0x109   : > { %3194 = vmatmul.mubr.bf16.gmra.mrb[16].mxu1 %v4086_v36  ;;  %3104 = vmatprep.mubr.bf16.mxu0 %v4101_v37  ;;  %v1298_v36 = vld [vmem:[%s6315_s0 + $0x1d0] sm:$0xff]  ;;  %v4910_v37 = vld [vmem:[%s5608_s15 + $0x2d8] sm:$0xff]  }
 0x10a   : > { %3201 = vmatprep.mubr.bf16.mxu1 %v4103_v39  ;;  %v1299_v39 = vld [vmem:[%s6315_s0 + $0x1d8] sm:$0xff]  ;;  %v4073_v46 = vcombine.high %v1290_v35, %v1298_v36  ;;  %v4072_v59 = vcombine.low %v1290_v35, %v1298_v36  ;;  %v1253_v35 = vld [vmem:[%s6315_s0 + $0x68] sm:$0xff]  ;;  %v4136_v36 = vcombine.low %v1354_v24, %v1362_v25 }
 0x10b   : > { %v4075_v47 = vcombine.high %v1291_v38, %v1299_v39  ;;  %v1315_v55 = vld [vmem:[%s6315_s0 + $0x258] sm:$0xff] }
 0x10c   : > { %v4091_v0 = vcombine.high %v1307_v54, %v1315_v55 }
 0x110   : > { %3105 = vmatmul.mubr.bf16.gmra.mrb[20].mxu0 %v4100_v49  ;;  %v4915_v49 = vld [vmem:[%s5608_s15 + $0x2a0] sm:$0xff]  }
 0x111   : > { %3202 = vmatmul.mubr.bf16.gmra.mrb[20].mxu1 %v4102_v51  ;;  %3112 = vmatprep.mubr.bf16.mxu0 %v4117_v52  ;;  %v1306_v51 = vld [vmem:[%s6315_s0 + $0x210] sm:$0xff] }
 0x112   : > { %3209 = vmatprep.mubr.bf16.mxu1 %v4119_v53  ;;  %v1314_v52 = vld [vmem:[%s6315_s0 + $0x250] sm:$0xff]  ;;  %v4918_v53 = vld [vmem:[%s5608_s15 + $0x2e8] sm:$0xff]  }
 0x118   : > { %3113 = vmatmul.mubr.bf16.gmra.mrb[24].mxu0 %v4116_v60  ;;  %v4922_v60 = vld [vmem:[%s5608_s15 + $0x2f0] sm:$0xff]  }
 0x119   : > { %3210 = vmatmul.mubr.bf16.gmra.mrb[24].mxu1 %v4118_v61  ;;  %3120 = vmatprep.mubr.bf16.mxu0 %v4133_v62  ;;  %v4074_v61 = vcombine.low %v1291_v38, %v1299_v39  ;;  %v4089_v62 = vcombine.high %v1306_v51, %v1314_v52 }
 0x11a   : > { %3217 = vmatprep.mubr.bf16.mxu1 %v4135_v63  ;;  %v4921_v63 = vld [vmem:[%s5608_s15 + $0x230] sm:$0xff]  }
 0x120   : > { %3121 = vmatmul.mubr.bf16.gmra.mrb[28].mxu0 %v4132_v4  ;;  %v1330_v4 = vld [vmem:[%s6315_s0 + $0x2d0] sm:$0xff] }
 0x121   : > { %3218 = vmatmul.mubr.bf16.gmra.mrb[28].mxu1 %v4134_v5  ;;  %3258 = vmatprep.mubr.bf16.mxu0 %v4025_v6  ;;  %v4926_v5 = vld [vmem:[%s5608_s15 + $0x2f8] sm:$0xff]  }
 0x122   : > { %3355 = vmatprep.mubr.bf16.mxu1 %v4027_v7  ;;  %v1323_v6 = vld [vmem:[%s6315_s0 + $0x298] sm:$0xff] }
 0x123   : > { %v1331_v7 = vld [vmem:[%s6315_s0 + $0x2d8] sm:$0xff] }
 0x128   : > { %3259 = vmatmul.mubr.bf16.vlgmr.msra.gmra.mrb[32].mxu0 %v4024_v11  ;;  %v4088_v11 = vcombine.low %v1306_v51, %v1314_v52  ;;  %v4934_v51 = vld [vmem:[%s5608_s15 + $0x3c8] sm:$0xff]  }
 0x129   : > { %3356 = vmatmul.mubr.bf16.vlgmr.msra.gmra.mrb[32].mxu1 %v4026_v13  ;;  %4537 = vmatpush3.bf16.msra.mxu0 %v4897_v14  ;;  %v4090_v13 = vcombine.low %v1307_v54, %v1315_v55  ;;  %v4105_v14 = vcombine.high %v1322_v3, %v1330_v4  ;;  %v4933_v52 = vld [vmem:[%s5608_s15 + $0x308] sm:$0xff]   ;;  %v1276_v54 = vld [vmem:[%s6315_s0 + $0x120] sm:$0xff] }
 0x12a   : > { %4601 = vmatpush3.bf16.msra.mxu1 %v4899_v15  ;;  %3266 = vmatprep.mubr.bf16.mxu0 %v4041_v16  ;;  %v4107_v15 = vcombine.high %v1323_v6, %v1331_v7  ;;  %v1338_v16 = vld [vmem:[%s6315_s0 + $0x310] sm:$0xff]  ;;  %v1284_v55 = vld [vmem:[%s6315_s0 + $0x160] sm:$0xff] }
 0x12b   : > { %3363 = vmatprep.mubr.bf16.mxu1 %v4043_v17  ;;  %4538 = vmatprep.subr.bf16.mxu0 %v4900_v18  ;;  %v1346_v17 = vld [vmem:[%s6315_s0 + $0x350] sm:$0xff]  ;;  %v1339_v18 = vld [vmem:[%s6315_s0 + $0x318] sm:$0xff] }
 0x12c   : > { %4602 = vmatprep.subr.bf16.mxu1 %v4902_v20  ;;  %v4104_v20 = vcombine.low %v1322_v3, %v1330_v4  ;;  %v4121_v22 = vcombine.high %v1338_v16, %v1346_v17  ;;  %v4942_v3 = vld [vmem:[%s5608_s15 + $0x3d8] sm:$0xff]   ;;  %v1292_v4 = vld [vmem:[%s6315_s0 + $0x1a0] sm:$0xff] }
 0x12d   : > { %4539 = vmatpush3.bf16.msra.mxu0 %v4901_v19  ;;  %v1347_v19 = vld [vmem:[%s6315_s0 + $0x358] sm:$0xff] }
 0x12e   : > { %4603 = vmatpush3.bf16.msra.mxu1 %v4903_v21  ;;  %4540 = vmatprep.subr.bf16.mxu0 %v4904_v26  ;;  %v4106_v21 = vcombine.low %v1323_v6, %v1331_v7  ;;  %v4123_v23 = vcombine.high %v1339_v18, %v1347_v19  ;;  %v1355_v26 = vld [vmem:[%s6315_s0 + $0x398] sm:$0xff]  ;;  %v1293_v6 = vld [vmem:[%s6315_s0 + $0x1a8] sm:$0xff] }
 0x12f   : > { %4604 = vmatprep.subr.bf16.mxu1 %v4906_v27  ;;  %v1363_v27 = vld [vmem:[%s6315_s0 + $0x3d8] sm:$0xff] }
 0x130   : > { %3267 = vmatmul.mubr.bf16.gmra.mrb[36].mxu0 %v4040_v28  ;;  %v4120_v28 = vcombine.low %v1338_v16, %v1346_v17  ;;  %v4941_v7 = vld [vmem:[%s5608_s15 + $0x318] sm:$0xff]   ;;  %v4945_v16 = vld [vmem:[%s5608_s15 + $0x320] sm:$0xff]  }
 0x131   : > { %3364 = vmatmul.mubr.bf16.gmra.mrb[36].mxu1 %v4042_v29  ;;  %3274 = vmatprep.mubr.bf16.mxu0 %v4057_v30  ;;  %v4122_v29 = vcombine.low %v1339_v18, %v1347_v19  ;;  %v4137_v30 = vcombine.high %v1354_v24, %v1362_v25  ;;  %v4947_v17 = vld [vmem:[%s5608_s15 + $0x3a0] sm:$0xff]   ;;  %v4948_v18 = vld [vmem:[%s5608_s15 + $0x368] sm:$0xff]  }
 0x132   : > { %3371 = vmatprep.mubr.bf16.mxu1 %v4059_v32  ;;  %4541 = vmatpush3.bf16.msra.mxu0 %v4905_v31  ;;  %v4139_v31 = vcombine.high %v1355_v26, %v1363_v27  ;;  %v1244_v32 = vld [vmem:[%s6315_s0 + $0x20] sm:$0xff]  ;;  %v4950_v19 = vld [vmem:[%s5608_s15 + $0x3e8] sm:$0xff]  }
 0x133   : > { %4605 = vmatpush3.bf16.msra.mxu1 %v4907_v33  ;;  %4542 = vmatprep.subr.bf16.mxu0 %v4908_v34  ;;  %v1252_v33 = vld [vmem:[%s6315_s0 + $0x60] sm:$0xff]  ;;  %v1245_v34 = vld [vmem:[%s6315_s0 + $0x28] sm:$0xff] }
 0x134   : > { %4606 = vmatprep.subr.bf16.mxu1 %v4910_v37  ;;  %v4138_v37 = vcombine.low %v1355_v26, %v1363_v27  ;;  %v4029_v38 = vcombine.high %v1244_v32, %v1252_v33  ;;  %v4031_v39 = vcombine.high %v1245_v34, %v1253_v35  ;;  %v1317_v24 = vld [vmem:[%s6315_s0 + $0x268] sm:$0xff]  ;;  %v4952_v26 = vld [vmem:[%s5608_s15 + $0x370] sm:$0xff]  }
 0x135   : > { %v4951_v25 = vld [vmem:[%s5608_s15 + $0x3a8] sm:$0xff]  }
 0x136   : > { %4543 = vmatpush3.bf16.msra.mxu0 %v4909_v40  ;;  %v1260_v40 = vld [vmem:[%s6315_s0 + $0xa0] sm:$0xff] }
 0x137   : > { %4607 = vmatpush3.bf16.msra.mxu1 %v4911_v41  ;;  %4544 = vmatprep.subr.bf16.mxu0 %v4912_v42  ;;  %v1268_v41 = vld [vmem:[%s6315_s0 + $0xe0] sm:$0xff]  ;;  %v4028_v42 = vcombine.low %v1244_v32, %v1252_v33  ;;  %v4953_v32 = vld [vmem:[%s5608_s15 + $0x330] sm:$0xff]  }
 0x138   : > { %3275 = vmatmul.mubr.bf16.gmra.mrb[40].mxu0 %v4056_v43  ;;  %4608 = vmatprep.subr.bf16.mxu1 %v4914_v44  ;;  %v1261_v43 = vld [vmem:[%s6315_s0 + $0xa8] sm:$0xff]  ;;  %v4955_v33 = vld [vmem:[%s5608_s15 + $0x3b0] sm:$0xff]  }
 0x139   : > { %3372 = vmatmul.mubr.bf16.gmra.mrb[40].mxu1 %v4058_v45  ;;  %3282 = vmatprep.mubr.bf16.mxu0 %v4073_v46  ;;  %v1269_v44 = vld [vmem:[%s6315_s0 + $0xe8] sm:$0xff]  ;;  %v4030_v45 = vcombine.low %v1245_v34, %v1253_v35  ;;  %v4929_v46 = vld [vmem:[%s5608_s15 + $0x300] sm:$0xff]   ;;  %v4956_v34 = vld [vmem:[%s5608_s15 + $0x378] sm:$0xff]  }
 0x13a   : > { %3379 = vmatprep.mubr.bf16.mxu1 %v4075_v47  ;;  %4545 = vmatpush3.bf16.msra.mxu0 %v4913_v48  ;;  %v4931_v47 = vld [vmem:[%s5608_s15 + $0x380] sm:$0xff]   ;;  %v4045_v48 = vcombine.high %v1260_v40, %v1268_v41  ;;  %v4958_v35 = vld [vmem:[%s5608_s15 + $0x3f8] sm:$0xff]  }
 0x13b   : > { %4609 = vmatpush3.bf16.msra.mxu1 %v4915_v49  ;;  %4546 = vmatprep.subr.bf16.mxu0 %v4916_v50  ;;  %v4047_v49 = vcombine.high %v1261_v43, %v1269_v44  ;;  %v4932_v50 = vld [vmem:[%s5608_s15 + $0x348] sm:$0xff]  }
 0x13c   : > { %4610 = vmatprep.subr.bf16.mxu1 %v4918_v53  ;;  %v4935_v53 = vld [vmem:[%s5608_s15 + $0x388] sm:$0xff]  }
 0x13e   : > { %4547 = vmatpush3.bf16.msra.mxu0 %v4917_v56  ;;  %v4936_v56 = vld [vmem:[%s5608_s15 + $0x350] sm:$0xff]  }
 0x13f   : > { %4611 = vmatpush3.bf16.msra.mxu1 %v4919_v57  ;;  %4548 = vmatprep.subr.bf16.mxu0 %v4920_v58  ;;  %v1277_v57 = vld [vmem:[%s6315_s0 + $0x128] sm:$0xff] }
 0x140   : > { %3283 = vmatmul.mubr.bf16.gmra.mrb[44].mxu0 %v4072_v59  ;;  %4612 = vmatprep.subr.bf16.mxu1 %v4922_v60  ;;  %v1285_v58 = vld [vmem:[%s6315_s0 + $0x168] sm:$0xff]  ;;  %v4938_v59 = vld [vmem:[%s5608_s15 + $0x3d0] sm:$0xff]   ;;  %v4044_v60 = vcombine.low %v1260_v40, %v1268_v41  ;;  %v4959_v41 = vld [vmem:[%s5608_s15 + $0x3b8] sm:$0xff]  }
 0x141   : > { %3380 = vmatmul.mubr.bf16.gmra.mrb[44].mxu1 %v4074_v61  ;;  %3290 = vmatprep.mubr.bf16.mxu0 %v4089_v62  ;;  %v4046_v61 = vcombine.low %v1261_v43, %v1269_v44  ;;  %v4061_v62 = vcombine.high %v1276_v54, %v1284_v55  ;;  %v1333_v40 = vld [vmem:[%s6315_s0 + $0x2e8] sm:$0xff] }
 0x142   : > { %3387 = vmatprep.mubr.bf16.mxu1 %v4091_v0  ;;  %4549 = vmatpush3.bf16.msra.mxu0 %v4921_v63  ;;  %v4063_v63 = vcombine.high %v1277_v57, %v1285_v58  ;;  %v4937_v0 = vld [vmem:[%s5608_s15 + $0x310] sm:$0xff]  }
 0x143   : > { %4613 = vmatpush3.bf16.msra.mxu1 %v4923_v1  ;;  %4550 = vmatprep.subr.bf16.mxu0 %v4924_v2  ;;  %v4939_v1 = vld [vmem:[%s5608_s15 + $0x390] sm:$0xff]   ;;  %v4940_v2 = vld [vmem:[%s5608_s15 + $0x358] sm:$0xff]  }
 0x144   : > { %4614 = vmatprep.subr.bf16.mxu1 %v4926_v5  ;;  %v1300_v5 = vld [vmem:[%s6315_s0 + $0x1e0] sm:$0xff] }
 0x145   : > { %v4076_v27 = vcombine.low %v1292_v4, %v1300_v5 }
 0x146   : > { %4551 = vmatpush3.bf16.msra.mxu0 %v4925_v8  ;;  %v1301_v8 = vld [vmem:[%s6315_s0 + $0x1e8] sm:$0xff] }
 0x147   : > { %4615 = vmatpush3.bf16.msra.mxu1 %v4927_v9  ;;  %4664 = vmatprep.subr.bf16.mxu0 %v4928_v10  ;;  %v4943_v9 = vld [vmem:[%s5608_s15 + $0x398] sm:$0xff]   ;;  %v4944_v10 = vld [vmem:[%s5608_s15 + $0x360] sm:$0xff]  }
 0x148   : > { %3291 = vmatmul.mubr.bf16.gmra.mrb[48].mxu0 %v4088_v11  ;;  %4728 = vmatprep.subr.bf16.mxu1 %v4930_v12  ;;  %v4060_v11 = vcombine.low %v1276_v54, %v1284_v55  ;;  %v4946_v12 = vld [vmem:[%s5608_s15 + $0x3e0] sm:$0xff]  }
 0x149   : > { %3388 = vmatmul.mubr.bf16.gmra.mrb[48].mxu1 %v4090_v13  ;;  %3298 = vmatprep.mubr.bf16.mxu0 %v4105_v14  ;;  %v4062_v13 = vcombine.low %v1277_v57, %v1285_v58  ;;  %v4077_v14 = vcombine.high %v1292_v4, %v1300_v5  ;;  %v1356_v54 = vld [vmem:[%s6315_s0 + $0x3a0] sm:$0xff]  ;;  %v1365_v57 = vld [vmem:[%s6315_s0 + $0x3e8] sm:$0xff] }
 0x14a   : > { %3395 = vmatprep.mubr.bf16.mxu1 %v4107_v15  ;;  %v4079_v15 = vcombine.high %v1293_v6, %v1301_v8  ;;  %v1364_v55 = vld [vmem:[%s6315_s0 + $0x3e0] sm:$0xff] }
 0x150   : > { %3299 = vmatmul.mubr.bf16.gmra.mrb[52].mxu0 %v4104_v20  ;;  %v1308_v20 = vld [vmem:[%s6315_s0 + $0x220] sm:$0xff] }
 0x151   : > { %3396 = vmatmul.mubr.bf16.gmra.mrb[52].mxu1 %v4106_v21  ;;  %3306 = vmatprep.mubr.bf16.mxu0 %v4121_v22  ;;  %v1316_v21 = vld [vmem:[%s6315_s0 + $0x260] sm:$0xff]  ;;  %v1309_v22 = vld [vmem:[%s6315_s0 + $0x228] sm:$0xff] }
 0x152   : > { %3403 = vmatprep.mubr.bf16.mxu1 %v4123_v23  ;;  %v4949_v23 = vld [vmem:[%s5608_s15 + $0x328] sm:$0xff]   ;;  %v4094_v43 = vcombine.low %v1309_v22, %v1317_v24 }
 0x158   : > { %3307 = vmatmul.mubr.bf16.gmra.mrb[56].mxu0 %v4120_v28  ;;  %v4954_v28 = vld [vmem:[%s5608_s15 + $0x3f0] sm:$0xff]  }
 0x159   : > { %3404 = vmatmul.mubr.bf16.gmra.mrb[56].mxu1 %v4122_v29  ;;  %3314 = vmatprep.mubr.bf16.mxu0 %v4137_v30  ;;  %v4078_v29 = vcombine.low %v1293_v6, %v1301_v8  ;;  %v4093_v30 = vcombine.high %v1308_v20, %v1316_v21  ;;  %v1262_v6 = vld [vmem:[%s6315_s0 + $0xb0] sm:$0xff]  ;;  %v1263_v8 = vld [vmem:[%s6315_s0 + $0xb8] sm:$0xff] }
 0x15a   : > { %3411 = vmatprep.mubr.bf16.mxu1 %v4139_v31  ;;  %v4095_v31 = vcombine.high %v1309_v22, %v1317_v24  ;;  %v1294_v22 = vld [vmem:[%s6315_s0 + $0x1b0] sm:$0xff]  ;;  %v1295_v24 = vld [vmem:[%s6315_s0 + $0x1b8] sm:$0xff] }
 0x160   : > { %3315 = vmatmul.mubr.bf16.gmra.mrb[60].mxu0 %v4136_v36  ;;  %v1324_v36 = vld [vmem:[%s6315_s0 + $0x2a0] sm:$0xff] }
 0x161   : > { %3412 = vmatmul.mubr.bf16.gmra.mrb[60].mxu1 %v4138_v37  ;;  %3452 = vmatprep.mubr.bf16.mxu0 %v4029_v38  ;;  %v1332_v37 = vld [vmem:[%s6315_s0 + $0x2e0] sm:$0xff]  ;;  %v4957_v38 = vld [vmem:[%s5608_s15 + $0x338] sm:$0xff]   ;;  %s4019_s15 = sshll.u32 %s1205_s27, 7 }
 0x162   : > { %3549 = vmatprep.mubr.bf16.mxu1 %v4031_v39  ;;  %v1325_v39 = vld [vmem:[%s6315_s0 + $0x2a8] sm:$0xff]  ;;  %v4109_v44 = vcombine.high %v1324_v36, %v1332_v37  ;;  %s6246_s29 = scalar_lea.vmem [#allocation3], %s4019_s15 }
 0x168   : > { %3453 = vmatmul.mubr.bf16.vlgmr.msra.gmra.mrb[64].mxu0 %v4028_v42  ;;  %v4092_v42 = vcombine.low %v1308_v20, %v1316_v21 }
 0x169   : > { %3550 = vmatmul.mubr.bf16.vlgmr.msra.gmra.mrb[64].mxu1 %v4030_v45  ;;  %4665 = vmatpush3.bf16.msra.mxu0 %v4929_v46  ;;  %v4111_v45 = vcombine.high %v1325_v39, %v1333_v40  ;;  %v1340_v46 = vld [vmem:[%s6315_s0 + $0x320] sm:$0xff] }
 0x16a   : > { %4729 = vmatpush3.bf16.msra.mxu1 %v4931_v47  ;;  %3460 = vmatprep.mubr.bf16.mxu0 %v4045_v48  ;;  %v1348_v47 = vld [vmem:[%s6315_s0 + $0x360] sm:$0xff]  ;;  %v1341_v48 = vld [vmem:[%s6315_s0 + $0x328] sm:$0xff] }
 0x16b   : > { %3557 = vmatprep.mubr.bf16.mxu1 %v4047_v49  ;;  %4666 = vmatprep.subr.bf16.mxu0 %v4932_v50  ;;  %v1349_v49 = vld [vmem:[%s6315_s0 + $0x368] sm:$0xff]  ;;  %v4108_v50 = vcombine.low %v1324_v36, %v1332_v37  ;;  %v4124_v58 = vcombine.low %v1340_v46, %v1348_v47 }
 0x16c   : > { %4730 = vmatprep.subr.bf16.mxu1 %v4934_v51  ;;  %v4110_v51 = vcombine.low %v1325_v39, %v1333_v40 }
 0x16d   : > { %4667 = vmatpush3.bf16.msra.mxu0 %v4933_v52  ;;  %v4125_v52 = vcombine.high %v1340_v46, %v1348_v47 }
 0x16e   : > { %4731 = vmatpush3.bf16.msra.mxu1 %v4935_v53  ;;  %4668 = vmatprep.subr.bf16.mxu0 %v4936_v56  ;;  %v4127_v53 = vcombine.high %v1341_v48, %v1349_v49  ;;  %v1357_v56 = vld [vmem:[%s6315_s0 + $0x3a8] sm:$0xff] }
 0x16f   : > { %4732 = vmatprep.subr.bf16.mxu1 %v4938_v59  ;;  %v4126_v59 = vcombine.low %v1341_v48, %v1349_v49 }
 0x170   : > { %3461 = vmatmul.mubr.bf16.gmra.mrb[68].mxu0 %v4044_v60  ;;  %v4141_v60 = vcombine.high %v1356_v54, %v1364_v55 }
 0x171   : > { %3558 = vmatmul.mubr.bf16.gmra.mrb[68].mxu1 %v4046_v61  ;;  %3468 = vmatprep.mubr.bf16.mxu0 %v4061_v62  ;;  %v4143_v61 = vcombine.high %v1357_v56, %v1365_v57  ;;  %v1246_v62 = vld [vmem:[%s6315_s0 + $0x30] sm:$0xff] }
 0x172   : > { %3565 = vmatprep.mubr.bf16.mxu1 %v4063_v63  ;;  %4669 = vmatpush3.bf16.msra.mxu0 %v4937_v0  ;;  %v1254_v63 = vld [vmem:[%s6315_s0 + $0x70] sm:$0xff]  ;;  %v1247_v0 = vld [vmem:[%s6315_s0 + $0x38] sm:$0xff] }
 0x173   : > { %4733 = vmatpush3.bf16.msra.mxu1 %v4939_v1  ;;  %4670 = vmatprep.subr.bf16.mxu0 %v4940_v2  ;;  %v1255_v1 = vld [vmem:[%s6315_s0 + $0x78] sm:$0xff]  ;;  %v4140_v2 = vcombine.low %v1356_v54, %v1364_v55  ;;  %v4033_v4 = vcombine.high %v1246_v62, %v1254_v63 }
 0x174   : > { %4734 = vmatprep.subr.bf16.mxu1 %v4942_v3  ;;  %v4142_v3 = vcombine.low %v1357_v56, %v1365_v57  ;;  %v4035_v5 = vcombine.high %v1247_v0, %v1255_v1  ;;  %v1327_v55 = vld [vmem:[%s6315_s0 + $0x2b8] sm:$0xff] }
 0x175   : > { %v1335_v56 = vld [vmem:[%s6315_s0 + $0x2f8] sm:$0xff] }
 0x176   : > { %4671 = vmatpush3.bf16.msra.mxu0 %v4941_v7  ;;  %v1270_v7 = vld [vmem:[%s6315_s0 + $0xf0] sm:$0xff] }
 0x177   : > { %4735 = vmatpush3.bf16.msra.mxu1 %v4943_v9  ;;  %4672 = vmatprep.subr.bf16.mxu0 %v4944_v10  ;;  %v1271_v9 = vld [vmem:[%s6315_s0 + $0xf8] sm:$0xff]  ;;  %v4032_v10 = vcombine.low %v1246_v62, %v1254_v63 }
 0x178   : > { %3469 = vmatmul.mubr.bf16.gmra.mrb[72].mxu0 %v4060_v11  ;;  %4736 = vmatprep.subr.bf16.mxu1 %v4946_v12  ;;  %v4034_v11 = vcombine.low %v1247_v0, %v1255_v1  ;;  %v4049_v12 = vcombine.high %v1262_v6, %v1270_v7 }
 0x179   : > { %3566 = vmatmul.mubr.bf16.gmra.mrb[72].mxu1 %v4062_v13  ;;  %3476 = vmatprep.mubr.bf16.mxu0 %v4077_v14  ;;  %v4051_v13 = vcombine.high %v1263_v8, %v1271_v9  ;;  %v1278_v14 = vld [vmem:[%s6315_s0 + $0x130] sm:$0xff] }
 0x17a   : > { %3573 = vmatprep.mubr.bf16.mxu1 %v4079_v15  ;;  %4673 = vmatpush3.bf16.msra.mxu0 %v4945_v16  ;;  %v1286_v15 = vld [vmem:[%s6315_s0 + $0x170] sm:$0xff]  ;;  %v1279_v16 = vld [vmem:[%s6315_s0 + $0x138] sm:$0xff] }
 0x17b   : > { %4737 = vmatpush3.bf16.msra.mxu1 %v4947_v17  ;;  %4674 = vmatprep.subr.bf16.mxu0 %v4948_v18  ;;  %v1287_v17 = vld [vmem:[%s6315_s0 + $0x178] sm:$0xff]  ;;  %v4048_v18 = vcombine.low %v1262_v6, %v1270_v7  ;;  %v4065_v20 = vcombine.high %v1278_v14, %v1286_v15 }
 0x17c   : > { %4738 = vmatprep.subr.bf16.mxu1 %v4950_v19  ;;  %v4050_v19 = vcombine.low %v1263_v8, %v1271_v9  ;;  %v4067_v21 = vcombine.high %v1279_v16, %v1287_v17 }
 0x17e   : > { %4675 = vmatpush3.bf16.msra.mxu0 %v4949_v23  ;;  %v1302_v23 = vld [vmem:[%s6315_s0 + $0x1f0] sm:$0xff] }
 0x17f   : > { %4739 = vmatpush3.bf16.msra.mxu1 %v4951_v25  ;;  %4676 = vmatprep.subr.bf16.mxu0 %v4952_v26  ;;  %v1303_v25 = vld [vmem:[%s6315_s0 + $0x1f8] sm:$0xff]  ;;  %v4064_v26 = vcombine.low %v1278_v14, %v1286_v15  ;;  %v4080_v37 = vcombine.low %v1294_v22, %v1302_v23 }
 0x180   : > { %3477 = vmatmul.mubr.bf16.gmra.mrb[76].mxu0 %v4076_v27  ;;  %4740 = vmatprep.subr.bf16.mxu1 %v4954_v28  ;;  %v4066_v27 = vcombine.low %v1279_v16, %v1287_v17  ;;  %v4081_v28 = vcombine.high %v1294_v22, %v1302_v23  ;;  %v1351_v14 = vld [vmem:[%s6315_s0 + $0x378] sm:$0xff] }
 0x181   : > { %3574 = vmatmul.mubr.bf16.gmra.mrb[76].mxu1 %v4078_v29  ;;  %3484 = vmatprep.mubr.bf16.mxu0 %v4093_v30  ;;  %v4083_v29 = vcombine.high %v1295_v24, %v1303_v25  ;;  %v1310_v30 = vld [vmem:[%s6315_s0 + $0x230] sm:$0xff] }
 0x182   : > { %3581 = vmatprep.mubr.bf16.mxu1 %v4095_v31  ;;  %4677 = vmatpush3.bf16.msra.mxu0 %v4953_v32  ;;  %v1318_v31 = vld [vmem:[%s6315_s0 + $0x270] sm:$0xff] }
 0x183   : > { %4741 = vmatpush3.bf16.msra.mxu1 %v4955_v33  ;;  %4678 = vmatprep.subr.bf16.mxu0 %v4956_v34  ;;  %v1311_v33 = vld [vmem:[%s6315_s0 + $0x238] sm:$0xff] }
 0x184   : > { %4742 = vmatprep.subr.bf16.mxu1 %v4958_v35  ;;  %v1319_v34 = vld [vmem:[%s6315_s0 + $0x278] sm:$0xff] }
 0x185   : > { %v4099_v46 = vcombine.high %v1311_v33, %v1319_v34  ;;  %v4098_v63 = vcombine.low %v1311_v33, %v1319_v34  ;;  %v1366_v33 = vld [vmem:[%s6315_s0 + $0x3f0] sm:$0xff] }
 0x186   : > { %4679 = vmatpush3.bf16.msra.mxu0 %v4957_v38 }
 0x187   : > { %4743 = vmatpush3.bf16.msra.mxu1 %v4959_v41  ;;  %v4082_v41 = vcombine.low %v1295_v24, %v1303_v25 }
 0x188   : > { %3485 = vmatmul.mubr.bf16.gmra.mrb[80].mxu0 %v4092_v42  ;;  %v4097_v42 = vcombine.high %v1310_v30, %v1318_v31 }
 0x189   : > { %3582 = vmatmul.mubr.bf16.gmra.mrb[80].mxu1 %v4094_v43  ;;  %3492 = vmatprep.mubr.bf16.mxu0 %v4109_v44 }
 0x18a   : > { %3589 = vmatprep.mubr.bf16.mxu1 %v4111_v45 }
 0x190   : > { %3493 = vmatmul.mubr.bf16.gmra.mrb[84].mxu0 %v4108_v50 }
 0x191   : > { %3590 = vmatmul.mubr.bf16.gmra.mrb[84].mxu1 %v4110_v51  ;;  %3500 = vmatprep.mubr.bf16.mxu0 %v4125_v52  ;;  %v1326_v52 = vld [vmem:[%s6315_s0 + $0x2b0] sm:$0xff] }
 0x192   : > { %3597 = vmatprep.mubr.bf16.mxu1 %v4127_v53  ;;  %v1334_v53 = vld [vmem:[%s6315_s0 + $0x2f0] sm:$0xff] }
 0x193   : > { %v4113_v0 = vcombine.high %v1326_v52, %v1334_v53  ;;  %v4112_v17 = vcombine.low %v1326_v52, %v1334_v53 }
 0x198   : > { %3501 = vmatmul.mubr.bf16.gmra.mrb[88].mxu0 %v4124_v58 }
 0x199   : > { %3598 = vmatmul.mubr.bf16.gmra.mrb[88].mxu1 %v4126_v59  ;;  %3508 = vmatprep.mubr.bf16.mxu0 %v4141_v60  ;;  %v4096_v59 = vcombine.low %v1310_v30, %v1318_v31 }
 0x19a   : > { %3605 = vmatprep.mubr.bf16.mxu1 %v4143_v61 }
 0x1a0   : > { %3509 = vmatmul.mubr.bf16.gmra.mrb[92].mxu0 %v4140_v2 }
 0x1a1   : > { %3606 = vmatmul.mubr.bf16.gmra.mrb[92].mxu1 %v4142_v3  ;;  %3646 = vmatprep.mubr.bf16.mxu0 %v4033_v4  ;;  %v4115_v4 = vcombine.high %v1327_v55, %v1335_v56 }
 0x1a2   : > { %3743 = vmatprep.mubr.bf16.mxu1 %v4035_v5 }
 0x1a8   : > { %3647 = vmatmul.mubr.bf16.vlgmr.msra.gmra.mrb[96].mxu0 %v4032_v10  ;;  %v1342_v10 = vld [vmem:[%s6315_s0 + $0x330] sm:$0xff] }
 0x1a9   : > { %3744 = vmatmul.mubr.bf16.vlgmr.msra.gmra.mrb[96].mxu1 %v4034_v11  ;;  %3654 = vmatprep.mubr.bf16.mxu0 %v4049_v12  ;;  %v1350_v11 = vld [vmem:[%s6315_s0 + $0x370] sm:$0xff] }
 0x1aa   : > { %3751 = vmatprep.mubr.bf16.mxu1 %v4051_v13  ;;  %v1343_v13 = vld [vmem:[%s6315_s0 + $0x338] sm:$0xff]  ;;  %v4129_v22 = vcombine.high %v1342_v10, %v1350_v11 }
 0x1b0   : > { %3655 = vmatmul.mubr.bf16.gmra.mrb[100].mxu0 %v4048_v18 }
 0x1b1   : > { %3752 = vmatmul.mubr.bf16.gmra.mrb[100].mxu1 %v4050_v19  ;;  %3662 = vmatprep.mubr.bf16.mxu0 %v4065_v20 }
 0x1b2   : > { %3759 = vmatprep.mubr.bf16.mxu1 %v4067_v21  ;;  %v4114_v21 = vcombine.low %v1327_v55, %v1335_v56 }
 0x1b8   : > { %3663 = vmatmul.mubr.bf16.gmra.mrb[104].mxu0 %v4064_v26  ;;  %v4131_v26 = vcombine.high %v1343_v13, %v1351_v14 }
 0x1b9   : > { %3760 = vmatmul.mubr.bf16.gmra.mrb[104].mxu1 %v4066_v27  ;;  %3670 = vmatprep.mubr.bf16.mxu0 %v4081_v28 }
 0x1ba   : > { %3767 = vmatprep.mubr.bf16.mxu1 %v4083_v29 }
 0x1bb   : > { %v4296_v32 = vpop.f32.mrb[0].mxu0 }
 0x1bc   : > { %v4360_v35 = vpop.f32.mrb[0].mxu1  ;;  %v4297_v36 = vpop.f32.mrb[1].mxu0 }
 0x1bd   : > { %v4298_v38 = vadd.f32 %v4297_v36, %v4296_v32  ;;  %v4361_v39 = vpop.f32.mrb[1].mxu1  ;;  %v4299_v40 = vpop.f32.mrb[2].mxu0  ;;  %v1358_v32 = vld [vmem:[%s6315_s0 + $0x3b0] sm:$0xff]  ;;  %v1367_v36 = vld [vmem:[%s6315_s0 + $0x3f8] sm:$0xff] }
 0x1be   : > { %v4362_v43 = vadd.f32 %v4361_v39, %v4360_v35  ;;  %v4363_v44 = vpop.f32.mrb[2].mxu1  ;;  %v4300_v45 = vpop.f32.mrb[3].mxu0  ;;  %v1359_v35 = vld [vmem:[%s6315_s0 + $0x3b8] sm:$0xff]  ;;  %v4128_v39 = vcombine.low %v1342_v10, %v1350_v11 }
 0x1bf   : > { %v4301_v47 = vadd.f32 %v4300_v45, %v4299_v40  ;;  %v4364_v48 = vpop.f32.mrb[3].mxu1 }
 0x1c0   : > { %v6078_v49 = vadd.f32 %v4362_v43, %v4298_v38  ;;  %v4365_v50 = vadd.f32 %v4364_v48, %v4363_v44  ;;  %3671 = vmatmul.mubr.bf16.gmra.mrb[108].mxu0 %v4080_v37  ;;  %v4130_v43 = vcombine.low %v1343_v13, %v1351_v14  ;;  %v4145_v44 = vcombine.high %v1358_v32, %v1366_v33 }
 0x1c1   : > { %3768 = vmatmul.mubr.bf16.gmra.mrb[108].mxu1 %v4082_v41  ;;  %3678 = vmatprep.mubr.bf16.mxu0 %v4097_v42  ;;  %v4147_v48 = vcombine.high %v1359_v35, %v1367_v36 }
 0x1c2   : > { %v6080_v51 = vadd.f32 %v4365_v50, %v4301_v47  ;;  %3775 = vmatprep.mubr.bf16.mxu1 %v4099_v46 }
 0x1c3   : > { %v4302_v54 = vpop.f32.mrb[4].mxu0 }
 0x1c4   : > { %v4366_v57 = vpop.f32.mrb[4].mxu1  ;;  %v4303_v58 = vpop.f32.mrb[5].mxu0 }
 0x1c5   : > { %v4304_v60 = vadd.f32 %v4303_v58, %v4302_v54  ;;  %v4367_v61 = vpop.f32.mrb[5].mxu1  ;;  %v4305_v62 = vpop.f32.mrb[6].mxu0 }
 0x1c6   : > { %v4368_v1 = vadd.f32 %v4367_v61, %v4366_v57  ;;  %v4369_v2 = vpop.f32.mrb[6].mxu1  ;;  %v4306_v3 = vpop.f32.mrb[7].mxu0 }
 0x1c7   : > { %v4307_v5 = vadd.f32 %v4306_v3, %v4305_v62  ;;  %v4370_v6 = vpop.f32.mrb[7].mxu1 }
 0x1c8   : > { %v6094_v7 = vadd.f32 %v4368_v1, %v4304_v60  ;;  %v4371_v8 = vadd.f32 %v4370_v6, %v4369_v2  ;;  %3679 = vmatmul.mubr.bf16.gmra.mrb[112].mxu0 %v4096_v59  ;;  %v4144_v59 = vcombine.low %v1358_v32, %v1366_v33 }
 0x1c9   : > { %3776 = vmatmul.mubr.bf16.gmra.mrb[112].mxu1 %v4098_v63  ;;  %3686 = vmatprep.mubr.bf16.mxu0 %v4113_v0  ;;  %v4146_v63 = vcombine.low %v1359_v35, %v1367_v36 }
 0x1ca   : > { %v6096_v9 = vadd.f32 %v4371_v8, %v4307_v5  ;;  %3783 = vmatprep.mubr.bf16.mxu1 %v4115_v4 }
 0x1cb   : > { %v4308_v12 = vpop.f32.mrb[8].mxu0 }
 0x1cc   : > { %v4372_v15 = vpop.f32.mrb[8].mxu1  ;;  %v4309_v16 = vpop.f32.mrb[9].mxu0 }
 0x1cd   : > { %v4310_v18 = vadd.f32 %v4309_v16, %v4308_v12  ;;  %v4373_v19 = vpop.f32.mrb[9].mxu1  ;;  %v4311_v20 = vpop.f32.mrb[10].mxu0 }
 0x1ce   : > { %v4374_v23 = vadd.f32 %v4373_v19, %v4372_v15  ;;  %v4375_v24 = vpop.f32.mrb[10].mxu1  ;;  %v4312_v25 = vpop.f32.mrb[11].mxu0 }
 0x1cf   : > { %v4313_v27 = vadd.f32 %v4312_v25, %v4311_v20  ;;  %v4376_v28 = vpop.f32.mrb[11].mxu1 }
 0x1d0   : > { %v6110_v29 = vadd.f32 %v4374_v23, %v4310_v18  ;;  %v4377_v30 = vadd.f32 %v4376_v28, %v4375_v24  ;;  %3687 = vmatmul.mubr.bf16.gmra.mrb[116].mxu0 %v4112_v17 }
 0x1d1   : > { %3784 = vmatmul.mubr.bf16.gmra.mrb[116].mxu1 %v4114_v21  ;;  %3694 = vmatprep.mubr.bf16.mxu0 %v4129_v22 }
 0x1d2   : > { %v6112_v31 = vadd.f32 %v4377_v30, %v4313_v27  ;;  %3791 = vmatprep.mubr.bf16.mxu1 %v4131_v26 }
 0x1d3   : > { %v4314_v34 = vpop.f32.mrb[12].mxu0 }
 0x1d4   : > { %v4378_v37 = vpop.f32.mrb[12].mxu1  ;;  %v4315_v38 = vpop.f32.mrb[13].mxu0 }
 0x1d5   : > { %v4316_v40 = vadd.f32 %v4315_v38, %v4314_v34  ;;  %v4379_v41 = vpop.f32.mrb[13].mxu1  ;;  %v4317_v42 = vpop.f32.mrb[14].mxu0 }
 0x1d6   : > { %v4380_v45 = vadd.f32 %v4379_v41, %v4378_v37  ;;  %v4381_v46 = vpop.f32.mrb[14].mxu1  ;;  %v4318_v47 = vpop.f32.mrb[15].mxu0 }
 0x1d7   : > { %v4319_v50 = vadd.f32 %v4318_v47, %v4317_v42  ;;  %v4382_v52 = vpop.f32.mrb[15].mxu1 }
 0x1d8   : > { %v6126_v53 = vadd.f32 %v4380_v45, %v4316_v40  ;;  %v4383_v54 = vadd.f32 %v4382_v52, %v4381_v46  ;;  %3695 = vmatmul.mubr.bf16.gmra.mrb[120].mxu0 %v4128_v39 }
 0x1d9   : > { %3792 = vmatmul.mubr.bf16.gmra.mrb[120].mxu1 %v4130_v43  ;;  %3702 = vmatprep.mubr.bf16.mxu0 %v4145_v44 }
 0x1da   : > { %v6128_v55 = vadd.f32 %v4383_v54, %v4319_v50  ;;  %3799 = vmatprep.mubr.bf16.mxu1 %v4147_v48 }
 0x1db   : > { %v4320_v56 = vpop.f32.mrb[16].mxu0 }
 0x1dc   : > { %v4384_v57 = vpop.f32.mrb[16].mxu1  ;;  %v4321_v58 = vpop.f32.mrb[17].mxu0 }
 0x1dd   : > { %v4322_v60 = vadd.f32 %v4321_v58, %v4320_v56  ;;  %v4385_v61 = vpop.f32.mrb[17].mxu1  ;;  %v4323_v62 = vpop.f32.mrb[18].mxu0 }
 0x1de   : > { %v4386_v0 = vadd.f32 %v4385_v61, %v4384_v57  ;;  %v4387_v1 = vpop.f32.mrb[18].mxu1  ;;  %v4324_v2 = vpop.f32.mrb[19].mxu0 }
 0x1df   : > { %v4325_v3 = vadd.f32 %v4324_v2, %v4323_v62  ;;  %v4388_v4 = vpop.f32.mrb[19].mxu1 }
 0x1e0   : > { %v6130_v5 = vadd.f32 %v4386_v0, %v4322_v60  ;;  %v4389_v6 = vadd.f32 %v4388_v4, %v4387_v1  ;;  %3703 = vmatmul.mubr.bf16.gmra.mrb[124].mxu0 %v4144_v59 }
 0x1e1   : > { %3800 = vmatmul.mubr.bf16.gmra.mrb[124].mxu1 %v4146_v63 }
 0x1e2   : > { %v6132_v8 = vadd.f32 %v4389_v6, %v4325_v3 }
 0x1e3   : > { %v4326_v10 = vpop.f32.mrb[20].mxu0 }
 0x1e4   : > { %v4390_v11 = vpop.f32.mrb[20].mxu1  ;;  %v4327_v12 = vpop.f32.mrb[21].mxu0 }
 0x1e5   : > { %v4328_v13 = vadd.f32 %v4327_v12, %v4326_v10  ;;  %v4391_v14 = vpop.f32.mrb[21].mxu1  ;;  %v4329_v15 = vpop.f32.mrb[22].mxu0 }
 0x1e6   : > { %v4392_v16 = vadd.f32 %v4391_v14, %v4390_v11  ;;  %v4393_v17 = vpop.f32.mrb[22].mxu1  ;;  %v4330_v18 = vpop.f32.mrb[23].mxu0 }
 0x1e7   : > { %v4331_v19 = vadd.f32 %v4330_v18, %v4329_v15  ;;  %v4394_v20 = vpop.f32.mrb[23].mxu1 }
 0x1e8   : > { %v6134_v21 = vadd.f32 %v4392_v16, %v4328_v13  ;;  %v4395_v22 = vadd.f32 %v4394_v20, %v4393_v17 }
 0x1ea   : > { %v6136_v23 = vadd.f32 %v4395_v22, %v4331_v19 }
 0x1eb   : > { %v4332_v24 = vpop.f32.mrb[24].mxu0 }
 0x1ec   : > { %v4396_v25 = vpop.f32.mrb[24].mxu1  ;;  %v4333_v26 = vpop.f32.mrb[25].mxu0 }
 0x1ed   : > { %v4334_v27 = vadd.f32 %v4333_v26, %v4332_v24  ;;  %v4397_v28 = vpop.f32.mrb[25].mxu1  ;;  %v4335_v30 = vpop.f32.mrb[26].mxu0 }
 0x1ee   : > { %v4398_v32 = vadd.f32 %v4397_v28, %v4396_v25  ;;  %v4399_v33 = vpop.f32.mrb[26].mxu1  ;;  %v4336_v34 = vpop.f32.mrb[27].mxu0 }
 0x1ef   : > { %v4337_v35 = vadd.f32 %v4336_v34, %v4335_v30  ;;  %v4400_v36 = vpop.f32.mrb[27].mxu1 }
 0x1f0   : > { %v6138_v37 = vadd.f32 %v4398_v32, %v4334_v27  ;;  %v4401_v38 = vadd.f32 %v4400_v36, %v4399_v33 }
 0x1f2   : > { %v6140_v39 = vadd.f32 %v4401_v38, %v4337_v35 }
 0x1f3   : > { %v4338_v40 = vpop.f32.mrb[28].mxu0 }
 0x1f4   : > { %v4402_v41 = vpop.f32.mrb[28].mxu1  ;;  %v4339_v42 = vpop.f32.mrb[29].mxu0 }
 0x1f5   : > { %v4340_v43 = vadd.f32 %v4339_v42, %v4338_v40  ;;  %v4403_v44 = vpop.f32.mrb[29].mxu1  ;;  %v4341_v45 = vpop.f32.mrb[30].mxu0 }
 0x1f6   : > { %v4404_v46 = vadd.f32 %v4403_v44, %v4402_v41  ;;  %v4405_v47 = vpop.f32.mrb[30].mxu1  ;;  %v4342_v48 = vpop.f32.mrb[31].mxu0 }
 0x1f7   : > { %v4343_v50 = vadd.f32 %v4342_v48, %v4341_v45  ;;  %v4406_v52 = vpop.f32.mrb[31].mxu1 }
 0x1f8   : > { %v6142_v54 = vadd.f32 %v4404_v46, %v4340_v43  ;;  %v4407_v56 = vadd.f32 %v4406_v52, %v4405_v47 }
 0x1fa   : > { %v6144_v57 = vadd.f32 %v4407_v56, %v4343_v50 }
 0x1fb   : > { %v4424_v58 = vpop.f32.mrb[32].mxu0 }
 0x1fc   : > { %v4488_v59 = vpop.f32.mrb[32].mxu1  ;;  %v4425_v60 = vpop.f32.mrb[33].mxu0 }
 0x1fd   : > { %v4426_v61 = vadd.f32 %v4425_v60, %v4424_v58  ;;  %v4489_v62 = vpop.f32.mrb[33].mxu1  ;;  %v4427_v63 = vpop.f32.mrb[34].mxu0 }
 0x1fe   : > { %v4490_v0 = vadd.f32 %v4489_v62, %v4488_v59  ;;  %v4491_v1 = vpop.f32.mrb[34].mxu1  ;;  %v4428_v2 = vpop.f32.mrb[35].mxu0 }
 0x1ff   : > { %v3261_v3 = vadd.f32 %v4426_v61, %v6078_v49  ;;  %v4429_v4 = vadd.f32 %v4428_v2, %v4427_v63  ;;  %v4492_v6 = vpop.f32.mrb[35].mxu1 }
 0x200   : > { %v4493_v10 = vadd.f32 %v4492_v6, %v4491_v1 }
 0x201   : > { %v6147_v11 = vadd.f32 %v4490_v0, %v3261_v3  ;;  %v3264_v12 = vadd.f32 %v4429_v4, %v6080_v51 }
 0x203   : > { %v6150_v13 = vadd.f32 %v4493_v10, %v3264_v12  ;;  %v4430_v14 = vpop.f32.mrb[36].mxu0 }
 0x204   : > { %v4494_v15 = vpop.f32.mrb[36].mxu1  ;;  %v4431_v16 = vpop.f32.mrb[37].mxu0 }
 0x205   : > { %v4432_v17 = vadd.f32 %v4431_v16, %v4430_v14  ;;  %v4495_v18 = vpop.f32.mrb[37].mxu1  ;;  %v4433_v19 = vpop.f32.mrb[38].mxu0 }
 0x206   : > { %v4496_v20 = vadd.f32 %v4495_v18, %v4494_v15  ;;  %v4497_v22 = vpop.f32.mrb[38].mxu1  ;;  %v4434_v24 = vpop.f32.mrb[39].mxu0 }
 0x207   : > { %v3269_v49 = vadd.f32 %v4432_v17, %v6094_v7  ;;  %v4435_v25 = vadd.f32 %v4434_v24, %v4433_v19  ;;  %v4498_v26 = vpop.f32.mrb[39].mxu1 }
 0x208   : > { %v4499_v27 = vadd.f32 %v4498_v26, %v4497_v22 }
 0x209   : > { %v6153_v28 = vadd.f32 %v4496_v20, %v3269_v49  ;;  %v3272_v51 = vadd.f32 %v4435_v25, %v6096_v9 }
 0x20b   : > { %v6156_v30 = vadd.f32 %v4499_v27, %v3272_v51  ;;  %v4436_v32 = vpop.f32.mrb[40].mxu0 }
 0x20c   : > { %v4500_v33 = vpop.f32.mrb[40].mxu1  ;;  %v4437_v34 = vpop.f32.mrb[41].mxu0 }
 0x20d   : > { %v4438_v35 = vadd.f32 %v4437_v34, %v4436_v32  ;;  %v4501_v36 = vpop.f32.mrb[41].mxu1  ;;  %v4439_v38 = vpop.f32.mrb[42].mxu0 }
 0x20e   : > { %v4502_v40 = vadd.f32 %v4501_v36, %v4500_v33  ;;  %v4503_v41 = vpop.f32.mrb[42].mxu1  ;;  %v4440_v42 = vpop.f32.mrb[43].mxu0 }
 0x20f   : > { %v3277_v7 = vadd.f32 %v4438_v35, %v6110_v29  ;;  %v4441_v43 = vadd.f32 %v4440_v42, %v4439_v38  ;;  %v4504_v44 = vpop.f32.mrb[43].mxu1 }
 0x210   : > { %v4505_v45 = vadd.f32 %v4504_v44, %v4503_v41 }
 0x211   : > { %v6159_v46 = vadd.f32 %v4502_v40, %v3277_v7  ;;  %v3280_v9 = vadd.f32 %v4441_v43, %v6112_v31 }
 0x213   : > { %v6162_v47 = vadd.f32 %v4505_v45, %v3280_v9  ;;  %v4442_v48 = vpop.f32.mrb[44].mxu0 }
 0x214   : > { %v4506_v50 = vpop.f32.mrb[44].mxu1  ;;  %v4443_v52 = vpop.f32.mrb[45].mxu0 }
 0x215   : > { %v4444_v56 = vadd.f32 %v4443_v52, %v4442_v48  ;;  %v4507_v58 = vpop.f32.mrb[45].mxu1  ;;  %v4445_v59 = vpop.f32.mrb[46].mxu0 }
 0x216   : > { %v4508_v60 = vadd.f32 %v4507_v58, %v4506_v50  ;;  %v4509_v61 = vpop.f32.mrb[46].mxu1  ;;  %v4446_v62 = vpop.f32.mrb[47].mxu0 }
 0x217   : > { %v3285_v29 = vadd.f32 %v4444_v56, %v6126_v53  ;;  %v4447_v63 = vadd.f32 %v4446_v62, %v4445_v59  ;;  %v4510_v0 = vpop.f32.mrb[47].mxu1 }
 0x218   : > { %v4511_v1 = vadd.f32 %v4510_v0, %v4509_v61 }
 0x219   : > { %v6165_v2 = vadd.f32 %v4508_v60, %v3285_v29  ;;  %v3288_v31 = vadd.f32 %v4447_v63, %v6128_v55 }
 0x21b   : > { %v6168_v3 = vadd.f32 %v4511_v1, %v3288_v31  ;;  %v4448_v4 = vpop.f32.mrb[48].mxu0 }
 0x21c   : > { %v4512_v6 = vpop.f32.mrb[48].mxu1  ;;  %v4449_v10 = vpop.f32.mrb[49].mxu0 }
 0x21d   : > { %v4450_v12 = vadd.f32 %v4449_v10, %v4448_v4  ;;  %v4513_v14 = vpop.f32.mrb[49].mxu1  ;;  %v4451_v15 = vpop.f32.mrb[50].mxu0 }
 0x21e   : > { %v4514_v16 = vadd.f32 %v4513_v14, %v4512_v6  ;;  %v4515_v17 = vpop.f32.mrb[50].mxu1  ;;  %v4452_v18 = vpop.f32.mrb[51].mxu0 }
 0x21f   : > { %v3293_v53 = vadd.f32 %v4450_v12, %v6130_v5  ;;  %v4453_v19 = vadd.f32 %v4452_v18, %v4451_v15  ;;  %v4516_v20 = vpop.f32.mrb[51].mxu1 }
 0x220   : > { %v4517_v22 = vadd.f32 %v4516_v20, %v4515_v17 }
 0x221   : > { %v6171_v24 = vadd.f32 %v4514_v16, %v3293_v53  ;;  %v3296_v55 = vadd.f32 %v4453_v19, %v6132_v8 }
 0x223   : > { %v6174_v49 = vadd.f32 %v4517_v22, %v3296_v55  ;;  %v4454_v25 = vpop.f32.mrb[52].mxu0 }
 0x224   : > { %v4518_v26 = vpop.f32.mrb[52].mxu1  ;;  %v4455_v27 = vpop.f32.mrb[53].mxu0 }
 0x225   : > { %v4456_v51 = vadd.f32 %v4455_v27, %v4454_v25  ;;  %v4519_v32 = vpop.f32.mrb[53].mxu1  ;;  %v4457_v33 = vpop.f32.mrb[54].mxu0 }
 0x226   : > { %v4520_v34 = vadd.f32 %v4519_v32, %v4518_v26  ;;  %v4521_v35 = vpop.f32.mrb[54].mxu1  ;;  %v4458_v36 = vpop.f32.mrb[55].mxu0 }
 0x227   : > { %v3301_v5 = vadd.f32 %v4456_v51, %v6134_v21  ;;  %v4459_v38 = vadd.f32 %v4458_v36, %v4457_v33  ;;  %v4522_v40 = vpop.f32.mrb[55].mxu1 }
 0x228   : > { %v4523_v41 = vadd.f32 %v4522_v40, %v4521_v35 }
 0x229   : > { %v6177_v42 = vadd.f32 %v4520_v34, %v3301_v5  ;;  %v3304_v8 = vadd.f32 %v4459_v38, %v6136_v23 }
 0x22b   : > { %v6180_v7 = vadd.f32 %v4523_v41, %v3304_v8  ;;  %v4460_v43 = vpop.f32.mrb[56].mxu0 }
 0x22c   : > { %v4524_v44 = vpop.f32.mrb[56].mxu1  ;;  %v4461_v45 = vpop.f32.mrb[57].mxu0 }
 0x22d   : > { %v4462_v9 = vadd.f32 %v4461_v45, %v4460_v43  ;;  %v4525_v48 = vpop.f32.mrb[57].mxu1  ;;  %v4463_v50 = vpop.f32.mrb[58].mxu0 }
 0x22e   : > { %v4526_v52 = vadd.f32 %v4525_v48, %v4524_v44  ;;  %v4527_v56 = vpop.f32.mrb[58].mxu1  ;;  %v4464_v58 = vpop.f32.mrb[59].mxu0 }
 0x22f   : > { %v3309_v21 = vadd.f32 %v4462_v9, %v6138_v37  ;;  %v4465_v59 = vadd.f32 %v4464_v58, %v4463_v50  ;;  %v4528_v60 = vpop.f32.mrb[59].mxu1 }
 0x230   : > { %v4529_v61 = vadd.f32 %v4528_v60, %v4527_v56 }
 0x231   : > { %v6183_v62 = vadd.f32 %v4526_v52, %v3309_v21  ;;  %v3312_v23 = vadd.f32 %v4465_v59, %v6140_v39 }
 0x233   : > { %v6186_v29 = vadd.f32 %v4529_v61, %v3312_v23  ;;  %v4466_v63 = vpop.f32.mrb[60].mxu0 }
 0x234   : > { %v4530_v0 = vpop.f32.mrb[60].mxu1  ;;  %v4467_v1 = vpop.f32.mrb[61].mxu0 }
 0x235   : > { %v4468_v31 = vadd.f32 %v4467_v1, %v4466_v63  ;;  %v4531_v4 = vpop.f32.mrb[61].mxu1  ;;  %v4469_v6 = vpop.f32.mrb[62].mxu0 }
 0x236   : > { %v4532_v10 = vadd.f32 %v4531_v4, %v4530_v0  ;;  %v4533_v12 = vpop.f32.mrb[62].mxu1  ;;  %v4470_v14 = vpop.f32.mrb[63].mxu0 }
 0x237   : > { %v3317_v37 = vadd.f32 %v4468_v31, %v6142_v54  ;;  %v4471_v15 = vadd.f32 %v4470_v14, %v4469_v6  ;;  %v4534_v16 = vpop.f32.mrb[63].mxu1 }
 0x238   : > { %v4535_v17 = vadd.f32 %v4534_v16, %v4533_v12 }
 0x239   : > { %v6189_v18 = vadd.f32 %v4532_v10, %v3317_v37  ;;  %v3320_v39 = vadd.f32 %v4471_v15, %v6144_v57 }
 0x23b   : > { %v6192_v53 = vadd.f32 %v4535_v17, %v3320_v39  ;;  %v4552_v19 = vpop.f32.mrb[64].mxu0 }
 0x23c   : > { %v4616_v20 = vpop.f32.mrb[64].mxu1  ;;  %v4553_v22 = vpop.f32.mrb[65].mxu0 }
 0x23d   : > { %v4554_v55 = vadd.f32 %v4553_v22, %v4552_v19  ;;  %v4617_v25 = vpop.f32.mrb[65].mxu1  ;;  %v4555_v26 = vpop.f32.mrb[66].mxu0 }
 0x23e   : > { %v4618_v27 = vadd.f32 %v4617_v25, %v4616_v20  ;;  %v4619_v51 = vpop.f32.mrb[66].mxu1  ;;  %v4556_v32 = vpop.f32.mrb[67].mxu0 }
 0x23f   : > { %v3455_v54 = vadd.f32 %v4554_v55, %v6147_v11  ;;  %v4557_v33 = vadd.f32 %v4556_v32, %v4555_v26  ;;  %v4620_v34 = vpop.f32.mrb[67].mxu1 }
 0x240   : > { %v4621_v35 = vadd.f32 %v4620_v34, %v4619_v51 }
 0x241   : > { %v6195_v36 = vadd.f32 %v4618_v27, %v3455_v54  ;;  %v3458_v57 = vadd.f32 %v4557_v33, %v6150_v13 }
 0x243   : > { %v6198_v5 = vadd.f32 %v4621_v35, %v3458_v57  ;;  %v4558_v38 = vpop.f32.mrb[68].mxu0 }
 0x244   : > { %v4622_v40 = vpop.f32.mrb[68].mxu1  ;;  %v4559_v41 = vpop.f32.mrb[69].mxu0 }
 0x245   : > { %v4560_v8 = vadd.f32 %v4559_v41, %v4558_v38  ;;  %v4623_v43 = vpop.f32.mrb[69].mxu1  ;;  %v4561_v44 = vpop.f32.mrb[70].mxu0 }
 0x246   : > { %v4624_v45 = vadd.f32 %v4623_v43, %v4622_v40  ;;  %v4625_v9 = vpop.f32.mrb[70].mxu1  ;;  %v4562_v48 = vpop.f32.mrb[71].mxu0 }
 0x247   : > { %v3463_v11 = vadd.f32 %v4560_v8, %v6153_v28  ;;  %v4563_v50 = vadd.f32 %v4562_v48, %v4561_v44  ;;  %v4626_v52 = vpop.f32.mrb[71].mxu1 }
 0x248   : > { %v4627_v56 = vadd.f32 %v4626_v52, %v4625_v9 }
 0x249   : > { %v6201_v58 = vadd.f32 %v4624_v45, %v3463_v11  ;;  %v3466_v13 = vadd.f32 %v4563_v50, %v6156_v30 }
 0x24b   : > { %v6204_v21 = vadd.f32 %v4627_v56, %v3466_v13  ;;  %v4564_v59 = vpop.f32.mrb[72].mxu0 }
 0x24c   : > { %v4628_v60 = vpop.f32.mrb[72].mxu1  ;;  %v4565_v61 = vpop.f32.mrb[73].mxu0 }
 0x24d   : > { %v4566_v23 = vadd.f32 %v4565_v61, %v4564_v59  ;;  %v4629_v63 = vpop.f32.mrb[73].mxu1  ;;  %v4567_v0 = vpop.f32.mrb[74].mxu0 }
 0x24e   : > { %v4630_v1 = vadd.f32 %v4629_v63, %v4628_v60  ;;  %v4631_v31 = vpop.f32.mrb[74].mxu1  ;;  %v4568_v4 = vpop.f32.mrb[75].mxu0 }
 0x24f   : > { %v3471_v28 = vadd.f32 %v4566_v23, %v6159_v46  ;;  %v4569_v6 = vadd.f32 %v4568_v4, %v4567_v0  ;;  %v4632_v10 = vpop.f32.mrb[75].mxu1 }
 0x250   : > { %v4633_v12 = vadd.f32 %v4632_v10, %v4631_v31 }
 0x251   : > { %v6207_v14 = vadd.f32 %v4630_v1, %v3471_v28  ;;  %v3474_v30 = vadd.f32 %v4569_v6, %v6162_v47 }
 0x253   : > { %v6210_v37 = vadd.f32 %v4633_v12, %v3474_v30  ;;  %v4570_v15 = vpop.f32.mrb[76].mxu0 }
 0x254   : > { %v4634_v16 = vpop.f32.mrb[76].mxu1  ;;  %v4571_v17 = vpop.f32.mrb[77].mxu0 }
 0x255   : > { %v4572_v39 = vadd.f32 %v4571_v17, %v4570_v15  ;;  %v4635_v19 = vpop.f32.mrb[77].mxu1  ;;  %v4573_v20 = vpop.f32.mrb[78].mxu0 }
 0x256   : > { %v4636_v22 = vadd.f32 %v4635_v19, %v4634_v16  ;;  %v4637_v55 = vpop.f32.mrb[78].mxu1  ;;  %v4574_v25 = vpop.f32.mrb[79].mxu0 }
 0x257   : > { %v3479_v46 = vadd.f32 %v4572_v39, %v6165_v2  ;;  %v4575_v26 = vadd.f32 %v4574_v25, %v4573_v20  ;;  %v4638_v27 = vpop.f32.mrb[79].mxu1 }
 0x258   : > { %v4639_v51 = vadd.f32 %v4638_v27, %v4637_v55 }
 0x259   : > { %v6213_v32 = vadd.f32 %v4636_v22, %v3479_v46  ;;  %v3482_v47 = vadd.f32 %v4575_v26, %v6168_v3 }
 0x25b   : > { %v6216_v54 = vadd.f32 %v4639_v51, %v3482_v47  ;;  %v4576_v33 = vpop.f32.mrb[80].mxu0 }
 0x25c   : > { %v4640_v34 = vpop.f32.mrb[80].mxu1  ;;  %v4577_v35 = vpop.f32.mrb[81].mxu0 }
 0x25d   : > { %v4578_v57 = vadd.f32 %v4577_v35, %v4576_v33  ;;  %v4641_v38 = vpop.f32.mrb[81].mxu1  ;;  %v4579_v40 = vpop.f32.mrb[82].mxu0 }
 0x25e   : > { %v4642_v41 = vadd.f32 %v4641_v38, %v4640_v34  ;;  %v4643_v8 = vpop.f32.mrb[82].mxu1  ;;  %v4580_v43 = vpop.f32.mrb[83].mxu0 }
 0x25f   : > { %v3487_v2 = vadd.f32 %v4578_v57, %v6171_v24  ;;  %v4581_v44 = vadd.f32 %v4580_v43, %v4579_v40  ;;  %v4644_v45 = vpop.f32.mrb[83].mxu1 }
 0x260   : > { %v4645_v9 = vadd.f32 %v4644_v45, %v4643_v8 }
 0x261   : > { %v6219_v48 = vadd.f32 %v4642_v41, %v3487_v2  ;;  %v3490_v3 = vadd.f32 %v4581_v44, %v6174_v49 }
 0x263   : > { %v6222_v11 = vadd.f32 %v4645_v9, %v3490_v3  ;;  %v4582_v50 = vpop.f32.mrb[84].mxu0 }
 0x264   : > { %v4646_v52 = vpop.f32.mrb[84].mxu1  ;;  %v4583_v56 = vpop.f32.mrb[85].mxu0 }
 0x265   : > { %v4584_v13 = vadd.f32 %v4583_v56, %v4582_v50  ;;  %v4647_v59 = vpop.f32.mrb[85].mxu1  ;;  %v4585_v60 = vpop.f32.mrb[86].mxu0 }
 0x266   : > { %v4648_v61 = vadd.f32 %v4647_v59, %v4646_v52  ;;  %v4649_v23 = vpop.f32.mrb[86].mxu1  ;;  %v4586_v63 = vpop.f32.mrb[87].mxu0 }
 0x267   : > { %v3495_v24 = vadd.f32 %v4584_v13, %v6177_v42  ;;  %v4587_v0 = vadd.f32 %v4586_v63, %v4585_v60  ;;  %v4650_v1 = vpop.f32.mrb[87].mxu1 }
 0x268   : > { %v4651_v31 = vadd.f32 %v4650_v1, %v4649_v23 }
 0x269   : > { %v6225_v4 = vadd.f32 %v4648_v61, %v3495_v24  ;;  %v3498_v49 = vadd.f32 %v4587_v0, %v6180_v7 }
 0x26b   : > { %v6228_v28 = vadd.f32 %v4651_v31, %v3498_v49  ;;  %v4588_v6 = vpop.f32.mrb[88].mxu0 }
 0x26c   : > { %v4652_v10 = vpop.f32.mrb[88].mxu1  ;;  %v4589_v12 = vpop.f32.mrb[89].mxu0 }
 0x26d   : > { %v4590_v30 = vadd.f32 %v4589_v12, %v4588_v6  ;;  %v4653_v15 = vpop.f32.mrb[89].mxu1  ;;  %v4591_v16 = vpop.f32.mrb[90].mxu0 }
 0x26e   : > { %v4654_v17 = vadd.f32 %v4653_v15, %v4652_v10  ;;  %v4655_v39 = vpop.f32.mrb[90].mxu1  ;;  %v4592_v19 = vpop.f32.mrb[91].mxu0 }
 0x26f   : > { %v3503_v42 = vadd.f32 %v4590_v30, %v6183_v62  ;;  %v4593_v20 = vadd.f32 %v4592_v19, %v4591_v16  ;;  %v4656_v22 = vpop.f32.mrb[91].mxu1 }
 0x270   : > { %v4657_v55 = vadd.f32 %v4656_v22, %v4655_v39 }
 0x271   : > { %v6231_v25 = vadd.f32 %v4654_v17, %v3503_v42  ;;  %v3506_v7 = vadd.f32 %v4593_v20, %v6186_v29 }
 0x273   : > { %v6234_v46 = vadd.f32 %v4657_v55, %v3506_v7  ;;  %v4594_v26 = vpop.f32.mrb[92].mxu0 }
 0x274   : > { %v4658_v27 = vpop.f32.mrb[92].mxu1  ;;  %v4595_v51 = vpop.f32.mrb[93].mxu0 }
 0x275   : > { %v4596_v47 = vadd.f32 %v4595_v51, %v4594_v26  ;;  %v4659_v33 = vpop.f32.mrb[93].mxu1  ;;  %v4597_v34 = vpop.f32.mrb[94].mxu0 }
 0x276   : > { %v4660_v35 = vadd.f32 %v4659_v33, %v4658_v27  ;;  %v4661_v57 = vpop.f32.mrb[94].mxu1  ;;  %v4598_v38 = vpop.f32.mrb[95].mxu0 }
 0x277   : > { %v3511_v62 = vadd.f32 %v4596_v47, %v6189_v18  ;;  %v4599_v40 = vadd.f32 %v4598_v38, %v4597_v34  ;;  %v4662_v41 = vpop.f32.mrb[95].mxu1 }
 0x278   : > { %v4663_v8 = vadd.f32 %v4662_v41, %v4661_v57 }
 0x279   : > { %v6237_v43 = vadd.f32 %v4660_v35, %v3511_v62  ;;  %v3514_v29 = vadd.f32 %v4599_v40, %v6192_v53 }
 0x27b   : > { %v6240_v2 = vadd.f32 %v4663_v8, %v3514_v29  ;;  %v4680_v44 = vpop.f32.mrb[96].mxu0 }
 0x27c   : > { %v4744_v45 = vpop.f32.mrb[96].mxu1  ;;  %v4681_v9 = vpop.f32.mrb[97].mxu0 }
 0x27d   : > { %v4682_v3 = vadd.f32 %v4681_v9, %v4680_v44  ;;  %v4745_v50 = vpop.f32.mrb[97].mxu1  ;;  %v4683_v52 = vpop.f32.mrb[98].mxu0 }
 0x27e   : > { %v4746_v56 = vadd.f32 %v4745_v50, %v4744_v45  ;;  %v4747_v13 = vpop.f32.mrb[98].mxu1  ;;  %v4684_v18 = vpop.f32.mrb[99].mxu0 }
 0x27f   : > { %v3649_v59 = vadd.f32 %v4682_v3, %v6195_v36  ;;  %v4685_v60 = vadd.f32 %v4684_v18, %v4683_v52  ;;  %v4748_v61 = vpop.f32.mrb[99].mxu1 }
 0x280   : > { %v4749_v23 = vadd.f32 %v4748_v61, %v4747_v13 }
 0x281   : > { %v3746_v63 = vadd.f32 %v4746_v56, %v3649_v59  ;;  %v3652_v53 = vadd.f32 %v4685_v60, %v6198_v5 }
 0x283   : > { %3808 = vst [vmem:[%s6246_s29] sm:$0xff] %v3746_v63  ;;  %v3749_v24 = vadd.f32 %v4749_v23, %v3652_v53  ;;  %v4686_v0 = vpop.f32.mrb[100].mxu0 }
 0x284   : > { %v4750_v1 = vpop.f32.mrb[100].mxu1  ;;  %v4687_v31 = vpop.f32.mrb[101].mxu0 }
 0x285   : > { %3809 = vst [vmem:[%s6246_s29 + $0x8] sm:$0xff] %v3749_v24  ;;  %v4688_v49 = vadd.f32 %v4687_v31, %v4686_v0  ;;  %v4751_v6 = vpop.f32.mrb[101].mxu1  ;;  %v4689_v36 = vpop.f32.mrb[102].mxu0 }
 0x286   : > { %v4752_v10 = vadd.f32 %v4751_v6, %v4750_v1  ;;  %v4753_v12 = vpop.f32.mrb[102].mxu1  ;;  %v4690_v30 = vpop.f32.mrb[103].mxu0 }
 0x287   : > { %v3657_v5 = vadd.f32 %v4688_v49, %v6201_v58  ;;  %v4691_v15 = vadd.f32 %v4690_v30, %v4689_v36  ;;  %v4754_v16 = vpop.f32.mrb[103].mxu1 }
 0x288   : > { %v4755_v17 = vadd.f32 %v4754_v16, %v4753_v12 }
 0x289   : > { %v3754_v39 = vadd.f32 %v4752_v10, %v3657_v5  ;;  %v3660_v19 = vadd.f32 %v4691_v15, %v6204_v21 }
 0x28b   : > { %3810 = vst [vmem:[%s6246_s29 + $0x10] sm:$0xff] %v3754_v39  ;;  %v3757_v42 = vadd.f32 %v4755_v17, %v3660_v19  ;;  %v4692_v20 = vpop.f32.mrb[104].mxu0 }
 0x28c   : > { %v4756_v22 = vpop.f32.mrb[104].mxu1  ;;  %v4693_v55 = vpop.f32.mrb[105].mxu0 }
 0x28d   : > { %3811 = vst [vmem:[%s6246_s29 + $0x18] sm:$0xff] %v3757_v42  ;;  %v4694_v7 = vadd.f32 %v4693_v55, %v4692_v20  ;;  %v4757_v26 = vpop.f32.mrb[105].mxu1  ;;  %v4695_v27 = vpop.f32.mrb[106].mxu0 }
 0x28e   : > { %v4758_v51 = vadd.f32 %v4757_v26, %v4756_v22  ;;  %v4759_v47 = vpop.f32.mrb[106].mxu1  ;;  %v4696_v58 = vpop.f32.mrb[107].mxu0 }
 0x28f   : > { %v3665_v33 = vadd.f32 %v4694_v7, %v6207_v14  ;;  %v4697_v34 = vadd.f32 %v4696_v58, %v4695_v27  ;;  %v4760_v35 = vpop.f32.mrb[107].mxu1 }
 0x290   : > { %v4761_v57 = vadd.f32 %v4760_v35, %v4759_v47 }
 0x291   : > { %v3762_v21 = vadd.f32 %v4758_v51, %v3665_v33  ;;  %v3668_v38 = vadd.f32 %v4697_v34, %v6210_v37 }
 0x293   : > { %3812 = vst [vmem:[%s6246_s29 + $0x20] sm:$0xff] %v3762_v21  ;;  %v3765_v62 = vadd.f32 %v4761_v57, %v3668_v38  ;;  %v4698_v40 = vpop.f32.mrb[108].mxu0 }
 0x294   : > { %v4762_v41 = vpop.f32.mrb[108].mxu1  ;;  %v4699_v8 = vpop.f32.mrb[109].mxu0 }
 0x295   : > { %3813 = vst [vmem:[%s6246_s29 + $0x28] sm:$0xff] %v3765_v62  ;;  %v4700_v29 = vadd.f32 %v4699_v8, %v4698_v40  ;;  %v4763_v44 = vpop.f32.mrb[109].mxu1  ;;  %v4701_v45 = vpop.f32.mrb[110].mxu0 }
 0x296   : > { %v4764_v9 = vadd.f32 %v4763_v44, %v4762_v41  ;;  %v4765_v3 = vpop.f32.mrb[110].mxu1  ;;  %v4702_v14 = vpop.f32.mrb[111].mxu0 }
 0x297   : > { %v3673_v50 = vadd.f32 %v4700_v29, %v6213_v32  ;;  %v4703_v52 = vadd.f32 %v4702_v14, %v4701_v45  ;;  %v4766_v56 = vpop.f32.mrb[111].mxu1 }
 0x298   : > { %v4767_v13 = vadd.f32 %v4766_v56, %v4765_v3 }
 0x299   : > { %v3770_v37 = vadd.f32 %v4764_v9, %v3673_v50  ;;  %v3676_v18 = vadd.f32 %v4703_v52, %v6216_v54 }
 0x29b   : > { %3814 = vst [vmem:[%s6246_s29 + $0x30] sm:$0xff] %v3770_v37  ;;  %v3773_v59 = vadd.f32 %v4767_v13, %v3676_v18  ;;  %v4704_v60 = vpop.f32.mrb[112].mxu0 }
 0x29c   : > { %v4768_v61 = vpop.f32.mrb[112].mxu1  ;;  %v4705_v23 = vpop.f32.mrb[113].mxu0 }
 0x29d   : > { %3815 = vst [vmem:[%s6246_s29 + $0x38] sm:$0xff] %v3773_v59  ;;  %v4706_v63 = vadd.f32 %v4705_v23, %v4704_v60  ;;  %v4769_v53 = vpop.f32.mrb[113].mxu1  ;;  %v4707_v24 = vpop.f32.mrb[114].mxu0  ;;  %v3895_v23 = vld [vmem:[%s6246_s29 + $0x8] sm:$0xff] (%p5050_p6) }
 0x29e   : > { %v4770_v0 = vadd.f32 %v4769_v53, %v4768_v61  ;;  %v4771_v1 = vpop.f32.mrb[114].mxu1  ;;  %v4708_v32 = vpop.f32.mrb[115].mxu0  ;;  %v3901_v53 = vld [vmem:[%s6246_s29 + $0x20] sm:$0xff] (%p5050_p6)  ;;  %3896 = vst [vmem:[%s3835_s3 + $0x10] sm:$0xff] (%p5050_p6), %v3895_v23 }
 0x29f   : > { %v3681_v31 = vadd.f32 %v4706_v63, %v6219_v48  ;;  %v4709_v49 = vadd.f32 %v4708_v32, %v4707_v24  ;;  %v4772_v6 = vpop.f32.mrb[115].mxu1  ;;  %v3899_v63 = vld [vmem:[%s6246_s29 + $0x18] sm:$0xff] (%p5050_p6)  ;;  %v3903_v24 = vld [vmem:[%s6246_s29 + $0x28] sm:$0xff] (%p5050_p6)  ;;  %3902 = vst [vmem:[%s3835_s3 + $0x40] sm:$0xff] (%p5050_p6), %v3901_v53 }
 0x2a0   : > { %v4773_v36 = vadd.f32 %v4772_v6, %v4771_v1  ;;  %3900 = vst [vmem:[%s3835_s3 + $0x30] sm:$0xff] (%p5050_p6), %v3899_v63  ;;  %3904 = vst [vmem:[%s3835_s3 + $0x50] sm:$0xff] (%p5050_p6), %v3903_v24 }
 0x2a1   : > { %v3778_v54 = vadd.f32 %v4770_v0, %v3681_v31  ;;  %v3684_v10 = vadd.f32 %v4709_v49, %v6222_v11 }
 0x2a2   : > { %v3905_v0 = vld [vmem:[%s6246_s29 + $0x30] sm:$0xff] (%p5050_p6) }
 0x2a3   : > { %3816 = vst [vmem:[%s6246_s29 + $0x40] sm:$0xff] %v3778_v54  ;;  %v3781_v12 = vadd.f32 %v4773_v36, %v3684_v10  ;;  %v4710_v30 = vpop.f32.mrb[116].mxu0  ;;  %3906 = vst [vmem:[%s3835_s3 + $0x60] sm:$0xff] (%p5050_p6), %v3905_v0 }
 0x2a4   : > { %v4774_v5 = vpop.f32.mrb[116].mxu1  ;;  %v4711_v15 = vpop.f32.mrb[117].mxu0  ;;  %v3907_v1 = vld [vmem:[%s6246_s29 + $0x38] sm:$0xff] (%p5050_p6) }
 0x2a5   : > { %3817 = vst [vmem:[%s6246_s29 + $0x48] sm:$0xff] %v3781_v12  ;;  %v4712_v16 = vadd.f32 %v4711_v15, %v4710_v30  ;;  %v4775_v17 = vpop.f32.mrb[117].mxu1  ;;  %v4713_v39 = vpop.f32.mrb[118].mxu0  ;;  %3908 = vst [vmem:[%s3835_s3 + $0x70] sm:$0xff] (%p5050_p6), %v3907_v1 }
 0x2a6   : > { %v4776_v19 = vadd.f32 %v4775_v17, %v4774_v5  ;;  %v4777_v42 = vpop.f32.mrb[118].mxu1  ;;  %v4714_v48 = vpop.f32.mrb[119].mxu0 }
 0x2a7   : > { %v3689_v20 = vadd.f32 %v4712_v16, %v6225_v4  ;;  %v4715_v22 = vadd.f32 %v4714_v48, %v4713_v39  ;;  %v4778_v55 = vpop.f32.mrb[119].mxu1 }
 0x2a8   : > { %v4779_v7 = vadd.f32 %v4778_v55, %v4777_v42 }
 0x2a9   : > { %v3786_v11 = vadd.f32 %v4776_v19, %v3689_v20  ;;  %v3692_v26 = vadd.f32 %v4715_v22, %v6228_v28 }
 0x2aa   : > { %v3909_v32 = vld [vmem:[%s6246_s29 + $0x40] sm:$0xff] (%p5050_p6) }
 0x2ab   : > { %3818 = vst [vmem:[%s6246_s29 + $0x50] sm:$0xff] %v3786_v11  ;;  %v3789_v27 = vadd.f32 %v4779_v7, %v3692_v26  ;;  %v4716_v51 = vpop.f32.mrb[120].mxu0  ;;  %3910 = vst [vmem:[%s3835_s3 + $0x80] sm:$0xff] (%p5050_p6), %v3909_v32 }
 0x2ac   : > { %v4780_v47 = vpop.f32.mrb[120].mxu1  ;;  %v4717_v58 = vpop.f32.mrb[121].mxu0  ;;  %v3911_v31 = vld [vmem:[%s6246_s29 + $0x48] sm:$0xff] (%p5050_p6) }
 0x2ad   : > { %3819 = vst [vmem:[%s6246_s29 + $0x58] sm:$0xff] %v3789_v27  ;;  %v4718_v33 = vadd.f32 %v4717_v58, %v4716_v51  ;;  %v4781_v34 = vpop.f32.mrb[121].mxu1  ;;  %v4719_v35 = vpop.f32.mrb[122].mxu0  ;;  %3912 = vst [vmem:[%s3835_s3 + $0x90] sm:$0xff] (%p5050_p6), %v3911_v31 }
 0x2ae   : > { %v4782_v57 = vadd.f32 %v4781_v34, %v4780_v47  ;;  %v4783_v21 = vpop.f32.mrb[122].mxu1  ;;  %v4720_v4 = vpop.f32.mrb[123].mxu0 }
 0x2af   : > { %v3697_v38 = vadd.f32 %v4718_v33, %v6231_v25  ;;  %v4721_v62 = vadd.f32 %v4720_v4, %v4719_v35  ;;  %v4784_v40 = vpop.f32.mrb[123].mxu1 }
 0x2b0   : > { %v4785_v41 = vadd.f32 %v4784_v40, %v4783_v21 }
 0x2b1   : > { %v3794_v28 = vadd.f32 %v4782_v57, %v3697_v38  ;;  %v3700_v8 = vadd.f32 %v4721_v62, %v6234_v46 }
 0x2b2   : > { %v3913_v49 = vld [vmem:[%s6246_s29 + $0x50] sm:$0xff] (%p5050_p6) }
 0x2b3   : > { %3820 = vst [vmem:[%s6246_s29 + $0x60] sm:$0xff] %v3794_v28  ;;  %v3797_v29 = vadd.f32 %v4785_v41, %v3700_v8  ;;  %v4722_v44 = vpop.f32.mrb[124].mxu0  ;;  %3914 = vst [vmem:[%s3835_s3 + $0xa0] sm:$0xff] (%p5050_p6), %v3913_v49 }
 0x2b4   : > { %v4786_v45 = vpop.f32.mrb[124].mxu1  ;;  %v4723_v9 = vpop.f32.mrb[125].mxu0  ;;  %v3915_v6 = vld [vmem:[%s6246_s29 + $0x58] sm:$0xff] (%p5050_p6) }
 0x2b5   : > { %3821 = vst [vmem:[%s6246_s29 + $0x68] sm:$0xff] %v3797_v29  ;;  %v4724_v3 = vadd.f32 %v4723_v9, %v4722_v44  ;;  %v4787_v14 = vpop.f32.mrb[125].mxu1  ;;  %v4725_v50 = vpop.f32.mrb[126].mxu0  ;;  %3916 = vst [vmem:[%s3835_s3 + $0xb0] sm:$0xff] (%p5050_p6), %v3915_v6 }
 0x2b6   : > { %v4788_v52 = vadd.f32 %v4787_v14, %v4786_v45  ;;  %v4789_v56 = vpop.f32.mrb[126].mxu1  ;;  %v4726_v25 = vpop.f32.mrb[127].mxu0 }
 0x2b7   : > { %v3705_v13 = vadd.f32 %v4724_v3, %v6237_v43  ;;  %v4727_v37 = vadd.f32 %v4726_v25, %v4725_v50  ;;  %v4790_v18 = vpop.f32.mrb[127].mxu1  ;;  %3830 = sbr.rel (!%p5050_p6) target bundleno = 710 (0x2c6), region = 73  ;;  %v3893_v43 = vld [vmem:[%s6246_s29] sm:$0xff] (%p5050_p6) }
 0x2b8   : > { %v4791_v59 = vadd.f32 %v4790_v18, %v4789_v56  ;;  %3894 = vst [vmem:[%s3835_s3] sm:$0xff] (%p5050_p6), %v3893_v43 }
 0x2b9   : > { %v3802_v46 = vadd.f32 %v4788_v52, %v3705_v13  ;;  %v3708_v60 = vadd.f32 %v4727_v37, %v6240_v2  ;;  %v3897_v2 = vld [vmem:[%s6246_s29 + $0x10] sm:$0xff] (%p5050_p6) }
 0x2ba   : > { %3898 = vst [vmem:[%s3835_s3 + $0x20] sm:$0xff] (%p5050_p6), %v3897_v2  ;;  %v3917_v36 = vld [vmem:[%s6246_s29 + $0x60] sm:$0xff] (%p5050_p6) }
 0x2bb   : > { %3822 = vst [vmem:[%s6246_s29 + $0x70] sm:$0xff] %v3802_v46  ;;  %v3805_v61 = vadd.f32 %v4791_v59, %v3708_v60  ;;  %3918 = vst [vmem:[%s3835_s3 + $0xc0] sm:$0xff] (%p5050_p6), %v3917_v36 }
 0x2bc   : > { %v3919_v54 = vld [vmem:[%s6246_s29 + $0x68] sm:$0xff] (%p5050_p6) }
 0x2bd   : > { %3823 = vst [vmem:[%s6246_s29 + $0x78] sm:$0xff] %v3805_v61  ;;  %3920 = vst [vmem:[%s3835_s3 + $0xd0] sm:$0xff] (%p5050_p6), %v3919_v54 }
 0x2c2   : > { %v3921_v10 = vld [vmem:[%s6246_s29 + $0x70] sm:$0xff] }
 0x2c3   : > { %3922 = vst [vmem:[%s3835_s3 + $0xe0] sm:$0xff] %v3921_v10 }
 0x2c4   : > { %v3923_v12 = vld [vmem:[%s6246_s29 + $0x78] sm:$0xff] }
 0x2c5   : > { %3924 = vst [vmem:[%s3835_s3 + $0xf0] sm:$0xff] %v3923_v12 }
 0x2c6 PF: > { %s12_s13 = sadd.s32 1, %s4998_s13   ;;  %s6319_s9 = smov %s4986_s10 }
 0x2c7   : > { %p9_p11 = scmp.ge.s32.totalorder %s12_s13, 4   ;;  %s6320_s10 = smov %s5055_s19 }
 0x2c8   : > { %s6321_s11 = smov %s4994_s12  ;;  %s6322_s12 = smov %s6324_s14 }
 0x2c9   :  { %11 = sbr.rel (!%p9_p11) target bundleno = 3 (0x3), region = 145 }

// kernel: discriminator_forward.11
= control target key start
LH: loop header
LB: loop body
LE: loop exit
PB: predicated region body
PF: predicated region fallthrough
CT: control target
= control target key end

     0   :  { %s1061_s0 = inlined_call_operand.vmem [shape: f32[128,256], index: 0, kind: input, shape index: {}]   ;;  %s1062_s1 = inlined_call_operand.vmem [shape: f32[1,256], index: 1, kind: input, shape index: {}]   ;;  %s1063_s2 = inlined_call_operand.vmem [shape: f32[1,256], index: 2, kind: input, shape index: {}]   ;;  %s1064_s3 = inlined_call_operand.vmem [shape: f32[128,256], index: 3, kind: output, shape index: {}]  }
   0x1   :  { %v470_v0 = vld [vmem:[%s1061_s0] sm:$0xff]  ;;  %v475_v1 = vld [vmem:[%s1061_s0 + $0x8] sm:$0xff]  ;;  %v480_v2 = vld [vmem:[%s1061_s0 + $0x10] sm:$0xff] }
   0x2   :  { %v485_v3 = vld [vmem:[%s1061_s0 + $0x18] sm:$0xff]  ;;  %v490_v4 = vld [vmem:[%s1061_s0 + $0x20] sm:$0xff]  ;;  %v495_v5 = vld [vmem:[%s1061_s0 + $0x28] sm:$0xff]  ;;  %v46_v6 = vadd.f32 %v480_v2, %v470_v0 }
   0x3   :  { %v502_v7 = vld [vmem:[%s1061_s0 + $0x30] sm:$0xff]  ;;  %v67_v8 = vadd.f32 %v485_v3, %v475_v1  ;;  %v509_v9 = vld [vmem:[%s1061_s0 + $0x38] sm:$0xff]  ;;  %v515_v11 = vld [vmem:[%s1061_s0 + $0x40] sm:$0xff] }
   0x4   :  { %v47_v10 = vadd.f32 %v46_v6, %v490_v4  ;;  %v521_v13 = vld [vmem:[%s1061_s0 + $0x48] sm:$0xff]  ;;  %v527_v15 = vld [vmem:[%s1061_s0 + $0x50] sm:$0xff]  ;;  %v533_v17 = vld [vmem:[%s1061_s0 + $0x58] sm:$0xff] }
   0x5   :  { %v68_v12 = vadd.f32 %v67_v8, %v495_v5  ;;  %v539_v19 = vld [vmem:[%s1061_s0 + $0x60] sm:$0xff]  ;;  %v545_v21 = vld [vmem:[%s1061_s0 + $0x68] sm:$0xff]  ;;  %v551_v23 = vld [vmem:[%s1061_s0 + $0x70] sm:$0xff] }
   0x6   :  { %v48_v14 = vadd.f32 %v47_v10, %v502_v7  ;;  %v557_v25 = vld [vmem:[%s1061_s0 + $0x78] sm:$0xff]  ;;  %v563_v27 = vld [vmem:[%s1061_s0 + $0x80] sm:$0xff]  ;;  %v569_v29 = vld [vmem:[%s1061_s0 + $0x88] sm:$0xff] }
   0x7   :  { %v69_v16 = vadd.f32 %v68_v12, %v509_v9  ;;  %v575_v31 = vld [vmem:[%s1061_s0 + $0x90] sm:$0xff]  ;;  %v581_v33 = vld [vmem:[%s1061_s0 + $0x98] sm:$0xff]  ;;  %v587_v35 = vld [vmem:[%s1061_s0 + $0xa0] sm:$0xff] }
   0x8   :  { %v49_v18 = vadd.f32 %v48_v14, %v515_v11  ;;  %v593_v37 = vld [vmem:[%s1061_s0 + $0xa8] sm:$0xff]  ;;  %v599_v39 = vld [vmem:[%s1061_s0 + $0xb0] sm:$0xff]  ;;  %v605_v41 = vld [vmem:[%s1061_s0 + $0xb8] sm:$0xff] }
   0x9   :  { %v70_v20 = vadd.f32 %v69_v16, %v521_v13  ;;  %v611_v43 = vld [vmem:[%s1061_s0 + $0xc0] sm:$0xff]  ;;  %v617_v45 = vld [vmem:[%s1061_s0 + $0xc8] sm:$0xff]  ;;  %v623_v47 = vld [vmem:[%s1061_s0 + $0xd0] sm:$0xff] }
   0xa   :  { %v50_v22 = vadd.f32 %v49_v18, %v527_v15  ;;  %v629_v49 = vld [vmem:[%s1061_s0 + $0xd8] sm:$0xff]  ;;  %v635_v51 = vld [vmem:[%s1061_s0 + $0xe0] sm:$0xff]  ;;  %v641_v53 = vld [vmem:[%s1061_s0 + $0xe8] sm:$0xff] }
   0xb   :  { %v71_v24 = vadd.f32 %v70_v20, %v533_v17  ;;  %v647_v55 = vld [vmem:[%s1061_s0 + $0xf0] sm:$0xff]  ;;  %v653_v57 = vld [vmem:[%s1061_s0 + $0xf8] sm:$0xff] }
   0xc   :  { %v51_v26 = vadd.f32 %v50_v22, %v539_v19 }
   0xd   :  { %v72_v28 = vadd.f32 %v71_v24, %v545_v21 }
   0xe   :  { %v52_v30 = vadd.f32 %v51_v26, %v551_v23 }
   0xf   :  { %v73_v32 = vadd.f32 %v72_v28, %v557_v25 }
  0x10   :  { %v53_v34 = vadd.f32 %v52_v30, %v563_v27 }
  0x11   :  { %v74_v36 = vadd.f32 %v73_v32, %v569_v29 }
  0x12   :  { %v54_v38 = vadd.f32 %v53_v34, %v575_v31 }
  0x13   :  { %v75_v40 = vadd.f32 %v74_v36, %v581_v33 }
  0x14   :  { %v55_v42 = vadd.f32 %v54_v38, %v587_v35 }
  0x15   :  { %v76_v44 = vadd.f32 %v75_v40, %v593_v37 }
  0x16   :  { %v56_v46 = vadd.f32 %v55_v42, %v599_v39 }
  0x17   :  { %v77_v48 = vadd.f32 %v76_v44, %v605_v41 }
  0x18   :  { %v57_v50 = vadd.f32 %v56_v46, %v611_v43 }
  0x19   :  { %v78_v52 = vadd.f32 %v77_v48, %v617_v45 }
  0x1a   :  { %v58_v54 = vadd.f32 %v57_v50, %v623_v47 }
  0x1b   :  { %v79_v56 = vadd.f32 %v78_v52, %v629_v49 }
  0x1c   :  { %v59_v58 = vadd.f32 %v58_v54, %v635_v51 }
  0x1d   :  { %v80_v59 = vadd.f32 %v79_v56, %v641_v53 }
  0x1e   :  { %v60_v60 = vadd.f32 %v59_v58, %v647_v55 }
  0x1f   :  { %v81_v61 = vadd.f32 %v80_v59, %v653_v57 }
  0x20   :  { %v61_v62 = vrot.slane %v60_v60, 4 }
  0x21   :  { %v82_v63 = vrot.slane %v81_v61, 4 }
  0x22   :  { %v62_v6 = vadd.f32 %v61_v62, %v60_v60 }
  0x23   :  { %v83_v8 = vadd.f32 %v82_v63, %v81_v61 }
  0x24   :  { %v63_v10 = vrot.slane %v62_v6, 2 }
  0x25   :  { %v84_v12 = vrot.slane %v83_v8, 2 }
  0x26   :  { %v64_v14 = vadd.f32 %v63_v10, %v62_v6 }
  0x27   :  { %v85_v16 = vadd.f32 %v84_v12, %v83_v8 }
  0x28   :  { %v65_v18 = vrot.slane %v64_v14, 1 }
  0x29   :  { %v86_v20 = vrot.slane %v85_v16, 1 }
  0x2a   :  { %v66_v22 = vadd.f32 %v65_v18, %v64_v14 }
  0x2b   :  { %v87_v24 = vadd.f32 %v86_v20, %v85_v16 }
  0x2c   :  { %v659_v26 = vmul.f32 0.0078125, %v66_v22 }
  0x2d   :  { %v661_v28 = vmul.f32 0.0078125, %v87_v24 }
  0x2e   :  { %v665_v30 = vsub.f32 %v470_v0, %v659_v26  ;;  %v673_v34 = vsub.f32 %v480_v2, %v659_v26  ;;  %v681_v38 = vsub.f32 %v490_v4, %v659_v26  ;;  %v717_v46 = vsub.f32 %v527_v15, %v659_v26 }
  0x2f   :  { %v669_v32 = vsub.f32 %v475_v1, %v661_v28  ;;  %v677_v36 = vsub.f32 %v485_v3, %v661_v28  ;;  %v685_v0 = vsub.f32 %v495_v5, %v661_v28  ;;  %v689_v1 = vsub.f32 %v502_v7, %v659_v26 }
  0x30   :  { %v693_v2 = vsub.f32 %v509_v9, %v661_v28  ;;  %v122_v3 = vmul.f32 %v665_v30, %v665_v30  ;;  %v124_v4 = vmul.f32 %v673_v34, %v673_v34  ;;  %v705_v7 = vsub.f32 %v515_v11, %v659_v26 }
  0x31   :  { %v123_v40 = vmul.f32 %v669_v32, %v669_v32  ;;  %v125_v5 = vmul.f32 %v677_v36, %v677_v36  ;;  %v709_v9 = vsub.f32 %v521_v13, %v661_v28  ;;  %v126_v42 = vmul.f32 %v681_v38, %v681_v38 }
  0x32   :  { %v127_v44 = vmul.f32 %v685_v0, %v685_v0  ;;  %v721_v48 = vsub.f32 %v533_v17, %v661_v28  ;;  %v128_v11 = vmul.f32 %v689_v1, %v689_v1  ;;  %v129_v13 = vmul.f32 %v693_v2, %v693_v2 }
  0x33   :  { %v154_v50 = vadd.f32 %v124_v4, %v122_v3  ;;  %v175_v52 = vadd.f32 %v125_v5, %v123_v40  ;;  %v729_v54 = vsub.f32 %v539_v19, %v659_v26  ;;  %v733_v15 = vsub.f32 %v545_v21, %v661_v28 }
  0x34   :  { %v130_v17 = vmul.f32 %v705_v7, %v705_v7  ;;  %v131_v56 = vmul.f32 %v709_v9, %v709_v9  ;;  %v741_v60 = vsub.f32 %v551_v23, %v659_v26  ;;  %v745_v19 = vsub.f32 %v557_v25, %v661_v28 }
  0x35   :  { %v155_v58 = vadd.f32 %v154_v50, %v126_v42  ;;  %v176_v59 = vadd.f32 %v175_v52, %v127_v44  ;;  %v132_v21 = vmul.f32 %v717_v46, %v717_v46  ;;  %v133_v61 = vmul.f32 %v721_v48, %v721_v48 }
  0x36   :  { %v753_v6 = vsub.f32 %v563_v27, %v659_v26  ;;  %v757_v23 = vsub.f32 %v569_v29, %v661_v28  ;;  %v134_v25 = vmul.f32 %v729_v54, %v729_v54  ;;  %v135_v8 = vmul.f32 %v733_v15, %v733_v15 }
  0x37   :  { %v156_v62 = vadd.f32 %v155_v58, %v128_v11  ;;  %v177_v63 = vadd.f32 %v176_v59, %v129_v13  ;;  %v765_v14 = vsub.f32 %v575_v31, %v659_v26  ;;  %v769_v27 = vsub.f32 %v581_v33, %v661_v28 }
  0x38   :  { %v136_v29 = vmul.f32 %v741_v60, %v741_v60  ;;  %v137_v16 = vmul.f32 %v745_v19, %v745_v19  ;;  %v777_v22 = vsub.f32 %v587_v35, %v659_v26  ;;  %v781_v31 = vsub.f32 %v593_v37, %v661_v28 }
  0x39   :  { %v157_v10 = vadd.f32 %v156_v62, %v130_v17  ;;  %v178_v12 = vadd.f32 %v177_v63, %v131_v56  ;;  %v138_v33 = vmul.f32 %v753_v6, %v753_v6  ;;  %v139_v24 = vmul.f32 %v757_v23, %v757_v23 }
  0x3a   :  { %v789_v4 = vsub.f32 %v599_v39, %v659_v26  ;;  %v793_v35 = vsub.f32 %v605_v41, %v661_v28  ;;  %v140_v37 = vmul.f32 %v765_v14, %v765_v14  ;;  %v141_v5 = vmul.f32 %v769_v27, %v769_v27 }
  0x3b   :  { %v158_v18 = vadd.f32 %v157_v10, %v132_v21  ;;  %v179_v20 = vadd.f32 %v178_v12, %v133_v61  ;;  %v801_v11 = vsub.f32 %v611_v43, %v659_v26  ;;  %v805_v39 = vsub.f32 %v617_v45, %v661_v28 }
  0x3c   :  { %v142_v41 = vmul.f32 %v777_v22, %v777_v22  ;;  %v143_v13 = vmul.f32 %v781_v31, %v781_v31  ;;  %v813_v17 = vsub.f32 %v623_v47, %v659_v26  ;;  %v817_v43 = vsub.f32 %v629_v49, %v661_v28 }
  0x3d   :  { %v159_v3 = vadd.f32 %v158_v18, %v134_v25  ;;  %v180_v40 = vadd.f32 %v179_v20, %v135_v8  ;;  %v144_v45 = vmul.f32 %v789_v4, %v789_v4  ;;  %v145_v56 = vmul.f32 %v793_v35, %v793_v35 }
  0x3e   :  { %v825_v21 = vsub.f32 %v635_v51, %v659_v26  ;;  %v829_v47 = vsub.f32 %v641_v53, %v661_v28  ;;  %v146_v49 = vmul.f32 %v801_v11, %v801_v11  ;;  %v147_v61 = vmul.f32 %v805_v39, %v805_v39 }
  0x3f   :  { %v160_v42 = vadd.f32 %v159_v3, %v136_v29  ;;  %v181_v44 = vadd.f32 %v180_v40, %v137_v16  ;;  %v837_v25 = vsub.f32 %v647_v55, %v659_v26  ;;  %v841_v51 = vsub.f32 %v653_v57, %v661_v28 }
  0x40   :  { %v148_v53 = vmul.f32 %v813_v17, %v813_v17  ;;  %v149_v8 = vmul.f32 %v817_v43, %v817_v43  ;;  %v150_v29 = vmul.f32 %v825_v21, %v825_v21  ;;  %v151_v16 = vmul.f32 %v829_v47, %v829_v47 }
  0x41   :  { %v161_v50 = vadd.f32 %v160_v42, %v138_v33  ;;  %v182_v52 = vadd.f32 %v181_v44, %v139_v24  ;;  %v152_v57 = vmul.f32 %v837_v25, %v837_v25  ;;  %v153_v28 = vmul.f32 %v841_v51, %v841_v51 }
  0x43   :  { %v162_v58 = vadd.f32 %v161_v50, %v140_v37  ;;  %v183_v59 = vadd.f32 %v182_v52, %v141_v5 }
  0x45   :  { %v163_v62 = vadd.f32 %v162_v58, %v142_v41  ;;  %v184_v63 = vadd.f32 %v183_v59, %v143_v13 }
  0x47   :  { %v164_v10 = vadd.f32 %v163_v62, %v144_v45  ;;  %v185_v12 = vadd.f32 %v184_v63, %v145_v56 }
  0x49   :  { %v165_v55 = vadd.f32 %v164_v10, %v146_v49  ;;  %v186_v26 = vadd.f32 %v185_v12, %v147_v61  ;;  %v209_v10 = vlaneseq }
  0x4b   :  { %v166_v18 = vadd.f32 %v165_v55, %v148_v53  ;;  %v187_v20 = vadd.f32 %v186_v26, %v149_v8  ;;  %v446_v53 = vmov 1966171168  }
  0x4c   :  { %v207_v8 = vunpack.c.l.s4 %v446_v53 }
  0x4d   :  { %v167_v33 = vadd.f32 %v166_v18, %v150_v29  ;;  %v188_v24 = vadd.f32 %v187_v20, %v151_v16  ;;  %v210_v29 = vshrl.u32 %v209_v10, 7  ;;  %v198_v18 = vld [vmem:[%s1062_s1] sm:$0x3] }
  0x4e   :  { %v208_v12 = vunpack.c.0.s8 %v207_v8 }
  0x4f   :  { %v168_v3 = vadd.f32 %v167_v33, %v152_v57  ;;  %v189_v40 = vadd.f32 %v188_v24, %v153_v28  ;;  %v225_v33 = vsub.s32 0, %v210_v29  ;;  %v229_v24 = vsub.s32 1, %v210_v29 }
  0x50   :  { %v211_v55 = vsub.s32 %v208_v12, %v210_v29 }
  0x51   :  { %v169_v37 = vrot.slane %v168_v3, 4  ;;  %v190_v5 = vrot.slane %v189_v40, 4 }
  0x53   :  { %v170_v42 = vadd.f32 %v169_v37, %v168_v3  ;;  %v191_v44 = vadd.f32 %v190_v5, %v189_v40  ;;  %v265_v3 = vld [vmem:[%s1063_s2] sm:$0x3] }
  0x55   :  { %v171_v41 = vrot.slane %v170_v42, 2  ;;  %v192_v13 = vrot.slane %v191_v44, 2 }
  0x57   :  { %v172_v50 = vadd.f32 %v171_v41, %v170_v42  ;;  %v193_v52 = vadd.f32 %v192_v13, %v191_v44  ;;  %v865_v42 = vrot.slane %v265_v3, %v225_v33  ;;  %v867_v44 = vrot.slane %v265_v3, %v229_v24 }
  0x59   :  { %v173_v45 = vrot.slane %v172_v50, 1  ;;  %v194_v56 = vrot.slane %v193_v52, 1 }
  0x5b   :  { %v174_v58 = vadd.f32 %v173_v45, %v172_v50  ;;  %v195_v59 = vadd.f32 %v194_v56, %v193_v52 }
  0x5d   :  { %v196_v49 = vmul.f32 0.0078125, %v174_v58  ;;  %v197_v61 = vmul.f32 0.0078125, %v195_v59 }
  0x5f   :  { %v199_v62 = vadd.f32 1e-05, %v196_v49  ;;  %v200_v63 = vadd.f32 1e-05, %v197_v61 }
  0x61   :  { %442 = vrsqrt.f32 %v199_v62 }
  0x62   :  { %444 = vrsqrt.f32 %v200_v63 }
  0x6b   :  { %v443_v16 = vpop.eup %442 }
  0x6c   :  { %v445_v26 = vpop.eup %444 }
  0x6d   :  { %v205_v57 = vcombine.low %v443_v16, %v445_v26 }
  0x6f   :  { %v212_v28 = vrot.slane %v205_v57, %v211_v55 }
  0x71   :  { %v219_v20 = vrot.slane %v212_v28, %v211_v55 }
  0x73   :  { %v221_v40 = vmul.f32 %v219_v20, %v198_v18 }
  0x75   :  { %v861_v37 = vrot.slane %v221_v40, %v225_v33  ;;  %v863_v5 = vrot.slane %v221_v40, %v229_v24 }
  0x77   :  { %v233_v41 = vmul.f32 %v861_v37, %v665_v30  ;;  %v234_v13 = vmul.f32 %v863_v5, %v669_v32  ;;  %v235_v50 = vmul.f32 %v861_v37, %v673_v34  ;;  %v236_v52 = vmul.f32 %v863_v5, %v677_v36 }
  0x78   :  { %v237_v45 = vmul.f32 %v861_v37, %v681_v38  ;;  %v238_v56 = vmul.f32 %v863_v5, %v685_v0  ;;  %v239_v58 = vmul.f32 %v861_v37, %v689_v1  ;;  %v240_v30 = vmul.f32 %v863_v5, %v693_v2 }
  0x79   :  { %v277_v32 = vadd.f32 %v865_v42, %v233_v41  ;;  %v278_v59 = vadd.f32 %v867_v44, %v234_v13  ;;  %v279_v34 = vadd.f32 %v865_v42, %v235_v50  ;;  %v280_v36 = vadd.f32 %v867_v44, %v236_v52 }
  0x7a   :  { %v281_v49 = vadd.f32 %v865_v42, %v237_v45  ;;  %v282_v38 = vadd.f32 %v867_v44, %v238_v56  ;;  %v283_v0 = vadd.f32 %v865_v42, %v239_v58  ;;  %v284_v61 = vadd.f32 %v867_v44, %v240_v30 }
  0x7b   :  { %vm309_vm0 = vcmp.ge.f32.partialorder %v277_v32, 0.0  ;;  %v341_v1 = vmul.f32 0.2, %v277_v32  ;;  %vm310_vm1 = vcmp.ge.f32.partialorder %v278_v59, 0.0  ;;  %v342_v2 = vmul.f32 0.2, %v278_v59 }
  0x7c   :  { %vm311_vm2 = vcmp.ge.f32.partialorder %v279_v34, 0.0  ;;  %v343_v62 = vmul.f32 0.2, %v279_v34  ;;  %vm312_vm3 = vcmp.ge.f32.partialorder %v280_v36, 0.0  ;;  %v344_v63 = vmul.f32 0.2, %v280_v36 }
  0x7d   :  { %v373_v53 = vsel %vm309_vm0, %v277_v32, %v341_v1  ;;  %v374_v8 = vsel %vm310_vm1, %v278_v59, %v342_v2  ;;  %vm313_vm4 = vcmp.ge.f32.partialorder %v281_v49, 0.0  ;;  %v345_v10 = vmul.f32 0.2, %v281_v49 }
  0x7e   :  { %405 = vst [vmem:[%s1064_s3] sm:$0xff] %v373_v53  ;;  %406 = vst [vmem:[%s1064_s3 + $0x8] sm:$0xff] %v374_v8  ;;  %v375_v12 = vsel %vm311_vm2, %v279_v34, %v343_v62  ;;  %v376_v29 = vsel %vm312_vm3, %v280_v36, %v344_v63  ;;  %vm314_vm5 = vcmp.ge.f32.partialorder %v282_v38, 0.0  ;;  %v346_v16 = vmul.f32 0.2, %v282_v38 }
  0x7f   :  { %407 = vst [vmem:[%s1064_s3 + $0x10] sm:$0xff] %v375_v12  ;;  %408 = vst [vmem:[%s1064_s3 + $0x18] sm:$0xff] %v376_v29  ;;  %v377_v55 = vsel %vm313_vm4, %v281_v49, %v345_v10  ;;  %vm315_vm6 = vcmp.ge.f32.partialorder %v283_v0, 0.0  ;;  %v347_v26 = vmul.f32 0.2, %v283_v0  ;;  %vm316_vm7 = vcmp.ge.f32.partialorder %v284_v61, 0.0 }
  0x80   :  { %409 = vst [vmem:[%s1064_s3 + $0x20] sm:$0xff] %v377_v55  ;;  %v378_v57 = vsel %vm314_vm5, %v282_v38, %v346_v16  ;;  %v348_v28 = vmul.f32 0.2, %v284_v61  ;;  %v241_v18 = vmul.f32 %v861_v37, %v705_v7  ;;  %v242_v20 = vmul.f32 %v863_v5, %v709_v9 }
  0x81   :  { %410 = vst [vmem:[%s1064_s3 + $0x28] sm:$0xff] %v378_v57  ;;  %v379_v33 = vsel %vm315_vm6, %v283_v0, %v347_v26  ;;  %v243_v24 = vmul.f32 %v861_v37, %v717_v46  ;;  %v244_v3 = vmul.f32 %v863_v5, %v721_v48  ;;  %v245_v40 = vmul.f32 %v861_v37, %v729_v54 }
  0x82   :  { %411 = vst [vmem:[%s1064_s3 + $0x30] sm:$0xff] %v379_v33  ;;  %v380_v7 = vsel %vm316_vm7, %v284_v61, %v348_v28  ;;  %v285_v9 = vadd.f32 %v865_v42, %v241_v18  ;;  %v286_v41 = vadd.f32 %v867_v44, %v242_v20  ;;  %v246_v13 = vmul.f32 %v863_v5, %v733_v15 }
  0x83   :  { %412 = vst [vmem:[%s1064_s3 + $0x38] sm:$0xff] %v380_v7  ;;  %v287_v46 = vadd.f32 %v865_v42, %v243_v24  ;;  %v288_v48 = vadd.f32 %v867_v44, %v244_v3  ;;  %v289_v54 = vadd.f32 %v865_v42, %v245_v40  ;;  %v247_v50 = vmul.f32 %v861_v37, %v741_v60 }
  0x84   :  { %vm317_vm8 = vcmp.ge.f32.partialorder %v285_v9, 0.0  ;;  %v349_v52 = vmul.f32 0.2, %v285_v9  ;;  %vm318_vm9 = vcmp.ge.f32.partialorder %v286_v41, 0.0  ;;  %v350_v45 = vmul.f32 0.2, %v286_v41 }
  0x85   :  { %vm319_vm10 = vcmp.ge.f32.partialorder %v287_v46, 0.0  ;;  %v351_v56 = vmul.f32 0.2, %v287_v46  ;;  %vm320_vm11 = vcmp.ge.f32.partialorder %v288_v48, 0.0  ;;  %v352_v15 = vmul.f32 0.2, %v288_v48 }
  0x86   :  { %v381_v58 = vsel %vm317_vm8, %v285_v9, %v349_v52  ;;  %v382_v30 = vsel %vm318_vm9, %v286_v41, %v350_v45  ;;  %vm321_vm12 = vcmp.ge.f32.partialorder %v289_v54, 0.0  ;;  %v353_v32 = vmul.f32 0.2, %v289_v54 }
  0x87   :  { %413 = vst [vmem:[%s1064_s3 + $0x40] sm:$0xff] %v381_v58  ;;  %414 = vst [vmem:[%s1064_s3 + $0x48] sm:$0xff] %v382_v30  ;;  %v383_v60 = vsel %vm319_vm10, %v287_v46, %v351_v56  ;;  %v384_v59 = vsel %vm320_vm11, %v288_v48, %v352_v15  ;;  %v290_v34 = vadd.f32 %v867_v44, %v246_v13 }
  0x88   :  { %v291_v36 = vadd.f32 %v865_v42, %v247_v50  ;;  %415 = vst [vmem:[%s1064_s3 + $0x50] sm:$0xff] %v383_v60  ;;  %416 = vst [vmem:[%s1064_s3 + $0x58] sm:$0xff] %v384_v59  ;;  %v385_v49 = vsel %vm321_vm12, %v289_v54, %v353_v32  ;;  %v248_v38 = vmul.f32 %v863_v5, %v745_v19 }
  0x89   :  { %v249_v0 = vmul.f32 %v861_v37, %v753_v6  ;;  %v250_v61 = vmul.f32 %v863_v5, %v757_v23  ;;  %417 = vst [vmem:[%s1064_s3 + $0x60] sm:$0xff] %v385_v49  ;;  %vm322_vm13 = vcmp.ge.f32.partialorder %v290_v34, 0.0  ;;  %v354_v1 = vmul.f32 0.2, %v290_v34 }
  0x8a   :  { %vm323_vm14 = vcmp.ge.f32.partialorder %v291_v36, 0.0  ;;  %v355_v2 = vmul.f32 0.2, %v291_v36  ;;  %v292_v62 = vadd.f32 %v867_v44, %v248_v38  ;;  %v251_v6 = vmul.f32 %v861_v37, %v765_v14 }
  0x8b   :  { %v293_v63 = vadd.f32 %v865_v42, %v249_v0  ;;  %v294_v19 = vadd.f32 %v867_v44, %v250_v61  ;;  %v386_v53 = vsel %vm322_vm13, %v290_v34, %v354_v1  ;;  %v252_v23 = vmul.f32 %v863_v5, %v769_v27 }
  0x8c   :  { %v387_v8 = vsel %vm323_vm14, %v291_v36, %v355_v2  ;;  %v253_v10 = vmul.f32 %v861_v37, %v777_v22  ;;  %418 = vst [vmem:[%s1064_s3 + $0x68] sm:$0xff] %v386_v53  ;;  %vm324_vm15 = vcmp.ge.f32.partialorder %v292_v62, 0.0  ;;  %v356_v12 = vmul.f32 0.2, %v292_v62 }
  0x8d   :  { %419 = vst [vmem:[%s1064_s3 + $0x70] sm:$0xff] %v387_v8  ;;  %vm325_vm0 = vcmp.ge.f32.partialorder %v293_v63, 0.0  ;;  %v357_v14 = vmul.f32 0.2, %v293_v63  ;;  %vm326_vm1 = vcmp.ge.f32.partialorder %v294_v19, 0.0  ;;  %v295_v16 = vadd.f32 %v865_v42, %v251_v6 }
  0x8e   :  { %v358_v29 = vmul.f32 0.2, %v294_v19  ;;  %v296_v27 = vadd.f32 %v867_v44, %v252_v23  ;;  %v388_v55 = vsel %vm324_vm15, %v292_v62, %v356_v12  ;;  %v297_v26 = vadd.f32 %v865_v42, %v253_v10 }
  0x8f   :  { %v389_v22 = vsel %vm325_vm0, %v293_v63, %v357_v14  ;;  %v254_v57 = vmul.f32 %v863_v5, %v781_v31  ;;  %420 = vst [vmem:[%s1064_s3 + $0x78] sm:$0xff] %v388_v55  ;;  %vm327_vm2 = vcmp.ge.f32.partialorder %v295_v16, 0.0  ;;  %v359_v18 = vmul.f32 0.2, %v295_v16 }
  0x90   :  { %421 = vst [vmem:[%s1064_s3 + $0x80] sm:$0xff] %v389_v22  ;;  %v390_v28 = vsel %vm326_vm1, %v294_v19, %v358_v29  ;;  %vm328_vm3 = vcmp.ge.f32.partialorder %v296_v27, 0.0  ;;  %v360_v20 = vmul.f32 0.2, %v296_v27  ;;  %vm329_vm4 = vcmp.ge.f32.partialorder %v297_v26, 0.0 }
  0x91   :  { %422 = vst [vmem:[%s1064_s3 + $0x88] sm:$0xff] %v390_v28  ;;  %v361_v33 = vmul.f32 0.2, %v297_v26  ;;  %v298_v31 = vadd.f32 %v867_v44, %v254_v57  ;;  %v391_v24 = vsel %vm327_vm2, %v295_v16, %v359_v18  ;;  %v255_v3 = vmul.f32 %v861_v37, %v789_v4 }
  0x92   :  { %v256_v40 = vmul.f32 %v863_v5, %v793_v35  ;;  %v257_v7 = vmul.f32 %v861_v37, %v801_v11  ;;  %423 = vst [vmem:[%s1064_s3 + $0x90] sm:$0xff] %v391_v24  ;;  %v392_v9 = vsel %vm328_vm3, %v296_v27, %v360_v20  ;;  %v258_v46 = vmul.f32 %v863_v5, %v805_v39 }
  0x93   :  { %v393_v41 = vsel %vm329_vm4, %v297_v26, %v361_v33  ;;  %vm330_vm5 = vcmp.ge.f32.partialorder %v298_v31, 0.0  ;;  %v362_v13 = vmul.f32 0.2, %v298_v31  ;;  %424 = vst [vmem:[%s1064_s3 + $0x98] sm:$0xff] %v392_v9  ;;  %v299_v4 = vadd.f32 %v865_v42, %v255_v3 }
  0x94   :  { %425 = vst [vmem:[%s1064_s3 + $0xa0] sm:$0xff] %v393_v41  ;;  %v300_v35 = vadd.f32 %v867_v44, %v256_v40  ;;  %v301_v11 = vadd.f32 %v865_v42, %v257_v7  ;;  %v259_v54 = vmul.f32 %v861_v37, %v813_v17  ;;  %v260_v50 = vmul.f32 %v863_v5, %v817_v43 }
  0x95   :  { %v394_v48 = vsel %vm330_vm5, %v298_v31, %v362_v13  ;;  %v261_v52 = vmul.f32 %v861_v37, %v825_v21  ;;  %vm331_vm6 = vcmp.ge.f32.partialorder %v299_v4, 0.0  ;;  %v363_v45 = vmul.f32 0.2, %v299_v4 }
  0x96   :  { %426 = vst [vmem:[%s1064_s3 + $0xa8] sm:$0xff] %v394_v48  ;;  %vm332_vm7 = vcmp.ge.f32.partialorder %v300_v35, 0.0  ;;  %v364_v56 = vmul.f32 0.2, %v300_v35  ;;  %vm333_vm8 = vcmp.ge.f32.partialorder %v301_v11, 0.0  ;;  %v302_v15 = vadd.f32 %v867_v44, %v258_v46 }
  0x97   :  { %v365_v39 = vmul.f32 0.2, %v301_v11  ;;  %v303_v17 = vadd.f32 %v865_v42, %v259_v54  ;;  %v395_v58 = vsel %vm331_vm6, %v299_v4, %v363_v45  ;;  %v304_v43 = vadd.f32 %v867_v44, %v260_v50 }
  0x98   :  { %v396_v30 = vsel %vm332_vm7, %v300_v35, %v364_v56  ;;  %v305_v21 = vadd.f32 %v865_v42, %v261_v52  ;;  %427 = vst [vmem:[%s1064_s3 + $0xb0] sm:$0xff] %v395_v58  ;;  %vm334_vm9 = vcmp.ge.f32.partialorder %v302_v15, 0.0  ;;  %v366_v60 = vmul.f32 0.2, %v302_v15 }
  0x99   :  { %428 = vst [vmem:[%s1064_s3 + $0xb8] sm:$0xff] %v396_v30  ;;  %v397_v32 = vsel %vm333_vm8, %v301_v11, %v365_v39  ;;  %vm335_vm10 = vcmp.ge.f32.partialorder %v303_v17, 0.0  ;;  %v367_v59 = vmul.f32 0.2, %v303_v17  ;;  %vm336_vm11 = vcmp.ge.f32.partialorder %v304_v43, 0.0 }
  0x9a   :  { %429 = vst [vmem:[%s1064_s3 + $0xc0] sm:$0xff] %v397_v32  ;;  %v368_v34 = vmul.f32 0.2, %v304_v43  ;;  %vm337_vm12 = vcmp.ge.f32.partialorder %v305_v21, 0.0  ;;  %v398_v36 = vsel %vm334_vm9, %v302_v15, %v366_v60  ;;  %v369_v49 = vmul.f32 0.2, %v305_v21 }
  0x9b   :  { %v262_v38 = vmul.f32 %v863_v5, %v829_v47  ;;  %v263_v0 = vmul.f32 %v861_v37, %v837_v25  ;;  %430 = vst [vmem:[%s1064_s3 + $0xc8] sm:$0xff] %v398_v36  ;;  %v399_v61 = vsel %vm335_vm10, %v303_v17, %v367_v59  ;;  %v264_v2 = vmul.f32 %v863_v5, %v841_v51 }
  0x9c   :  { %v400_v1 = vsel %vm336_vm11, %v304_v43, %v368_v34  ;;  %431 = vst [vmem:[%s1064_s3 + $0xd0] sm:$0xff] %v399_v61  ;;  %v401_v47 = vsel %vm337_vm12, %v305_v21, %v369_v49 }
  0x9d   :  { %432 = vst [vmem:[%s1064_s3 + $0xd8] sm:$0xff] %v400_v1  ;;  %v306_v25 = vadd.f32 %v867_v44, %v262_v38  ;;  %v307_v37 = vadd.f32 %v865_v42, %v263_v0  ;;  %433 = vst [vmem:[%s1064_s3 + $0xe0] sm:$0xff] %v401_v47  ;;  %v308_v62 = vadd.f32 %v867_v44, %v264_v2 }
  0x9f   :  { %vm338_vm13 = vcmp.ge.f32.partialorder %v306_v25, 0.0  ;;  %v370_v51 = vmul.f32 0.2, %v306_v25  ;;  %vm339_vm14 = vcmp.ge.f32.partialorder %v307_v37, 0.0  ;;  %v371_v5 = vmul.f32 0.2, %v307_v37 }
  0xa0   :  { %vm340_vm15 = vcmp.ge.f32.partialorder %v308_v62, 0.0  ;;  %v372_v63 = vmul.f32 0.2, %v308_v62 }
  0xa1   :  { %v402_v19 = vsel %vm338_vm13, %v306_v25, %v370_v51  ;;  %v403_v6 = vsel %vm339_vm14, %v307_v37, %v371_v5 }
  0xa2   :  { %434 = vst [vmem:[%s1064_s3 + $0xe8] sm:$0xff] %v402_v19  ;;  %435 = vst [vmem:[%s1064_s3 + $0xf0] sm:$0xff] %v403_v6  ;;  %v404_v42 = vsel %vm340_vm15, %v308_v62, %v372_v63 }
  0xa3   :  { %436 = vst [vmem:[%s1064_s3 + $0xf8] sm:$0xff] %v404_v42 }

// kernel: discriminator_forward.12
= control target key start
LH: loop header
LB: loop body
LE: loop exit
PB: predicated region body
PF: predicated region fallthrough
CT: control target
= control target key end

     0   :  { %s10371_s9 = smov 0   ;;  %s10373_s10 = smov 0   ;;  %s12333_s0 = inlined_call_operand.vmem [shape: bf16[32,4096], index: 0, kind: input, shape index: {}]   ;;  %s12334_s1 = inlined_call_operand.vmem [shape: bf16[4096,512], index: 1, kind: input, shape index: {}]   ;;  %s12335_s2 = inlined_call_operand.vmem [shape: f32[32,512], index: 2, kind: output, shape index: {}]  }
   0x1   :  { %s10375_s11 = smov 0   ;;  %s10377_s12 = smov 0  }
   0x2   :  { %s10379_s13 = smov 0  }
   0x3 LB: > { %s21_s14 = sadd.s32 1, %s10350_s12  ;;  %s8794_s15 = sadd.s32 4294967295, %s10354_s13   ;;  %s10354_s13 = sphi %s10379_s13, %s12_s13   ;;  %s10350_s12 = sphi %s10377_s12, %s12340_s12   ;;  %s10346_s11 = sphi %s10375_s11, %s12339_s11   ;;  %s10342_s10 = sphi %s10373_s10, %s12338_s10   ;;  %s10338_s9 = sphi %s10371_s9, %s12337_s9  }
   0x4   : > { %p22_p0 = scmp.ge.s32.totalorder %s21_s14, 2  ;;  %p64_p1 = scmp.ne.s32.totalorder %s10342_s10, %s10338_s9 }
   0x5   : > { %p65_p2 = scmp.eq.s32.totalorder %s10354_s13, 0  ;;  %p96_p4 = scmp.eq.s32.totalorder %s8794_s15, 1 }
   0x6   : > { %s12342_s14 = smov (%p22_p0, %s21_s14), 0  ;;  %s57_s17 = sadd.s32 1, %s10342_s10 }
   0x7   : > { %p66_p3 = por %p65_p2, %p64_p1  ;;  %s54_s16 = ssub.s32 %s10350_s12, %s12342_s14 }
   0x8   : > { %p55_p5 = scmp.eq.s32.totalorder %s54_s16, 0  ;;  %p10406_p6 = por %p96_p4, %p64_p1 }
   0x9   : > { %p8798_p7 = scmp.ge.s32.totalorder %s10354_s13, 2 }
   0xa   : > { %s10411_s19 = scalar_select %p55_p5, %s10342_s10, %s57_s17  }
   0xb   : > { %128 = sbr.rel (%p8798_p7) target bundleno = 278 (0x116), region = 20 }
  0x12   : > { %131 = sbr.rel (!%p66_p3) target bundleno = 278 (0x116), region = 24  ;;  %s133_s20 = sand.u32 (%p66_p3), 1, %s10342_s10  }
  0x13   : > { %s9386_s21 = sshll.u32 (%p66_p3), %s10350_s12, 3  ;;  %s8799_s22 = sshll.u32 (%p66_p3), %s133_s20, 12 }
  0x14   : > { %s10419_s25 = scalar_lea.vmem (%p66_p3), %s12334_s1, %s9386_s21  ;;  %s10424_s26 = scalar_lea.vmem (%p66_p3), [#allocation2], %s8799_s22 }
  0x15   : > { %v1191_v0 = vld [vmem:[%s10419_s25] sm:$0xff] (%p66_p3)  ;;  %v1193_v1 = vld [vmem:[%s10419_s25 + $0x10] sm:$0xff] (%p66_p3) }
  0x16   : > { %v1195_v2 = vld [vmem:[%s10419_s25 + $0x20] sm:$0xff] (%p66_p3)  ;;  %1192 = vst [vmem:[%s10424_s26] sm:$0xff] (%p66_p3), %v1191_v0  ;;  %1194 = vst [vmem:[%s10424_s26 + $0x8] sm:$0xff] (%p66_p3), %v1193_v1  ;;  %v1197_v3 = vld [vmem:[%s10419_s25 + $0x30] sm:$0xff] (%p66_p3) }
  0x17   : > { %1196 = vst [vmem:[%s10424_s26 + $0x10] sm:$0xff] (%p66_p3), %v1195_v2  ;;  %v1199_v4 = vld [vmem:[%s10419_s25 + $0x40] sm:$0xff] (%p66_p3)  ;;  %v1201_v5 = vld [vmem:[%s10419_s25 + $0x50] sm:$0xff] (%p66_p3)  ;;  %1198 = vst [vmem:[%s10424_s26 + $0x18] sm:$0xff] (%p66_p3), %v1197_v3 }
  0x18   : > { %1200 = vst [vmem:[%s10424_s26 + $0x20] sm:$0xff] (%p66_p3), %v1199_v4  ;;  %1202 = vst [vmem:[%s10424_s26 + $0x28] sm:$0xff] (%p66_p3), %v1201_v5  ;;  %v1203_v6 = vld [vmem:[%s10419_s25 + $0x60] sm:$0xff] (%p66_p3)  ;;  %v1205_v7 = vld [vmem:[%s10419_s25 + $0x70] sm:$0xff] (%p66_p3) }
  0x19   : > { %v1207_v8 = vld [vmem:[%s10419_s25 + $0x80] sm:$0xff]  ;;  %1204 = vst [vmem:[%s10424_s26 + $0x30] sm:$0xff] %v1203_v6  ;;  %1206 = vst [vmem:[%s10424_s26 + $0x38] sm:$0xff] %v1205_v7  ;;  %v1209_v9 = vld [vmem:[%s10419_s25 + $0x90] sm:$0xff] }
  0x1a   : > { %1208 = vst [vmem:[%s10424_s26 + $0x40] sm:$0xff] %v1207_v8  ;;  %v1211_v10 = vld [vmem:[%s10419_s25 + $0xa0] sm:$0xff]  ;;  %v1213_v11 = vld [vmem:[%s10419_s25 + $0xb0] sm:$0xff]  ;;  %1210 = vst [vmem:[%s10424_s26 + $0x48] sm:$0xff] %v1209_v9 }
  0x1b   : > { %1212 = vst [vmem:[%s10424_s26 + $0x50] sm:$0xff] %v1211_v10  ;;  %1214 = vst [vmem:[%s10424_s26 + $0x58] sm:$0xff] %v1213_v11  ;;  %v1215_v12 = vld [vmem:[%s10419_s25 + $0xc0] sm:$0xff]  ;;  %v1217_v13 = vld [vmem:[%s10419_s25 + $0xd0] sm:$0xff] }
  0x1c   : > { %v1219_v14 = vld [vmem:[%s10419_s25 + $0xe0] sm:$0xff]  ;;  %1216 = vst [vmem:[%s10424_s26 + $0x60] sm:$0xff] %v1215_v12  ;;  %1218 = vst [vmem:[%s10424_s26 + $0x68] sm:$0xff] %v1217_v13  ;;  %v1221_v15 = vld [vmem:[%s10419_s25 + $0xf0] sm:$0xff] }
  0x1d   : > { %1220 = vst [vmem:[%s10424_s26 + $0x70] sm:$0xff] %v1219_v14  ;;  %v1223_v16 = vld [vmem:[%s10419_s25 + $0x100] sm:$0xff]  ;;  %v1225_v17 = vld [vmem:[%s10419_s25 + $0x110] sm:$0xff]  ;;  %1222 = vst [vmem:[%s10424_s26 + $0x78] sm:$0xff] %v1221_v15 }
  0x1e   : > { %1224 = vst [vmem:[%s10424_s26 + $0x80] sm:$0xff] %v1223_v16  ;;  %1226 = vst [vmem:[%s10424_s26 + $0x88] sm:$0xff] %v1225_v17  ;;  %v1227_v18 = vld [vmem:[%s10419_s25 + $0x120] sm:$0xff]  ;;  %v1229_v19 = vld [vmem:[%s10419_s25 + $0x130] sm:$0xff] }
  0x1f   : > { %v1231_v20 = vld [vmem:[%s10419_s25 + $0x140] sm:$0xff]  ;;  %1228 = vst [vmem:[%s10424_s26 + $0x90] sm:$0xff] %v1227_v18  ;;  %1230 = vst [vmem:[%s10424_s26 + $0x98] sm:$0xff] %v1229_v19  ;;  %v1233_v21 = vld [vmem:[%s10419_s25 + $0x150] sm:$0xff] }
  0x20   : > { %1232 = vst [vmem:[%s10424_s26 + $0xa0] sm:$0xff] %v1231_v20  ;;  %v1235_v22 = vld [vmem:[%s10419_s25 + $0x160] sm:$0xff]  ;;  %v1237_v23 = vld [vmem:[%s10419_s25 + $0x170] sm:$0xff]  ;;  %1234 = vst [vmem:[%s10424_s26 + $0xa8] sm:$0xff] %v1233_v21 }
  0x21   : > { %1236 = vst [vmem:[%s10424_s26 + $0xb0] sm:$0xff] %v1235_v22  ;;  %1238 = vst [vmem:[%s10424_s26 + $0xb8] sm:$0xff] %v1237_v23  ;;  %v1239_v24 = vld [vmem:[%s10419_s25 + $0x180] sm:$0xff]  ;;  %v1241_v25 = vld [vmem:[%s10419_s25 + $0x190] sm:$0xff] }
  0x22   : > { %v1243_v26 = vld [vmem:[%s10419_s25 + $0x1a0] sm:$0xff]  ;;  %1240 = vst [vmem:[%s10424_s26 + $0xc0] sm:$0xff] %v1239_v24  ;;  %1242 = vst [vmem:[%s10424_s26 + $0xc8] sm:$0xff] %v1241_v25  ;;  %v1245_v27 = vld [vmem:[%s10419_s25 + $0x1b0] sm:$0xff] }
  0x23   : > { %1244 = vst [vmem:[%s10424_s26 + $0xd0] sm:$0xff] %v1243_v26  ;;  %v1247_v28 = vld [vmem:[%s10419_s25 + $0x1c0] sm:$0xff]  ;;  %v1249_v29 = vld [vmem:[%s10419_s25 + $0x1d0] sm:$0xff]  ;;  %1246 = vst [vmem:[%s10424_s26 + $0xd8] sm:$0xff] %v1245_v27 }
  0x24   : > { %1248 = vst [vmem:[%s10424_s26 + $0xe0] sm:$0xff] %v1247_v28  ;;  %1250 = vst [vmem:[%s10424_s26 + $0xe8] sm:$0xff] %v1249_v29  ;;  %v1251_v30 = vld [vmem:[%s10419_s25 + $0x1e0] sm:$0xff]  ;;  %v1253_v31 = vld [vmem:[%s10419_s25 + $0x1f0] sm:$0xff] }
  0x25   : > { %v1255_v32 = vld [vmem:[%s10419_s25 + $0x200] sm:$0xff]  ;;  %1252 = vst [vmem:[%s10424_s26 + $0xf0] sm:$0xff] %v1251_v30  ;;  %1254 = vst [vmem:[%s10424_s26 + $0xf8] sm:$0xff] %v1253_v31  ;;  %v1257_v33 = vld [vmem:[%s10419_s25 + $0x210] sm:$0xff] }
  0x26   : > { %1256 = vst [vmem:[%s10424_s26 + $0x100] sm:$0xff] %v1255_v32  ;;  %v1259_v34 = vld [vmem:[%s10419_s25 + $0x220] sm:$0xff]  ;;  %v1261_v35 = vld [vmem:[%s10419_s25 + $0x230] sm:$0xff]  ;;  %1258 = vst [vmem:[%s10424_s26 + $0x108] sm:$0xff] %v1257_v33 }
  0x27   : > { %1260 = vst [vmem:[%s10424_s26 + $0x110] sm:$0xff] %v1259_v34  ;;  %1262 = vst [vmem:[%s10424_s26 + $0x118] sm:$0xff] %v1261_v35  ;;  %v1263_v36 = vld [vmem:[%s10419_s25 + $0x240] sm:$0xff]  ;;  %v1265_v37 = vld [vmem:[%s10419_s25 + $0x250] sm:$0xff] }
  0x28   : > { %v1267_v38 = vld [vmem:[%s10419_s25 + $0x260] sm:$0xff]  ;;  %1264 = vst [vmem:[%s10424_s26 + $0x120] sm:$0xff] %v1263_v36  ;;  %1266 = vst [vmem:[%s10424_s26 + $0x128] sm:$0xff] %v1265_v37  ;;  %v1269_v39 = vld [vmem:[%s10419_s25 + $0x270] sm:$0xff] }
  0x29   : > { %1268 = vst [vmem:[%s10424_s26 + $0x130] sm:$0xff] %v1267_v38  ;;  %v1271_v40 = vld [vmem:[%s10419_s25 + $0x280] sm:$0xff]  ;;  %v1273_v41 = vld [vmem:[%s10419_s25 + $0x290] sm:$0xff]  ;;  %1270 = vst [vmem:[%s10424_s26 + $0x138] sm:$0xff] %v1269_v39 }
  0x2a   : > { %1272 = vst [vmem:[%s10424_s26 + $0x140] sm:$0xff] %v1271_v40  ;;  %1274 = vst [vmem:[%s10424_s26 + $0x148] sm:$0xff] %v1273_v41  ;;  %v1275_v42 = vld [vmem:[%s10419_s25 + $0x2a0] sm:$0xff]  ;;  %v1277_v43 = vld [vmem:[%s10419_s25 + $0x2b0] sm:$0xff] }
  0x2b   : > { %v1279_v44 = vld [vmem:[%s10419_s25 + $0x2c0] sm:$0xff]  ;;  %1276 = vst [vmem:[%s10424_s26 + $0x150] sm:$0xff] %v1275_v42  ;;  %1278 = vst [vmem:[%s10424_s26 + $0x158] sm:$0xff] %v1277_v43  ;;  %v1281_v45 = vld [vmem:[%s10419_s25 + $0x2d0] sm:$0xff] }
  0x2c   : > { %1280 = vst [vmem:[%s10424_s26 + $0x160] sm:$0xff] %v1279_v44  ;;  %v1283_v46 = vld [vmem:[%s10419_s25 + $0x2e0] sm:$0xff]  ;;  %v1285_v47 = vld [vmem:[%s10419_s25 + $0x2f0] sm:$0xff]  ;;  %1282 = vst [vmem:[%s10424_s26 + $0x168] sm:$0xff] %v1281_v45 }
  0x2d   : > { %1284 = vst [vmem:[%s10424_s26 + $0x170] sm:$0xff] %v1283_v46  ;;  %1286 = vst [vmem:[%s10424_s26 + $0x178] sm:$0xff] %v1285_v47  ;;  %v1287_v48 = vld [vmem:[%s10419_s25 + $0x300] sm:$0xff]  ;;  %v1289_v49 = vld [vmem:[%s10419_s25 + $0x310] sm:$0xff] }
  0x2e   : > { %v1291_v50 = vld [vmem:[%s10419_s25 + $0x320] sm:$0xff]  ;;  %1288 = vst [vmem:[%s10424_s26 + $0x180] sm:$0xff] %v1287_v48  ;;  %1290 = vst [vmem:[%s10424_s26 + $0x188] sm:$0xff] %v1289_v49  ;;  %v1293_v51 = vld [vmem:[%s10419_s25 + $0x330] sm:$0xff] }
  0x2f   : > { %1292 = vst [vmem:[%s10424_s26 + $0x190] sm:$0xff] %v1291_v50  ;;  %v1295_v52 = vld [vmem:[%s10419_s25 + $0x340] sm:$0xff]  ;;  %v1297_v53 = vld [vmem:[%s10419_s25 + $0x350] sm:$0xff]  ;;  %1294 = vst [vmem:[%s10424_s26 + $0x198] sm:$0xff] %v1293_v51 }
  0x30   : > { %1296 = vst [vmem:[%s10424_s26 + $0x1a0] sm:$0xff] %v1295_v52  ;;  %1298 = vst [vmem:[%s10424_s26 + $0x1a8] sm:$0xff] %v1297_v53  ;;  %v1299_v54 = vld [vmem:[%s10419_s25 + $0x360] sm:$0xff]  ;;  %v1301_v55 = vld [vmem:[%s10419_s25 + $0x370] sm:$0xff] }
  0x31   : > { %v1303_v56 = vld [vmem:[%s10419_s25 + $0x380] sm:$0xff]  ;;  %1300 = vst [vmem:[%s10424_s26 + $0x1b0] sm:$0xff] %v1299_v54  ;;  %1302 = vst [vmem:[%s10424_s26 + $0x1b8] sm:$0xff] %v1301_v55  ;;  %v1305_v57 = vld [vmem:[%s10419_s25 + $0x390] sm:$0xff] }
  0x32   : > { %1304 = vst [vmem:[%s10424_s26 + $0x1c0] sm:$0xff] %v1303_v56  ;;  %v1307_v58 = vld [vmem:[%s10419_s25 + $0x3a0] sm:$0xff]  ;;  %v1309_v59 = vld [vmem:[%s10419_s25 + $0x3b0] sm:$0xff]  ;;  %1306 = vst [vmem:[%s10424_s26 + $0x1c8] sm:$0xff] %v1305_v57 }
  0x33   : > { %1308 = vst [vmem:[%s10424_s26 + $0x1d0] sm:$0xff] %v1307_v58  ;;  %1310 = vst [vmem:[%s10424_s26 + $0x1d8] sm:$0xff] %v1309_v59  ;;  %v1311_v60 = vld [vmem:[%s10419_s25 + $0x3c0] sm:$0xff]  ;;  %v1313_v61 = vld [vmem:[%s10419_s25 + $0x3d0] sm:$0xff] }
  0x34   : > { %v1315_v62 = vld [vmem:[%s10419_s25 + $0x3e0] sm:$0xff]  ;;  %1312 = vst [vmem:[%s10424_s26 + $0x1e0] sm:$0xff] %v1311_v60  ;;  %1314 = vst [vmem:[%s10424_s26 + $0x1e8] sm:$0xff] %v1313_v61  ;;  %v1317_v63 = vld [vmem:[%s10419_s25 + $0x3f0] sm:$0xff] }
  0x35   : > { %1316 = vst [vmem:[%s10424_s26 + $0x1f0] sm:$0xff] %v1315_v62  ;;  %v1319_v0 = vld [vmem:[%s10419_s25 + $0x400] sm:$0xff]  ;;  %v1321_v1 = vld [vmem:[%s10419_s25 + $0x410] sm:$0xff]  ;;  %1318 = vst [vmem:[%s10424_s26 + $0x1f8] sm:$0xff] %v1317_v63 }
  0x36   : > { %1320 = vst [vmem:[%s10424_s26 + $0x200] sm:$0xff] %v1319_v0  ;;  %1322 = vst [vmem:[%s10424_s26 + $0x208] sm:$0xff] %v1321_v1  ;;  %v1323_v2 = vld [vmem:[%s10419_s25 + $0x420] sm:$0xff]  ;;  %v1325_v3 = vld [vmem:[%s10419_s25 + $0x430] sm:$0xff] }
  0x37   : > { %v1327_v4 = vld [vmem:[%s10419_s25 + $0x440] sm:$0xff]  ;;  %1324 = vst [vmem:[%s10424_s26 + $0x210] sm:$0xff] %v1323_v2  ;;  %1326 = vst [vmem:[%s10424_s26 + $0x218] sm:$0xff] %v1325_v3  ;;  %v1329_v5 = vld [vmem:[%s10419_s25 + $0x450] sm:$0xff] }
  0x38   : > { %1328 = vst [vmem:[%s10424_s26 + $0x220] sm:$0xff] %v1327_v4  ;;  %v1331_v6 = vld [vmem:[%s10419_s25 + $0x460] sm:$0xff]  ;;  %v1333_v7 = vld [vmem:[%s10419_s25 + $0x470] sm:$0xff]  ;;  %1330 = vst [vmem:[%s10424_s26 + $0x228] sm:$0xff] %v1329_v5 }
  0x39   : > { %1332 = vst [vmem:[%s10424_s26 + $0x230] sm:$0xff] %v1331_v6  ;;  %1334 = vst [vmem:[%s10424_s26 + $0x238] sm:$0xff] %v1333_v7  ;;  %v1335_v8 = vld [vmem:[%s10419_s25 + $0x480] sm:$0xff]  ;;  %v1337_v9 = vld [vmem:[%s10419_s25 + $0x490] sm:$0xff] }
  0x3a   : > { %v1339_v10 = vld [vmem:[%s10419_s25 + $0x4a0] sm:$0xff]  ;;  %1336 = vst [vmem:[%s10424_s26 + $0x240] sm:$0xff] %v1335_v8  ;;  %1338 = vst [vmem:[%s10424_s26 + $0x248] sm:$0xff] %v1337_v9  ;;  %v1341_v11 = vld [vmem:[%s10419_s25 + $0x4b0] sm:$0xff] }
  0x3b   : > { %1340 = vst [vmem:[%s10424_s26 + $0x250] sm:$0xff] %v1339_v10  ;;  %v1343_v12 = vld [vmem:[%s10419_s25 + $0x4c0] sm:$0xff]  ;;  %v1345_v13 = vld [vmem:[%s10419_s25 + $0x4d0] sm:$0xff]  ;;  %1342 = vst [vmem:[%s10424_s26 + $0x258] sm:$0xff] %v1341_v11 }
  0x3c   : > { %1344 = vst [vmem:[%s10424_s26 + $0x260] sm:$0xff] %v1343_v12  ;;  %1346 = vst [vmem:[%s10424_s26 + $0x268] sm:$0xff] %v1345_v13  ;;  %v1347_v14 = vld [vmem:[%s10419_s25 + $0x4e0] sm:$0xff]  ;;  %v1349_v15 = vld [vmem:[%s10419_s25 + $0x4f0] sm:$0xff] }
  0x3d   : > { %v1351_v16 = vld [vmem:[%s10419_s25 + $0x500] sm:$0xff]  ;;  %1348 = vst [vmem:[%s10424_s26 + $0x270] sm:$0xff] %v1347_v14  ;;  %1350 = vst [vmem:[%s10424_s26 + $0x278] sm:$0xff] %v1349_v15  ;;  %v1353_v17 = vld [vmem:[%s10419_s25 + $0x510] sm:$0xff] }
  0x3e   : > { %1352 = vst [vmem:[%s10424_s26 + $0x280] sm:$0xff] %v1351_v16  ;;  %v1355_v18 = vld [vmem:[%s10419_s25 + $0x520] sm:$0xff]  ;;  %v1357_v19 = vld [vmem:[%s10419_s25 + $0x530] sm:$0xff]  ;;  %1354 = vst [vmem:[%s10424_s26 + $0x288] sm:$0xff] %v1353_v17 }
  0x3f   : > { %1356 = vst [vmem:[%s10424_s26 + $0x290] sm:$0xff] %v1355_v18  ;;  %1358 = vst [vmem:[%s10424_s26 + $0x298] sm:$0xff] %v1357_v19  ;;  %v1359_v20 = vld [vmem:[%s10419_s25 + $0x540] sm:$0xff]  ;;  %v1361_v21 = vld [vmem:[%s10419_s25 + $0x550] sm:$0xff] }
  0x40   : > { %v1363_v22 = vld [vmem:[%s10419_s25 + $0x560] sm:$0xff]  ;;  %1360 = vst [vmem:[%s10424_s26 + $0x2a0] sm:$0xff] %v1359_v20  ;;  %1362 = vst [vmem:[%s10424_s26 + $0x2a8] sm:$0xff] %v1361_v21  ;;  %v1365_v23 = vld [vmem:[%s10419_s25 + $0x570] sm:$0xff] }
  0x41   : > { %1364 = vst [vmem:[%s10424_s26 + $0x2b0] sm:$0xff] %v1363_v22  ;;  %v1367_v24 = vld [vmem:[%s10419_s25 + $0x580] sm:$0xff]  ;;  %v1369_v25 = vld [vmem:[%s10419_s25 + $0x590] sm:$0xff]  ;;  %1366 = vst [vmem:[%s10424_s26 + $0x2b8] sm:$0xff] %v1365_v23 }
  0x42   : > { %1368 = vst [vmem:[%s10424_s26 + $0x2c0] sm:$0xff] %v1367_v24  ;;  %1370 = vst [vmem:[%s10424_s26 + $0x2c8] sm:$0xff] %v1369_v25  ;;  %v1371_v26 = vld [vmem:[%s10419_s25 + $0x5a0] sm:$0xff]  ;;  %v1373_v27 = vld [vmem:[%s10419_s25 + $0x5b0] sm:$0xff] }
  0x43   : > { %v1375_v28 = vld [vmem:[%s10419_s25 + $0x5c0] sm:$0xff]  ;;  %1372 = vst [vmem:[%s10424_s26 + $0x2d0] sm:$0xff] %v1371_v26  ;;  %1374 = vst [vmem:[%s10424_s26 + $0x2d8] sm:$0xff] %v1373_v27  ;;  %v1377_v29 = vld [vmem:[%s10419_s25 + $0x5d0] sm:$0xff] }
  0x44   : > { %1376 = vst [vmem:[%s10424_s26 + $0x2e0] sm:$0xff] %v1375_v28  ;;  %v1379_v30 = vld [vmem:[%s10419_s25 + $0x5e0] sm:$0xff]  ;;  %v1381_v31 = vld [vmem:[%s10419_s25 + $0x5f0] sm:$0xff]  ;;  %1378 = vst [vmem:[%s10424_s26 + $0x2e8] sm:$0xff] %v1377_v29 }
  0x45   : > { %1380 = vst [vmem:[%s10424_s26 + $0x2f0] sm:$0xff] %v1379_v30  ;;  %1382 = vst [vmem:[%s10424_s26 + $0x2f8] sm:$0xff] %v1381_v31  ;;  %v1383_v32 = vld [vmem:[%s10419_s25 + $0x600] sm:$0xff]  ;;  %v1385_v33 = vld [vmem:[%s10419_s25 + $0x610] sm:$0xff] }
  0x46   : > { %v1387_v34 = vld [vmem:[%s10419_s25 + $0x620] sm:$0xff]  ;;  %1384 = vst [vmem:[%s10424_s26 + $0x300] sm:$0xff] %v1383_v32  ;;  %1386 = vst [vmem:[%s10424_s26 + $0x308] sm:$0xff] %v1385_v33  ;;  %v1389_v35 = vld [vmem:[%s10419_s25 + $0x630] sm:$0xff] }
  0x47   : > { %1388 = vst [vmem:[%s10424_s26 + $0x310] sm:$0xff] %v1387_v34  ;;  %v1391_v36 = vld [vmem:[%s10419_s25 + $0x640] sm:$0xff]  ;;  %v1393_v37 = vld [vmem:[%s10419_s25 + $0x650] sm:$0xff]  ;;  %1390 = vst [vmem:[%s10424_s26 + $0x318] sm:$0xff] %v1389_v35 }
  0x48   : > { %1392 = vst [vmem:[%s10424_s26 + $0x320] sm:$0xff] %v1391_v36  ;;  %1394 = vst [vmem:[%s10424_s26 + $0x328] sm:$0xff] %v1393_v37  ;;  %v1395_v38 = vld [vmem:[%s10419_s25 + $0x660] sm:$0xff]  ;;  %v1397_v39 = vld [vmem:[%s10419_s25 + $0x670] sm:$0xff] }
  0x49   : > { %v1399_v40 = vld [vmem:[%s10419_s25 + $0x680] sm:$0xff]  ;;  %1396 = vst [vmem:[%s10424_s26 + $0x330] sm:$0xff] %v1395_v38  ;;  %1398 = vst [vmem:[%s10424_s26 + $0x338] sm:$0xff] %v1397_v39  ;;  %v1401_v41 = vld [vmem:[%s10419_s25 + $0x690] sm:$0xff] }
  0x4a   : > { %1400 = vst [vmem:[%s10424_s26 + $0x340] sm:$0xff] %v1399_v40  ;;  %v1403_v42 = vld [vmem:[%s10419_s25 + $0x6a0] sm:$0xff]  ;;  %v1405_v43 = vld [vmem:[%s10419_s25 + $0x6b0] sm:$0xff]  ;;  %1402 = vst [vmem:[%s10424_s26 + $0x348] sm:$0xff] %v1401_v41 }
  0x4b   : > { %1404 = vst [vmem:[%s10424_s26 + $0x350] sm:$0xff] %v1403_v42  ;;  %1406 = vst [vmem:[%s10424_s26 + $0x358] sm:$0xff] %v1405_v43  ;;  %v1407_v44 = vld [vmem:[%s10419_s25 + $0x6c0] sm:$0xff]  ;;  %v1409_v45 = vld [vmem:[%s10419_s25 + $0x6d0] sm:$0xff] }
  0x4c   : > { %v1411_v46 = vld [vmem:[%s10419_s25 + $0x6e0] sm:$0xff]  ;;  %1408 = vst [vmem:[%s10424_s26 + $0x360] sm:$0xff] %v1407_v44  ;;  %1410 = vst [vmem:[%s10424_s26 + $0x368] sm:$0xff] %v1409_v45  ;;  %v1413_v47 = vld [vmem:[%s10419_s25 + $0x6f0] sm:$0xff] }
  0x4d   : > { %1412 = vst [vmem:[%s10424_s26 + $0x370] sm:$0xff] %v1411_v46  ;;  %v1415_v48 = vld [vmem:[%s10419_s25 + $0x700] sm:$0xff]  ;;  %v1417_v49 = vld [vmem:[%s10419_s25 + $0x710] sm:$0xff]  ;;  %1414 = vst [vmem:[%s10424_s26 + $0x378] sm:$0xff] %v1413_v47 }
  0x4e   : > { %1416 = vst [vmem:[%s10424_s26 + $0x380] sm:$0xff] %v1415_v48  ;;  %1418 = vst [vmem:[%s10424_s26 + $0x388] sm:$0xff] %v1417_v49  ;;  %v1419_v50 = vld [vmem:[%s10419_s25 + $0x720] sm:$0xff]  ;;  %v1421_v51 = vld [vmem:[%s10419_s25 + $0x730] sm:$0xff] }
  0x4f   : > { %v1423_v52 = vld [vmem:[%s10419_s25 + $0x740] sm:$0xff]  ;;  %1420 = vst [vmem:[%s10424_s26 + $0x390] sm:$0xff] %v1419_v50  ;;  %1422 = vst [vmem:[%s10424_s26 + $0x398] sm:$0xff] %v1421_v51  ;;  %v1425_v53 = vld [vmem:[%s10419_s25 + $0x750] sm:$0xff] }
  0x50   : > { %1424 = vst [vmem:[%s10424_s26 + $0x3a0] sm:$0xff] %v1423_v52  ;;  %v1427_v54 = vld [vmem:[%s10419_s25 + $0x760] sm:$0xff]  ;;  %v1429_v55 = vld [vmem:[%s10419_s25 + $0x770] sm:$0xff]  ;;  %1426 = vst [vmem:[%s10424_s26 + $0x3a8] sm:$0xff] %v1425_v53 }
  0x51   : > { %1428 = vst [vmem:[%s10424_s26 + $0x3b0] sm:$0xff] %v1427_v54  ;;  %1430 = vst [vmem:[%s10424_s26 + $0x3b8] sm:$0xff] %v1429_v55  ;;  %v1431_v56 = vld [vmem:[%s10419_s25 + $0x780] sm:$0xff]  ;;  %v1433_v57 = vld [vmem:[%s10419_s25 + $0x790] sm:$0xff] }
  0x52   : > { %v1435_v58 = vld [vmem:[%s10419_s25 + $0x7a0] sm:$0xff]  ;;  %1432 = vst [vmem:[%s10424_s26 + $0x3c0] sm:$0xff] %v1431_v56  ;;  %1434 = vst [vmem:[%s10424_s26 + $0x3c8] sm:$0xff] %v1433_v57  ;;  %v1437_v59 = vld [vmem:[%s10419_s25 + $0x7b0] sm:$0xff] }
  0x53   : > { %1436 = vst [vmem:[%s10424_s26 + $0x3d0] sm:$0xff] %v1435_v58  ;;  %v1439_v60 = vld [vmem:[%s10419_s25 + $0x7c0] sm:$0xff]  ;;  %v1441_v61 = vld [vmem:[%s10419_s25 + $0x7d0] sm:$0xff]  ;;  %1438 = vst [vmem:[%s10424_s26 + $0x3d8] sm:$0xff] %v1437_v59 }
  0x54   : > { %1440 = vst [vmem:[%s10424_s26 + $0x3e0] sm:$0xff] %v1439_v60  ;;  %1442 = vst [vmem:[%s10424_s26 + $0x3e8] sm:$0xff] %v1441_v61  ;;  %v1443_v62 = vld [vmem:[%s10419_s25 + $0x7e0] sm:$0xff]  ;;  %v1445_v63 = vld [vmem:[%s10419_s25 + $0x7f0] sm:$0xff] }
  0x55   : > { %v1447_v0 = vld [vmem:[%s10419_s25 + $0x800] sm:$0xff]  ;;  %1444 = vst [vmem:[%s10424_s26 + $0x3f0] sm:$0xff] %v1443_v62  ;;  %1446 = vst [vmem:[%s10424_s26 + $0x3f8] sm:$0xff] %v1445_v63  ;;  %v1449_v1 = vld [vmem:[%s10419_s25 + $0x810] sm:$0xff] }
  0x56   : > { %1448 = vst [vmem:[%s10424_s26 + $0x400] sm:$0xff] %v1447_v0  ;;  %v1451_v2 = vld [vmem:[%s10419_s25 + $0x820] sm:$0xff]  ;;  %v1453_v3 = vld [vmem:[%s10419_s25 + $0x830] sm:$0xff]  ;;  %1450 = vst [vmem:[%s10424_s26 + $0x408] sm:$0xff] %v1449_v1 }
  0x57   : > { %1452 = vst [vmem:[%s10424_s26 + $0x410] sm:$0xff] %v1451_v2  ;;  %1454 = vst [vmem:[%s10424_s26 + $0x418] sm:$0xff] %v1453_v3  ;;  %v1455_v4 = vld [vmem:[%s10419_s25 + $0x840] sm:$0xff]  ;;  %v1457_v5 = vld [vmem:[%s10419_s25 + $0x850] sm:$0xff] }
  0x58   : > { %v1459_v6 = vld [vmem:[%s10419_s25 + $0x860] sm:$0xff]  ;;  %1456 = vst [vmem:[%s10424_s26 + $0x420] sm:$0xff] %v1455_v4  ;;  %1458 = vst [vmem:[%s10424_s26 + $0x428] sm:$0xff] %v1457_v5  ;;  %v1461_v7 = vld [vmem:[%s10419_s25 + $0x870] sm:$0xff] }
  0x59   : > { %1460 = vst [vmem:[%s10424_s26 + $0x430] sm:$0xff] %v1459_v6  ;;  %v1463_v8 = vld [vmem:[%s10419_s25 + $0x880] sm:$0xff]  ;;  %v1465_v9 = vld [vmem:[%s10419_s25 + $0x890] sm:$0xff]  ;;  %1462 = vst [vmem:[%s10424_s26 + $0x438] sm:$0xff] %v1461_v7 }
  0x5a   : > { %1464 = vst [vmem:[%s10424_s26 + $0x440] sm:$0xff] %v1463_v8  ;;  %1466 = vst [vmem:[%s10424_s26 + $0x448] sm:$0xff] %v1465_v9  ;;  %v1467_v10 = vld [vmem:[%s10419_s25 + $0x8a0] sm:$0xff]  ;;  %v1469_v11 = vld [vmem:[%s10419_s25 + $0x8b0] sm:$0xff] }
  0x5b   : > { %v1471_v12 = vld [vmem:[%s10419_s25 + $0x8c0] sm:$0xff]  ;;  %1468 = vst [vmem:[%s10424_s26 + $0x450] sm:$0xff] %v1467_v10  ;;  %1470 = vst [vmem:[%s10424_s26 + $0x458] sm:$0xff] %v1469_v11  ;;  %v1473_v13 = vld [vmem:[%s10419_s25 + $0x8d0] sm:$0xff] }
  0x5c   : > { %1472 = vst [vmem:[%s10424_s26 + $0x460] sm:$0xff] %v1471_v12  ;;  %v1475_v14 = vld [vmem:[%s10419_s25 + $0x8e0] sm:$0xff]  ;;  %v1477_v15 = vld [vmem:[%s10419_s25 + $0x8f0] sm:$0xff]  ;;  %1474 = vst [vmem:[%s10424_s26 + $0x468] sm:$0xff] %v1473_v13 }
  0x5d   : > { %1476 = vst [vmem:[%s10424_s26 + $0x470] sm:$0xff] %v1475_v14  ;;  %1478 = vst [vmem:[%s10424_s26 + $0x478] sm:$0xff] %v1477_v15  ;;  %v1479_v16 = vld [vmem:[%s10419_s25 + $0x900] sm:$0xff]  ;;  %v1481_v17 = vld [vmem:[%s10419_s25 + $0x910] sm:$0xff] }
  0x5e   : > { %v1483_v18 = vld [vmem:[%s10419_s25 + $0x920] sm:$0xff]  ;;  %1480 = vst [vmem:[%s10424_s26 + $0x480] sm:$0xff] %v1479_v16  ;;  %1482 = vst [vmem:[%s10424_s26 + $0x488] sm:$0xff] %v1481_v17  ;;  %v1485_v19 = vld [vmem:[%s10419_s25 + $0x930] sm:$0xff] }
  0x5f   : > { %1484 = vst [vmem:[%s10424_s26 + $0x490] sm:$0xff] %v1483_v18  ;;  %v1487_v20 = vld [vmem:[%s10419_s25 + $0x940] sm:$0xff]  ;;  %v1489_v21 = vld [vmem:[%s10419_s25 + $0x950] sm:$0xff]  ;;  %1486 = vst [vmem:[%s10424_s26 + $0x498] sm:$0xff] %v1485_v19 }
  0x60   : > { %1488 = vst [vmem:[%s10424_s26 + $0x4a0] sm:$0xff] %v1487_v20  ;;  %1490 = vst [vmem:[%s10424_s26 + $0x4a8] sm:$0xff] %v1489_v21  ;;  %v1491_v22 = vld [vmem:[%s10419_s25 + $0x960] sm:$0xff]  ;;  %v1493_v23 = vld [vmem:[%s10419_s25 + $0x970] sm:$0xff] }
  0x61   : > { %v1495_v24 = vld [vmem:[%s10419_s25 + $0x980] sm:$0xff]  ;;  %1492 = vst [vmem:[%s10424_s26 + $0x4b0] sm:$0xff] %v1491_v22  ;;  %1494 = vst [vmem:[%s10424_s26 + $0x4b8] sm:$0xff] %v1493_v23  ;;  %v1497_v25 = vld [vmem:[%s10419_s25 + $0x990] sm:$0xff] }
  0x62   : > { %1496 = vst [vmem:[%s10424_s26 + $0x4c0] sm:$0xff] %v1495_v24  ;;  %v1499_v26 = vld [vmem:[%s10419_s25 + $0x9a0] sm:$0xff]  ;;  %v1501_v27 = vld [vmem:[%s10419_s25 + $0x9b0] sm:$0xff]  ;;  %1498 = vst [vmem:[%s10424_s26 + $0x4c8] sm:$0xff] %v1497_v25 }
  0x63   : > { %1500 = vst [vmem:[%s10424_s26 + $0x4d0] sm:$0xff] %v1499_v26  ;;  %1502 = vst [vmem:[%s10424_s26 + $0x4d8] sm:$0xff] %v1501_v27  ;;  %v1503_v28 = vld [vmem:[%s10419_s25 + $0x9c0] sm:$0xff]  ;;  %v1505_v29 = vld [vmem:[%s10419_s25 + $0x9d0] sm:$0xff] }
  0x64   : > { %v1507_v30 = vld [vmem:[%s10419_s25 + $0x9e0] sm:$0xff]  ;;  %1504 = vst [vmem:[%s10424_s26 + $0x4e0] sm:$0xff] %v1503_v28  ;;  %1506 = vst [vmem:[%s10424_s26 + $0x4e8] sm:$0xff] %v1505_v29  ;;  %v1509_v31 = vld [vmem:[%s10419_s25 + $0x9f0] sm:$0xff] }
  0x65   : > { %1508 = vst [vmem:[%s10424_s26 + $0x4f0] sm:$0xff] %v1507_v30  ;;  %v1511_v32 = vld [vmem:[%s10419_s25 + $0xa00] sm:$0xff]  ;;  %v1513_v33 = vld [vmem:[%s10419_s25 + $0xa10] sm:$0xff]  ;;  %1510 = vst [vmem:[%s10424_s26 + $0x4f8] sm:$0xff] %v1509_v31 }
  0x66   : > { %1512 = vst [vmem:[%s10424_s26 + $0x500] sm:$0xff] %v1511_v32  ;;  %1514 = vst [vmem:[%s10424_s26 + $0x508] sm:$0xff] %v1513_v33  ;;  %v1515_v34 = vld [vmem:[%s10419_s25 + $0xa20] sm:$0xff]  ;;  %v1517_v35 = vld [vmem:[%s10419_s25 + $0xa30] sm:$0xff] }
  0x67   : > { %v1519_v36 = vld [vmem:[%s10419_s25 + $0xa40] sm:$0xff]  ;;  %1516 = vst [vmem:[%s10424_s26 + $0x510] sm:$0xff] %v1515_v34  ;;  %1518 = vst [vmem:[%s10424_s26 + $0x518] sm:$0xff] %v1517_v35  ;;  %v1521_v37 = vld [vmem:[%s10419_s25 + $0xa50] sm:$0xff] }
  0x68   : > { %1520 = vst [vmem:[%s10424_s26 + $0x520] sm:$0xff] %v1519_v36  ;;  %v1523_v38 = vld [vmem:[%s10419_s25 + $0xa60] sm:$0xff]  ;;  %v1525_v39 = vld [vmem:[%s10419_s25 + $0xa70] sm:$0xff]  ;;  %1522 = vst [vmem:[%s10424_s26 + $0x528] sm:$0xff] %v1521_v37 }
  0x69   : > { %1524 = vst [vmem:[%s10424_s26 + $0x530] sm:$0xff] %v1523_v38  ;;  %1526 = vst [vmem:[%s10424_s26 + $0x538] sm:$0xff] %v1525_v39  ;;  %v1527_v40 = vld [vmem:[%s10419_s25 + $0xa80] sm:$0xff]  ;;  %v1529_v41 = vld [vmem:[%s10419_s25 + $0xa90] sm:$0xff] }
  0x6a   : > { %v1531_v42 = vld [vmem:[%s10419_s25 + $0xaa0] sm:$0xff]  ;;  %1528 = vst [vmem:[%s10424_s26 + $0x540] sm:$0xff] %v1527_v40  ;;  %1530 = vst [vmem:[%s10424_s26 + $0x548] sm:$0xff] %v1529_v41  ;;  %v1533_v43 = vld [vmem:[%s10419_s25 + $0xab0] sm:$0xff] }
  0x6b   : > { %1532 = vst [vmem:[%s10424_s26 + $0x550] sm:$0xff] %v1531_v42  ;;  %v1535_v44 = vld [vmem:[%s10419_s25 + $0xac0] sm:$0xff]  ;;  %v1537_v45 = vld [vmem:[%s10419_s25 + $0xad0] sm:$0xff]  ;;  %1534 = vst [vmem:[%s10424_s26 + $0x558] sm:$0xff] %v1533_v43 }
  0x6c   : > { %1536 = vst [vmem:[%s10424_s26 + $0x560] sm:$0xff] %v1535_v44  ;;  %1538 = vst [vmem:[%s10424_s26 + $0x568] sm:$0xff] %v1537_v45  ;;  %v1539_v46 = vld [vmem:[%s10419_s25 + $0xae0] sm:$0xff]  ;;  %v1541_v47 = vld [vmem:[%s10419_s25 + $0xaf0] sm:$0xff] }
  0x6d   : > { %v1543_v48 = vld [vmem:[%s10419_s25 + $0xb00] sm:$0xff]  ;;  %1540 = vst [vmem:[%s10424_s26 + $0x570] sm:$0xff] %v1539_v46  ;;  %1542 = vst [vmem:[%s10424_s26 + $0x578] sm:$0xff] %v1541_v47  ;;  %v1545_v49 = vld [vmem:[%s10419_s25 + $0xb10] sm:$0xff] }
  0x6e   : > { %1544 = vst [vmem:[%s10424_s26 + $0x580] sm:$0xff] %v1543_v48  ;;  %v1547_v50 = vld [vmem:[%s10419_s25 + $0xb20] sm:$0xff]  ;;  %v1549_v51 = vld [vmem:[%s10419_s25 + $0xb30] sm:$0xff]  ;;  %1546 = vst [vmem:[%s10424_s26 + $0x588] sm:$0xff] %v1545_v49 }
  0x6f   : > { %1548 = vst [vmem:[%s10424_s26 + $0x590] sm:$0xff] %v1547_v50  ;;  %1550 = vst [vmem:[%s10424_s26 + $0x598] sm:$0xff] %v1549_v51  ;;  %v1551_v52 = vld [vmem:[%s10419_s25 + $0xb40] sm:$0xff]  ;;  %v1553_v53 = vld [vmem:[%s10419_s25 + $0xb50] sm:$0xff] }
  0x70   : > { %v1555_v54 = vld [vmem:[%s10419_s25 + $0xb60] sm:$0xff]  ;;  %1552 = vst [vmem:[%s10424_s26 + $0x5a0] sm:$0xff] %v1551_v52  ;;  %1554 = vst [vmem:[%s10424_s26 + $0x5a8] sm:$0xff] %v1553_v53  ;;  %v1557_v55 = vld [vmem:[%s10419_s25 + $0xb70] sm:$0xff] }
  0x71   : > { %1556 = vst [vmem:[%s10424_s26 + $0x5b0] sm:$0xff] %v1555_v54  ;;  %v1559_v56 = vld [vmem:[%s10419_s25 + $0xb80] sm:$0xff]  ;;  %v1561_v57 = vld [vmem:[%s10419_s25 + $0xb90] sm:$0xff]  ;;  %1558 = vst [vmem:[%s10424_s26 + $0x5b8] sm:$0xff] %v1557_v55 }
  0x72   : > { %1560 = vst [vmem:[%s10424_s26 + $0x5c0] sm:$0xff] %v1559_v56  ;;  %1562 = vst [vmem:[%s10424_s26 + $0x5c8] sm:$0xff] %v1561_v57  ;;  %v1563_v58 = vld [vmem:[%s10419_s25 + $0xba0] sm:$0xff]  ;;  %v1565_v59 = vld [vmem:[%s10419_s25 + $0xbb0] sm:$0xff] }
  0x73   : > { %v1567_v60 = vld [vmem:[%s10419_s25 + $0xbc0] sm:$0xff]  ;;  %1564 = vst [vmem:[%s10424_s26 + $0x5d0] sm:$0xff] %v1563_v58  ;;  %1566 = vst [vmem:[%s10424_s26 + $0x5d8] sm:$0xff] %v1565_v59  ;;  %v1569_v61 = vld [vmem:[%s10419_s25 + $0xbd0] sm:$0xff] }
  0x74   : > { %1568 = vst [vmem:[%s10424_s26 + $0x5e0] sm:$0xff] %v1567_v60  ;;  %v1571_v62 = vld [vmem:[%s10419_s25 + $0xbe0] sm:$0xff]  ;;  %v1573_v63 = vld [vmem:[%s10419_s25 + $0xbf0] sm:$0xff]  ;;  %1570 = vst [vmem:[%s10424_s26 + $0x5e8] sm:$0xff] %v1569_v61 }
  0x75   : > { %1572 = vst [vmem:[%s10424_s26 + $0x5f0] sm:$0xff] %v1571_v62  ;;  %1574 = vst [vmem:[%s10424_s26 + $0x5f8] sm:$0xff] %v1573_v63  ;;  %v1575_v0 = vld [vmem:[%s10419_s25 + $0xc00] sm:$0xff]  ;;  %v1577_v1 = vld [vmem:[%s10419_s25 + $0xc10] sm:$0xff] }
  0x76   : > { %v1579_v2 = vld [vmem:[%s10419_s25 + $0xc20] sm:$0xff]  ;;  %1576 = vst [vmem:[%s10424_s26 + $0x600] sm:$0xff] %v1575_v0  ;;  %1578 = vst [vmem:[%s10424_s26 + $0x608] sm:$0xff] %v1577_v1  ;;  %v1581_v3 = vld [vmem:[%s10419_s25 + $0xc30] sm:$0xff] }
  0x77   : > { %1580 = vst [vmem:[%s10424_s26 + $0x610] sm:$0xff] %v1579_v2  ;;  %v1583_v4 = vld [vmem:[%s10419_s25 + $0xc40] sm:$0xff]  ;;  %v1585_v5 = vld [vmem:[%s10419_s25 + $0xc50] sm:$0xff]  ;;  %1582 = vst [vmem:[%s10424_s26 + $0x618] sm:$0xff] %v1581_v3 }
  0x78   : > { %1584 = vst [vmem:[%s10424_s26 + $0x620] sm:$0xff] %v1583_v4  ;;  %1586 = vst [vmem:[%s10424_s26 + $0x628] sm:$0xff] %v1585_v5  ;;  %v1587_v6 = vld [vmem:[%s10419_s25 + $0xc60] sm:$0xff]  ;;  %v1589_v7 = vld [vmem:[%s10419_s25 + $0xc70] sm:$0xff] }
  0x79   : > { %v1591_v8 = vld [vmem:[%s10419_s25 + $0xc80] sm:$0xff]  ;;  %1588 = vst [vmem:[%s10424_s26 + $0x630] sm:$0xff] %v1587_v6  ;;  %1590 = vst [vmem:[%s10424_s26 + $0x638] sm:$0xff] %v1589_v7  ;;  %v1593_v9 = vld [vmem:[%s10419_s25 + $0xc90] sm:$0xff] }
  0x7a   : > { %1592 = vst [vmem:[%s10424_s26 + $0x640] sm:$0xff] %v1591_v8  ;;  %v1595_v10 = vld [vmem:[%s10419_s25 + $0xca0] sm:$0xff]  ;;  %v1597_v11 = vld [vmem:[%s10419_s25 + $0xcb0] sm:$0xff]  ;;  %1594 = vst [vmem:[%s10424_s26 + $0x648] sm:$0xff] %v1593_v9 }
  0x7b   : > { %1596 = vst [vmem:[%s10424_s26 + $0x650] sm:$0xff] %v1595_v10  ;;  %1598 = vst [vmem:[%s10424_s26 + $0x658] sm:$0xff] %v1597_v11  ;;  %v1599_v12 = vld [vmem:[%s10419_s25 + $0xcc0] sm:$0xff]  ;;  %v1601_v13 = vld [vmem:[%s10419_s25 + $0xcd0] sm:$0xff] }
  0x7c   : > { %v1603_v14 = vld [vmem:[%s10419_s25 + $0xce0] sm:$0xff]  ;;  %1600 = vst [vmem:[%s10424_s26 + $0x660] sm:$0xff] %v1599_v12  ;;  %1602 = vst [vmem:[%s10424_s26 + $0x668] sm:$0xff] %v1601_v13  ;;  %v1605_v15 = vld [vmem:[%s10419_s25 + $0xcf0] sm:$0xff] }
  0x7d   : > { %1604 = vst [vmem:[%s10424_s26 + $0x670] sm:$0xff] %v1603_v14  ;;  %v1607_v16 = vld [vmem:[%s10419_s25 + $0xd00] sm:$0xff]  ;;  %v1609_v17 = vld [vmem:[%s10419_s25 + $0xd10] sm:$0xff]  ;;  %1606 = vst [vmem:[%s10424_s26 + $0x678] sm:$0xff] %v1605_v15 }
  0x7e   : > { %1608 = vst [vmem:[%s10424_s26 + $0x680] sm:$0xff] %v1607_v16  ;;  %1610 = vst [vmem:[%s10424_s26 + $0x688] sm:$0xff] %v1609_v17  ;;  %v1611_v18 = vld [vmem:[%s10419_s25 + $0xd20] sm:$0xff]  ;;  %v1613_v19 = vld [vmem:[%s10419_s25 + $0xd30] sm:$0xff] }
  0x7f   : > { %v1615_v20 = vld [vmem:[%s10419_s25 + $0xd40] sm:$0xff]  ;;  %1612 = vst [vmem:[%s10424_s26 + $0x690] sm:$0xff] %v1611_v18  ;;  %1614 = vst [vmem:[%s10424_s26 + $0x698] sm:$0xff] %v1613_v19  ;;  %v1617_v21 = vld [vmem:[%s10419_s25 + $0xd50] sm:$0xff] }
  0x80   : > { %1616 = vst [vmem:[%s10424_s26 + $0x6a0] sm:$0xff] %v1615_v20  ;;  %v1619_v22 = vld [vmem:[%s10419_s25 + $0xd60] sm:$0xff]  ;;  %v1621_v23 = vld [vmem:[%s10419_s25 + $0xd70] sm:$0xff]  ;;  %1618 = vst [vmem:[%s10424_s26 + $0x6a8] sm:$0xff] %v1617_v21 }
  0x81   : > { %1620 = vst [vmem:[%s10424_s26 + $0x6b0] sm:$0xff] %v1619_v22  ;;  %1622 = vst [vmem:[%s10424_s26 + $0x6b8] sm:$0xff] %v1621_v23  ;;  %v1623_v24 = vld [vmem:[%s10419_s25 + $0xd80] sm:$0xff]  ;;  %v1625_v25 = vld [vmem:[%s10419_s25 + $0xd90] sm:$0xff] }
  0x82   : > { %v1627_v26 = vld [vmem:[%s10419_s25 + $0xda0] sm:$0xff]  ;;  %1624 = vst [vmem:[%s10424_s26 + $0x6c0] sm:$0xff] %v1623_v24  ;;  %1626 = vst [vmem:[%s10424_s26 + $0x6c8] sm:$0xff] %v1625_v25  ;;  %v1629_v27 = vld [vmem:[%s10419_s25 + $0xdb0] sm:$0xff] }
  0x83   : > { %1628 = vst [vmem:[%s10424_s26 + $0x6d0] sm:$0xff] %v1627_v26  ;;  %v1631_v28 = vld [vmem:[%s10419_s25 + $0xdc0] sm:$0xff]  ;;  %v1633_v29 = vld [vmem:[%s10419_s25 + $0xdd0] sm:$0xff]  ;;  %1630 = vst [vmem:[%s10424_s26 + $0x6d8] sm:$0xff] %v1629_v27 }
  0x84   : > { %1632 = vst [vmem:[%s10424_s26 + $0x6e0] sm:$0xff] %v1631_v28  ;;  %1634 = vst [vmem:[%s10424_s26 + $0x6e8] sm:$0xff] %v1633_v29  ;;  %v1635_v30 = vld [vmem:[%s10419_s25 + $0xde0] sm:$0xff]  ;;  %v1637_v31 = vld [vmem:[%s10419_s25 + $0xdf0] sm:$0xff] }
  0x85   : > { %v1639_v32 = vld [vmem:[%s10419_s25 + $0xe00] sm:$0xff]  ;;  %1636 = vst [vmem:[%s10424_s26 + $0x6f0] sm:$0xff] %v1635_v30  ;;  %1638 = vst [vmem:[%s10424_s26 + $0x6f8] sm:$0xff] %v1637_v31  ;;  %v1641_v33 = vld [vmem:[%s10419_s25 + $0xe10] sm:$0xff] }
  0x86   : > { %1640 = vst [vmem:[%s10424_s26 + $0x700] sm:$0xff] %v1639_v32  ;;  %v1643_v34 = vld [vmem:[%s10419_s25 + $0xe20] sm:$0xff]  ;;  %v1645_v35 = vld [vmem:[%s10419_s25 + $0xe30] sm:$0xff]  ;;  %1642 = vst [vmem:[%s10424_s26 + $0x708] sm:$0xff] %v1641_v33 }
  0x87   : > { %1644 = vst [vmem:[%s10424_s26 + $0x710] sm:$0xff] %v1643_v34  ;;  %1646 = vst [vmem:[%s10424_s26 + $0x718] sm:$0xff] %v1645_v35  ;;  %v1647_v36 = vld [vmem:[%s10419_s25 + $0xe40] sm:$0xff]  ;;  %v1649_v37 = vld [vmem:[%s10419_s25 + $0xe50] sm:$0xff] }
  0x88   : > { %v1651_v38 = vld [vmem:[%s10419_s25 + $0xe60] sm:$0xff]  ;;  %1648 = vst [vmem:[%s10424_s26 + $0x720] sm:$0xff] %v1647_v36  ;;  %1650 = vst [vmem:[%s10424_s26 + $0x728] sm:$0xff] %v1649_v37  ;;  %v1653_v39 = vld [vmem:[%s10419_s25 + $0xe70] sm:$0xff] }
  0x89   : > { %1652 = vst [vmem:[%s10424_s26 + $0x730] sm:$0xff] %v1651_v38  ;;  %v1655_v40 = vld [vmem:[%s10419_s25 + $0xe80] sm:$0xff]  ;;  %v1657_v41 = vld [vmem:[%s10419_s25 + $0xe90] sm:$0xff]  ;;  %1654 = vst [vmem:[%s10424_s26 + $0x738] sm:$0xff] %v1653_v39 }
  0x8a   : > { %1656 = vst [vmem:[%s10424_s26 + $0x740] sm:$0xff] %v1655_v40  ;;  %1658 = vst [vmem:[%s10424_s26 + $0x748] sm:$0xff] %v1657_v41  ;;  %v1659_v42 = vld [vmem:[%s10419_s25 + $0xea0] sm:$0xff]  ;;  %v1661_v43 = vld [vmem:[%s10419_s25 + $0xeb0] sm:$0xff] }
  0x8b   : > { %v1663_v44 = vld [vmem:[%s10419_s25 + $0xec0] sm:$0xff]  ;;  %1660 = vst [vmem:[%s10424_s26 + $0x750] sm:$0xff] %v1659_v42  ;;  %1662 = vst [vmem:[%s10424_s26 + $0x758] sm:$0xff] %v1661_v43  ;;  %v1665_v45 = vld [vmem:[%s10419_s25 + $0xed0] sm:$0xff] }
  0x8c   : > { %1664 = vst [vmem:[%s10424_s26 + $0x760] sm:$0xff] %v1663_v44  ;;  %v1667_v46 = vld [vmem:[%s10419_s25 + $0xee0] sm:$0xff]  ;;  %v1669_v47 = vld [vmem:[%s10419_s25 + $0xef0] sm:$0xff]  ;;  %1666 = vst [vmem:[%s10424_s26 + $0x768] sm:$0xff] %v1665_v45 }
  0x8d   : > { %1668 = vst [vmem:[%s10424_s26 + $0x770] sm:$0xff] %v1667_v46  ;;  %1670 = vst [vmem:[%s10424_s26 + $0x778] sm:$0xff] %v1669_v47  ;;  %v1671_v48 = vld [vmem:[%s10419_s25 + $0xf00] sm:$0xff]  ;;  %v1673_v49 = vld [vmem:[%s10419_s25 + $0xf10] sm:$0xff] }
  0x8e   : > { %v1675_v50 = vld [vmem:[%s10419_s25 + $0xf20] sm:$0xff]  ;;  %1672 = vst [vmem:[%s10424_s26 + $0x780] sm:$0xff] %v1671_v48  ;;  %1674 = vst [vmem:[%s10424_s26 + $0x788] sm:$0xff] %v1673_v49  ;;  %v1677_v51 = vld [vmem:[%s10419_s25 + $0xf30] sm:$0xff] }
  0x8f   : > { %1676 = vst [vmem:[%s10424_s26 + $0x790] sm:$0xff] %v1675_v50  ;;  %v1679_v52 = vld [vmem:[%s10419_s25 + $0xf40] sm:$0xff]  ;;  %v1681_v53 = vld [vmem:[%s10419_s25 + $0xf50] sm:$0xff]  ;;  %1678 = vst [vmem:[%s10424_s26 + $0x798] sm:$0xff] %v1677_v51 }
  0x90   : > { %1680 = vst [vmem:[%s10424_s26 + $0x7a0] sm:$0xff] %v1679_v52  ;;  %1682 = vst [vmem:[%s10424_s26 + $0x7a8] sm:$0xff] %v1681_v53  ;;  %v1683_v54 = vld [vmem:[%s10419_s25 + $0xf60] sm:$0xff]  ;;  %v1685_v55 = vld [vmem:[%s10419_s25 + $0xf70] sm:$0xff] }
  0x91   : > { %v1687_v56 = vld [vmem:[%s10419_s25 + $0xf80] sm:$0xff]  ;;  %1684 = vst [vmem:[%s10424_s26 + $0x7b0] sm:$0xff] %v1683_v54  ;;  %1686 = vst [vmem:[%s10424_s26 + $0x7b8] sm:$0xff] %v1685_v55  ;;  %v1689_v57 = vld [vmem:[%s10419_s25 + $0xf90] sm:$0xff] }
  0x92   : > { %1688 = vst [vmem:[%s10424_s26 + $0x7c0] sm:$0xff] %v1687_v56  ;;  %v1691_v58 = vld [vmem:[%s10419_s25 + $0xfa0] sm:$0xff]  ;;  %v1693_v59 = vld [vmem:[%s10419_s25 + $0xfb0] sm:$0xff]  ;;  %1690 = vst [vmem:[%s10424_s26 + $0x7c8] sm:$0xff] %v1689_v57 }
  0x93   : > { %1692 = vst [vmem:[%s10424_s26 + $0x7d0] sm:$0xff] %v1691_v58  ;;  %1694 = vst [vmem:[%s10424_s26 + $0x7d8] sm:$0xff] %v1693_v59  ;;  %v1695_v60 = vld [vmem:[%s10419_s25 + $0xfc0] sm:$0xff]  ;;  %v1697_v61 = vld [vmem:[%s10419_s25 + $0xfd0] sm:$0xff] }
  0x94   : > { %v1699_v62 = vld [vmem:[%s10419_s25 + $0xfe0] sm:$0xff]  ;;  %1696 = vst [vmem:[%s10424_s26 + $0x7e0] sm:$0xff] %v1695_v60  ;;  %1698 = vst [vmem:[%s10424_s26 + $0x7e8] sm:$0xff] %v1697_v61  ;;  %v1701_v63 = vld [vmem:[%s10419_s25 + $0xff0] sm:$0xff] }
  0x95   : > { %1700 = vst [vmem:[%s10424_s26 + $0x7f0] sm:$0xff] %v1699_v62  ;;  %v1703_v0 = vld [vmem:[%s10419_s25 + $0x1000] sm:$0xff]  ;;  %v1705_v1 = vld [vmem:[%s10419_s25 + $0x1010] sm:$0xff]  ;;  %1702 = vst [vmem:[%s10424_s26 + $0x7f8] sm:$0xff] %v1701_v63 }
  0x96   : > { %1704 = vst [vmem:[%s10424_s26 + $0x800] sm:$0xff] %v1703_v0  ;;  %1706 = vst [vmem:[%s10424_s26 + $0x808] sm:$0xff] %v1705_v1  ;;  %v1707_v2 = vld [vmem:[%s10419_s25 + $0x1020] sm:$0xff]  ;;  %v1709_v3 = vld [vmem:[%s10419_s25 + $0x1030] sm:$0xff] }
  0x97   : > { %v1711_v4 = vld [vmem:[%s10419_s25 + $0x1040] sm:$0xff]  ;;  %1708 = vst [vmem:[%s10424_s26 + $0x810] sm:$0xff] %v1707_v2  ;;  %1710 = vst [vmem:[%s10424_s26 + $0x818] sm:$0xff] %v1709_v3  ;;  %v1713_v5 = vld [vmem:[%s10419_s25 + $0x1050] sm:$0xff] }
  0x98   : > { %1712 = vst [vmem:[%s10424_s26 + $0x820] sm:$0xff] %v1711_v4  ;;  %v1715_v6 = vld [vmem:[%s10419_s25 + $0x1060] sm:$0xff]  ;;  %v1717_v7 = vld [vmem:[%s10419_s25 + $0x1070] sm:$0xff]  ;;  %1714 = vst [vmem:[%s10424_s26 + $0x828] sm:$0xff] %v1713_v5 }
  0x99   : > { %1716 = vst [vmem:[%s10424_s26 + $0x830] sm:$0xff] %v1715_v6  ;;  %1718 = vst [vmem:[%s10424_s26 + $0x838] sm:$0xff] %v1717_v7  ;;  %v1719_v8 = vld [vmem:[%s10419_s25 + $0x1080] sm:$0xff]  ;;  %v1721_v9 = vld [vmem:[%s10419_s25 + $0x1090] sm:$0xff] }
  0x9a   : > { %v1723_v10 = vld [vmem:[%s10419_s25 + $0x10a0] sm:$0xff]  ;;  %1720 = vst [vmem:[%s10424_s26 + $0x840] sm:$0xff] %v1719_v8  ;;  %1722 = vst [vmem:[%s10424_s26 + $0x848] sm:$0xff] %v1721_v9  ;;  %v1725_v11 = vld [vmem:[%s10419_s25 + $0x10b0] sm:$0xff] }
  0x9b   : > { %1724 = vst [vmem:[%s10424_s26 + $0x850] sm:$0xff] %v1723_v10  ;;  %v1727_v12 = vld [vmem:[%s10419_s25 + $0x10c0] sm:$0xff]  ;;  %v1729_v13 = vld [vmem:[%s10419_s25 + $0x10d0] sm:$0xff]  ;;  %1726 = vst [vmem:[%s10424_s26 + $0x858] sm:$0xff] %v1725_v11 }
  0x9c   : > { %1728 = vst [vmem:[%s10424_s26 + $0x860] sm:$0xff] %v1727_v12  ;;  %1730 = vst [vmem:[%s10424_s26 + $0x868] sm:$0xff] %v1729_v13  ;;  %v1731_v14 = vld [vmem:[%s10419_s25 + $0x10e0] sm:$0xff]  ;;  %v1733_v15 = vld [vmem:[%s10419_s25 + $0x10f0] sm:$0xff] }
  0x9d   : > { %v1735_v16 = vld [vmem:[%s10419_s25 + $0x1100] sm:$0xff]  ;;  %1732 = vst [vmem:[%s10424_s26 + $0x870] sm:$0xff] %v1731_v14  ;;  %1734 = vst [vmem:[%s10424_s26 + $0x878] sm:$0xff] %v1733_v15  ;;  %v1737_v17 = vld [vmem:[%s10419_s25 + $0x1110] sm:$0xff] }
  0x9e   : > { %1736 = vst [vmem:[%s10424_s26 + $0x880] sm:$0xff] %v1735_v16  ;;  %v1739_v18 = vld [vmem:[%s10419_s25 + $0x1120] sm:$0xff]  ;;  %v1741_v19 = vld [vmem:[%s10419_s25 + $0x1130] sm:$0xff]  ;;  %1738 = vst [vmem:[%s10424_s26 + $0x888] sm:$0xff] %v1737_v17 }
  0x9f   : > { %1740 = vst [vmem:[%s10424_s26 + $0x890] sm:$0xff] %v1739_v18  ;;  %1742 = vst [vmem:[%s10424_s26 + $0x898] sm:$0xff] %v1741_v19  ;;  %v1743_v20 = vld [vmem:[%s10419_s25 + $0x1140] sm:$0xff]  ;;  %v1745_v21 = vld [vmem:[%s10419_s25 + $0x1150] sm:$0xff] }
  0xa0   : > { %v1747_v22 = vld [vmem:[%s10419_s25 + $0x1160] sm:$0xff]  ;;  %1744 = vst [vmem:[%s10424_s26 + $0x8a0] sm:$0xff] %v1743_v20  ;;  %1746 = vst [vmem:[%s10424_s26 + $0x8a8] sm:$0xff] %v1745_v21  ;;  %v1749_v23 = vld [vmem:[%s10419_s25 + $0x1170] sm:$0xff] }
  0xa1   : > { %1748 = vst [vmem:[%s10424_s26 + $0x8b0] sm:$0xff] %v1747_v22  ;;  %v1751_v24 = vld [vmem:[%s10419_s25 + $0x1180] sm:$0xff]  ;;  %v1753_v25 = vld [vmem:[%s10419_s25 + $0x1190] sm:$0xff]  ;;  %1750 = vst [vmem:[%s10424_s26 + $0x8b8] sm:$0xff] %v1749_v23 }
  0xa2   : > { %1752 = vst [vmem:[%s10424_s26 + $0x8c0] sm:$0xff] %v1751_v24  ;;  %1754 = vst [vmem:[%s10424_s26 + $0x8c8] sm:$0xff] %v1753_v25  ;;  %v1755_v26 = vld [vmem:[%s10419_s25 + $0x11a0] sm:$0xff]  ;;  %v1757_v27 = vld [vmem:[%s10419_s25 + $0x11b0] sm:$0xff] }
  0xa3   : > { %v1759_v28 = vld [vmem:[%s10419_s25 + $0x11c0] sm:$0xff]  ;;  %1756 = vst [vmem:[%s10424_s26 + $0x8d0] sm:$0xff] %v1755_v26  ;;  %1758 = vst [vmem:[%s10424_s26 + $0x8d8] sm:$0xff] %v1757_v27  ;;  %v1761_v29 = vld [vmem:[%s10419_s25 + $0x11d0] sm:$0xff] }
  0xa4   : > { %1760 = vst [vmem:[%s10424_s26 + $0x8e0] sm:$0xff] %v1759_v28  ;;  %v1763_v30 = vld [vmem:[%s10419_s25 + $0x11e0] sm:$0xff]  ;;  %v1765_v31 = vld [vmem:[%s10419_s25 + $0x11f0] sm:$0xff]  ;;  %1762 = vst [vmem:[%s10424_s26 + $0x8e8] sm:$0xff] %v1761_v29 }
  0xa5   : > { %1764 = vst [vmem:[%s10424_s26 + $0x8f0] sm:$0xff] %v1763_v30  ;;  %1766 = vst [vmem:[%s10424_s26 + $0x8f8] sm:$0xff] %v1765_v31  ;;  %v1767_v32 = vld [vmem:[%s10419_s25 + $0x1200] sm:$0xff]  ;;  %v1769_v33 = vld [vmem:[%s10419_s25 + $0x1210] sm:$0xff] }
  0xa6   : > { %v1771_v34 = vld [vmem:[%s10419_s25 + $0x1220] sm:$0xff]  ;;  %1768 = vst [vmem:[%s10424_s26 + $0x900] sm:$0xff] %v1767_v32  ;;  %1770 = vst [vmem:[%s10424_s26 + $0x908] sm:$0xff] %v1769_v33  ;;  %v1773_v35 = vld [vmem:[%s10419_s25 + $0x1230] sm:$0xff] }
  0xa7   : > { %1772 = vst [vmem:[%s10424_s26 + $0x910] sm:$0xff] %v1771_v34  ;;  %v1775_v36 = vld [vmem:[%s10419_s25 + $0x1240] sm:$0xff]  ;;  %v1777_v37 = vld [vmem:[%s10419_s25 + $0x1250] sm:$0xff]  ;;  %1774 = vst [vmem:[%s10424_s26 + $0x918] sm:$0xff] %v1773_v35 }
  0xa8   : > { %1776 = vst [vmem:[%s10424_s26 + $0x920] sm:$0xff] %v1775_v36  ;;  %1778 = vst [vmem:[%s10424_s26 + $0x928] sm:$0xff] %v1777_v37  ;;  %v1779_v38 = vld [vmem:[%s10419_s25 + $0x1260] sm:$0xff]  ;;  %v1781_v39 = vld [vmem:[%s10419_s25 + $0x1270] sm:$0xff] }
  0xa9   : > { %v1783_v40 = vld [vmem:[%s10419_s25 + $0x1280] sm:$0xff]  ;;  %1780 = vst [vmem:[%s10424_s26 + $0x930] sm:$0xff] %v1779_v38  ;;  %1782 = vst [vmem:[%s10424_s26 + $0x938] sm:$0xff] %v1781_v39  ;;  %v1785_v41 = vld [vmem:[%s10419_s25 + $0x1290] sm:$0xff] }
  0xaa   : > { %1784 = vst [vmem:[%s10424_s26 + $0x940] sm:$0xff] %v1783_v40  ;;  %v1787_v42 = vld [vmem:[%s10419_s25 + $0x12a0] sm:$0xff]  ;;  %v1789_v43 = vld [vmem:[%s10419_s25 + $0x12b0] sm:$0xff]  ;;  %1786 = vst [vmem:[%s10424_s26 + $0x948] sm:$0xff] %v1785_v41 }
  0xab   : > { %1788 = vst [vmem:[%s10424_s26 + $0x950] sm:$0xff] %v1787_v42  ;;  %1790 = vst [vmem:[%s10424_s26 + $0x958] sm:$0xff] %v1789_v43  ;;  %v1791_v44 = vld [vmem:[%s10419_s25 + $0x12c0] sm:$0xff]  ;;  %v1793_v45 = vld [vmem:[%s10419_s25 + $0x12d0] sm:$0xff] }
  0xac   : > { %v1795_v46 = vld [vmem:[%s10419_s25 + $0x12e0] sm:$0xff]  ;;  %1792 = vst [vmem:[%s10424_s26 + $0x960] sm:$0xff] %v1791_v44  ;;  %1794 = vst [vmem:[%s10424_s26 + $0x968] sm:$0xff] %v1793_v45  ;;  %v1797_v47 = vld [vmem:[%s10419_s25 + $0x12f0] sm:$0xff] }
  0xad   : > { %1796 = vst [vmem:[%s10424_s26 + $0x970] sm:$0xff] %v1795_v46  ;;  %v1799_v48 = vld [vmem:[%s10419_s25 + $0x1300] sm:$0xff]  ;;  %v1801_v49 = vld [vmem:[%s10419_s25 + $0x1310] sm:$0xff]  ;;  %1798 = vst [vmem:[%s10424_s26 + $0x978] sm:$0xff] %v1797_v47 }
  0xae   : > { %1800 = vst [vmem:[%s10424_s26 + $0x980] sm:$0xff] %v1799_v48  ;;  %1802 = vst [vmem:[%s10424_s26 + $0x988] sm:$0xff] %v1801_v49  ;;  %v1803_v50 = vld [vmem:[%s10419_s25 + $0x1320] sm:$0xff]  ;;  %v1805_v51 = vld [vmem:[%s10419_s25 + $0x1330] sm:$0xff] }
  0xaf   : > { %v1807_v52 = vld [vmem:[%s10419_s25 + $0x1340] sm:$0xff]  ;;  %1804 = vst [vmem:[%s10424_s26 + $0x990] sm:$0xff] %v1803_v50  ;;  %1806 = vst [vmem:[%s10424_s26 + $0x998] sm:$0xff] %v1805_v51  ;;  %v1809_v53 = vld [vmem:[%s10419_s25 + $0x1350] sm:$0xff] }
  0xb0   : > { %1808 = vst [vmem:[%s10424_s26 + $0x9a0] sm:$0xff] %v1807_v52  ;;  %v1811_v54 = vld [vmem:[%s10419_s25 + $0x1360] sm:$0xff]  ;;  %v1813_v55 = vld [vmem:[%s10419_s25 + $0x1370] sm:$0xff]  ;;  %1810 = vst [vmem:[%s10424_s26 + $0x9a8] sm:$0xff] %v1809_v53 }
  0xb1   : > { %1812 = vst [vmem:[%s10424_s26 + $0x9b0] sm:$0xff] %v1811_v54  ;;  %1814 = vst [vmem:[%s10424_s26 + $0x9b8] sm:$0xff] %v1813_v55  ;;  %v1815_v56 = vld [vmem:[%s10419_s25 + $0x1380] sm:$0xff]  ;;  %v1817_v57 = vld [vmem:[%s10419_s25 + $0x1390] sm:$0xff] }
  0xb2   : > { %v1819_v58 = vld [vmem:[%s10419_s25 + $0x13a0] sm:$0xff]  ;;  %1816 = vst [vmem:[%s10424_s26 + $0x9c0] sm:$0xff] %v1815_v56  ;;  %1818 = vst [vmem:[%s10424_s26 + $0x9c8] sm:$0xff] %v1817_v57  ;;  %v1821_v59 = vld [vmem:[%s10419_s25 + $0x13b0] sm:$0xff] }
  0xb3   : > { %1820 = vst [vmem:[%s10424_s26 + $0x9d0] sm:$0xff] %v1819_v58  ;;  %v1823_v60 = vld [vmem:[%s10419_s25 + $0x13c0] sm:$0xff]  ;;  %v1825_v61 = vld [vmem:[%s10419_s25 + $0x13d0] sm:$0xff]  ;;  %1822 = vst [vmem:[%s10424_s26 + $0x9d8] sm:$0xff] %v1821_v59 }
  0xb4   : > { %1824 = vst [vmem:[%s10424_s26 + $0x9e0] sm:$0xff] %v1823_v60  ;;  %1826 = vst [vmem:[%s10424_s26 + $0x9e8] sm:$0xff] %v1825_v61  ;;  %v1827_v62 = vld [vmem:[%s10419_s25 + $0x13e0] sm:$0xff]  ;;  %v1829_v63 = vld [vmem:[%s10419_s25 + $0x13f0] sm:$0xff] }
  0xb5   : > { %v1831_v0 = vld [vmem:[%s10419_s25 + $0x1400] sm:$0xff]  ;;  %1828 = vst [vmem:[%s10424_s26 + $0x9f0] sm:$0xff] %v1827_v62  ;;  %1830 = vst [vmem:[%s10424_s26 + $0x9f8] sm:$0xff] %v1829_v63  ;;  %v1833_v1 = vld [vmem:[%s10419_s25 + $0x1410] sm:$0xff] }
  0xb6   : > { %1832 = vst [vmem:[%s10424_s26 + $0xa00] sm:$0xff] %v1831_v0  ;;  %v1835_v2 = vld [vmem:[%s10419_s25 + $0x1420] sm:$0xff]  ;;  %v1837_v3 = vld [vmem:[%s10419_s25 + $0x1430] sm:$0xff]  ;;  %1834 = vst [vmem:[%s10424_s26 + $0xa08] sm:$0xff] %v1833_v1 }
  0xb7   : > { %1836 = vst [vmem:[%s10424_s26 + $0xa10] sm:$0xff] %v1835_v2  ;;  %1838 = vst [vmem:[%s10424_s26 + $0xa18] sm:$0xff] %v1837_v3  ;;  %v1839_v4 = vld [vmem:[%s10419_s25 + $0x1440] sm:$0xff]  ;;  %v1841_v5 = vld [vmem:[%s10419_s25 + $0x1450] sm:$0xff] }
  0xb8   : > { %v1843_v6 = vld [vmem:[%s10419_s25 + $0x1460] sm:$0xff]  ;;  %1840 = vst [vmem:[%s10424_s26 + $0xa20] sm:$0xff] %v1839_v4  ;;  %1842 = vst [vmem:[%s10424_s26 + $0xa28] sm:$0xff] %v1841_v5  ;;  %v1845_v7 = vld [vmem:[%s10419_s25 + $0x1470] sm:$0xff] }
  0xb9   : > { %1844 = vst [vmem:[%s10424_s26 + $0xa30] sm:$0xff] %v1843_v6  ;;  %v1847_v8 = vld [vmem:[%s10419_s25 + $0x1480] sm:$0xff]  ;;  %v1849_v9 = vld [vmem:[%s10419_s25 + $0x1490] sm:$0xff]  ;;  %1846 = vst [vmem:[%s10424_s26 + $0xa38] sm:$0xff] %v1845_v7 }
  0xba   : > { %1848 = vst [vmem:[%s10424_s26 + $0xa40] sm:$0xff] %v1847_v8  ;;  %1850 = vst [vmem:[%s10424_s26 + $0xa48] sm:$0xff] %v1849_v9  ;;  %v1851_v10 = vld [vmem:[%s10419_s25 + $0x14a0] sm:$0xff]  ;;  %v1853_v11 = vld [vmem:[%s10419_s25 + $0x14b0] sm:$0xff] }
  0xbb   : > { %v1855_v12 = vld [vmem:[%s10419_s25 + $0x14c0] sm:$0xff]  ;;  %1852 = vst [vmem:[%s10424_s26 + $0xa50] sm:$0xff] %v1851_v10  ;;  %1854 = vst [vmem:[%s10424_s26 + $0xa58] sm:$0xff] %v1853_v11  ;;  %v1857_v13 = vld [vmem:[%s10419_s25 + $0x14d0] sm:$0xff] }
  0xbc   : > { %1856 = vst [vmem:[%s10424_s26 + $0xa60] sm:$0xff] %v1855_v12  ;;  %v1859_v14 = vld [vmem:[%s10419_s25 + $0x14e0] sm:$0xff]  ;;  %v1861_v15 = vld [vmem:[%s10419_s25 + $0x14f0] sm:$0xff]  ;;  %1858 = vst [vmem:[%s10424_s26 + $0xa68] sm:$0xff] %v1857_v13 }
  0xbd   : > { %1860 = vst [vmem:[%s10424_s26 + $0xa70] sm:$0xff] %v1859_v14  ;;  %1862 = vst [vmem:[%s10424_s26 + $0xa78] sm:$0xff] %v1861_v15  ;;  %v1863_v16 = vld [vmem:[%s10419_s25 + $0x1500] sm:$0xff]  ;;  %v1865_v17 = vld [vmem:[%s10419_s25 + $0x1510] sm:$0xff] }
  0xbe   : > { %v1867_v18 = vld [vmem:[%s10419_s25 + $0x1520] sm:$0xff]  ;;  %1864 = vst [vmem:[%s10424_s26 + $0xa80] sm:$0xff] %v1863_v16  ;;  %1866 = vst [vmem:[%s10424_s26 + $0xa88] sm:$0xff] %v1865_v17  ;;  %v1869_v19 = vld [vmem:[%s10419_s25 + $0x1530] sm:$0xff] }
  0xbf   : > { %1868 = vst [vmem:[%s10424_s26 + $0xa90] sm:$0xff] %v1867_v18  ;;  %v1871_v20 = vld [vmem:[%s10419_s25 + $0x1540] sm:$0xff]  ;;  %v1873_v21 = vld [vmem:[%s10419_s25 + $0x1550] sm:$0xff]  ;;  %1870 = vst [vmem:[%s10424_s26 + $0xa98] sm:$0xff] %v1869_v19 }
  0xc0   : > { %1872 = vst [vmem:[%s10424_s26 + $0xaa0] sm:$0xff] %v1871_v20  ;;  %1874 = vst [vmem:[%s10424_s26 + $0xaa8] sm:$0xff] %v1873_v21  ;;  %v1875_v22 = vld [vmem:[%s10419_s25 + $0x1560] sm:$0xff]  ;;  %v1877_v23 = vld [vmem:[%s10419_s25 + $0x1570] sm:$0xff] }
  0xc1   : > { %v1879_v24 = vld [vmem:[%s10419_s25 + $0x1580] sm:$0xff]  ;;  %1876 = vst [vmem:[%s10424_s26 + $0xab0] sm:$0xff] %v1875_v22  ;;  %1878 = vst [vmem:[%s10424_s26 + $0xab8] sm:$0xff] %v1877_v23  ;;  %v1881_v25 = vld [vmem:[%s10419_s25 + $0x1590] sm:$0xff] }
  0xc2   : > { %1880 = vst [vmem:[%s10424_s26 + $0xac0] sm:$0xff] %v1879_v24  ;;  %v1883_v26 = vld [vmem:[%s10419_s25 + $0x15a0] sm:$0xff]  ;;  %v1885_v27 = vld [vmem:[%s10419_s25 + $0x15b0] sm:$0xff]  ;;  %1882 = vst [vmem:[%s10424_s26 + $0xac8] sm:$0xff] %v1881_v25 }
  0xc3   : > { %1884 = vst [vmem:[%s10424_s26 + $0xad0] sm:$0xff] %v1883_v26  ;;  %1886 = vst [vmem:[%s10424_s26 + $0xad8] sm:$0xff] %v1885_v27  ;;  %v1887_v28 = vld [vmem:[%s10419_s25 + $0x15c0] sm:$0xff]  ;;  %v1889_v29 = vld [vmem:[%s10419_s25 + $0x15d0] sm:$0xff] }
  0xc4   : > { %v1891_v30 = vld [vmem:[%s10419_s25 + $0x15e0] sm:$0xff]  ;;  %1888 = vst [vmem:[%s10424_s26 + $0xae0] sm:$0xff] %v1887_v28  ;;  %1890 = vst [vmem:[%s10424_s26 + $0xae8] sm:$0xff] %v1889_v29  ;;  %v1893_v31 = vld [vmem:[%s10419_s25 + $0x15f0] sm:$0xff] }
  0xc5   : > { %1892 = vst [vmem:[%s10424_s26 + $0xaf0] sm:$0xff] %v1891_v30  ;;  %v1895_v32 = vld [vmem:[%s10419_s25 + $0x1600] sm:$0xff]  ;;  %v1897_v33 = vld [vmem:[%s10419_s25 + $0x1610] sm:$0xff]  ;;  %1894 = vst [vmem:[%s10424_s26 + $0xaf8] sm:$0xff] %v1893_v31 }
  0xc6   : > { %1896 = vst [vmem:[%s10424_s26 + $0xb00] sm:$0xff] %v1895_v32  ;;  %1898 = vst [vmem:[%s10424_s26 + $0xb08] sm:$0xff] %v1897_v33  ;;  %v1899_v34 = vld [vmem:[%s10419_s25 + $0x1620] sm:$0xff]  ;;  %v1901_v35 = vld [vmem:[%s10419_s25 + $0x1630] sm:$0xff] }
  0xc7   : > { %v1903_v36 = vld [vmem:[%s10419_s25 + $0x1640] sm:$0xff]  ;;  %1900 = vst [vmem:[%s10424_s26 + $0xb10] sm:$0xff] %v1899_v34  ;;  %1902 = vst [vmem:[%s10424_s26 + $0xb18] sm:$0xff] %v1901_v35  ;;  %v1905_v37 = vld [vmem:[%s10419_s25 + $0x1650] sm:$0xff] }
  0xc8   : > { %1904 = vst [vmem:[%s10424_s26 + $0xb20] sm:$0xff] %v1903_v36  ;;  %v1907_v38 = vld [vmem:[%s10419_s25 + $0x1660] sm:$0xff]  ;;  %v1909_v39 = vld [vmem:[%s10419_s25 + $0x1670] sm:$0xff]  ;;  %1906 = vst [vmem:[%s10424_s26 + $0xb28] sm:$0xff] %v1905_v37 }
  0xc9   : > { %1908 = vst [vmem:[%s10424_s26 + $0xb30] sm:$0xff] %v1907_v38  ;;  %1910 = vst [vmem:[%s10424_s26 + $0xb38] sm:$0xff] %v1909_v39  ;;  %v1911_v40 = vld [vmem:[%s10419_s25 + $0x1680] sm:$0xff]  ;;  %v1913_v41 = vld [vmem:[%s10419_s25 + $0x1690] sm:$0xff] }
  0xca   : > { %v1915_v42 = vld [vmem:[%s10419_s25 + $0x16a0] sm:$0xff]  ;;  %1912 = vst [vmem:[%s10424_s26 + $0xb40] sm:$0xff] %v1911_v40  ;;  %1914 = vst [vmem:[%s10424_s26 + $0xb48] sm:$0xff] %v1913_v41  ;;  %v1917_v43 = vld [vmem:[%s10419_s25 + $0x16b0] sm:$0xff] }
  0xcb   : > { %1916 = vst [vmem:[%s10424_s26 + $0xb50] sm:$0xff] %v1915_v42  ;;  %v1919_v44 = vld [vmem:[%s10419_s25 + $0x16c0] sm:$0xff]  ;;  %v1921_v45 = vld [vmem:[%s10419_s25 + $0x16d0] sm:$0xff]  ;;  %1918 = vst [vmem:[%s10424_s26 + $0xb58] sm:$0xff] %v1917_v43 }
  0xcc   : > { %1920 = vst [vmem:[%s10424_s26 + $0xb60] sm:$0xff] %v1919_v44  ;;  %1922 = vst [vmem:[%s10424_s26 + $0xb68] sm:$0xff] %v1921_v45  ;;  %v1923_v46 = vld [vmem:[%s10419_s25 + $0x16e0] sm:$0xff]  ;;  %v1925_v47 = vld [vmem:[%s10419_s25 + $0x16f0] sm:$0xff] }
  0xcd   : > { %v1927_v48 = vld [vmem:[%s10419_s25 + $0x1700] sm:$0xff]  ;;  %1924 = vst [vmem:[%s10424_s26 + $0xb70] sm:$0xff] %v1923_v46  ;;  %1926 = vst [vmem:[%s10424_s26 + $0xb78] sm:$0xff] %v1925_v47  ;;  %v1929_v49 = vld [vmem:[%s10419_s25 + $0x1710] sm:$0xff] }
  0xce   : > { %1928 = vst [vmem:[%s10424_s26 + $0xb80] sm:$0xff] %v1927_v48  ;;  %v1931_v50 = vld [vmem:[%s10419_s25 + $0x1720] sm:$0xff]  ;;  %v1933_v51 = vld [vmem:[%s10419_s25 + $0x1730] sm:$0xff]  ;;  %1930 = vst [vmem:[%s10424_s26 + $0xb88] sm:$0xff] %v1929_v49 }
  0xcf   : > { %1932 = vst [vmem:[%s10424_s26 + $0xb90] sm:$0xff] %v1931_v50  ;;  %1934 = vst [vmem:[%s10424_s26 + $0xb98] sm:$0xff] %v1933_v51  ;;  %v1935_v52 = vld [vmem:[%s10419_s25 + $0x1740] sm:$0xff]  ;;  %v1937_v53 = vld [vmem:[%s10419_s25 + $0x1750] sm:$0xff] }
  0xd0   : > { %v1939_v54 = vld [vmem:[%s10419_s25 + $0x1760] sm:$0xff]  ;;  %1936 = vst [vmem:[%s10424_s26 + $0xba0] sm:$0xff] %v1935_v52  ;;  %1938 = vst [vmem:[%s10424_s26 + $0xba8] sm:$0xff] %v1937_v53  ;;  %v1941_v55 = vld [vmem:[%s10419_s25 + $0x1770] sm:$0xff] }
  0xd1   : > { %1940 = vst [vmem:[%s10424_s26 + $0xbb0] sm:$0xff] %v1939_v54  ;;  %v1943_v56 = vld [vmem:[%s10419_s25 + $0x1780] sm:$0xff]  ;;  %v1945_v57 = vld [vmem:[%s10419_s25 + $0x1790] sm:$0xff]  ;;  %1942 = vst [vmem:[%s10424_s26 + $0xbb8] sm:$0xff] %v1941_v55 }
  0xd2   : > { %1944 = vst [vmem:[%s10424_s26 + $0xbc0] sm:$0xff] %v1943_v56  ;;  %1946 = vst [vmem:[%s10424_s26 + $0xbc8] sm:$0xff] %v1945_v57  ;;  %v1947_v58 = vld [vmem:[%s10419_s25 + $0x17a0] sm:$0xff]  ;;  %v1949_v59 = vld [vmem:[%s10419_s25 + $0x17b0] sm:$0xff] }
  0xd3   : > { %v1951_v60 = vld [vmem:[%s10419_s25 + $0x17c0] sm:$0xff]  ;;  %1948 = vst [vmem:[%s10424_s26 + $0xbd0] sm:$0xff] %v1947_v58  ;;  %1950 = vst [vmem:[%s10424_s26 + $0xbd8] sm:$0xff] %v1949_v59  ;;  %v1953_v61 = vld [vmem:[%s10419_s25 + $0x17d0] sm:$0xff] }
  0xd4   : > { %1952 = vst [vmem:[%s10424_s26 + $0xbe0] sm:$0xff] %v1951_v60  ;;  %v1955_v62 = vld [vmem:[%s10419_s25 + $0x17e0] sm:$0xff]  ;;  %v1957_v63 = vld [vmem:[%s10419_s25 + $0x17f0] sm:$0xff]  ;;  %1954 = vst [vmem:[%s10424_s26 + $0xbe8] sm:$0xff] %v1953_v61 }
  0xd5   : > { %1956 = vst [vmem:[%s10424_s26 + $0xbf0] sm:$0xff] %v1955_v62  ;;  %1958 = vst [vmem:[%s10424_s26 + $0xbf8] sm:$0xff] %v1957_v63  ;;  %v1959_v0 = vld [vmem:[%s10419_s25 + $0x1800] sm:$0xff]  ;;  %v1961_v1 = vld [vmem:[%s10419_s25 + $0x1810] sm:$0xff] }
  0xd6   : > { %v1963_v2 = vld [vmem:[%s10419_s25 + $0x1820] sm:$0xff]  ;;  %1960 = vst [vmem:[%s10424_s26 + $0xc00] sm:$0xff] %v1959_v0  ;;  %1962 = vst [vmem:[%s10424_s26 + $0xc08] sm:$0xff] %v1961_v1  ;;  %v1965_v3 = vld [vmem:[%s10419_s25 + $0x1830] sm:$0xff] }
  0xd7   : > { %1964 = vst [vmem:[%s10424_s26 + $0xc10] sm:$0xff] %v1963_v2  ;;  %v1967_v4 = vld [vmem:[%s10419_s25 + $0x1840] sm:$0xff]  ;;  %v1969_v5 = vld [vmem:[%s10419_s25 + $0x1850] sm:$0xff]  ;;  %1966 = vst [vmem:[%s10424_s26 + $0xc18] sm:$0xff] %v1965_v3 }
  0xd8   : > { %1968 = vst [vmem:[%s10424_s26 + $0xc20] sm:$0xff] %v1967_v4  ;;  %1970 = vst [vmem:[%s10424_s26 + $0xc28] sm:$0xff] %v1969_v5  ;;  %v1971_v6 = vld [vmem:[%s10419_s25 + $0x1860] sm:$0xff]  ;;  %v1973_v7 = vld [vmem:[%s10419_s25 + $0x1870] sm:$0xff] }
  0xd9   : > { %v1975_v8 = vld [vmem:[%s10419_s25 + $0x1880] sm:$0xff]  ;;  %1972 = vst [vmem:[%s10424_s26 + $0xc30] sm:$0xff] %v1971_v6  ;;  %1974 = vst [vmem:[%s10424_s26 + $0xc38] sm:$0xff] %v1973_v7  ;;  %v1977_v9 = vld [vmem:[%s10419_s25 + $0x1890] sm:$0xff] }
  0xda   : > { %1976 = vst [vmem:[%s10424_s26 + $0xc40] sm:$0xff] %v1975_v8  ;;  %v1979_v10 = vld [vmem:[%s10419_s25 + $0x18a0] sm:$0xff]  ;;  %v1981_v11 = vld [vmem:[%s10419_s25 + $0x18b0] sm:$0xff]  ;;  %1978 = vst [vmem:[%s10424_s26 + $0xc48] sm:$0xff] %v1977_v9 }
  0xdb   : > { %1980 = vst [vmem:[%s10424_s26 + $0xc50] sm:$0xff] %v1979_v10  ;;  %1982 = vst [vmem:[%s10424_s26 + $0xc58] sm:$0xff] %v1981_v11  ;;  %v1983_v12 = vld [vmem:[%s10419_s25 + $0x18c0] sm:$0xff]  ;;  %v1985_v13 = vld [vmem:[%s10419_s25 + $0x18d0] sm:$0xff] }
  0xdc   : > { %v1987_v14 = vld [vmem:[%s10419_s25 + $0x18e0] sm:$0xff]  ;;  %1984 = vst [vmem:[%s10424_s26 + $0xc60] sm:$0xff] %v1983_v12  ;;  %1986 = vst [vmem:[%s10424_s26 + $0xc68] sm:$0xff] %v1985_v13  ;;  %v1989_v15 = vld [vmem:[%s10419_s25 + $0x18f0] sm:$0xff] }
  0xdd   : > { %1988 = vst [vmem:[%s10424_s26 + $0xc70] sm:$0xff] %v1987_v14  ;;  %v1991_v16 = vld [vmem:[%s10419_s25 + $0x1900] sm:$0xff]  ;;  %v1993_v17 = vld [vmem:[%s10419_s25 + $0x1910] sm:$0xff]  ;;  %1990 = vst [vmem:[%s10424_s26 + $0xc78] sm:$0xff] %v1989_v15 }
  0xde   : > { %1992 = vst [vmem:[%s10424_s26 + $0xc80] sm:$0xff] %v1991_v16  ;;  %1994 = vst [vmem:[%s10424_s26 + $0xc88] sm:$0xff] %v1993_v17  ;;  %v1995_v18 = vld [vmem:[%s10419_s25 + $0x1920] sm:$0xff]  ;;  %v1997_v19 = vld [vmem:[%s10419_s25 + $0x1930] sm:$0xff] }
  0xdf   : > { %v1999_v20 = vld [vmem:[%s10419_s25 + $0x1940] sm:$0xff]  ;;  %1996 = vst [vmem:[%s10424_s26 + $0xc90] sm:$0xff] %v1995_v18  ;;  %1998 = vst [vmem:[%s10424_s26 + $0xc98] sm:$0xff] %v1997_v19  ;;  %v2001_v21 = vld [vmem:[%s10419_s25 + $0x1950] sm:$0xff] }
  0xe0   : > { %2000 = vst [vmem:[%s10424_s26 + $0xca0] sm:$0xff] %v1999_v20  ;;  %v2003_v22 = vld [vmem:[%s10419_s25 + $0x1960] sm:$0xff]  ;;  %v2005_v23 = vld [vmem:[%s10419_s25 + $0x1970] sm:$0xff]  ;;  %2002 = vst [vmem:[%s10424_s26 + $0xca8] sm:$0xff] %v2001_v21 }
  0xe1   : > { %2004 = vst [vmem:[%s10424_s26 + $0xcb0] sm:$0xff] %v2003_v22  ;;  %2006 = vst [vmem:[%s10424_s26 + $0xcb8] sm:$0xff] %v2005_v23  ;;  %v2007_v24 = vld [vmem:[%s10419_s25 + $0x1980] sm:$0xff]  ;;  %v2009_v25 = vld [vmem:[%s10419_s25 + $0x1990] sm:$0xff] }
  0xe2   : > { %v2011_v26 = vld [vmem:[%s10419_s25 + $0x19a0] sm:$0xff]  ;;  %2008 = vst [vmem:[%s10424_s26 + $0xcc0] sm:$0xff] %v2007_v24  ;;  %2010 = vst [vmem:[%s10424_s26 + $0xcc8] sm:$0xff] %v2009_v25  ;;  %v2013_v27 = vld [vmem:[%s10419_s25 + $0x19b0] sm:$0xff] }
  0xe3   : > { %2012 = vst [vmem:[%s10424_s26 + $0xcd0] sm:$0xff] %v2011_v26  ;;  %v2015_v28 = vld [vmem:[%s10419_s25 + $0x19c0] sm:$0xff]  ;;  %v2017_v29 = vld [vmem:[%s10419_s25 + $0x19d0] sm:$0xff]  ;;  %2014 = vst [vmem:[%s10424_s26 + $0xcd8] sm:$0xff] %v2013_v27 }
  0xe4   : > { %2016 = vst [vmem:[%s10424_s26 + $0xce0] sm:$0xff] %v2015_v28  ;;  %2018 = vst [vmem:[%s10424_s26 + $0xce8] sm:$0xff] %v2017_v29  ;;  %v2019_v30 = vld [vmem:[%s10419_s25 + $0x19e0] sm:$0xff]  ;;  %v2021_v31 = vld [vmem:[%s10419_s25 + $0x19f0] sm:$0xff] }
  0xe5   : > { %v2023_v32 = vld [vmem:[%s10419_s25 + $0x1a00] sm:$0xff]  ;;  %2020 = vst [vmem:[%s10424_s26 + $0xcf0] sm:$0xff] %v2019_v30  ;;  %2022 = vst [vmem:[%s10424_s26 + $0xcf8] sm:$0xff] %v2021_v31  ;;  %v2025_v33 = vld [vmem:[%s10419_s25 + $0x1a10] sm:$0xff] }
  0xe6   : > { %2024 = vst [vmem:[%s10424_s26 + $0xd00] sm:$0xff] %v2023_v32  ;;  %v2027_v34 = vld [vmem:[%s10419_s25 + $0x1a20] sm:$0xff]  ;;  %v2029_v35 = vld [vmem:[%s10419_s25 + $0x1a30] sm:$0xff]  ;;  %2026 = vst [vmem:[%s10424_s26 + $0xd08] sm:$0xff] %v2025_v33 }
  0xe7   : > { %2028 = vst [vmem:[%s10424_s26 + $0xd10] sm:$0xff] %v2027_v34  ;;  %2030 = vst [vmem:[%s10424_s26 + $0xd18] sm:$0xff] %v2029_v35  ;;  %v2031_v36 = vld [vmem:[%s10419_s25 + $0x1a40] sm:$0xff]  ;;  %v2033_v37 = vld [vmem:[%s10419_s25 + $0x1a50] sm:$0xff] }
  0xe8   : > { %v2035_v38 = vld [vmem:[%s10419_s25 + $0x1a60] sm:$0xff]  ;;  %2032 = vst [vmem:[%s10424_s26 + $0xd20] sm:$0xff] %v2031_v36  ;;  %2034 = vst [vmem:[%s10424_s26 + $0xd28] sm:$0xff] %v2033_v37  ;;  %v2037_v39 = vld [vmem:[%s10419_s25 + $0x1a70] sm:$0xff] }
  0xe9   : > { %2036 = vst [vmem:[%s10424_s26 + $0xd30] sm:$0xff] %v2035_v38  ;;  %v2039_v40 = vld [vmem:[%s10419_s25 + $0x1a80] sm:$0xff]  ;;  %v2041_v41 = vld [vmem:[%s10419_s25 + $0x1a90] sm:$0xff]  ;;  %2038 = vst [vmem:[%s10424_s26 + $0xd38] sm:$0xff] %v2037_v39 }
  0xea   : > { %2040 = vst [vmem:[%s10424_s26 + $0xd40] sm:$0xff] %v2039_v40  ;;  %2042 = vst [vmem:[%s10424_s26 + $0xd48] sm:$0xff] %v2041_v41  ;;  %v2043_v42 = vld [vmem:[%s10419_s25 + $0x1aa0] sm:$0xff]  ;;  %v2045_v43 = vld [vmem:[%s10419_s25 + $0x1ab0] sm:$0xff] }
  0xeb   : > { %v2047_v44 = vld [vmem:[%s10419_s25 + $0x1ac0] sm:$0xff]  ;;  %2044 = vst [vmem:[%s10424_s26 + $0xd50] sm:$0xff] %v2043_v42  ;;  %2046 = vst [vmem:[%s10424_s26 + $0xd58] sm:$0xff] %v2045_v43  ;;  %v2049_v45 = vld [vmem:[%s10419_s25 + $0x1ad0] sm:$0xff] }
  0xec   : > { %2048 = vst [vmem:[%s10424_s26 + $0xd60] sm:$0xff] %v2047_v44  ;;  %v2051_v46 = vld [vmem:[%s10419_s25 + $0x1ae0] sm:$0xff]  ;;  %v2053_v47 = vld [vmem:[%s10419_s25 + $0x1af0] sm:$0xff]  ;;  %2050 = vst [vmem:[%s10424_s26 + $0xd68] sm:$0xff] %v2049_v45 }
  0xed   : > { %2052 = vst [vmem:[%s10424_s26 + $0xd70] sm:$0xff] %v2051_v46  ;;  %2054 = vst [vmem:[%s10424_s26 + $0xd78] sm:$0xff] %v2053_v47  ;;  %v2055_v48 = vld [vmem:[%s10419_s25 + $0x1b00] sm:$0xff]  ;;  %v2057_v49 = vld [vmem:[%s10419_s25 + $0x1b10] sm:$0xff] }
  0xee   : > { %v2059_v50 = vld [vmem:[%s10419_s25 + $0x1b20] sm:$0xff]  ;;  %2056 = vst [vmem:[%s10424_s26 + $0xd80] sm:$0xff] %v2055_v48  ;;  %2058 = vst [vmem:[%s10424_s26 + $0xd88] sm:$0xff] %v2057_v49  ;;  %v2061_v51 = vld [vmem:[%s10419_s25 + $0x1b30] sm:$0xff] }
  0xef   : > { %2060 = vst [vmem:[%s10424_s26 + $0xd90] sm:$0xff] %v2059_v50  ;;  %v2063_v52 = vld [vmem:[%s10419_s25 + $0x1b40] sm:$0xff]  ;;  %v2065_v53 = vld [vmem:[%s10419_s25 + $0x1b50] sm:$0xff]  ;;  %2062 = vst [vmem:[%s10424_s26 + $0xd98] sm:$0xff] %v2061_v51 }
  0xf0   : > { %2064 = vst [vmem:[%s10424_s26 + $0xda0] sm:$0xff] %v2063_v52  ;;  %2066 = vst [vmem:[%s10424_s26 + $0xda8] sm:$0xff] %v2065_v53  ;;  %v2067_v54 = vld [vmem:[%s10419_s25 + $0x1b60] sm:$0xff]  ;;  %v2069_v55 = vld [vmem:[%s10419_s25 + $0x1b70] sm:$0xff] }
  0xf1   : > { %v2071_v56 = vld [vmem:[%s10419_s25 + $0x1b80] sm:$0xff]  ;;  %2068 = vst [vmem:[%s10424_s26 + $0xdb0] sm:$0xff] %v2067_v54  ;;  %2070 = vst [vmem:[%s10424_s26 + $0xdb8] sm:$0xff] %v2069_v55  ;;  %v2073_v57 = vld [vmem:[%s10419_s25 + $0x1b90] sm:$0xff] }
  0xf2   : > { %2072 = vst [vmem:[%s10424_s26 + $0xdc0] sm:$0xff] %v2071_v56  ;;  %v2075_v58 = vld [vmem:[%s10419_s25 + $0x1ba0] sm:$0xff]  ;;  %v2077_v59 = vld [vmem:[%s10419_s25 + $0x1bb0] sm:$0xff]  ;;  %2074 = vst [vmem:[%s10424_s26 + $0xdc8] sm:$0xff] %v2073_v57 }
  0xf3   : > { %2076 = vst [vmem:[%s10424_s26 + $0xdd0] sm:$0xff] %v2075_v58  ;;  %2078 = vst [vmem:[%s10424_s26 + $0xdd8] sm:$0xff] %v2077_v59  ;;  %v2079_v60 = vld [vmem:[%s10419_s25 + $0x1bc0] sm:$0xff]  ;;  %v2081_v61 = vld [vmem:[%s10419_s25 + $0x1bd0] sm:$0xff] }
  0xf4   : > { %v2083_v62 = vld [vmem:[%s10419_s25 + $0x1be0] sm:$0xff]  ;;  %2080 = vst [vmem:[%s10424_s26 + $0xde0] sm:$0xff] %v2079_v60  ;;  %2082 = vst [vmem:[%s10424_s26 + $0xde8] sm:$0xff] %v2081_v61  ;;  %v2085_v63 = vld [vmem:[%s10419_s25 + $0x1bf0] sm:$0xff] }
  0xf5   : > { %2084 = vst [vmem:[%s10424_s26 + $0xdf0] sm:$0xff] %v2083_v62  ;;  %v2087_v0 = vld [vmem:[%s10419_s25 + $0x1c00] sm:$0xff]  ;;  %v2089_v1 = vld [vmem:[%s10419_s25 + $0x1c10] sm:$0xff]  ;;  %2086 = vst [vmem:[%s10424_s26 + $0xdf8] sm:$0xff] %v2085_v63 }
  0xf6   : > { %2088 = vst [vmem:[%s10424_s26 + $0xe00] sm:$0xff] %v2087_v0  ;;  %2090 = vst [vmem:[%s10424_s26 + $0xe08] sm:$0xff] %v2089_v1  ;;  %v2091_v2 = vld [vmem:[%s10419_s25 + $0x1c20] sm:$0xff]  ;;  %v2093_v3 = vld [vmem:[%s10419_s25 + $0x1c30] sm:$0xff] }
  0xf7   : > { %v2095_v4 = vld [vmem:[%s10419_s25 + $0x1c40] sm:$0xff]  ;;  %2092 = vst [vmem:[%s10424_s26 + $0xe10] sm:$0xff] %v2091_v2  ;;  %2094 = vst [vmem:[%s10424_s26 + $0xe18] sm:$0xff] %v2093_v3  ;;  %v2097_v5 = vld [vmem:[%s10419_s25 + $0x1c50] sm:$0xff] }
  0xf8   : > { %2096 = vst [vmem:[%s10424_s26 + $0xe20] sm:$0xff] %v2095_v4  ;;  %v2099_v6 = vld [vmem:[%s10419_s25 + $0x1c60] sm:$0xff]  ;;  %v2101_v7 = vld [vmem:[%s10419_s25 + $0x1c70] sm:$0xff]  ;;  %2098 = vst [vmem:[%s10424_s26 + $0xe28] sm:$0xff] %v2097_v5 }
  0xf9   : > { %2100 = vst [vmem:[%s10424_s26 + $0xe30] sm:$0xff] %v2099_v6  ;;  %2102 = vst [vmem:[%s10424_s26 + $0xe38] sm:$0xff] %v2101_v7  ;;  %v2103_v8 = vld [vmem:[%s10419_s25 + $0x1c80] sm:$0xff]  ;;  %v2105_v9 = vld [vmem:[%s10419_s25 + $0x1c90] sm:$0xff] }
  0xfa   : > { %v2107_v10 = vld [vmem:[%s10419_s25 + $0x1ca0] sm:$0xff]  ;;  %2104 = vst [vmem:[%s10424_s26 + $0xe40] sm:$0xff] %v2103_v8  ;;  %2106 = vst [vmem:[%s10424_s26 + $0xe48] sm:$0xff] %v2105_v9  ;;  %v2109_v11 = vld [vmem:[%s10419_s25 + $0x1cb0] sm:$0xff] }
  0xfb   : > { %2108 = vst [vmem:[%s10424_s26 + $0xe50] sm:$0xff] %v2107_v10  ;;  %v2111_v12 = vld [vmem:[%s10419_s25 + $0x1cc0] sm:$0xff]  ;;  %v2113_v13 = vld [vmem:[%s10419_s25 + $0x1cd0] sm:$0xff]  ;;  %2110 = vst [vmem:[%s10424_s26 + $0xe58] sm:$0xff] %v2109_v11 }
  0xfc   : > { %2112 = vst [vmem:[%s10424_s26 + $0xe60] sm:$0xff] %v2111_v12  ;;  %2114 = vst [vmem:[%s10424_s26 + $0xe68] sm:$0xff] %v2113_v13  ;;  %v2115_v14 = vld [vmem:[%s10419_s25 + $0x1ce0] sm:$0xff]  ;;  %v2117_v15 = vld [vmem:[%s10419_s25 + $0x1cf0] sm:$0xff] }
  0xfd   : > { %v2119_v16 = vld [vmem:[%s10419_s25 + $0x1d00] sm:$0xff]  ;;  %2116 = vst [vmem:[%s10424_s26 + $0xe70] sm:$0xff] %v2115_v14  ;;  %2118 = vst [vmem:[%s10424_s26 + $0xe78] sm:$0xff] %v2117_v15  ;;  %v2121_v17 = vld [vmem:[%s10419_s25 + $0x1d10] sm:$0xff] }
  0xfe   : > { %2120 = vst [vmem:[%s10424_s26 + $0xe80] sm:$0xff] %v2119_v16  ;;  %v2123_v18 = vld [vmem:[%s10419_s25 + $0x1d20] sm:$0xff]  ;;  %v2125_v19 = vld [vmem:[%s10419_s25 + $0x1d30] sm:$0xff]  ;;  %2122 = vst [vmem:[%s10424_s26 + $0xe88] sm:$0xff] %v2121_v17 }
  0xff   : > { %2124 = vst [vmem:[%s10424_s26 + $0xe90] sm:$0xff] %v2123_v18  ;;  %2126 = vst [vmem:[%s10424_s26 + $0xe98] sm:$0xff] %v2125_v19  ;;  %v2127_v20 = vld [vmem:[%s10419_s25 + $0x1d40] sm:$0xff]  ;;  %v2129_v21 = vld [vmem:[%s10419_s25 + $0x1d50] sm:$0xff] }
 0x100   : > { %v2131_v22 = vld [vmem:[%s10419_s25 + $0x1d60] sm:$0xff]  ;;  %2128 = vst [vmem:[%s10424_s26 + $0xea0] sm:$0xff] %v2127_v20  ;;  %2130 = vst [vmem:[%s10424_s26 + $0xea8] sm:$0xff] %v2129_v21  ;;  %v2133_v23 = vld [vmem:[%s10419_s25 + $0x1d70] sm:$0xff] }
 0x101   : > { %2132 = vst [vmem:[%s10424_s26 + $0xeb0] sm:$0xff] %v2131_v22  ;;  %v2135_v24 = vld [vmem:[%s10419_s25 + $0x1d80] sm:$0xff]  ;;  %v2137_v25 = vld [vmem:[%s10419_s25 + $0x1d90] sm:$0xff]  ;;  %2134 = vst [vmem:[%s10424_s26 + $0xeb8] sm:$0xff] %v2133_v23 }
 0x102   : > { %2136 = vst [vmem:[%s10424_s26 + $0xec0] sm:$0xff] %v2135_v24  ;;  %2138 = vst [vmem:[%s10424_s26 + $0xec8] sm:$0xff] %v2137_v25  ;;  %v2139_v26 = vld [vmem:[%s10419_s25 + $0x1da0] sm:$0xff]  ;;  %v2141_v27 = vld [vmem:[%s10419_s25 + $0x1db0] sm:$0xff] }
 0x103   : > { %v2143_v28 = vld [vmem:[%s10419_s25 + $0x1dc0] sm:$0xff]  ;;  %2140 = vst [vmem:[%s10424_s26 + $0xed0] sm:$0xff] %v2139_v26  ;;  %2142 = vst [vmem:[%s10424_s26 + $0xed8] sm:$0xff] %v2141_v27  ;;  %v2145_v29 = vld [vmem:[%s10419_s25 + $0x1dd0] sm:$0xff] }
 0x104   : > { %2144 = vst [vmem:[%s10424_s26 + $0xee0] sm:$0xff] %v2143_v28  ;;  %v2147_v30 = vld [vmem:[%s10419_s25 + $0x1de0] sm:$0xff]  ;;  %v2149_v31 = vld [vmem:[%s10419_s25 + $0x1df0] sm:$0xff]  ;;  %2146 = vst [vmem:[%s10424_s26 + $0xee8] sm:$0xff] %v2145_v29 }
 0x105   : > { %2148 = vst [vmem:[%s10424_s26 + $0xef0] sm:$0xff] %v2147_v30  ;;  %2150 = vst [vmem:[%s10424_s26 + $0xef8] sm:$0xff] %v2149_v31  ;;  %v2151_v32 = vld [vmem:[%s10419_s25 + $0x1e00] sm:$0xff]  ;;  %v2153_v33 = vld [vmem:[%s10419_s25 + $0x1e10] sm:$0xff] }
 0x106   : > { %v2155_v34 = vld [vmem:[%s10419_s25 + $0x1e20] sm:$0xff]  ;;  %2152 = vst [vmem:[%s10424_s26 + $0xf00] sm:$0xff] %v2151_v32  ;;  %2154 = vst [vmem:[%s10424_s26 + $0xf08] sm:$0xff] %v2153_v33  ;;  %v2157_v35 = vld [vmem:[%s10419_s25 + $0x1e30] sm:$0xff] }
 0x107   : > { %2156 = vst [vmem:[%s10424_s26 + $0xf10] sm:$0xff] %v2155_v34  ;;  %v2159_v36 = vld [vmem:[%s10419_s25 + $0x1e40] sm:$0xff]  ;;  %v2161_v37 = vld [vmem:[%s10419_s25 + $0x1e50] sm:$0xff]  ;;  %2158 = vst [vmem:[%s10424_s26 + $0xf18] sm:$0xff] %v2157_v35 }
 0x108   : > { %2160 = vst [vmem:[%s10424_s26 + $0xf20] sm:$0xff] %v2159_v36  ;;  %2162 = vst [vmem:[%s10424_s26 + $0xf28] sm:$0xff] %v2161_v37  ;;  %v2163_v38 = vld [vmem:[%s10419_s25 + $0x1e60] sm:$0xff]  ;;  %v2165_v39 = vld [vmem:[%s10419_s25 + $0x1e70] sm:$0xff] }
 0x109   : > { %v2167_v40 = vld [vmem:[%s10419_s25 + $0x1e80] sm:$0xff]  ;;  %2164 = vst [vmem:[%s10424_s26 + $0xf30] sm:$0xff] %v2163_v38  ;;  %2166 = vst [vmem:[%s10424_s26 + $0xf38] sm:$0xff] %v2165_v39  ;;  %v2169_v41 = vld [vmem:[%s10419_s25 + $0x1e90] sm:$0xff] }
 0x10a   : > { %2168 = vst [vmem:[%s10424_s26 + $0xf40] sm:$0xff] %v2167_v40  ;;  %v2171_v42 = vld [vmem:[%s10419_s25 + $0x1ea0] sm:$0xff]  ;;  %v2173_v43 = vld [vmem:[%s10419_s25 + $0x1eb0] sm:$0xff]  ;;  %2170 = vst [vmem:[%s10424_s26 + $0xf48] sm:$0xff] %v2169_v41 }
 0x10b   : > { %2172 = vst [vmem:[%s10424_s26 + $0xf50] sm:$0xff] %v2171_v42  ;;  %2174 = vst [vmem:[%s10424_s26 + $0xf58] sm:$0xff] %v2173_v43  ;;  %v2175_v44 = vld [vmem:[%s10419_s25 + $0x1ec0] sm:$0xff]  ;;  %v2177_v45 = vld [vmem:[%s10419_s25 + $0x1ed0] sm:$0xff] }
 0x10c   : > { %v2179_v46 = vld [vmem:[%s10419_s25 + $0x1ee0] sm:$0xff]  ;;  %2176 = vst [vmem:[%s10424_s26 + $0xf60] sm:$0xff] %v2175_v44  ;;  %2178 = vst [vmem:[%s10424_s26 + $0xf68] sm:$0xff] %v2177_v45  ;;  %v2181_v47 = vld [vmem:[%s10419_s25 + $0x1ef0] sm:$0xff] }
 0x10d   : > { %2180 = vst [vmem:[%s10424_s26 + $0xf70] sm:$0xff] %v2179_v46  ;;  %v2183_v48 = vld [vmem:[%s10419_s25 + $0x1f00] sm:$0xff]  ;;  %v2185_v49 = vld [vmem:[%s10419_s25 + $0x1f10] sm:$0xff]  ;;  %2182 = vst [vmem:[%s10424_s26 + $0xf78] sm:$0xff] %v2181_v47 }
 0x10e   : > { %2184 = vst [vmem:[%s10424_s26 + $0xf80] sm:$0xff] %v2183_v48  ;;  %2186 = vst [vmem:[%s10424_s26 + $0xf88] sm:$0xff] %v2185_v49  ;;  %v2187_v50 = vld [vmem:[%s10419_s25 + $0x1f20] sm:$0xff]  ;;  %v2189_v51 = vld [vmem:[%s10419_s25 + $0x1f30] sm:$0xff] }
 0x10f   : > { %v2191_v52 = vld [vmem:[%s10419_s25 + $0x1f40] sm:$0xff]  ;;  %2188 = vst [vmem:[%s10424_s26 + $0xf90] sm:$0xff] %v2187_v50  ;;  %2190 = vst [vmem:[%s10424_s26 + $0xf98] sm:$0xff] %v2189_v51  ;;  %v2193_v53 = vld [vmem:[%s10419_s25 + $0x1f50] sm:$0xff] }
 0x110   : > { %2192 = vst [vmem:[%s10424_s26 + $0xfa0] sm:$0xff] %v2191_v52  ;;  %v2195_v54 = vld [vmem:[%s10419_s25 + $0x1f60] sm:$0xff]  ;;  %v2197_v55 = vld [vmem:[%s10419_s25 + $0x1f70] sm:$0xff]  ;;  %2194 = vst [vmem:[%s10424_s26 + $0xfa8] sm:$0xff] %v2193_v53 }
 0x111   : > { %2196 = vst [vmem:[%s10424_s26 + $0xfb0] sm:$0xff] %v2195_v54  ;;  %2198 = vst [vmem:[%s10424_s26 + $0xfb8] sm:$0xff] %v2197_v55  ;;  %v2199_v56 = vld [vmem:[%s10419_s25 + $0x1f80] sm:$0xff]  ;;  %v2201_v57 = vld [vmem:[%s10419_s25 + $0x1f90] sm:$0xff] }
 0x112   : > { %v2203_v58 = vld [vmem:[%s10419_s25 + $0x1fa0] sm:$0xff]  ;;  %2200 = vst [vmem:[%s10424_s26 + $0xfc0] sm:$0xff] %v2199_v56  ;;  %2202 = vst [vmem:[%s10424_s26 + $0xfc8] sm:$0xff] %v2201_v57  ;;  %v2205_v59 = vld [vmem:[%s10419_s25 + $0x1fb0] sm:$0xff] }
 0x113   : > { %2204 = vst [vmem:[%s10424_s26 + $0xfd0] sm:$0xff] %v2203_v58  ;;  %v2207_v60 = vld [vmem:[%s10419_s25 + $0x1fc0] sm:$0xff]  ;;  %v2209_v61 = vld [vmem:[%s10419_s25 + $0x1fd0] sm:$0xff]  ;;  %2206 = vst [vmem:[%s10424_s26 + $0xfd8] sm:$0xff] %v2205_v59 }
 0x114   : > { %2208 = vst [vmem:[%s10424_s26 + $0xfe0] sm:$0xff] %v2207_v60  ;;  %2210 = vst [vmem:[%s10424_s26 + $0xfe8] sm:$0xff] %v2209_v61  ;;  %v2211_v62 = vld [vmem:[%s10419_s25 + $0x1fe0] sm:$0xff]  ;;  %v2213_v63 = vld [vmem:[%s10419_s25 + $0x1ff0] sm:$0xff] }
 0x115   : > { %2212 = vst [vmem:[%s10424_s26 + $0xff0] sm:$0xff] %v2211_v62  ;;  %2214 = vst [vmem:[%s10424_s26 + $0xff8] sm:$0xff] %v2213_v63 }
 0x116 PF: > { %p8802_p8 = scmp.ge.s32.totalorder %s10354_s13, 1  ;;  %p4303_p9 = scmp.lt.s32.totalorder %s10354_s13, 3 }
 0x118   : > { %p4304_p10 = pnand %p8802_p8, %p4303_p9 }
 0x119   : > { %s4310_s27 = sand.u32 (!%p4304_p10), 1, %s10338_s9   ;;  %v11453_v0 = vld [vmem:[%s12333_s0] sm:$0xff] (!%p4304_p10) }
 0x11a   : > { %4307 = sbr.rel (%p4304_p10) target bundleno = 1033 (0x409), region = 76  ;;  %v11458_v1 = vld [vmem:[%s12333_s0 + $0x80] sm:$0xff] (!%p4304_p10)  ;;  %s8803_s6 = sshll.u32 (!%p4304_p10), %s4310_s27, 12 }
 0x11b   : > { %v11463_v2 = vld [vmem:[%s12333_s0 + $0x40] sm:$0xff] (!%p4304_p10)  ;;  %v8805_v3 = vcombine.low (!%p4304_p10), %v11453_v0, %v11458_v1  ;;  %v8806_v4 = vcombine.high (!%p4304_p10), %v11453_v0, %v11458_v1  ;;  %s11480_s15 = scalar_lea.vmem (!%p4304_p10), [#allocation2], %s8803_s6 }
 0x11c   : > { %v11474_v5 = vld [vmem:[%s12333_s0 + $0xc0] sm:$0xff] (!%p4304_p10)  ;;  %v9554_v12 = vld [vmem:[%s11480_s15 + $0x14] ss:$8 sps:$4 sm:$0xff] (!%p4304_p10)   ;;  %v9558_v14 = vld [vmem:[%s11480_s15 + $0x10] ss:$8 sps:$4 sm:$0xff] (!%p4304_p10)  }
 0x11d   : > { %v8821_v6 = vcombine.low (!%p4304_p10), %v11463_v2, %v11474_v5  ;;  %v8822_v7 = vcombine.high (!%p4304_p10), %v11463_v2, %v11474_v5  ;;  %v9548_v8 = vld [vmem:[%s11480_s15 + $0x4] ss:$8 sps:$4 sm:$0xff] (!%p4304_p10)   ;;  %7834 = vmatprep.mubr.bf16.mxu1 (!%p4304_p10), %v8806_v4  ;;  %v9552_v10 = vld [vmem:[%s11480_s15] ss:$8 sps:$4 sm:$0xff] (!%p4304_p10)   ;;  %v9556_v13 = vld [vmem:[%s11480_s15 + $0x814] ss:$8 sps:$4 sm:$0xff] (!%p4304_p10)  }
 0x11e   : > { %v9550_v9 = vld [vmem:[%s11480_s15 + $0x804] ss:$8 sps:$4 sm:$0xff] (!%p4304_p10)   ;;  %7802 = vmatprep.subr.bf16.mxu1 (!%p4304_p10), %v9548_v8  ;;  %v9553_v11 = vld [vmem:[%s11480_s15 + $0x800] ss:$8 sps:$4 sm:$0xff] (!%p4304_p10)   ;;  %v9559_v15 = vld [vmem:[%s11480_s15 + $0x810] ss:$8 sps:$4 sm:$0xff] (!%p4304_p10)  }
 0x11f   : > { %8258 = vmatprep.mubr.bf16.mxu0 (!%p4304_p10), %v8822_v7  ;;  %8226 = vmatprep.subr.bf16.mxu0 (!%p4304_p10), %v9550_v9  ;;  %v9560_v16 = vld [vmem:[%s11480_s15 + $0x24] ss:$8 sps:$4 sm:$0xff] (!%p4304_p10)   ;;  %v9564_v18 = vld [vmem:[%s11480_s15 + $0x20] ss:$8 sps:$4 sm:$0xff] (!%p4304_p10)   ;;  %v9566_v20 = vld [vmem:[%s11480_s15 + $0x34] ss:$8 sps:$4 sm:$0xff] (!%p4304_p10)  }
 0x120   : > { %7803 = vmatpush1.bf16.msra.mxu1 (!%p4304_p10), %v9552_v10  ;;  %8227 = vmatpush1.bf16.msra.mxu0 (!%p4304_p10), %v9553_v11  ;;  %v9562_v17 = vld [vmem:[%s11480_s15 + $0x824] ss:$8 sps:$4 sm:$0xff] (!%p4304_p10)   ;;  %v9565_v19 = vld [vmem:[%s11480_s15 + $0x820] ss:$8 sps:$4 sm:$0xff] (!%p4304_p10)   ;;  %v9568_v21 = vld [vmem:[%s11480_s15 + $0x834] ss:$8 sps:$4 sm:$0xff] (!%p4304_p10)  }
 0x121   : > { %7804 = vmatprep.subr.bf16.mxu1 %v9554_v12  ;;  %8228 = vmatprep.subr.bf16.mxu0 %v9556_v13  ;;  %v9570_v22 = vld [vmem:[%s11480_s15 + $0x30] ss:$8 sps:$4 sm:$0xff]   ;;  %v9572_v24 = vld [vmem:[%s11480_s15 + $0x44] ss:$8 sps:$4 sm:$0xff]   ;;  %v9576_v26 = vld [vmem:[%s11480_s15 + $0x40] ss:$8 sps:$4 sm:$0xff]  }
 0x122   : > { %v9571_v23 = vld [vmem:[%s11480_s15 + $0x830] ss:$8 sps:$4 sm:$0xff]   ;;  %v9574_v25 = vld [vmem:[%s11480_s15 + $0x844] ss:$8 sps:$4 sm:$0xff]   ;;  %v9577_v27 = vld [vmem:[%s11480_s15 + $0x840] ss:$8 sps:$4 sm:$0xff]  }
 0x123   : > { %v9578_v28 = vld [vmem:[%s11480_s15 + $0x54] ss:$8 sps:$4 sm:$0xff]   ;;  %v9582_v30 = vld [vmem:[%s11480_s15 + $0x50] ss:$8 sps:$4 sm:$0xff]   ;;  %v9584_v32 = vld [vmem:[%s11480_s15 + $0x64] ss:$8 sps:$4 sm:$0xff]  }
 0x124   : > { %7805 = vmatpush1.bf16.msra.mxu1 %v9558_v14  ;;  %8229 = vmatpush1.bf16.msra.mxu0 %v9559_v15  ;;  %v9580_v29 = vld [vmem:[%s11480_s15 + $0x854] ss:$8 sps:$4 sm:$0xff]   ;;  %v9583_v31 = vld [vmem:[%s11480_s15 + $0x850] ss:$8 sps:$4 sm:$0xff]   ;;  %v9586_v33 = vld [vmem:[%s11480_s15 + $0x864] ss:$8 sps:$4 sm:$0xff]  }
 0x125   : > { %7806 = vmatprep.subr.bf16.mxu1 %v9560_v16  ;;  %8230 = vmatprep.subr.bf16.mxu0 %v9562_v17  ;;  %v9588_v34 = vld [vmem:[%s11480_s15 + $0x60] ss:$8 sps:$4 sm:$0xff]   ;;  %v9590_v36 = vld [vmem:[%s11480_s15 + $0x74] ss:$8 sps:$4 sm:$0xff]   ;;  %v9594_v38 = vld [vmem:[%s11480_s15 + $0x70] ss:$8 sps:$4 sm:$0xff]  }
 0x126   : > { %v9589_v35 = vld [vmem:[%s11480_s15 + $0x860] ss:$8 sps:$4 sm:$0xff]   ;;  %v9592_v37 = vld [vmem:[%s11480_s15 + $0x874] ss:$8 sps:$4 sm:$0xff]   ;;  %v9595_v39 = vld [vmem:[%s11480_s15 + $0x870] ss:$8 sps:$4 sm:$0xff]  }
 0x127   : > { %v9596_v40 = vld [vmem:[%s11480_s15 + $0x84] ss:$8 sps:$4 sm:$0xff]   ;;  %v9600_v42 = vld [vmem:[%s11480_s15 + $0x80] ss:$8 sps:$4 sm:$0xff]   ;;  %v9602_v44 = vld [vmem:[%s11480_s15 + $0x94] ss:$8 sps:$4 sm:$0xff]  }
 0x128   : > { %7807 = vmatpush1.bf16.msra.mxu1 %v9564_v18  ;;  %8231 = vmatpush1.bf16.msra.mxu0 %v9565_v19  ;;  %v9598_v41 = vld [vmem:[%s11480_s15 + $0x884] ss:$8 sps:$4 sm:$0xff]   ;;  %v9601_v43 = vld [vmem:[%s11480_s15 + $0x880] ss:$8 sps:$4 sm:$0xff]   ;;  %v9604_v45 = vld [vmem:[%s11480_s15 + $0x894] ss:$8 sps:$4 sm:$0xff]  }
 0x129   : > { %7808 = vmatprep.subr.bf16.mxu1 %v9566_v20  ;;  %8232 = vmatprep.subr.bf16.mxu0 %v9568_v21  ;;  %v9606_v46 = vld [vmem:[%s11480_s15 + $0x90] ss:$8 sps:$4 sm:$0xff]   ;;  %v9608_v48 = vld [vmem:[%s11480_s15 + $0xa4] ss:$8 sps:$4 sm:$0xff]   ;;  %v9612_v50 = vld [vmem:[%s11480_s15 + $0xa0] ss:$8 sps:$4 sm:$0xff]  }
 0x12a   : > { %v9607_v47 = vld [vmem:[%s11480_s15 + $0x890] ss:$8 sps:$4 sm:$0xff]   ;;  %v9610_v49 = vld [vmem:[%s11480_s15 + $0x8a4] ss:$8 sps:$4 sm:$0xff]   ;;  %v9613_v51 = vld [vmem:[%s11480_s15 + $0x8a0] ss:$8 sps:$4 sm:$0xff]  }
 0x12b   : > { %v9614_v52 = vld [vmem:[%s11480_s15 + $0xb4] ss:$8 sps:$4 sm:$0xff]   ;;  %v9618_v54 = vld [vmem:[%s11480_s15 + $0xb0] ss:$8 sps:$4 sm:$0xff]   ;;  %v9620_v56 = vld [vmem:[%s11480_s15 + $0xc4] ss:$8 sps:$4 sm:$0xff]  }
 0x12c   : > { %7809 = vmatpush1.bf16.msra.mxu1 %v9570_v22  ;;  %8233 = vmatpush1.bf16.msra.mxu0 %v9571_v23  ;;  %v9616_v53 = vld [vmem:[%s11480_s15 + $0x8b4] ss:$8 sps:$4 sm:$0xff]   ;;  %v9619_v55 = vld [vmem:[%s11480_s15 + $0x8b0] ss:$8 sps:$4 sm:$0xff]   ;;  %v9622_v57 = vld [vmem:[%s11480_s15 + $0x8c4] ss:$8 sps:$4 sm:$0xff]  }
 0x12d   : > { %7810 = vmatprep.subr.bf16.mxu1 %v9572_v24  ;;  %8234 = vmatprep.subr.bf16.mxu0 %v9574_v25  ;;  %v9624_v58 = vld [vmem:[%s11480_s15 + $0xc0] ss:$8 sps:$4 sm:$0xff]   ;;  %v9626_v60 = vld [vmem:[%s11480_s15 + $0xd4] ss:$8 sps:$4 sm:$0xff]   ;;  %v9630_v62 = vld [vmem:[%s11480_s15 + $0xd0] ss:$8 sps:$4 sm:$0xff]  }
 0x12e   : > { %v9625_v59 = vld [vmem:[%s11480_s15 + $0x8c0] ss:$8 sps:$4 sm:$0xff]   ;;  %v9628_v61 = vld [vmem:[%s11480_s15 + $0x8d4] ss:$8 sps:$4 sm:$0xff]   ;;  %v9631_v63 = vld [vmem:[%s11480_s15 + $0x8d0] ss:$8 sps:$4 sm:$0xff]  }
 0x12f   : > { %v9632_v4 = vld [vmem:[%s11480_s15 + $0xe4] ss:$8 sps:$4 sm:$0xff]   ;;  %v9636_v8 = vld [vmem:[%s11480_s15 + $0xe0] ss:$8 sps:$4 sm:$0xff]   ;;  %v9638_v10 = vld [vmem:[%s11480_s15 + $0xf4] ss:$8 sps:$4 sm:$0xff]  }
 0x130   : > { %7811 = vmatpush1.bf16.msra.mxu1 %v9576_v26  ;;  %8235 = vmatpush1.bf16.msra.mxu0 %v9577_v27  ;;  %v9634_v7 = vld [vmem:[%s11480_s15 + $0x8e4] ss:$8 sps:$4 sm:$0xff]   ;;  %v9637_v9 = vld [vmem:[%s11480_s15 + $0x8e0] ss:$8 sps:$4 sm:$0xff]   ;;  %v9640_v11 = vld [vmem:[%s11480_s15 + $0x8f4] ss:$8 sps:$4 sm:$0xff]  }
 0x131   : > { %7812 = vmatprep.subr.bf16.mxu1 %v9578_v28  ;;  %8236 = vmatprep.subr.bf16.mxu0 %v9580_v29  ;;  %v9642_v12 = vld [vmem:[%s11480_s15 + $0xf0] ss:$8 sps:$4 sm:$0xff]   ;;  %v9646_v14 = vld [vmem:[%s11480_s15 + $0x104] ss:$8 sps:$4 sm:$0xff]   ;;  %v9644_v20 = vld [vmem:[%s11480_s15 + $0x100] ss:$8 sps:$4 sm:$0xff]  }
 0x132   : > { %v9643_v13 = vld [vmem:[%s11480_s15 + $0x8f0] ss:$8 sps:$4 sm:$0xff]   ;;  %v9649_v15 = vld [vmem:[%s11480_s15 + $0x904] ss:$8 sps:$4 sm:$0xff]   ;;  %v9647_v21 = vld [vmem:[%s11480_s15 + $0x900] ss:$8 sps:$4 sm:$0xff]  }
 0x133   : > { %v4378_v16 = vld [vmem:[%s12333_s0 + $0x100] sm:$0xff]  ;;  %v9652_v22 = vld [vmem:[%s11480_s15 + $0x114] ss:$8 sps:$4 sm:$0xff]   ;;  %v9650_v26 = vld [vmem:[%s11480_s15 + $0x110] ss:$8 sps:$4 sm:$0xff]   ;;  %s9387_s9 = sshll.u32 (%p10406_p6), %s10346_s11, 4 }
 0x134   : > { %7813 = vmatpush1.bf16.msra.mxu1 %v9582_v30  ;;  %8237 = vmatpush1.bf16.msra.mxu0 %v9583_v31  ;;  %v4394_v17 = vld [vmem:[%s12333_s0 + $0x180] sm:$0xff]  ;;  %v9655_v23 = vld [vmem:[%s11480_s15 + $0x914] ss:$8 sps:$4 sm:$0xff]   ;;  %v9653_v27 = vld [vmem:[%s11480_s15 + $0x910] ss:$8 sps:$4 sm:$0xff]   ;;  %s8670_s5 = scalar_lea.vmem (%p10406_p6), %s12335_s2, %s9387_s9 }
 0x135   : > { %7814 = vmatprep.subr.bf16.mxu1 %v9584_v32  ;;  %8238 = vmatprep.subr.bf16.mxu0 %v9586_v33  ;;  %v4386_v18 = vld [vmem:[%s12333_s0 + $0x140] sm:$0xff]  ;;  %v8838_v24 = vcombine.high %v4378_v16, %v4394_v17  ;;  %v9664_v5 = vld [vmem:[%s11480_s15 + $0x134] ss:$8 sps:$4 sm:$0xff]   ;;  %v9662_v30 = vld [vmem:[%s11480_s15 + $0x130] ss:$8 sps:$4 sm:$0xff]  }
 0x136   : > { %v4402_v19 = vld [vmem:[%s12333_s0 + $0x1c0] sm:$0xff]  ;;  %v9665_v31 = vld [vmem:[%s11480_s15 + $0x930] ss:$8 sps:$4 sm:$0xff]  }
 0x137   : > { %v8854_v25 = vcombine.high %v4386_v18, %v4402_v19  ;;  %v9658_v28 = vld [vmem:[%s11480_s15 + $0x124] ss:$8 sps:$4 sm:$0xff]   ;;  %v9656_v0 = vld [vmem:[%s11480_s15 + $0x120] ss:$8 sps:$4 sm:$0xff]   ;;  %v8853_v2 = vcombine.low %v4386_v18, %v4402_v19  ;;  %v9722_v18 = vld [vmem:[%s11480_s15 + $0x1d0] ss:$8 sps:$4 sm:$0xff]  }
 0x138   : > { %7815 = vmatpush1.bf16.msra.mxu1 %v9588_v34  ;;  %8239 = vmatpush1.bf16.msra.mxu0 %v9589_v35  ;;  %v9661_v29 = vld [vmem:[%s11480_s15 + $0x924] ss:$8 sps:$4 sm:$0xff]   ;;  %v9659_v1 = vld [vmem:[%s11480_s15 + $0x920] ss:$8 sps:$4 sm:$0xff]   ;;  %v9725_v19 = vld [vmem:[%s11480_s15 + $0x9d0] ss:$8 sps:$4 sm:$0xff]  }
 0x139   : > { %7816 = vmatprep.subr.bf16.mxu1 %v9590_v36  ;;  %8240 = vmatprep.subr.bf16.mxu0 %v9592_v37  ;;  %v9670_v32 = vld [vmem:[%s11480_s15 + $0x144] ss:$8 sps:$4 sm:$0xff]   ;;  %v9668_v34 = vld [vmem:[%s11480_s15 + $0x140] ss:$8 sps:$4 sm:$0xff]   ;;  %v9676_v36 = vld [vmem:[%s11480_s15 + $0x154] ss:$8 sps:$4 sm:$0xff]  }
 0x13a   : > { %v9673_v33 = vld [vmem:[%s11480_s15 + $0x944] ss:$8 sps:$4 sm:$0xff]   ;;  %v9671_v35 = vld [vmem:[%s11480_s15 + $0x940] ss:$8 sps:$4 sm:$0xff]   ;;  %v9679_v37 = vld [vmem:[%s11480_s15 + $0x954] ss:$8 sps:$4 sm:$0xff]  }
 0x13c   : > { %7817 = vmatpush1.bf16.msra.mxu1 %v9594_v38  ;;  %8241 = vmatpush1.bf16.msra.mxu0 %v9595_v39  ;;  %v9674_v38 = vld [vmem:[%s11480_s15 + $0x150] ss:$8 sps:$4 sm:$0xff]  }
 0x13d   : > { %7818 = vmatprep.subr.bf16.mxu1 %v9596_v40  ;;  %8242 = vmatprep.subr.bf16.mxu0 %v9598_v41  ;;  %v9677_v39 = vld [vmem:[%s11480_s15 + $0x950] ss:$8 sps:$4 sm:$0xff]   ;;  %v9682_v40 = vld [vmem:[%s11480_s15 + $0x164] ss:$8 sps:$4 sm:$0xff]  }
 0x13e   : > { %v9685_v41 = vld [vmem:[%s11480_s15 + $0x964] ss:$8 sps:$4 sm:$0xff]  }
 0x140   : > { %7819 = vmatpush1.bf16.msra.mxu1 %v9600_v42  ;;  %8243 = vmatpush1.bf16.msra.mxu0 %v9601_v43  ;;  %v11593_v42 = vld [vmem:[%s12333_s0 + $0x8] sm:$0xff] }
 0x141   : > { %7820 = vmatprep.subr.bf16.mxu1 %v9602_v44  ;;  %8244 = vmatprep.subr.bf16.mxu0 %v9604_v45  ;;  %v11598_v43 = vld [vmem:[%s12333_s0 + $0x88] sm:$0xff] }
 0x142   : > { %v9680_v44 = vld [vmem:[%s11480_s15 + $0x160] ss:$8 sps:$4 sm:$0xff]   ;;  %v8808_v45 = vcombine.high %v11593_v42, %v11598_v43 }
 0x144   : > { %7821 = vmatpush1.bf16.msra.mxu1 %v9606_v46  ;;  %8245 = vmatpush1.bf16.msra.mxu0 %v9607_v47  ;;  %v9683_v46 = vld [vmem:[%s11480_s15 + $0x960] ss:$8 sps:$4 sm:$0xff]  }
 0x145   : > { %7822 = vmatprep.subr.bf16.mxu1 %v9608_v48  ;;  %8246 = vmatprep.subr.bf16.mxu0 %v9610_v49  ;;  %v11607_v47 = vld [vmem:[%s12333_s0 + $0x48] sm:$0xff]  ;;  %v9688_v49 = vld [vmem:[%s11480_s15 + $0x174] ss:$8 sps:$4 sm:$0xff]  }
 0x146   : > { %v11612_v48 = vld [vmem:[%s12333_s0 + $0xc8] sm:$0xff] }
 0x148   : > { %7823 = vmatpush1.bf16.msra.mxu1 %v9612_v50  ;;  %8247 = vmatpush1.bf16.msra.mxu0 %v9613_v51  ;;  %v8824_v50 = vcombine.high %v11607_v47, %v11612_v48  ;;  %v9691_v51 = vld [vmem:[%s11480_s15 + $0x974] ss:$8 sps:$4 sm:$0xff]  }
 0x149   : > { %7824 = vmatprep.subr.bf16.mxu1 %v9614_v52  ;;  %8248 = vmatprep.subr.bf16.mxu0 %v9616_v53  ;;  %v9686_v52 = vld [vmem:[%s11480_s15 + $0x170] ss:$8 sps:$4 sm:$0xff]  }
 0x14a   : > { %v9689_v53 = vld [vmem:[%s11480_s15 + $0x970] ss:$8 sps:$4 sm:$0xff]  }
 0x14c   : > { %7825 = vmatpush1.bf16.msra.mxu1 %v9618_v54  ;;  %8249 = vmatpush1.bf16.msra.mxu0 %v9619_v55  ;;  %v9694_v54 = vld [vmem:[%s11480_s15 + $0x184] ss:$8 sps:$4 sm:$0xff]  }
 0x14d   : > { %7826 = vmatprep.subr.bf16.mxu1 %v9620_v56  ;;  %8250 = vmatprep.subr.bf16.mxu0 %v9622_v57  ;;  %v9697_v55 = vld [vmem:[%s11480_s15 + $0x984] ss:$8 sps:$4 sm:$0xff]   ;;  %v9692_v56 = vld [vmem:[%s11480_s15 + $0x180] ss:$8 sps:$4 sm:$0xff]  }
 0x14e   : > { %v9695_v57 = vld [vmem:[%s11480_s15 + $0x980] ss:$8 sps:$4 sm:$0xff]  }
 0x150   : > { %7827 = vmatpush1.bf16.msra.mxu1 %v9624_v58  ;;  %8251 = vmatpush1.bf16.msra.mxu0 %v9625_v59  ;;  %v9700_v58 = vld [vmem:[%s11480_s15 + $0x194] ss:$8 sps:$4 sm:$0xff]  }
 0x151   : > { %7828 = vmatprep.subr.bf16.mxu1 %v9626_v60  ;;  %8252 = vmatprep.subr.bf16.mxu0 %v9628_v61  ;;  %v9703_v59 = vld [vmem:[%s11480_s15 + $0x994] ss:$8 sps:$4 sm:$0xff]   ;;  %v9698_v60 = vld [vmem:[%s11480_s15 + $0x190] ss:$8 sps:$4 sm:$0xff]  }
 0x152   : > { %v9701_v61 = vld [vmem:[%s11480_s15 + $0x990] ss:$8 sps:$4 sm:$0xff]  }
 0x154   : > { %7829 = vmatpush1.bf16.msra.mxu1 %v9630_v62  ;;  %8253 = vmatpush1.bf16.msra.mxu0 %v9631_v63  ;;  %v9706_v62 = vld [vmem:[%s11480_s15 + $0x1a4] ss:$8 sps:$4 sm:$0xff]  }
 0x155   : > { %7830 = vmatprep.subr.bf16.mxu1 %v9632_v4  ;;  %8254 = vmatprep.subr.bf16.mxu0 %v9634_v7  ;;  %v9709_v63 = vld [vmem:[%s11480_s15 + $0x9a4] ss:$8 sps:$4 sm:$0xff]   ;;  %v9704_v4 = vld [vmem:[%s11480_s15 + $0x1a0] ss:$8 sps:$4 sm:$0xff]  }
 0x156   : > { %v9707_v7 = vld [vmem:[%s11480_s15 + $0x9a0] ss:$8 sps:$4 sm:$0xff]  }
 0x158   : > { %7831 = vmatpush1.bf16.msra.mxu1 %v9636_v8  ;;  %8255 = vmatpush1.bf16.msra.mxu0 %v9637_v9  ;;  %v9712_v8 = vld [vmem:[%s11480_s15 + $0x1b4] ss:$8 sps:$4 sm:$0xff]  }
 0x159   : > { %7832 = vmatprep.subr.bf16.mxu1 %v9638_v10  ;;  %8256 = vmatprep.subr.bf16.mxu0 %v9640_v11  ;;  %v9715_v9 = vld [vmem:[%s11480_s15 + $0x9b4] ss:$8 sps:$4 sm:$0xff]   ;;  %v9710_v10 = vld [vmem:[%s11480_s15 + $0x1b0] ss:$8 sps:$4 sm:$0xff]  }
 0x15a   : > { %v9713_v11 = vld [vmem:[%s11480_s15 + $0x9b0] ss:$8 sps:$4 sm:$0xff]  }
 0x15c   : > { %7833 = vmatpush1.bf16.msra.mxu1 %v9642_v12  ;;  %8257 = vmatpush1.bf16.msra.mxu0 %v9643_v13  ;;  %v9718_v12 = vld [vmem:[%s11480_s15 + $0x1c4] ss:$8 sps:$4 sm:$0xff]  }
 0x15d   : > { %7855 = vmatprep.subr.bf16.mxu1 %v9646_v14  ;;  %8279 = vmatprep.subr.bf16.mxu0 %v9649_v15  ;;  %v9721_v13 = vld [vmem:[%s11480_s15 + $0x9c4] ss:$8 sps:$4 sm:$0xff]   ;;  %v9716_v14 = vld [vmem:[%s11480_s15 + $0x1c0] ss:$8 sps:$4 sm:$0xff]  }
 0x15e   : > { %v9719_v15 = vld [vmem:[%s11480_s15 + $0x9c0] ss:$8 sps:$4 sm:$0xff]  }
 0x15f   : > { %7835 = vmatmul.mubr.bf16.vlgmr.msra.gmra.mrb[0].mxu1 %v8805_v3  ;;  %8259 = vmatmul.mubr.bf16.vlgmr.msra.gmra.mrb[0].mxu0 %v8821_v6  ;;  %v8837_v3 = vcombine.low %v4378_v16, %v4394_v17  ;;  %v9667_v6 = vld [vmem:[%s11480_s15 + $0x934] ss:$8 sps:$4 sm:$0xff]  }
 0x160   : > { %7856 = vmatpush1.bf16.msra.mxu1 %v9644_v20  ;;  %8280 = vmatpush1.bf16.msra.mxu0 %v9647_v21  ;;  %v9724_v16 = vld [vmem:[%s11480_s15 + $0x1d4] ss:$8 sps:$4 sm:$0xff]   ;;  %v9730_v20 = vld [vmem:[%s11480_s15 + $0x1e4] ss:$8 sps:$4 sm:$0xff]  }
 0x161   : > { %7857 = vmatprep.subr.bf16.mxu1 %v9652_v22  ;;  %8281 = vmatprep.subr.bf16.mxu0 %v9655_v23  ;;  %v9727_v17 = vld [vmem:[%s11480_s15 + $0x9d4] ss:$8 sps:$4 sm:$0xff]   ;;  %v9733_v21 = vld [vmem:[%s11480_s15 + $0x9e4] ss:$8 sps:$4 sm:$0xff]   ;;  %v9728_v22 = vld [vmem:[%s11480_s15 + $0x1e0] ss:$8 sps:$4 sm:$0xff]  }
 0x162   : > { %7844 = vmatprep.mubr.bf16.mxu1 %v8838_v24  ;;  %8268 = vmatprep.mubr.bf16.mxu0 %v8854_v25  ;;  %v9731_v23 = vld [vmem:[%s11480_s15 + $0x9e0] ss:$8 sps:$4 sm:$0xff]   ;;  %v9736_v24 = vld [vmem:[%s11480_s15 + $0x1f4] ss:$8 sps:$4 sm:$0xff]  }
 0x163   : > { %v9739_v25 = vld [vmem:[%s11480_s15 + $0x9f4] ss:$8 sps:$4 sm:$0xff]  }
 0x164   : > { %7858 = vmatpush1.bf16.msra.mxu1 %v9650_v26  ;;  %8282 = vmatpush1.bf16.msra.mxu0 %v9653_v27  ;;  %v9734_v26 = vld [vmem:[%s11480_s15 + $0x1f0] ss:$8 sps:$4 sm:$0xff]  }
 0x165   : > { %7859 = vmatprep.subr.bf16.mxu1 %v9658_v28  ;;  %8283 = vmatprep.subr.bf16.mxu0 %v9661_v29  ;;  %v9737_v27 = vld [vmem:[%s11480_s15 + $0x9f0] ss:$8 sps:$4 sm:$0xff]   ;;  %v9742_v28 = vld [vmem:[%s11480_s15 + $0x204] ss:$8 sps:$4 sm:$0xff]  }
 0x166   : > { %v9745_v29 = vld [vmem:[%s11480_s15 + $0xa04] ss:$8 sps:$4 sm:$0xff]  }
 0x167   : > { %7845 = vmatmul.mubr.bf16.gmra.mrb[4].mxu1 %v8837_v3  ;;  %8269 = vmatmul.mubr.bf16.gmra.mrb[4].mxu0 %v8853_v2  ;;  %v4379_v3 = vld [vmem:[%s12333_s0 + $0x108] sm:$0xff] }
 0x168   : > { %7860 = vmatpush1.bf16.msra.mxu1 %v9656_v0  ;;  %8284 = vmatpush1.bf16.msra.mxu0 %v9659_v1  ;;  %v9740_v0 = vld [vmem:[%s11480_s15 + $0x200] ss:$8 sps:$4 sm:$0xff]  }
 0x169   : > { %7861 = vmatprep.subr.bf16.mxu1 %v9664_v5  ;;  %8285 = vmatprep.subr.bf16.mxu0 %v9667_v6  ;;  %v9743_v1 = vld [vmem:[%s11480_s15 + $0xa00] ss:$8 sps:$4 sm:$0xff]   ;;  %v8807_v5 = vcombine.low %v11593_v42, %v11598_v43  ;;  %v8823_v6 = vcombine.low %v11607_v47, %v11612_v48  ;;  %v11683_v42 = vld [vmem:[%s12333_s0 + $0x10] sm:$0xff] }
 0x16a   : > { %7887 = vmatprep.mubr.bf16.mxu1 %v8808_v45  ;;  %8311 = vmatprep.mubr.bf16.mxu0 %v8824_v50  ;;  %v4395_v2 = vld [vmem:[%s12333_s0 + $0x188] sm:$0xff]  ;;  %v11688_v43 = vld [vmem:[%s12333_s0 + $0x90] sm:$0xff] }
 0x16b   : > { %v11698_v47 = vld [vmem:[%s12333_s0 + $0xd0] sm:$0xff]  ;;  %v8810_v50 = vcombine.high %v11683_v42, %v11688_v43 }
 0x16c   : > { %7862 = vmatpush1.bf16.msra.mxu1 %v9662_v30  ;;  %8286 = vmatpush1.bf16.msra.mxu0 %v9665_v31  ;;  %v4387_v30 = vld [vmem:[%s12333_s0 + $0x148] sm:$0xff]  ;;  %v9760_v48 = vld [vmem:[%s11480_s15 + $0x234] ss:$8 sps:$4 sm:$0xff]  }
 0x16d   : > { %7863 = vmatprep.subr.bf16.mxu1 %v9670_v32  ;;  %8287 = vmatprep.subr.bf16.mxu0 %v9673_v33  ;;  %v4403_v31 = vld [vmem:[%s12333_s0 + $0x1c8] sm:$0xff]  ;;  %v9748_v32 = vld [vmem:[%s11480_s15 + $0x214] ss:$8 sps:$4 sm:$0xff]  }
 0x16e   : > { %v9751_v33 = vld [vmem:[%s11480_s15 + $0xa14] ss:$8 sps:$4 sm:$0xff]   ;;  %v8855_v45 = vcombine.low %v4387_v30, %v4403_v31 }
 0x170   : > { %7864 = vmatpush1.bf16.msra.mxu1 %v9668_v34  ;;  %8288 = vmatpush1.bf16.msra.mxu0 %v9671_v35  ;;  %v8840_v34 = vcombine.high %v4379_v3, %v4395_v2  ;;  %v8856_v35 = vcombine.high %v4387_v30, %v4403_v31  ;;  %v9826_v30 = vld [vmem:[%s11480_s15 + $0x2e4] ss:$8 sps:$4 sm:$0xff]  }
 0x171   : > { %7865 = vmatprep.subr.bf16.mxu1 %v9676_v36  ;;  %8289 = vmatprep.subr.bf16.mxu0 %v9679_v37  ;;  %v9746_v36 = vld [vmem:[%s11480_s15 + $0x210] ss:$8 sps:$4 sm:$0xff]   ;;  %v9829_v31 = vld [vmem:[%s11480_s15 + $0xae4] ss:$8 sps:$4 sm:$0xff]  }
 0x172   : > { %v9749_v37 = vld [vmem:[%s11480_s15 + $0xa10] ss:$8 sps:$4 sm:$0xff]  }
 0x174   : > { %7866 = vmatpush1.bf16.msra.mxu1 %v9674_v38  ;;  %8290 = vmatpush1.bf16.msra.mxu0 %v9677_v39  ;;  %v9754_v38 = vld [vmem:[%s11480_s15 + $0x224] ss:$8 sps:$4 sm:$0xff]  }
 0x175   : > { %7867 = vmatprep.subr.bf16.mxu1 %v9682_v40  ;;  %8291 = vmatprep.subr.bf16.mxu0 %v9685_v41  ;;  %v9757_v39 = vld [vmem:[%s11480_s15 + $0xa24] ss:$8 sps:$4 sm:$0xff]   ;;  %v9752_v40 = vld [vmem:[%s11480_s15 + $0x220] ss:$8 sps:$4 sm:$0xff]  }
 0x176   : > { %v9755_v41 = vld [vmem:[%s11480_s15 + $0xa20] ss:$8 sps:$4 sm:$0xff]  }
 0x178   : > { %7868 = vmatpush1.bf16.msra.mxu1 %v9680_v44  ;;  %8292 = vmatpush1.bf16.msra.mxu0 %v9683_v46  ;;  %v8839_v44 = vcombine.low %v4379_v3, %v4395_v2  ;;  %v11693_v46 = vld [vmem:[%s12333_s0 + $0x50] sm:$0xff] }
 0x179   : > { %7869 = vmatprep.subr.bf16.mxu1 %v9688_v49  ;;  %8293 = vmatprep.subr.bf16.mxu0 %v9691_v51  ;;  %v9763_v49 = vld [vmem:[%s11480_s15 + $0xa34] ss:$8 sps:$4 sm:$0xff]   ;;  %v8826_v51 = vcombine.high %v11693_v46, %v11698_v47 }
 0x17a   : > { %v9820_v3 = vld [vmem:[%s11480_s15 + $0x2d4] ss:$8 sps:$4 sm:$0xff]  }
 0x17b   : > { %v9823_v2 = vld [vmem:[%s11480_s15 + $0xad4] ss:$8 sps:$4 sm:$0xff]  }
 0x17c   : > { %7870 = vmatpush1.bf16.msra.mxu1 %v9686_v52  ;;  %8294 = vmatpush1.bf16.msra.mxu0 %v9689_v53  ;;  %v9758_v52 = vld [vmem:[%s11480_s15 + $0x230] ss:$8 sps:$4 sm:$0xff]  }
 0x17d   : > { %7871 = vmatprep.subr.bf16.mxu1 %v9694_v54  ;;  %8295 = vmatprep.subr.bf16.mxu0 %v9697_v55  ;;  %v9761_v53 = vld [vmem:[%s11480_s15 + $0xa30] ss:$8 sps:$4 sm:$0xff]   ;;  %v9766_v54 = vld [vmem:[%s11480_s15 + $0x244] ss:$8 sps:$4 sm:$0xff]  }
 0x17e   : > { %v9769_v55 = vld [vmem:[%s11480_s15 + $0xa44] ss:$8 sps:$4 sm:$0xff]  }
 0x180   : > { %7872 = vmatpush1.bf16.msra.mxu1 %v9692_v56  ;;  %8296 = vmatpush1.bf16.msra.mxu0 %v9695_v57  ;;  %v9764_v56 = vld [vmem:[%s11480_s15 + $0x240] ss:$8 sps:$4 sm:$0xff]  }
 0x181   : > { %7873 = vmatprep.subr.bf16.mxu1 %v9700_v58  ;;  %8297 = vmatprep.subr.bf16.mxu0 %v9703_v59  ;;  %v9767_v57 = vld [vmem:[%s11480_s15 + $0xa40] ss:$8 sps:$4 sm:$0xff]   ;;  %v9772_v58 = vld [vmem:[%s11480_s15 + $0x254] ss:$8 sps:$4 sm:$0xff]  }
 0x182   : > { %v9775_v59 = vld [vmem:[%s11480_s15 + $0xa54] ss:$8 sps:$4 sm:$0xff]  }
 0x184   : > { %7874 = vmatpush1.bf16.msra.mxu1 %v9698_v60  ;;  %8298 = vmatpush1.bf16.msra.mxu0 %v9701_v61  ;;  %v9770_v60 = vld [vmem:[%s11480_s15 + $0x250] ss:$8 sps:$4 sm:$0xff]  }
 0x185   : > { %7875 = vmatprep.subr.bf16.mxu1 %v9706_v62  ;;  %8299 = vmatprep.subr.bf16.mxu0 %v9709_v63  ;;  %v9773_v61 = vld [vmem:[%s11480_s15 + $0xa50] ss:$8 sps:$4 sm:$0xff]   ;;  %v9778_v62 = vld [vmem:[%s11480_s15 + $0x264] ss:$8 sps:$4 sm:$0xff]  }
 0x186   : > { %v9781_v63 = vld [vmem:[%s11480_s15 + $0xa64] ss:$8 sps:$4 sm:$0xff]  }
 0x188   : > { %7876 = vmatpush1.bf16.msra.mxu1 %v9704_v4  ;;  %8300 = vmatpush1.bf16.msra.mxu0 %v9707_v7  ;;  %v9776_v4 = vld [vmem:[%s11480_s15 + $0x260] ss:$8 sps:$4 sm:$0xff]  }
 0x189   : > { %7877 = vmatprep.subr.bf16.mxu1 %v9712_v8  ;;  %8301 = vmatprep.subr.bf16.mxu0 %v9715_v9  ;;  %v9779_v7 = vld [vmem:[%s11480_s15 + $0xa60] ss:$8 sps:$4 sm:$0xff]   ;;  %v9784_v8 = vld [vmem:[%s11480_s15 + $0x274] ss:$8 sps:$4 sm:$0xff]  }
 0x18a   : > { %v9787_v9 = vld [vmem:[%s11480_s15 + $0xa74] ss:$8 sps:$4 sm:$0xff]  }
 0x18c   : > { %7878 = vmatpush1.bf16.msra.mxu1 %v9710_v10  ;;  %8302 = vmatpush1.bf16.msra.mxu0 %v9713_v11  ;;  %v9782_v10 = vld [vmem:[%s11480_s15 + $0x270] ss:$8 sps:$4 sm:$0xff]  }
 0x18d   : > { %7879 = vmatprep.subr.bf16.mxu1 %v9718_v12  ;;  %8303 = vmatprep.subr.bf16.mxu0 %v9721_v13  ;;  %v9785_v11 = vld [vmem:[%s11480_s15 + $0xa70] ss:$8 sps:$4 sm:$0xff]   ;;  %v9790_v12 = vld [vmem:[%s11480_s15 + $0x284] ss:$8 sps:$4 sm:$0xff]  }
 0x18e   : > { %v9793_v13 = vld [vmem:[%s11480_s15 + $0xa84] ss:$8 sps:$4 sm:$0xff]  }
 0x190   : > { %7880 = vmatpush1.bf16.msra.mxu1 %v9716_v14  ;;  %8304 = vmatpush1.bf16.msra.mxu0 %v9719_v15  ;;  %v9788_v14 = vld [vmem:[%s11480_s15 + $0x280] ss:$8 sps:$4 sm:$0xff]  }
 0x191   : > { %7881 = vmatprep.subr.bf16.mxu1 %v9724_v16  ;;  %8305 = vmatprep.subr.bf16.mxu0 %v9727_v17  ;;  %v9791_v15 = vld [vmem:[%s11480_s15 + $0xa80] ss:$8 sps:$4 sm:$0xff]   ;;  %v9796_v16 = vld [vmem:[%s11480_s15 + $0x294] ss:$8 sps:$4 sm:$0xff]  }
 0x192   : > { %v9799_v17 = vld [vmem:[%s11480_s15 + $0xa94] ss:$8 sps:$4 sm:$0xff]  }
 0x194   : > { %7882 = vmatpush1.bf16.msra.mxu1 %v9722_v18  ;;  %8306 = vmatpush1.bf16.msra.mxu0 %v9725_v19  ;;  %v9794_v18 = vld [vmem:[%s11480_s15 + $0x290] ss:$8 sps:$4 sm:$0xff]  }
 0x195   : > { %7883 = vmatprep.subr.bf16.mxu1 %v9730_v20  ;;  %8307 = vmatprep.subr.bf16.mxu0 %v9733_v21  ;;  %v9797_v19 = vld [vmem:[%s11480_s15 + $0xa90] ss:$8 sps:$4 sm:$0xff]   ;;  %v9802_v20 = vld [vmem:[%s11480_s15 + $0x2a4] ss:$8 sps:$4 sm:$0xff]  }
 0x196   : > { %v9805_v21 = vld [vmem:[%s11480_s15 + $0xaa4] ss:$8 sps:$4 sm:$0xff]  }
 0x198   : > { %7884 = vmatpush1.bf16.msra.mxu1 %v9728_v22  ;;  %8308 = vmatpush1.bf16.msra.mxu0 %v9731_v23  ;;  %v9800_v22 = vld [vmem:[%s11480_s15 + $0x2a0] ss:$8 sps:$4 sm:$0xff]  }
 0x199   : > { %7885 = vmatprep.subr.bf16.mxu1 %v9736_v24  ;;  %8309 = vmatprep.subr.bf16.mxu0 %v9739_v25  ;;  %v9803_v23 = vld [vmem:[%s11480_s15 + $0xaa0] ss:$8 sps:$4 sm:$0xff]   ;;  %v9808_v24 = vld [vmem:[%s11480_s15 + $0x2b4] ss:$8 sps:$4 sm:$0xff]  }
 0x19a   : > { %v9811_v25 = vld [vmem:[%s11480_s15 + $0xab4] ss:$8 sps:$4 sm:$0xff]  }
 0x19c   : > { %7886 = vmatpush1.bf16.msra.mxu1 %v9734_v26  ;;  %8310 = vmatpush1.bf16.msra.mxu0 %v9737_v27  ;;  %v9806_v26 = vld [vmem:[%s11480_s15 + $0x2b0] ss:$8 sps:$4 sm:$0xff]  }
 0x19d   : > { %7908 = vmatprep.subr.bf16.mxu1 %v9742_v28  ;;  %8332 = vmatprep.subr.bf16.mxu0 %v9745_v29  ;;  %v9809_v27 = vld [vmem:[%s11480_s15 + $0xab0] ss:$8 sps:$4 sm:$0xff]   ;;  %v9814_v28 = vld [vmem:[%s11480_s15 + $0x2c4] ss:$8 sps:$4 sm:$0xff]  }
 0x19e   : > { %v9817_v29 = vld [vmem:[%s11480_s15 + $0xac4] ss:$8 sps:$4 sm:$0xff]  }
 0x19f   : > { %7888 = vmatmul.mubr.bf16.vlgmr.msra.gmra.mrb[0].mxu1 %v8807_v5  ;;  %8312 = vmatmul.mubr.bf16.vlgmr.msra.gmra.mrb[0].mxu0 %v8823_v6  ;;  %v9818_v5 = vld [vmem:[%s11480_s15 + $0x2d0] ss:$8 sps:$4 sm:$0xff]  }
 0x1a0   : > { %7909 = vmatpush1.bf16.msra.mxu1 %v9740_v0  ;;  %8333 = vmatpush1.bf16.msra.mxu0 %v9743_v1  ;;  %v9812_v0 = vld [vmem:[%s11480_s15 + $0x2c0] ss:$8 sps:$4 sm:$0xff]   ;;  %v9821_v6 = vld [vmem:[%s11480_s15 + $0xad0] ss:$8 sps:$4 sm:$0xff]  }
 0x1a1   : > { %7910 = vmatprep.subr.bf16.mxu1 %v9748_v32  ;;  %8334 = vmatprep.subr.bf16.mxu0 %v9751_v33  ;;  %v9815_v1 = vld [vmem:[%s11480_s15 + $0xac0] ss:$8 sps:$4 sm:$0xff]  }
 0x1a2   : > { %7897 = vmatprep.mubr.bf16.mxu1 %v8840_v34  ;;  %8321 = vmatprep.mubr.bf16.mxu0 %v8856_v35  ;;  %v9824_v32 = vld [vmem:[%s11480_s15 + $0x2e0] ss:$8 sps:$4 sm:$0xff]   ;;  %v9832_v34 = vld [vmem:[%s11480_s15 + $0x2f4] ss:$8 sps:$4 sm:$0xff]  }
 0x1a3   : > { %v9827_v33 = vld [vmem:[%s11480_s15 + $0xae0] ss:$8 sps:$4 sm:$0xff]   ;;  %v9835_v35 = vld [vmem:[%s11480_s15 + $0xaf4] ss:$8 sps:$4 sm:$0xff]  }
 0x1a4   : > { %7911 = vmatpush1.bf16.msra.mxu1 %v9746_v36  ;;  %8335 = vmatpush1.bf16.msra.mxu0 %v9749_v37  ;;  %v9830_v36 = vld [vmem:[%s11480_s15 + $0x2f0] ss:$8 sps:$4 sm:$0xff]  }
 0x1a5   : > { %7912 = vmatprep.subr.bf16.mxu1 %v9754_v38  ;;  %8336 = vmatprep.subr.bf16.mxu0 %v9757_v39  ;;  %v9833_v37 = vld [vmem:[%s11480_s15 + $0xaf0] ss:$8 sps:$4 sm:$0xff]   ;;  %v9838_v38 = vld [vmem:[%s11480_s15 + $0x304] ss:$8 sps:$4 sm:$0xff]  }
 0x1a6   : > { %v9841_v39 = vld [vmem:[%s11480_s15 + $0xb04] ss:$8 sps:$4 sm:$0xff]  }
 0x1a7   : > { %7898 = vmatmul.mubr.bf16.gmra.mrb[4].mxu1 %v8839_v44  ;;  %8322 = vmatmul.mubr.bf16.gmra.mrb[4].mxu0 %v8855_v45  ;;  %v4380_v44 = vld [vmem:[%s12333_s0 + $0x110] sm:$0xff] }
 0x1a8   : > { %7913 = vmatpush1.bf16.msra.mxu1 %v9752_v40  ;;  %8337 = vmatpush1.bf16.msra.mxu0 %v9755_v41  ;;  %v9836_v40 = vld [vmem:[%s11480_s15 + $0x300] ss:$8 sps:$4 sm:$0xff]   ;;  %v4396_v45 = vld [vmem:[%s12333_s0 + $0x190] sm:$0xff] }
 0x1a9   : > { %7914 = vmatprep.subr.bf16.mxu1 %v9760_v48  ;;  %8338 = vmatprep.subr.bf16.mxu0 %v9763_v49  ;;  %v9839_v41 = vld [vmem:[%s11480_s15 + $0xb00] ss:$8 sps:$4 sm:$0xff]   ;;  %v8809_v48 = vcombine.low %v11683_v42, %v11688_v43  ;;  %v8825_v49 = vcombine.low %v11693_v46, %v11698_v47  ;;  %v9847_v42 = vld [vmem:[%s11480_s15 + $0xb14] ss:$8 sps:$4 sm:$0xff]   ;;  %v8842_v43 = vcombine.high %v4380_v44, %v4396_v45  ;;  %v9842_v47 = vld [vmem:[%s11480_s15 + $0x310] ss:$8 sps:$4 sm:$0xff]  }
 0x1aa   : > { %7940 = vmatprep.mubr.bf16.mxu1 %v8810_v50  ;;  %8364 = vmatprep.mubr.bf16.mxu0 %v8826_v51  ;;  %v4388_v50 = vld [vmem:[%s12333_s0 + $0x150] sm:$0xff] }
 0x1ab   : > { %v4404_v51 = vld [vmem:[%s12333_s0 + $0x1d0] sm:$0xff] }
 0x1ac   : > { %7915 = vmatpush1.bf16.msra.mxu1 %v9758_v52  ;;  %8339 = vmatpush1.bf16.msra.mxu0 %v9761_v53  ;;  %v9844_v52 = vld [vmem:[%s11480_s15 + $0x314] ss:$8 sps:$4 sm:$0xff]   ;;  %v8858_v46 = vcombine.high %v4388_v50, %v4404_v51  ;;  %v9845_v53 = vld [vmem:[%s11480_s15 + $0xb10] ss:$8 sps:$4 sm:$0xff]  }
 0x1ad   : > { %7916 = vmatprep.subr.bf16.mxu1 %v9766_v54  ;;  %8340 = vmatprep.subr.bf16.mxu0 %v9769_v55  ;;  %v9850_v54 = vld [vmem:[%s11480_s15 + $0x324] ss:$8 sps:$4 sm:$0xff]  }
 0x1ae   : > { %v9853_v55 = vld [vmem:[%s11480_s15 + $0xb24] ss:$8 sps:$4 sm:$0xff]  }
 0x1b0   : > { %7917 = vmatpush1.bf16.msra.mxu1 %v9764_v56  ;;  %8341 = vmatpush1.bf16.msra.mxu0 %v9767_v57  ;;  %v9848_v56 = vld [vmem:[%s11480_s15 + $0x320] ss:$8 sps:$4 sm:$0xff]  }
 0x1b1   : > { %7918 = vmatprep.subr.bf16.mxu1 %v9772_v58  ;;  %8342 = vmatprep.subr.bf16.mxu0 %v9775_v59  ;;  %v9851_v57 = vld [vmem:[%s11480_s15 + $0xb20] ss:$8 sps:$4 sm:$0xff]   ;;  %v11787_v58 = vld [vmem:[%s12333_s0 + $0x18] sm:$0xff] }
 0x1b2   : > { %v11792_v59 = vld [vmem:[%s12333_s0 + $0x98] sm:$0xff] }
 0x1b4   : > { %7919 = vmatpush1.bf16.msra.mxu1 %v9770_v60  ;;  %8343 = vmatpush1.bf16.msra.mxu0 %v9773_v61  ;;  %v8841_v60 = vcombine.low %v4380_v44, %v4396_v45  ;;  %v8857_v61 = vcombine.low %v4388_v50, %v4404_v51  ;;  %v9916_v44 = vld [vmem:[%s11480_s15 + $0x3d4] ss:$8 sps:$4 sm:$0xff]   ;;  %v9922_v50 = vld [vmem:[%s11480_s15 + $0x3e4] ss:$8 sps:$4 sm:$0xff]  }
 0x1b5   : > { %7920 = vmatprep.subr.bf16.mxu1 %v9778_v62  ;;  %8344 = vmatprep.subr.bf16.mxu0 %v9781_v63  ;;  %v11797_v62 = vld [vmem:[%s12333_s0 + $0x58] sm:$0xff]  ;;  %v9925_v51 = vld [vmem:[%s11480_s15 + $0xbe4] ss:$8 sps:$4 sm:$0xff]  }
 0x1b6   : > { %v11802_v63 = vld [vmem:[%s12333_s0 + $0xd8] sm:$0xff] }
 0x1b7   : > { %v9919_v45 = vld [vmem:[%s11480_s15 + $0xbd4] ss:$8 sps:$4 sm:$0xff]  }
 0x1b8   : > { %7921 = vmatpush1.bf16.msra.mxu1 %v9776_v4  ;;  %8345 = vmatpush1.bf16.msra.mxu0 %v9779_v7  ;;  %v9856_v4 = vld [vmem:[%s11480_s15 + $0x334] ss:$8 sps:$4 sm:$0xff]  }
 0x1b9   : > { %7922 = vmatprep.subr.bf16.mxu1 %v9784_v8  ;;  %8346 = vmatprep.subr.bf16.mxu0 %v9787_v9  ;;  %v9859_v7 = vld [vmem:[%s11480_s15 + $0xb34] ss:$8 sps:$4 sm:$0xff]   ;;  %v8812_v8 = vcombine.high %v11787_v58, %v11792_v59  ;;  %v8828_v9 = vcombine.high %v11797_v62, %v11802_v63 }
 0x1bc   : > { %7923 = vmatpush1.bf16.msra.mxu1 %v9782_v10  ;;  %8347 = vmatpush1.bf16.msra.mxu0 %v9785_v11  ;;  %v9854_v10 = vld [vmem:[%s11480_s15 + $0x330] ss:$8 sps:$4 sm:$0xff]  }
 0x1bd   : > { %7924 = vmatprep.subr.bf16.mxu1 %v9790_v12  ;;  %8348 = vmatprep.subr.bf16.mxu0 %v9793_v13  ;;  %v9857_v11 = vld [vmem:[%s11480_s15 + $0xb30] ss:$8 sps:$4 sm:$0xff]   ;;  %v9862_v12 = vld [vmem:[%s11480_s15 + $0x344] ss:$8 sps:$4 sm:$0xff]  }
 0x1be   : > { %v9865_v13 = vld [vmem:[%s11480_s15 + $0xb44] ss:$8 sps:$4 sm:$0xff]  }
 0x1c0   : > { %7925 = vmatpush1.bf16.msra.mxu1 %v9788_v14  ;;  %8349 = vmatpush1.bf16.msra.mxu0 %v9791_v15  ;;  %v9860_v14 = vld [vmem:[%s11480_s15 + $0x340] ss:$8 sps:$4 sm:$0xff]  }
 0x1c1   : > { %7926 = vmatprep.subr.bf16.mxu1 %v9796_v16  ;;  %8350 = vmatprep.subr.bf16.mxu0 %v9799_v17  ;;  %v9863_v15 = vld [vmem:[%s11480_s15 + $0xb40] ss:$8 sps:$4 sm:$0xff]   ;;  %v9868_v16 = vld [vmem:[%s11480_s15 + $0x354] ss:$8 sps:$4 sm:$0xff]  }
 0x1c2   : > { %v9871_v17 = vld [vmem:[%s11480_s15 + $0xb54] ss:$8 sps:$4 sm:$0xff]  }
 0x1c4   : > { %7927 = vmatpush1.bf16.msra.mxu1 %v9794_v18  ;;  %8351 = vmatpush1.bf16.msra.mxu0 %v9797_v19  ;;  %v9866_v18 = vld [vmem:[%s11480_s15 + $0x350] ss:$8 sps:$4 sm:$0xff]  }
 0x1c5   : > { %7928 = vmatprep.subr.bf16.mxu1 %v9802_v20  ;;  %8352 = vmatprep.subr.bf16.mxu0 %v9805_v21  ;;  %v9869_v19 = vld [vmem:[%s11480_s15 + $0xb50] ss:$8 sps:$4 sm:$0xff]   ;;  %v9874_v20 = vld [vmem:[%s11480_s15 + $0x364] ss:$8 sps:$4 sm:$0xff]  }
 0x1c6   : > { %v9877_v21 = vld [vmem:[%s11480_s15 + $0xb64] ss:$8 sps:$4 sm:$0xff]  }
 0x1c8   : > { %7929 = vmatpush1.bf16.msra.mxu1 %v9800_v22  ;;  %8353 = vmatpush1.bf16.msra.mxu0 %v9803_v23  ;;  %v9872_v22 = vld [vmem:[%s11480_s15 + $0x360] ss:$8 sps:$4 sm:$0xff]  }
 0x1c9   : > { %7930 = vmatprep.subr.bf16.mxu1 %v9808_v24  ;;  %8354 = vmatprep.subr.bf16.mxu0 %v9811_v25  ;;  %v9875_v23 = vld [vmem:[%s11480_s15 + $0xb60] ss:$8 sps:$4 sm:$0xff]   ;;  %v9880_v24 = vld [vmem:[%s11480_s15 + $0x374] ss:$8 sps:$4 sm:$0xff]  }
 0x1ca   : > { %v9883_v25 = vld [vmem:[%s11480_s15 + $0xb74] ss:$8 sps:$4 sm:$0xff]  }
 0x1cc   : > { %7931 = vmatpush1.bf16.msra.mxu1 %v9806_v26  ;;  %8355 = vmatpush1.bf16.msra.mxu0 %v9809_v27  ;;  %v9878_v26 = vld [vmem:[%s11480_s15 + $0x370] ss:$8 sps:$4 sm:$0xff]  }
 0x1cd   : > { %7932 = vmatprep.subr.bf16.mxu1 %v9814_v28  ;;  %8356 = vmatprep.subr.bf16.mxu0 %v9817_v29  ;;  %v9881_v27 = vld [vmem:[%s11480_s15 + $0xb70] ss:$8 sps:$4 sm:$0xff]   ;;  %v9886_v28 = vld [vmem:[%s11480_s15 + $0x384] ss:$8 sps:$4 sm:$0xff]  }
 0x1ce   : > { %v9889_v29 = vld [vmem:[%s11480_s15 + $0xb84] ss:$8 sps:$4 sm:$0xff]  }
 0x1d0   : > { %7933 = vmatpush1.bf16.msra.mxu1 %v9812_v0  ;;  %8357 = vmatpush1.bf16.msra.mxu0 %v9815_v1  ;;  %v9884_v0 = vld [vmem:[%s11480_s15 + $0x380] ss:$8 sps:$4 sm:$0xff]  }
 0x1d1   : > { %7934 = vmatprep.subr.bf16.mxu1 %v9820_v3  ;;  %8358 = vmatprep.subr.bf16.mxu0 %v9823_v2  ;;  %v9887_v1 = vld [vmem:[%s11480_s15 + $0xb80] ss:$8 sps:$4 sm:$0xff]   ;;  %v9892_v3 = vld [vmem:[%s11480_s15 + $0x394] ss:$8 sps:$4 sm:$0xff]  }
 0x1d2   : > { %v9895_v2 = vld [vmem:[%s11480_s15 + $0xb94] ss:$8 sps:$4 sm:$0xff]  }
 0x1d4   : > { %7935 = vmatpush1.bf16.msra.mxu1 %v9818_v5  ;;  %8359 = vmatpush1.bf16.msra.mxu0 %v9821_v6  ;;  %v9890_v5 = vld [vmem:[%s11480_s15 + $0x390] ss:$8 sps:$4 sm:$0xff]  }
 0x1d5   : > { %7936 = vmatprep.subr.bf16.mxu1 %v9826_v30  ;;  %8360 = vmatprep.subr.bf16.mxu0 %v9829_v31  ;;  %v9893_v6 = vld [vmem:[%s11480_s15 + $0xb90] ss:$8 sps:$4 sm:$0xff]   ;;  %v9898_v30 = vld [vmem:[%s11480_s15 + $0x3a4] ss:$8 sps:$4 sm:$0xff]  }
 0x1d6   : > { %v9901_v31 = vld [vmem:[%s11480_s15 + $0xba4] ss:$8 sps:$4 sm:$0xff]  }
 0x1d8   : > { %7937 = vmatpush1.bf16.msra.mxu1 %v9824_v32  ;;  %8361 = vmatpush1.bf16.msra.mxu0 %v9827_v33  ;;  %v9896_v32 = vld [vmem:[%s11480_s15 + $0x3a0] ss:$8 sps:$4 sm:$0xff]  }
 0x1d9   : > { %7938 = vmatprep.subr.bf16.mxu1 %v9832_v34  ;;  %8362 = vmatprep.subr.bf16.mxu0 %v9835_v35  ;;  %v9899_v33 = vld [vmem:[%s11480_s15 + $0xba0] ss:$8 sps:$4 sm:$0xff]   ;;  %v9904_v34 = vld [vmem:[%s11480_s15 + $0x3b4] ss:$8 sps:$4 sm:$0xff]  }
 0x1da   : > { %v9907_v35 = vld [vmem:[%s11480_s15 + $0xbb4] ss:$8 sps:$4 sm:$0xff]  }
 0x1dc   : > { %7939 = vmatpush1.bf16.msra.mxu1 %v9830_v36  ;;  %8363 = vmatpush1.bf16.msra.mxu0 %v9833_v37  ;;  %v9902_v36 = vld [vmem:[%s11480_s15 + $0x3b0] ss:$8 sps:$4 sm:$0xff]  }
 0x1dd   : > { %7961 = vmatprep.subr.bf16.mxu1 %v9838_v38  ;;  %8385 = vmatprep.subr.bf16.mxu0 %v9841_v39  ;;  %v9905_v37 = vld [vmem:[%s11480_s15 + $0xbb0] ss:$8 sps:$4 sm:$0xff]   ;;  %v9910_v38 = vld [vmem:[%s11480_s15 + $0x3c4] ss:$8 sps:$4 sm:$0xff]  }
 0x1de   : > { %v9913_v39 = vld [vmem:[%s11480_s15 + $0xbc4] ss:$8 sps:$4 sm:$0xff]  }
 0x1df   : > { %7941 = vmatmul.mubr.bf16.vlgmr.msra.gmra.mrb[0].mxu1 %v8809_v48  ;;  %8365 = vmatmul.mubr.bf16.vlgmr.msra.gmra.mrb[0].mxu0 %v8825_v49  ;;  %v9914_v48 = vld [vmem:[%s11480_s15 + $0x3d0] ss:$8 sps:$4 sm:$0xff]  }
 0x1e0   : > { %7962 = vmatpush1.bf16.msra.mxu1 %v9836_v40  ;;  %8386 = vmatpush1.bf16.msra.mxu0 %v9839_v41  ;;  %v9908_v40 = vld [vmem:[%s11480_s15 + $0x3c0] ss:$8 sps:$4 sm:$0xff]   ;;  %v9917_v49 = vld [vmem:[%s11480_s15 + $0xbd0] ss:$8 sps:$4 sm:$0xff]  }
 0x1e1   : > { %7963 = vmatprep.subr.bf16.mxu1 %v9844_v52  ;;  %8387 = vmatprep.subr.bf16.mxu0 %v9847_v42  ;;  %v9911_v41 = vld [vmem:[%s11480_s15 + $0xbc0] ss:$8 sps:$4 sm:$0xff]  }
 0x1e2   : > { %7950 = vmatprep.mubr.bf16.mxu1 %v8842_v43  ;;  %8374 = vmatprep.mubr.bf16.mxu0 %v8858_v46  ;;  %v9920_v52 = vld [vmem:[%s11480_s15 + $0x3e0] ss:$8 sps:$4 sm:$0xff]   ;;  %v9928_v43 = vld [vmem:[%s11480_s15 + $0x3f4] ss:$8 sps:$4 sm:$0xff]  }
 0x1e3   : > { %v9923_v42 = vld [vmem:[%s11480_s15 + $0xbe0] ss:$8 sps:$4 sm:$0xff]   ;;  %v9931_v46 = vld [vmem:[%s11480_s15 + $0xbf4] ss:$8 sps:$4 sm:$0xff]  }
 0x1e4   : > { %7964 = vmatpush1.bf16.msra.mxu1 %v9842_v47  ;;  %8388 = vmatpush1.bf16.msra.mxu0 %v9845_v53  ;;  %v9926_v47 = vld [vmem:[%s11480_s15 + $0x3f0] ss:$8 sps:$4 sm:$0xff]  }
 0x1e5   : > { %7965 = vmatprep.subr.bf16.mxu1 %v9850_v54  ;;  %8389 = vmatprep.subr.bf16.mxu0 %v9853_v55  ;;  %v9929_v53 = vld [vmem:[%s11480_s15 + $0xbf0] ss:$8 sps:$4 sm:$0xff]   ;;  %v9934_v54 = vld [vmem:[%s11480_s15 + $0x404] ss:$8 sps:$4 sm:$0xff]  }
 0x1e6   : > { %v9937_v55 = vld [vmem:[%s11480_s15 + $0xc04] ss:$8 sps:$4 sm:$0xff]  }
 0x1e7   : > { %7951 = vmatmul.mubr.bf16.gmra.mrb[4].mxu1 %v8841_v60  ;;  %8375 = vmatmul.mubr.bf16.gmra.mrb[4].mxu0 %v8857_v61  ;;  %v4381_v60 = vld [vmem:[%s12333_s0 + $0x118] sm:$0xff] }
 0x1e8   : > { %7966 = vmatpush1.bf16.msra.mxu1 %v9848_v56  ;;  %8390 = vmatpush1.bf16.msra.mxu0 %v9851_v57  ;;  %v9932_v56 = vld [vmem:[%s11480_s15 + $0x400] ss:$8 sps:$4 sm:$0xff]   ;;  %v4397_v61 = vld [vmem:[%s12333_s0 + $0x198] sm:$0xff] }
 0x1e9   : > { %7967 = vmatprep.subr.bf16.mxu1 %v9856_v4  ;;  %8391 = vmatprep.subr.bf16.mxu0 %v9859_v7  ;;  %v9935_v57 = vld [vmem:[%s11480_s15 + $0xc00] ss:$8 sps:$4 sm:$0xff]   ;;  %v8811_v4 = vcombine.low %v11787_v58, %v11792_v59  ;;  %v8827_v7 = vcombine.low %v11797_v62, %v11802_v63  ;;  %v9943_v58 = vld [vmem:[%s11480_s15 + $0xc14] ss:$8 sps:$4 sm:$0xff]   ;;  %v8844_v59 = vcombine.high %v4381_v60, %v4397_v61  ;;  %v9938_v63 = vld [vmem:[%s11480_s15 + $0x410] ss:$8 sps:$4 sm:$0xff]  }
 0x1ea   : > { %7993 = vmatprep.mubr.bf16.mxu1 %v8812_v8  ;;  %8417 = vmatprep.mubr.bf16.mxu0 %v8828_v9  ;;  %v4389_v8 = vld [vmem:[%s12333_s0 + $0x158] sm:$0xff] }
 0x1eb   : > { %v4405_v9 = vld [vmem:[%s12333_s0 + $0x1d8] sm:$0xff] }
 0x1ec   : > { %7968 = vmatpush1.bf16.msra.mxu1 %v9854_v10  ;;  %8392 = vmatpush1.bf16.msra.mxu0 %v9857_v11  ;;  %v9940_v10 = vld [vmem:[%s11480_s15 + $0x414] ss:$8 sps:$4 sm:$0xff]   ;;  %v8860_v62 = vcombine.high %v4389_v8, %v4405_v9  ;;  %v9941_v11 = vld [vmem:[%s11480_s15 + $0xc10] ss:$8 sps:$4 sm:$0xff]  }
 0x1ed   : > { %7969 = vmatprep.subr.bf16.mxu1 %v9862_v12  ;;  %8393 = vmatprep.subr.bf16.mxu0 %v9865_v13  ;;  %v9946_v12 = vld [vmem:[%s11480_s15 + $0x424] ss:$8 sps:$4 sm:$0xff]  }
 0x1ee   : > { %v9949_v13 = vld [vmem:[%s11480_s15 + $0xc24] ss:$8 sps:$4 sm:$0xff]  }
 0x1f0   : > { %7970 = vmatpush1.bf16.msra.mxu1 %v9860_v14  ;;  %8394 = vmatpush1.bf16.msra.mxu0 %v9863_v15  ;;  %v9944_v14 = vld [vmem:[%s11480_s15 + $0x420] ss:$8 sps:$4 sm:$0xff]  }
 0x1f1   : > { %7971 = vmatprep.subr.bf16.mxu1 %v9868_v16  ;;  %8395 = vmatprep.subr.bf16.mxu0 %v9871_v17  ;;  %v9947_v15 = vld [vmem:[%s11480_s15 + $0xc20] ss:$8 sps:$4 sm:$0xff]  }
 0x1f2   : > { %v11891_v16 = vld [vmem:[%s12333_s0 + $0x20] sm:$0xff] }
 0x1f3   : > { %v11896_v17 = vld [vmem:[%s12333_s0 + $0xa0] sm:$0xff] }
 0x1f4   : > { %7972 = vmatpush1.bf16.msra.mxu1 %v9866_v18  ;;  %8396 = vmatpush1.bf16.msra.mxu0 %v9869_v19  ;;  %v8843_v18 = vcombine.low %v4381_v60, %v4397_v61  ;;  %v8859_v19 = vcombine.low %v4389_v8, %v4405_v9  ;;  %v10012_v60 = vld [vmem:[%s11480_s15 + $0x4d4] ss:$8 sps:$4 sm:$0xff]   ;;  %v10018_v8 = vld [vmem:[%s11480_s15 + $0x4e4] ss:$8 sps:$4 sm:$0xff]  }
 0x1f5   : > { %7973 = vmatprep.subr.bf16.mxu1 %v9874_v20  ;;  %8397 = vmatprep.subr.bf16.mxu0 %v9877_v21  ;;  %v11901_v20 = vld [vmem:[%s12333_s0 + $0x60] sm:$0xff]  ;;  %v10015_v61 = vld [vmem:[%s11480_s15 + $0xcd4] ss:$8 sps:$4 sm:$0xff]  }
 0x1f6   : > { %v11906_v21 = vld [vmem:[%s12333_s0 + $0xe0] sm:$0xff] }
 0x1f7   : > { %v10021_v9 = vld [vmem:[%s11480_s15 + $0xce4] ss:$8 sps:$4 sm:$0xff]  }
 0x1f8   : > { %7974 = vmatpush1.bf16.msra.mxu1 %v9872_v22  ;;  %8398 = vmatpush1.bf16.msra.mxu0 %v9875_v23  ;;  %v9952_v22 = vld [vmem:[%s11480_s15 + $0x434] ss:$8 sps:$4 sm:$0xff]  }
 0x1f9   : > { %7975 = vmatprep.subr.bf16.mxu1 %v9880_v24  ;;  %8399 = vmatprep.subr.bf16.mxu0 %v9883_v25  ;;  %v9955_v23 = vld [vmem:[%s11480_s15 + $0xc34] ss:$8 sps:$4 sm:$0xff]   ;;  %v8814_v24 = vcombine.high %v11891_v16, %v11896_v17  ;;  %v8830_v25 = vcombine.high %v11901_v20, %v11906_v21 }
 0x1fc   : > { %7976 = vmatpush1.bf16.msra.mxu1 %v9878_v26  ;;  %8400 = vmatpush1.bf16.msra.mxu0 %v9881_v27  ;;  %v9950_v26 = vld [vmem:[%s11480_s15 + $0x430] ss:$8 sps:$4 sm:$0xff]  }
 0x1fd   : > { %7977 = vmatprep.subr.bf16.mxu1 %v9886_v28  ;;  %8401 = vmatprep.subr.bf16.mxu0 %v9889_v29  ;;  %v9953_v27 = vld [vmem:[%s11480_s15 + $0xc30] ss:$8 sps:$4 sm:$0xff]   ;;  %v9958_v28 = vld [vmem:[%s11480_s15 + $0x444] ss:$8 sps:$4 sm:$0xff]  }
 0x1fe   : > { %v9961_v29 = vld [vmem:[%s11480_s15 + $0xc44] ss:$8 sps:$4 sm:$0xff]  }
 0x200   : > { %7978 = vmatpush1.bf16.msra.mxu1 %v9884_v0  ;;  %8402 = vmatpush1.bf16.msra.mxu0 %v9887_v1  ;;  %v9956_v0 = vld [vmem:[%s11480_s15 + $0x440] ss:$8 sps:$4 sm:$0xff]  }
 0x201   : > { %7979 = vmatprep.subr.bf16.mxu1 %v9892_v3  ;;  %8403 = vmatprep.subr.bf16.mxu0 %v9895_v2  ;;  %v9959_v1 = vld [vmem:[%s11480_s15 + $0xc40] ss:$8 sps:$4 sm:$0xff]   ;;  %v9964_v3 = vld [vmem:[%s11480_s15 + $0x454] ss:$8 sps:$4 sm:$0xff]  }
 0x202   : > { %v9967_v2 = vld [vmem:[%s11480_s15 + $0xc54] ss:$8 sps:$4 sm:$0xff]  }
 0x204   : > { %7980 = vmatpush1.bf16.msra.mxu1 %v9890_v5  ;;  %8404 = vmatpush1.bf16.msra.mxu0 %v9893_v6  ;;  %v9962_v5 = vld [vmem:[%s11480_s15 + $0x450] ss:$8 sps:$4 sm:$0xff]  }
 0x205   : > { %7981 = vmatprep.subr.bf16.mxu1 %v9898_v30  ;;  %8405 = vmatprep.subr.bf16.mxu0 %v9901_v31  ;;  %v9965_v6 = vld [vmem:[%s11480_s15 + $0xc50] ss:$8 sps:$4 sm:$0xff]   ;;  %v9970_v30 = vld [vmem:[%s11480_s15 + $0x464] ss:$8 sps:$4 sm:$0xff]  }
 0x206   : > { %v9973_v31 = vld [vmem:[%s11480_s15 + $0xc64] ss:$8 sps:$4 sm:$0xff]  }
 0x208   : > { %7982 = vmatpush1.bf16.msra.mxu1 %v9896_v32  ;;  %8406 = vmatpush1.bf16.msra.mxu0 %v9899_v33  ;;  %v9968_v32 = vld [vmem:[%s11480_s15 + $0x460] ss:$8 sps:$4 sm:$0xff]  }
 0x209   : > { %7983 = vmatprep.subr.bf16.mxu1 %v9904_v34  ;;  %8407 = vmatprep.subr.bf16.mxu0 %v9907_v35  ;;  %v9971_v33 = vld [vmem:[%s11480_s15 + $0xc60] ss:$8 sps:$4 sm:$0xff]   ;;  %v9976_v34 = vld [vmem:[%s11480_s15 + $0x474] ss:$8 sps:$4 sm:$0xff]  }
 0x20a   : > { %v9979_v35 = vld [vmem:[%s11480_s15 + $0xc74] ss:$8 sps:$4 sm:$0xff]  }
 0x20c   : > { %7984 = vmatpush1.bf16.msra.mxu1 %v9902_v36  ;;  %8408 = vmatpush1.bf16.msra.mxu0 %v9905_v37  ;;  %v9974_v36 = vld [vmem:[%s11480_s15 + $0x470] ss:$8 sps:$4 sm:$0xff]  }
 0x20d   : > { %7985 = vmatprep.subr.bf16.mxu1 %v9910_v38  ;;  %8409 = vmatprep.subr.bf16.mxu0 %v9913_v39  ;;  %v9977_v37 = vld [vmem:[%s11480_s15 + $0xc70] ss:$8 sps:$4 sm:$0xff]   ;;  %v9982_v38 = vld [vmem:[%s11480_s15 + $0x484] ss:$8 sps:$4 sm:$0xff]  }
 0x20e   : > { %v9985_v39 = vld [vmem:[%s11480_s15 + $0xc84] ss:$8 sps:$4 sm:$0xff]  }
 0x210   : > { %7986 = vmatpush1.bf16.msra.mxu1 %v9908_v40  ;;  %8410 = vmatpush1.bf16.msra.mxu0 %v9911_v41  ;;  %v9980_v40 = vld [vmem:[%s11480_s15 + $0x480] ss:$8 sps:$4 sm:$0xff]  }
 0x211   : > { %7987 = vmatprep.subr.bf16.mxu1 %v9916_v44  ;;  %8411 = vmatprep.subr.bf16.mxu0 %v9919_v45  ;;  %v9983_v41 = vld [vmem:[%s11480_s15 + $0xc80] ss:$8 sps:$4 sm:$0xff]   ;;  %v9988_v44 = vld [vmem:[%s11480_s15 + $0x494] ss:$8 sps:$4 sm:$0xff]  }
 0x212   : > { %v9991_v45 = vld [vmem:[%s11480_s15 + $0xc94] ss:$8 sps:$4 sm:$0xff]  }
 0x214   : > { %7988 = vmatpush1.bf16.msra.mxu1 %v9914_v48  ;;  %8412 = vmatpush1.bf16.msra.mxu0 %v9917_v49  ;;  %v9986_v48 = vld [vmem:[%s11480_s15 + $0x490] ss:$8 sps:$4 sm:$0xff]  }
 0x215   : > { %7989 = vmatprep.subr.bf16.mxu1 %v9922_v50  ;;  %8413 = vmatprep.subr.bf16.mxu0 %v9925_v51  ;;  %v9989_v49 = vld [vmem:[%s11480_s15 + $0xc90] ss:$8 sps:$4 sm:$0xff]   ;;  %v9994_v50 = vld [vmem:[%s11480_s15 + $0x4a4] ss:$8 sps:$4 sm:$0xff]  }
 0x216   : > { %v9997_v51 = vld [vmem:[%s11480_s15 + $0xca4] ss:$8 sps:$4 sm:$0xff]  }
 0x218   : > { %7990 = vmatpush1.bf16.msra.mxu1 %v9920_v52  ;;  %8414 = vmatpush1.bf16.msra.mxu0 %v9923_v42  ;;  %v9992_v52 = vld [vmem:[%s11480_s15 + $0x4a0] ss:$8 sps:$4 sm:$0xff]  }
 0x219   : > { %7991 = vmatprep.subr.bf16.mxu1 %v9928_v43  ;;  %8415 = vmatprep.subr.bf16.mxu0 %v9931_v46  ;;  %v9995_v42 = vld [vmem:[%s11480_s15 + $0xca0] ss:$8 sps:$4 sm:$0xff]   ;;  %v10000_v43 = vld [vmem:[%s11480_s15 + $0x4b4] ss:$8 sps:$4 sm:$0xff]  }
 0x21a   : > { %v10003_v46 = vld [vmem:[%s11480_s15 + $0xcb4] ss:$8 sps:$4 sm:$0xff]  }
 0x21c   : > { %7992 = vmatpush1.bf16.msra.mxu1 %v9926_v47  ;;  %8416 = vmatpush1.bf16.msra.mxu0 %v9929_v53  ;;  %v9998_v47 = vld [vmem:[%s11480_s15 + $0x4b0] ss:$8 sps:$4 sm:$0xff]  }
 0x21d   : > { %8014 = vmatprep.subr.bf16.mxu1 %v9934_v54  ;;  %8438 = vmatprep.subr.bf16.mxu0 %v9937_v55  ;;  %v10001_v53 = vld [vmem:[%s11480_s15 + $0xcb0] ss:$8 sps:$4 sm:$0xff]   ;;  %v10006_v54 = vld [vmem:[%s11480_s15 + $0x4c4] ss:$8 sps:$4 sm:$0xff]  }
 0x21e   : > { %v10009_v55 = vld [vmem:[%s11480_s15 + $0xcc4] ss:$8 sps:$4 sm:$0xff]  }
 0x21f   : > { %7994 = vmatmul.mubr.bf16.vlgmr.msra.gmra.mrb[0].mxu1 %v8811_v4  ;;  %8418 = vmatmul.mubr.bf16.vlgmr.msra.gmra.mrb[0].mxu0 %v8827_v7  ;;  %v10010_v4 = vld [vmem:[%s11480_s15 + $0x4d0] ss:$8 sps:$4 sm:$0xff]  }
 0x220   : > { %8015 = vmatpush1.bf16.msra.mxu1 %v9932_v56  ;;  %8439 = vmatpush1.bf16.msra.mxu0 %v9935_v57  ;;  %v10004_v56 = vld [vmem:[%s11480_s15 + $0x4c0] ss:$8 sps:$4 sm:$0xff]   ;;  %v10013_v7 = vld [vmem:[%s11480_s15 + $0xcd0] ss:$8 sps:$4 sm:$0xff]  }
 0x221   : > { %8016 = vmatprep.subr.bf16.mxu1 %v9940_v10  ;;  %8440 = vmatprep.subr.bf16.mxu0 %v9943_v58  ;;  %v10007_v57 = vld [vmem:[%s11480_s15 + $0xcc0] ss:$8 sps:$4 sm:$0xff]  }
 0x222   : > { %8003 = vmatprep.mubr.bf16.mxu1 %v8844_v59  ;;  %8427 = vmatprep.mubr.bf16.mxu0 %v8860_v62  ;;  %v10016_v10 = vld [vmem:[%s11480_s15 + $0x4e0] ss:$8 sps:$4 sm:$0xff]   ;;  %v10024_v59 = vld [vmem:[%s11480_s15 + $0x4f4] ss:$8 sps:$4 sm:$0xff]  }
 0x223   : > { %v10019_v58 = vld [vmem:[%s11480_s15 + $0xce0] ss:$8 sps:$4 sm:$0xff]   ;;  %v10027_v62 = vld [vmem:[%s11480_s15 + $0xcf4] ss:$8 sps:$4 sm:$0xff]  }
 0x224   : > { %8017 = vmatpush1.bf16.msra.mxu1 %v9938_v63  ;;  %8441 = vmatpush1.bf16.msra.mxu0 %v9941_v11  ;;  %v10022_v63 = vld [vmem:[%s11480_s15 + $0x4f0] ss:$8 sps:$4 sm:$0xff]  }
 0x225   : > { %8018 = vmatprep.subr.bf16.mxu1 %v9946_v12  ;;  %8442 = vmatprep.subr.bf16.mxu0 %v9949_v13  ;;  %v10025_v11 = vld [vmem:[%s11480_s15 + $0xcf0] ss:$8 sps:$4 sm:$0xff]   ;;  %v10030_v12 = vld [vmem:[%s11480_s15 + $0x504] ss:$8 sps:$4 sm:$0xff]  }
 0x226   : > { %v10033_v13 = vld [vmem:[%s11480_s15 + $0xd04] ss:$8 sps:$4 sm:$0xff]  }
 0x227   : > { %8004 = vmatmul.mubr.bf16.gmra.mrb[4].mxu1 %v8843_v18  ;;  %8428 = vmatmul.mubr.bf16.gmra.mrb[4].mxu0 %v8859_v19  ;;  %v4390_v18 = vld [vmem:[%s12333_s0 + $0x160] sm:$0xff] }
 0x228   : > { %8019 = vmatpush1.bf16.msra.mxu1 %v9944_v14  ;;  %8443 = vmatpush1.bf16.msra.mxu0 %v9947_v15  ;;  %v4382_v14 = vld [vmem:[%s12333_s0 + $0x120] sm:$0xff] }
 0x229   : > { %8020 = vmatprep.subr.bf16.mxu1 %v9952_v22  ;;  %8444 = vmatprep.subr.bf16.mxu0 %v9955_v23  ;;  %v4398_v15 = vld [vmem:[%s12333_s0 + $0x1a0] sm:$0xff]  ;;  %v8813_v22 = vcombine.low %v11891_v16, %v11896_v17  ;;  %v8829_v23 = vcombine.low %v11901_v20, %v11906_v21  ;;  %v11993_v20 = vld [vmem:[%s12333_s0 + $0x28] sm:$0xff] }
 0x22a   : > { %8046 = vmatprep.mubr.bf16.mxu1 %v8814_v24  ;;  %8470 = vmatprep.mubr.bf16.mxu0 %v8830_v25  ;;  %v4406_v19 = vld [vmem:[%s12333_s0 + $0x1e0] sm:$0xff]  ;;  %v11998_v21 = vld [vmem:[%s12333_s0 + $0xa8] sm:$0xff] }
 0x22b   : > { %v10028_v24 = vld [vmem:[%s11480_s15 + $0x500] ss:$8 sps:$4 sm:$0xff]   ;;  %v10042_v16 = vld [vmem:[%s11480_s15 + $0x524] ss:$8 sps:$4 sm:$0xff]  }
 0x22c   : > { %8021 = vmatpush1.bf16.msra.mxu1 %v9950_v26  ;;  %8445 = vmatpush1.bf16.msra.mxu0 %v9953_v27  ;;  %v10031_v25 = vld [vmem:[%s11480_s15 + $0xd00] ss:$8 sps:$4 sm:$0xff]   ;;  %v10036_v26 = vld [vmem:[%s11480_s15 + $0x514] ss:$8 sps:$4 sm:$0xff]   ;;  %v10045_v17 = vld [vmem:[%s11480_s15 + $0xd24] ss:$8 sps:$4 sm:$0xff]  }
 0x22d   : > { %8022 = vmatprep.subr.bf16.mxu1 %v9958_v28  ;;  %8446 = vmatprep.subr.bf16.mxu0 %v9961_v29  ;;  %v10039_v27 = vld [vmem:[%s11480_s15 + $0xd14] ss:$8 sps:$4 sm:$0xff]   ;;  %v10034_v28 = vld [vmem:[%s11480_s15 + $0x510] ss:$8 sps:$4 sm:$0xff]  }
 0x22e   : > { %v10037_v29 = vld [vmem:[%s11480_s15 + $0xd10] ss:$8 sps:$4 sm:$0xff]  }
 0x230   : > { %8023 = vmatpush1.bf16.msra.mxu1 %v9956_v0  ;;  %8447 = vmatpush1.bf16.msra.mxu0 %v9959_v1  ;;  %v8846_v0 = vcombine.high %v4382_v14, %v4398_v15  ;;  %v8862_v1 = vcombine.high %v4390_v18, %v4406_v19 }
 0x231   : > { %8024 = vmatprep.subr.bf16.mxu1 %v9964_v3  ;;  %8448 = vmatprep.subr.bf16.mxu0 %v9967_v2  ;;  %v12003_v3 = vld [vmem:[%s12333_s0 + $0x68] sm:$0xff] }
 0x232   : > { %v12008_v2 = vld [vmem:[%s12333_s0 + $0xe8] sm:$0xff] }
 0x234   : > { %8025 = vmatpush1.bf16.msra.mxu1 %v9962_v5  ;;  %8449 = vmatpush1.bf16.msra.mxu0 %v9965_v6  ;;  %v8845_v5 = vcombine.low %v4382_v14, %v4398_v15  ;;  %v8861_v6 = vcombine.low %v4390_v18, %v4406_v19  ;;  %v10100_v14 = vld [vmem:[%s11480_s15 + $0x5c0] ss:$8 sps:$4 sm:$0xff]   ;;  %v10108_v18 = vld [vmem:[%s11480_s15 + $0x5d4] ss:$8 sps:$4 sm:$0xff]  }
 0x235   : > { %8026 = vmatprep.subr.bf16.mxu1 %v9970_v30  ;;  %8450 = vmatprep.subr.bf16.mxu0 %v9973_v31  ;;  %v10040_v30 = vld [vmem:[%s11480_s15 + $0x520] ss:$8 sps:$4 sm:$0xff]   ;;  %v10111_v19 = vld [vmem:[%s11480_s15 + $0xdd4] ss:$8 sps:$4 sm:$0xff]  }
 0x236   : > { %v10043_v31 = vld [vmem:[%s11480_s15 + $0xd20] ss:$8 sps:$4 sm:$0xff]  }
 0x237   : > { %v10103_v15 = vld [vmem:[%s11480_s15 + $0xdc0] ss:$8 sps:$4 sm:$0xff]  }
 0x238   : > { %8027 = vmatpush1.bf16.msra.mxu1 %v9968_v32  ;;  %8451 = vmatpush1.bf16.msra.mxu0 %v9971_v33  ;;  %v10048_v32 = vld [vmem:[%s11480_s15 + $0x534] ss:$8 sps:$4 sm:$0xff]  }
 0x239   : > { %8028 = vmatprep.subr.bf16.mxu1 %v9976_v34  ;;  %8452 = vmatprep.subr.bf16.mxu0 %v9979_v35  ;;  %v10051_v33 = vld [vmem:[%s11480_s15 + $0xd34] ss:$8 sps:$4 sm:$0xff]   ;;  %v8816_v34 = vcombine.high %v11993_v20, %v11998_v21  ;;  %v8832_v35 = vcombine.high %v12003_v3, %v12008_v2 }
 0x23c   : > { %8029 = vmatpush1.bf16.msra.mxu1 %v9974_v36  ;;  %8453 = vmatpush1.bf16.msra.mxu0 %v9977_v37  ;;  %v10046_v36 = vld [vmem:[%s11480_s15 + $0x530] ss:$8 sps:$4 sm:$0xff]  }
 0x23d   : > { %8030 = vmatprep.subr.bf16.mxu1 %v9982_v38  ;;  %8454 = vmatprep.subr.bf16.mxu0 %v9985_v39  ;;  %v10049_v37 = vld [vmem:[%s11480_s15 + $0xd30] ss:$8 sps:$4 sm:$0xff]   ;;  %v10054_v38 = vld [vmem:[%s11480_s15 + $0x544] ss:$8 sps:$4 sm:$0xff]  }
 0x23e   : > { %v10057_v39 = vld [vmem:[%s11480_s15 + $0xd44] ss:$8 sps:$4 sm:$0xff]  }
 0x240   : > { %8031 = vmatpush1.bf16.msra.mxu1 %v9980_v40  ;;  %8455 = vmatpush1.bf16.msra.mxu0 %v9983_v41  ;;  %v10052_v40 = vld [vmem:[%s11480_s15 + $0x540] ss:$8 sps:$4 sm:$0xff]  }
 0x241   : > { %8032 = vmatprep.subr.bf16.mxu1 %v9988_v44  ;;  %8456 = vmatprep.subr.bf16.mxu0 %v9991_v45  ;;  %v10055_v41 = vld [vmem:[%s11480_s15 + $0xd40] ss:$8 sps:$4 sm:$0xff]   ;;  %v10060_v44 = vld [vmem:[%s11480_s15 + $0x554] ss:$8 sps:$4 sm:$0xff]  }
 0x242   : > { %v10063_v45 = vld [vmem:[%s11480_s15 + $0xd54] ss:$8 sps:$4 sm:$0xff]  }
 0x244   : > { %8033 = vmatpush1.bf16.msra.mxu1 %v9986_v48  ;;  %8457 = vmatpush1.bf16.msra.mxu0 %v9989_v49  ;;  %v10058_v48 = vld [vmem:[%s11480_s15 + $0x550] ss:$8 sps:$4 sm:$0xff]  }
 0x245   : > { %8034 = vmatprep.subr.bf16.mxu1 %v9994_v50  ;;  %8458 = vmatprep.subr.bf16.mxu0 %v9997_v51  ;;  %v10061_v49 = vld [vmem:[%s11480_s15 + $0xd50] ss:$8 sps:$4 sm:$0xff]   ;;  %v10066_v50 = vld [vmem:[%s11480_s15 + $0x564] ss:$8 sps:$4 sm:$0xff]  }
 0x246   : > { %v10069_v51 = vld [vmem:[%s11480_s15 + $0xd64] ss:$8 sps:$4 sm:$0xff]  }
 0x248   : > { %8035 = vmatpush1.bf16.msra.mxu1 %v9992_v52  ;;  %8459 = vmatpush1.bf16.msra.mxu0 %v9995_v42  ;;  %v10064_v52 = vld [vmem:[%s11480_s15 + $0x560] ss:$8 sps:$4 sm:$0xff]  }
 0x249   : > { %8036 = vmatprep.subr.bf16.mxu1 %v10000_v43  ;;  %8460 = vmatprep.subr.bf16.mxu0 %v10003_v46  ;;  %v10067_v42 = vld [vmem:[%s11480_s15 + $0xd60] ss:$8 sps:$4 sm:$0xff]   ;;  %v10072_v43 = vld [vmem:[%s11480_s15 + $0x574] ss:$8 sps:$4 sm:$0xff]  }
 0x24a   : > { %v10075_v46 = vld [vmem:[%s11480_s15 + $0xd74] ss:$8 sps:$4 sm:$0xff]  }
 0x24c   : > { %8037 = vmatpush1.bf16.msra.mxu1 %v9998_v47  ;;  %8461 = vmatpush1.bf16.msra.mxu0 %v10001_v53  ;;  %v10070_v47 = vld [vmem:[%s11480_s15 + $0x570] ss:$8 sps:$4 sm:$0xff]  }
 0x24d   : > { %8038 = vmatprep.subr.bf16.mxu1 %v10006_v54  ;;  %8462 = vmatprep.subr.bf16.mxu0 %v10009_v55  ;;  %v10073_v53 = vld [vmem:[%s11480_s15 + $0xd70] ss:$8 sps:$4 sm:$0xff]   ;;  %v10078_v54 = vld [vmem:[%s11480_s15 + $0x584] ss:$8 sps:$4 sm:$0xff]  }
 0x24e   : > { %v10081_v55 = vld [vmem:[%s11480_s15 + $0xd84] ss:$8 sps:$4 sm:$0xff]  }
 0x250   : > { %8039 = vmatpush1.bf16.msra.mxu1 %v10004_v56  ;;  %8463 = vmatpush1.bf16.msra.mxu0 %v10007_v57  ;;  %v10076_v56 = vld [vmem:[%s11480_s15 + $0x580] ss:$8 sps:$4 sm:$0xff]  }
 0x251   : > { %8040 = vmatprep.subr.bf16.mxu1 %v10012_v60  ;;  %8464 = vmatprep.subr.bf16.mxu0 %v10015_v61  ;;  %v10079_v57 = vld [vmem:[%s11480_s15 + $0xd80] ss:$8 sps:$4 sm:$0xff]   ;;  %v10084_v60 = vld [vmem:[%s11480_s15 + $0x594] ss:$8 sps:$4 sm:$0xff]  }
 0x252   : > { %v10087_v61 = vld [vmem:[%s11480_s15 + $0xd94] ss:$8 sps:$4 sm:$0xff]  }
 0x254   : > { %8041 = vmatpush1.bf16.msra.mxu1 %v10010_v4  ;;  %8465 = vmatpush1.bf16.msra.mxu0 %v10013_v7  ;;  %v10082_v4 = vld [vmem:[%s11480_s15 + $0x590] ss:$8 sps:$4 sm:$0xff]  }
 0x255   : > { %8042 = vmatprep.subr.bf16.mxu1 %v10018_v8  ;;  %8466 = vmatprep.subr.bf16.mxu0 %v10021_v9  ;;  %v10085_v7 = vld [vmem:[%s11480_s15 + $0xd90] ss:$8 sps:$4 sm:$0xff]   ;;  %v10090_v8 = vld [vmem:[%s11480_s15 + $0x5a4] ss:$8 sps:$4 sm:$0xff]  }
 0x256   : > { %v10093_v9 = vld [vmem:[%s11480_s15 + $0xda4] ss:$8 sps:$4 sm:$0xff]  }
 0x258   : > { %8043 = vmatpush1.bf16.msra.mxu1 %v10016_v10  ;;  %8467 = vmatpush1.bf16.msra.mxu0 %v10019_v58  ;;  %v10088_v10 = vld [vmem:[%s11480_s15 + $0x5a0] ss:$8 sps:$4 sm:$0xff]  }
 0x259   : > { %8044 = vmatprep.subr.bf16.mxu1 %v10024_v59  ;;  %8468 = vmatprep.subr.bf16.mxu0 %v10027_v62  ;;  %v10091_v58 = vld [vmem:[%s11480_s15 + $0xda0] ss:$8 sps:$4 sm:$0xff]   ;;  %v10096_v59 = vld [vmem:[%s11480_s15 + $0x5b4] ss:$8 sps:$4 sm:$0xff]  }
 0x25a   : > { %v10099_v62 = vld [vmem:[%s11480_s15 + $0xdb4] ss:$8 sps:$4 sm:$0xff]  }
 0x25c   : > { %8045 = vmatpush1.bf16.msra.mxu1 %v10022_v63  ;;  %8469 = vmatpush1.bf16.msra.mxu0 %v10025_v11  ;;  %v10094_v63 = vld [vmem:[%s11480_s15 + $0x5b0] ss:$8 sps:$4 sm:$0xff]  }
 0x25d   : > { %8067 = vmatprep.subr.bf16.mxu1 %v10030_v12  ;;  %8491 = vmatprep.subr.bf16.mxu0 %v10033_v13  ;;  %v10097_v11 = vld [vmem:[%s11480_s15 + $0xdb0] ss:$8 sps:$4 sm:$0xff]   ;;  %v10102_v12 = vld [vmem:[%s11480_s15 + $0x5c4] ss:$8 sps:$4 sm:$0xff]  }
 0x25e   : > { %v10105_v13 = vld [vmem:[%s11480_s15 + $0xdc4] ss:$8 sps:$4 sm:$0xff]  }
 0x25f   : > { %8047 = vmatmul.mubr.bf16.vlgmr.msra.gmra.mrb[0].mxu1 %v8813_v22  ;;  %8471 = vmatmul.mubr.bf16.vlgmr.msra.gmra.mrb[0].mxu0 %v8829_v23  ;;  %v10106_v22 = vld [vmem:[%s11480_s15 + $0x5d0] ss:$8 sps:$4 sm:$0xff]  }
 0x260   : > { %8068 = vmatpush1.bf16.msra.mxu1 %v10028_v24  ;;  %8492 = vmatpush1.bf16.msra.mxu0 %v10031_v25  ;;  %v10109_v23 = vld [vmem:[%s11480_s15 + $0xdd0] ss:$8 sps:$4 sm:$0xff]   ;;  %v10114_v24 = vld [vmem:[%s11480_s15 + $0x5e4] ss:$8 sps:$4 sm:$0xff]  }
 0x261   : > { %8069 = vmatprep.subr.bf16.mxu1 %v10036_v26  ;;  %8493 = vmatprep.subr.bf16.mxu0 %v10039_v27  ;;  %v10117_v25 = vld [vmem:[%s11480_s15 + $0xde4] ss:$8 sps:$4 sm:$0xff]   ;;  %v10112_v26 = vld [vmem:[%s11480_s15 + $0x5e0] ss:$8 sps:$4 sm:$0xff]  }
 0x262   : > { %8056 = vmatprep.mubr.bf16.mxu1 %v8846_v0  ;;  %8480 = vmatprep.mubr.bf16.mxu0 %v8862_v1  ;;  %v10115_v27 = vld [vmem:[%s11480_s15 + $0xde0] ss:$8 sps:$4 sm:$0xff]   ;;  %v10118_v0 = vld [vmem:[%s11480_s15 + $0x5f0] ss:$8 sps:$4 sm:$0xff]  }
 0x263   : > { %v10121_v1 = vld [vmem:[%s11480_s15 + $0xdf0] ss:$8 sps:$4 sm:$0xff]  }
 0x264   : > { %8070 = vmatpush1.bf16.msra.mxu1 %v10034_v28  ;;  %8494 = vmatpush1.bf16.msra.mxu0 %v10037_v29  ;;  %v10120_v28 = vld [vmem:[%s11480_s15 + $0x5f4] ss:$8 sps:$4 sm:$0xff]  }
 0x265   : > { %8071 = vmatprep.subr.bf16.mxu1 %v10042_v16  ;;  %8495 = vmatprep.subr.bf16.mxu0 %v10045_v17  ;;  %v10123_v29 = vld [vmem:[%s11480_s15 + $0xdf4] ss:$8 sps:$4 sm:$0xff]   ;;  %v10126_v16 = vld [vmem:[%s11480_s15 + $0x604] ss:$8 sps:$4 sm:$0xff]  }
 0x266   : > { %v10129_v17 = vld [vmem:[%s11480_s15 + $0xe04] ss:$8 sps:$4 sm:$0xff]  }
 0x267   : > { %8057 = vmatmul.mubr.bf16.gmra.mrb[4].mxu1 %v8845_v5  ;;  %8481 = vmatmul.mubr.bf16.gmra.mrb[4].mxu0 %v8861_v6  ;;  %v4383_v5 = vld [vmem:[%s12333_s0 + $0x128] sm:$0xff]  ;;  %v8815_v6 = vcombine.low %v11993_v20, %v11998_v21 }
 0x268   : > { %8072 = vmatpush1.bf16.msra.mxu1 %v10040_v30  ;;  %8496 = vmatpush1.bf16.msra.mxu0 %v10043_v31  ;;  %v8831_v30 = vcombine.low %v12003_v3, %v12008_v2  ;;  %v4399_v31 = vld [vmem:[%s12333_s0 + $0x1a8] sm:$0xff]  ;;  %v10132_v3 = vld [vmem:[%s11480_s15 + $0x614] ss:$8 sps:$4 sm:$0xff]  }
 0x269   : > { %8073 = vmatprep.subr.bf16.mxu1 %v10048_v32  ;;  %8497 = vmatprep.subr.bf16.mxu0 %v10051_v33  ;;  %v4391_v32 = vld [vmem:[%s12333_s0 + $0x168] sm:$0xff]  ;;  %v10135_v2 = vld [vmem:[%s11480_s15 + $0xe14] ss:$8 sps:$4 sm:$0xff]  }
 0x26a   : > { %8099 = vmatprep.mubr.bf16.mxu1 %v8816_v34  ;;  %8523 = vmatprep.mubr.bf16.mxu0 %v8832_v35  ;;  %v4407_v33 = vld [vmem:[%s12333_s0 + $0x1e8] sm:$0xff]  ;;  %v8848_v34 = vcombine.high %v4383_v5, %v4399_v31 }
 0x26b   : > { %v10124_v20 = vld [vmem:[%s11480_s15 + $0x600] ss:$8 sps:$4 sm:$0xff]   ;;  %v8864_v35 = vcombine.high %v4391_v32, %v4407_v33 }
 0x26c   : > { %8074 = vmatpush1.bf16.msra.mxu1 %v10046_v36  ;;  %8498 = vmatpush1.bf16.msra.mxu0 %v10049_v37  ;;  %v10127_v21 = vld [vmem:[%s11480_s15 + $0xe00] ss:$8 sps:$4 sm:$0xff]   ;;  %v10130_v36 = vld [vmem:[%s11480_s15 + $0x610] ss:$8 sps:$4 sm:$0xff]  }
 0x26d   : > { %8075 = vmatprep.subr.bf16.mxu1 %v10054_v38  ;;  %8499 = vmatprep.subr.bf16.mxu0 %v10057_v39  ;;  %v10133_v37 = vld [vmem:[%s11480_s15 + $0xe10] ss:$8 sps:$4 sm:$0xff]   ;;  %v10138_v38 = vld [vmem:[%s11480_s15 + $0x624] ss:$8 sps:$4 sm:$0xff]  }
 0x26e   : > { %v10141_v39 = vld [vmem:[%s11480_s15 + $0xe24] ss:$8 sps:$4 sm:$0xff]  }
 0x270   : > { %8076 = vmatpush1.bf16.msra.mxu1 %v10052_v40  ;;  %8500 = vmatpush1.bf16.msra.mxu0 %v10055_v41  ;;  %v12097_v40 = vld [vmem:[%s12333_s0 + $0x30] sm:$0xff]  ;;  %v8847_v41 = vcombine.low %v4383_v5, %v4399_v31  ;;  %v10196_v5 = vld [vmem:[%s11480_s15 + $0x6c0] ss:$8 sps:$4 sm:$0xff]  }
 0x271   : > { %8077 = vmatprep.subr.bf16.mxu1 %v10060_v44  ;;  %8501 = vmatprep.subr.bf16.mxu0 %v10063_v45  ;;  %v8863_v44 = vcombine.low %v4391_v32, %v4407_v33  ;;  %v12102_v45 = vld [vmem:[%s12333_s0 + $0xb0] sm:$0xff] }
 0x272   : > { %v10207_v31 = vld [vmem:[%s11480_s15 + $0xed4] ss:$8 sps:$4 sm:$0xff]   ;;  %v10202_v32 = vld [vmem:[%s11480_s15 + $0x6d0] ss:$8 sps:$4 sm:$0xff]  }
 0x273   : > { %v10205_v33 = vld [vmem:[%s11480_s15 + $0xed0] ss:$8 sps:$4 sm:$0xff]  }
 0x274   : > { %8078 = vmatpush1.bf16.msra.mxu1 %v10058_v48  ;;  %8502 = vmatpush1.bf16.msra.mxu0 %v10061_v49  ;;  %v12107_v48 = vld [vmem:[%s12333_s0 + $0x70] sm:$0xff] }
 0x275   : > { %8079 = vmatprep.subr.bf16.mxu1 %v10066_v50  ;;  %8503 = vmatprep.subr.bf16.mxu0 %v10069_v51  ;;  %v12112_v49 = vld [vmem:[%s12333_s0 + $0xf0] sm:$0xff]  ;;  %v10136_v50 = vld [vmem:[%s11480_s15 + $0x620] ss:$8 sps:$4 sm:$0xff]  }
 0x276   : > { %v10139_v51 = vld [vmem:[%s11480_s15 + $0xe20] ss:$8 sps:$4 sm:$0xff]  }
 0x278   : > { %8080 = vmatpush1.bf16.msra.mxu1 %v10064_v52  ;;  %8504 = vmatpush1.bf16.msra.mxu0 %v10067_v42  ;;  %v10144_v52 = vld [vmem:[%s11480_s15 + $0x634] ss:$8 sps:$4 sm:$0xff]  }
 0x279   : > { %8081 = vmatprep.subr.bf16.mxu1 %v10072_v43  ;;  %8505 = vmatprep.subr.bf16.mxu0 %v10075_v46  ;;  %v10147_v42 = vld [vmem:[%s11480_s15 + $0xe34] ss:$8 sps:$4 sm:$0xff]   ;;  %v8818_v43 = vcombine.high %v12097_v40, %v12102_v45  ;;  %v8834_v46 = vcombine.high %v12107_v48, %v12112_v49 }
 0x27c   : > { %8082 = vmatpush1.bf16.msra.mxu1 %v10070_v47  ;;  %8506 = vmatpush1.bf16.msra.mxu0 %v10073_v53  ;;  %v10142_v47 = vld [vmem:[%s11480_s15 + $0x630] ss:$8 sps:$4 sm:$0xff]  }
 0x27d   : > { %8083 = vmatprep.subr.bf16.mxu1 %v10078_v54  ;;  %8507 = vmatprep.subr.bf16.mxu0 %v10081_v55  ;;  %v10145_v53 = vld [vmem:[%s11480_s15 + $0xe30] ss:$8 sps:$4 sm:$0xff]   ;;  %v10150_v54 = vld [vmem:[%s11480_s15 + $0x644] ss:$8 sps:$4 sm:$0xff]  }
 0x27e   : > { %v10153_v55 = vld [vmem:[%s11480_s15 + $0xe44] ss:$8 sps:$4 sm:$0xff]  }
 0x280   : > { %8084 = vmatpush1.bf16.msra.mxu1 %v10076_v56  ;;  %8508 = vmatpush1.bf16.msra.mxu0 %v10079_v57  ;;  %v10148_v56 = vld [vmem:[%s11480_s15 + $0x640] ss:$8 sps:$4 sm:$0xff]  }
 0x281   : > { %8085 = vmatprep.subr.bf16.mxu1 %v10084_v60  ;;  %8509 = vmatprep.subr.bf16.mxu0 %v10087_v61  ;;  %v10151_v57 = vld [vmem:[%s11480_s15 + $0xe40] ss:$8 sps:$4 sm:$0xff]   ;;  %v10156_v60 = vld [vmem:[%s11480_s15 + $0x654] ss:$8 sps:$4 sm:$0xff]  }
 0x282   : > { %v10159_v61 = vld [vmem:[%s11480_s15 + $0xe54] ss:$8 sps:$4 sm:$0xff]  }
 0x284   : > { %8086 = vmatpush1.bf16.msra.mxu1 %v10082_v4  ;;  %8510 = vmatpush1.bf16.msra.mxu0 %v10085_v7  ;;  %v10154_v4 = vld [vmem:[%s11480_s15 + $0x650] ss:$8 sps:$4 sm:$0xff]  }
 0x285   : > { %8087 = vmatprep.subr.bf16.mxu1 %v10090_v8  ;;  %8511 = vmatprep.subr.bf16.mxu0 %v10093_v9  ;;  %v10157_v7 = vld [vmem:[%s11480_s15 + $0xe50] ss:$8 sps:$4 sm:$0xff]   ;;  %v10162_v8 = vld [vmem:[%s11480_s15 + $0x664] ss:$8 sps:$4 sm:$0xff]  }
 0x286   : > { %v10165_v9 = vld [vmem:[%s11480_s15 + $0xe64] ss:$8 sps:$4 sm:$0xff]  }
 0x288   : > { %8088 = vmatpush1.bf16.msra.mxu1 %v10088_v10  ;;  %8512 = vmatpush1.bf16.msra.mxu0 %v10091_v58  ;;  %v10160_v10 = vld [vmem:[%s11480_s15 + $0x660] ss:$8 sps:$4 sm:$0xff]  }
 0x289   : > { %8089 = vmatprep.subr.bf16.mxu1 %v10096_v59  ;;  %8513 = vmatprep.subr.bf16.mxu0 %v10099_v62  ;;  %v10163_v58 = vld [vmem:[%s11480_s15 + $0xe60] ss:$8 sps:$4 sm:$0xff]   ;;  %v10168_v59 = vld [vmem:[%s11480_s15 + $0x674] ss:$8 sps:$4 sm:$0xff]  }
 0x28a   : > { %v10171_v62 = vld [vmem:[%s11480_s15 + $0xe74] ss:$8 sps:$4 sm:$0xff]  }
 0x28c   : > { %8090 = vmatpush1.bf16.msra.mxu1 %v10094_v63  ;;  %8514 = vmatpush1.bf16.msra.mxu0 %v10097_v11  ;;  %v10166_v63 = vld [vmem:[%s11480_s15 + $0x670] ss:$8 sps:$4 sm:$0xff]  }
 0x28d   : > { %8091 = vmatprep.subr.bf16.mxu1 %v10102_v12  ;;  %8515 = vmatprep.subr.bf16.mxu0 %v10105_v13  ;;  %v10169_v11 = vld [vmem:[%s11480_s15 + $0xe70] ss:$8 sps:$4 sm:$0xff]   ;;  %v10174_v12 = vld [vmem:[%s11480_s15 + $0x684] ss:$8 sps:$4 sm:$0xff]  }
 0x28e   : > { %v10177_v13 = vld [vmem:[%s11480_s15 + $0xe84] ss:$8 sps:$4 sm:$0xff]  }
 0x290   : > { %8092 = vmatpush1.bf16.msra.mxu1 %v10100_v14  ;;  %8516 = vmatpush1.bf16.msra.mxu0 %v10103_v15  ;;  %v10172_v14 = vld [vmem:[%s11480_s15 + $0x680] ss:$8 sps:$4 sm:$0xff]  }
 0x291   : > { %8093 = vmatprep.subr.bf16.mxu1 %v10108_v18  ;;  %8517 = vmatprep.subr.bf16.mxu0 %v10111_v19  ;;  %v10175_v15 = vld [vmem:[%s11480_s15 + $0xe80] ss:$8 sps:$4 sm:$0xff]   ;;  %v10180_v18 = vld [vmem:[%s11480_s15 + $0x694] ss:$8 sps:$4 sm:$0xff]  }
 0x292   : > { %v10183_v19 = vld [vmem:[%s11480_s15 + $0xe94] ss:$8 sps:$4 sm:$0xff]  }
 0x294   : > { %8094 = vmatpush1.bf16.msra.mxu1 %v10106_v22  ;;  %8518 = vmatpush1.bf16.msra.mxu0 %v10109_v23  ;;  %v10178_v22 = vld [vmem:[%s11480_s15 + $0x690] ss:$8 sps:$4 sm:$0xff]  }
 0x295   : > { %8095 = vmatprep.subr.bf16.mxu1 %v10114_v24  ;;  %8519 = vmatprep.subr.bf16.mxu0 %v10117_v25  ;;  %v10181_v23 = vld [vmem:[%s11480_s15 + $0xe90] ss:$8 sps:$4 sm:$0xff]   ;;  %v10186_v24 = vld [vmem:[%s11480_s15 + $0x6a4] ss:$8 sps:$4 sm:$0xff]  }
 0x296   : > { %v10189_v25 = vld [vmem:[%s11480_s15 + $0xea4] ss:$8 sps:$4 sm:$0xff]  }
 0x298   : > { %8096 = vmatpush1.bf16.msra.mxu1 %v10112_v26  ;;  %8520 = vmatpush1.bf16.msra.mxu0 %v10115_v27  ;;  %v10184_v26 = vld [vmem:[%s11480_s15 + $0x6a0] ss:$8 sps:$4 sm:$0xff]  }
 0x299   : > { %8097 = vmatprep.subr.bf16.mxu1 %v10120_v28  ;;  %8521 = vmatprep.subr.bf16.mxu0 %v10123_v29  ;;  %v10187_v27 = vld [vmem:[%s11480_s15 + $0xea0] ss:$8 sps:$4 sm:$0xff]   ;;  %v10192_v28 = vld [vmem:[%s11480_s15 + $0x6b4] ss:$8 sps:$4 sm:$0xff]  }
 0x29a   : > { %v10195_v29 = vld [vmem:[%s11480_s15 + $0xeb4] ss:$8 sps:$4 sm:$0xff]  }
 0x29c   : > { %8098 = vmatpush1.bf16.msra.mxu1 %v10118_v0  ;;  %8522 = vmatpush1.bf16.msra.mxu0 %v10121_v1  ;;  %v10190_v0 = vld [vmem:[%s11480_s15 + $0x6b0] ss:$8 sps:$4 sm:$0xff]  }
 0x29d   : > { %8120 = vmatprep.subr.bf16.mxu1 %v10126_v16  ;;  %8544 = vmatprep.subr.bf16.mxu0 %v10129_v17  ;;  %v10193_v1 = vld [vmem:[%s11480_s15 + $0xeb0] ss:$8 sps:$4 sm:$0xff]   ;;  %v10198_v16 = vld [vmem:[%s11480_s15 + $0x6c4] ss:$8 sps:$4 sm:$0xff]  }
 0x29e   : > { %v10201_v17 = vld [vmem:[%s11480_s15 + $0xec4] ss:$8 sps:$4 sm:$0xff]  }
 0x29f   : > { %8100 = vmatmul.mubr.bf16.vlgmr.msra.gmra.mrb[0].mxu1 %v8815_v6  ;;  %8524 = vmatmul.mubr.bf16.vlgmr.msra.gmra.mrb[0].mxu0 %v8831_v30  ;;  %v10199_v6 = vld [vmem:[%s11480_s15 + $0xec0] ss:$8 sps:$4 sm:$0xff]   ;;  %v10204_v30 = vld [vmem:[%s11480_s15 + $0x6d4] ss:$8 sps:$4 sm:$0xff]  }
 0x2a0   : > { %8121 = vmatpush1.bf16.msra.mxu1 %v10124_v20  ;;  %8545 = vmatpush1.bf16.msra.mxu0 %v10127_v21  ;;  %v10210_v20 = vld [vmem:[%s11480_s15 + $0x6e4] ss:$8 sps:$4 sm:$0xff]  }
 0x2a1   : > { %8122 = vmatprep.subr.bf16.mxu1 %v10132_v3  ;;  %8546 = vmatprep.subr.bf16.mxu0 %v10135_v2  ;;  %v10213_v21 = vld [vmem:[%s11480_s15 + $0xee4] ss:$8 sps:$4 sm:$0xff]   ;;  %v10208_v3 = vld [vmem:[%s11480_s15 + $0x6e0] ss:$8 sps:$4 sm:$0xff]  }
 0x2a2   : > { %8109 = vmatprep.mubr.bf16.mxu1 %v8848_v34  ;;  %8533 = vmatprep.mubr.bf16.mxu0 %v8864_v35  ;;  %v10211_v2 = vld [vmem:[%s11480_s15 + $0xee0] ss:$8 sps:$4 sm:$0xff]   ;;  %v10216_v34 = vld [vmem:[%s11480_s15 + $0x6f4] ss:$8 sps:$4 sm:$0xff]  }
 0x2a3   : > { %v10219_v35 = vld [vmem:[%s11480_s15 + $0xef4] ss:$8 sps:$4 sm:$0xff]  }
 0x2a4   : > { %8123 = vmatpush1.bf16.msra.mxu1 %v10130_v36  ;;  %8547 = vmatpush1.bf16.msra.mxu0 %v10133_v37  ;;  %v10214_v36 = vld [vmem:[%s11480_s15 + $0x6f0] ss:$8 sps:$4 sm:$0xff]  }
 0x2a5   : > { %8124 = vmatprep.subr.bf16.mxu1 %v10138_v38  ;;  %8548 = vmatprep.subr.bf16.mxu0 %v10141_v39  ;;  %v10217_v37 = vld [vmem:[%s11480_s15 + $0xef0] ss:$8 sps:$4 sm:$0xff]   ;;  %v10222_v38 = vld [vmem:[%s11480_s15 + $0x704] ss:$8 sps:$4 sm:$0xff]  }
 0x2a6   : > { %v10225_v39 = vld [vmem:[%s11480_s15 + $0xf04] ss:$8 sps:$4 sm:$0xff]  }
 0x2a7   : > { %8110 = vmatmul.mubr.bf16.gmra.mrb[4].mxu1 %v8847_v41  ;;  %8534 = vmatmul.mubr.bf16.gmra.mrb[4].mxu0 %v8863_v44  ;;  %v4384_v41 = vld [vmem:[%s12333_s0 + $0x130] sm:$0xff]  ;;  %v8817_v44 = vcombine.low %v12097_v40, %v12102_v45  ;;  %v10220_v40 = vld [vmem:[%s11480_s15 + $0x700] ss:$8 sps:$4 sm:$0xff]  }
 0x2a8   : > { %8125 = vmatpush1.bf16.msra.mxu1 %v10136_v50  ;;  %8549 = vmatpush1.bf16.msra.mxu0 %v10139_v51  ;;  %v8833_v50 = vcombine.low %v12107_v48, %v12112_v49  ;;  %v4400_v51 = vld [vmem:[%s12333_s0 + $0x1b0] sm:$0xff]  ;;  %v10223_v45 = vld [vmem:[%s11480_s15 + $0xf00] ss:$8 sps:$4 sm:$0xff]  }
 0x2a9   : > { %8126 = vmatprep.subr.bf16.mxu1 %v10144_v52  ;;  %8550 = vmatprep.subr.bf16.mxu0 %v10147_v42  ;;  %v4392_v52 = vld [vmem:[%s12333_s0 + $0x170] sm:$0xff] }
 0x2aa   : > { %8152 = vmatprep.mubr.bf16.mxu1 %v8818_v43  ;;  %8576 = vmatprep.mubr.bf16.mxu0 %v8834_v46  ;;  %v4408_v42 = vld [vmem:[%s12333_s0 + $0x1f0] sm:$0xff]  ;;  %v8850_v43 = vcombine.high %v4384_v41, %v4400_v51 }
 0x2ab   : > { %v10228_v48 = vld [vmem:[%s11480_s15 + $0x714] ss:$8 sps:$4 sm:$0xff]   ;;  %v8866_v46 = vcombine.high %v4392_v52, %v4408_v42 }
 0x2ac   : > { %8127 = vmatpush1.bf16.msra.mxu1 %v10142_v47  ;;  %8551 = vmatpush1.bf16.msra.mxu0 %v10145_v53  ;;  %v10231_v49 = vld [vmem:[%s11480_s15 + $0xf14] ss:$8 sps:$4 sm:$0xff]   ;;  %v10226_v47 = vld [vmem:[%s11480_s15 + $0x710] ss:$8 sps:$4 sm:$0xff]  }
 0x2ad   : > { %8128 = vmatprep.subr.bf16.mxu1 %v10150_v54  ;;  %8552 = vmatprep.subr.bf16.mxu0 %v10153_v55  ;;  %v10229_v53 = vld [vmem:[%s11480_s15 + $0xf10] ss:$8 sps:$4 sm:$0xff]   ;;  %v10234_v54 = vld [vmem:[%s11480_s15 + $0x724] ss:$8 sps:$4 sm:$0xff]  }
 0x2ae   : > { %v10237_v55 = vld [vmem:[%s11480_s15 + $0xf24] ss:$8 sps:$4 sm:$0xff]  }
 0x2b0   : > { %8129 = vmatpush1.bf16.msra.mxu1 %v10148_v56  ;;  %8553 = vmatpush1.bf16.msra.mxu0 %v10151_v57  ;;  %v12201_v56 = vld [vmem:[%s12333_s0 + $0x38] sm:$0xff]  ;;  %v8849_v57 = vcombine.low %v4384_v41, %v4400_v51  ;;  %v10292_v41 = vld [vmem:[%s11480_s15 + $0x7c0] ss:$8 sps:$4 sm:$0xff]  }
 0x2b1   : > { %8130 = vmatprep.subr.bf16.mxu1 %v10156_v60  ;;  %8554 = vmatprep.subr.bf16.mxu0 %v10159_v61  ;;  %v8865_v60 = vcombine.low %v4392_v52, %v4408_v42  ;;  %v12206_v61 = vld [vmem:[%s12333_s0 + $0xb8] sm:$0xff] }
 0x2b2   : > { %v10303_v51 = vld [vmem:[%s11480_s15 + $0xfd4] ss:$8 sps:$4 sm:$0xff]   ;;  %v10298_v52 = vld [vmem:[%s11480_s15 + $0x7d0] ss:$8 sps:$4 sm:$0xff]  }
 0x2b3   : > { %v10301_v42 = vld [vmem:[%s11480_s15 + $0xfd0] ss:$8 sps:$4 sm:$0xff]  }
 0x2b4   : > { %8131 = vmatpush1.bf16.msra.mxu1 %v10154_v4  ;;  %8555 = vmatpush1.bf16.msra.mxu0 %v10157_v7  ;;  %v12211_v4 = vld [vmem:[%s12333_s0 + $0x78] sm:$0xff] }
 0x2b5   : > { %8132 = vmatprep.subr.bf16.mxu1 %v10162_v8  ;;  %8556 = vmatprep.subr.bf16.mxu0 %v10165_v9  ;;  %v12216_v7 = vld [vmem:[%s12333_s0 + $0xf8] sm:$0xff]  ;;  %v10232_v8 = vld [vmem:[%s11480_s15 + $0x720] ss:$8 sps:$4 sm:$0xff]  }
 0x2b6   : > { %v10235_v9 = vld [vmem:[%s11480_s15 + $0xf20] ss:$8 sps:$4 sm:$0xff]  }
 0x2b8   : > { %8133 = vmatpush1.bf16.msra.mxu1 %v10160_v10  ;;  %8557 = vmatpush1.bf16.msra.mxu0 %v10163_v58  ;;  %v10240_v10 = vld [vmem:[%s11480_s15 + $0x734] ss:$8 sps:$4 sm:$0xff]  }
 0x2b9   : > { %8134 = vmatprep.subr.bf16.mxu1 %v10168_v59  ;;  %8558 = vmatprep.subr.bf16.mxu0 %v10171_v62  ;;  %v10243_v58 = vld [vmem:[%s11480_s15 + $0xf34] ss:$8 sps:$4 sm:$0xff]   ;;  %v8820_v59 = vcombine.high %v12201_v56, %v12206_v61  ;;  %v8836_v62 = vcombine.high %v12211_v4, %v12216_v7 }
 0x2bc   : > { %8135 = vmatpush1.bf16.msra.mxu1 %v10166_v63  ;;  %8559 = vmatpush1.bf16.msra.mxu0 %v10169_v11  ;;  %v10238_v63 = vld [vmem:[%s11480_s15 + $0x730] ss:$8 sps:$4 sm:$0xff]  }
 0x2bd   : > { %8136 = vmatprep.subr.bf16.mxu1 %v10174_v12  ;;  %8560 = vmatprep.subr.bf16.mxu0 %v10177_v13  ;;  %v10241_v11 = vld [vmem:[%s11480_s15 + $0xf30] ss:$8 sps:$4 sm:$0xff]   ;;  %v10246_v12 = vld [vmem:[%s11480_s15 + $0x744] ss:$8 sps:$4 sm:$0xff]  }
 0x2be   : > { %v10249_v13 = vld [vmem:[%s11480_s15 + $0xf44] ss:$8 sps:$4 sm:$0xff]  }
 0x2c0   : > { %8137 = vmatpush1.bf16.msra.mxu1 %v10172_v14  ;;  %8561 = vmatpush1.bf16.msra.mxu0 %v10175_v15  ;;  %v10244_v14 = vld [vmem:[%s11480_s15 + $0x740] ss:$8 sps:$4 sm:$0xff]  }
 0x2c1   : > { %8138 = vmatprep.subr.bf16.mxu1 %v10180_v18  ;;  %8562 = vmatprep.subr.bf16.mxu0 %v10183_v19  ;;  %v10247_v15 = vld [vmem:[%s11480_s15 + $0xf40] ss:$8 sps:$4 sm:$0xff]   ;;  %v10252_v18 = vld [vmem:[%s11480_s15 + $0x754] ss:$8 sps:$4 sm:$0xff]  }
 0x2c2   : > { %v10255_v19 = vld [vmem:[%s11480_s15 + $0xf54] ss:$8 sps:$4 sm:$0xff]  }
 0x2c4   : > { %8139 = vmatpush1.bf16.msra.mxu1 %v10178_v22  ;;  %8563 = vmatpush1.bf16.msra.mxu0 %v10181_v23  ;;  %v10250_v22 = vld [vmem:[%s11480_s15 + $0x750] ss:$8 sps:$4 sm:$0xff]  }
 0x2c5   : > { %8140 = vmatprep.subr.bf16.mxu1 %v10186_v24  ;;  %8564 = vmatprep.subr.bf16.mxu0 %v10189_v25  ;;  %v10253_v23 = vld [vmem:[%s11480_s15 + $0xf50] ss:$8 sps:$4 sm:$0xff]   ;;  %v10258_v24 = vld [vmem:[%s11480_s15 + $0x764] ss:$8 sps:$4 sm:$0xff]  }
 0x2c6   : > { %v10261_v25 = vld [vmem:[%s11480_s15 + $0xf64] ss:$8 sps:$4 sm:$0xff]  }
 0x2c8   : > { %8141 = vmatpush1.bf16.msra.mxu1 %v10184_v26  ;;  %8565 = vmatpush1.bf16.msra.mxu0 %v10187_v27  ;;  %v10256_v26 = vld [vmem:[%s11480_s15 + $0x760] ss:$8 sps:$4 sm:$0xff]  }
 0x2c9   : > { %8142 = vmatprep.subr.bf16.mxu1 %v10192_v28  ;;  %8566 = vmatprep.subr.bf16.mxu0 %v10195_v29  ;;  %v10259_v27 = vld [vmem:[%s11480_s15 + $0xf60] ss:$8 sps:$4 sm:$0xff]   ;;  %v10264_v28 = vld [vmem:[%s11480_s15 + $0x774] ss:$8 sps:$4 sm:$0xff]  }
 0x2ca   : > { %v10267_v29 = vld [vmem:[%s11480_s15 + $0xf74] ss:$8 sps:$4 sm:$0xff]  }
 0x2cc   : > { %8143 = vmatpush1.bf16.msra.mxu1 %v10190_v0  ;;  %8567 = vmatpush1.bf16.msra.mxu0 %v10193_v1  ;;  %v10262_v0 = vld [vmem:[%s11480_s15 + $0x770] ss:$8 sps:$4 sm:$0xff]  }
 0x2cd   : > { %8144 = vmatprep.subr.bf16.mxu1 %v10198_v16  ;;  %8568 = vmatprep.subr.bf16.mxu0 %v10201_v17  ;;  %v10265_v1 = vld [vmem:[%s11480_s15 + $0xf70] ss:$8 sps:$4 sm:$0xff]   ;;  %v10270_v16 = vld [vmem:[%s11480_s15 + $0x784] ss:$8 sps:$4 sm:$0xff]  }
 0x2ce   : > { %v10273_v17 = vld [vmem:[%s11480_s15 + $0xf84] ss:$8 sps:$4 sm:$0xff]  }
 0x2d0   : > { %8145 = vmatpush1.bf16.msra.mxu1 %v10196_v5  ;;  %8569 = vmatpush1.bf16.msra.mxu0 %v10199_v6  ;;  %v10268_v5 = vld [vmem:[%s11480_s15 + $0x780] ss:$8 sps:$4 sm:$0xff]  }
 0x2d1   : > { %8146 = vmatprep.subr.bf16.mxu1 %v10204_v30  ;;  %8570 = vmatprep.subr.bf16.mxu0 %v10207_v31  ;;  %v10271_v6 = vld [vmem:[%s11480_s15 + $0xf80] ss:$8 sps:$4 sm:$0xff]   ;;  %v10276_v30 = vld [vmem:[%s11480_s15 + $0x794] ss:$8 sps:$4 sm:$0xff]  }
 0x2d2   : > { %v10279_v31 = vld [vmem:[%s11480_s15 + $0xf94] ss:$8 sps:$4 sm:$0xff]  }
 0x2d4   : > { %8147 = vmatpush1.bf16.msra.mxu1 %v10202_v32  ;;  %8571 = vmatpush1.bf16.msra.mxu0 %v10205_v33  ;;  %v10274_v32 = vld [vmem:[%s11480_s15 + $0x790] ss:$8 sps:$4 sm:$0xff]  }
 0x2d5   : > { %8148 = vmatprep.subr.bf16.mxu1 %v10210_v20  ;;  %8572 = vmatprep.subr.bf16.mxu0 %v10213_v21  ;;  %v10277_v33 = vld [vmem:[%s11480_s15 + $0xf90] ss:$8 sps:$4 sm:$0xff]   ;;  %v10282_v20 = vld [vmem:[%s11480_s15 + $0x7a4] ss:$8 sps:$4 sm:$0xff]  }
 0x2d6   : > { %v10285_v21 = vld [vmem:[%s11480_s15 + $0xfa4] ss:$8 sps:$4 sm:$0xff]  }
 0x2d8   : > { %8149 = vmatpush1.bf16.msra.mxu1 %v10208_v3  ;;  %8573 = vmatpush1.bf16.msra.mxu0 %v10211_v2  ;;  %v10280_v3 = vld [vmem:[%s11480_s15 + $0x7a0] ss:$8 sps:$4 sm:$0xff]  }
 0x2d9   : > { %8150 = vmatprep.subr.bf16.mxu1 %v10216_v34  ;;  %8574 = vmatprep.subr.bf16.mxu0 %v10219_v35  ;;  %v10283_v2 = vld [vmem:[%s11480_s15 + $0xfa0] ss:$8 sps:$4 sm:$0xff]   ;;  %v10288_v34 = vld [vmem:[%s11480_s15 + $0x7b4] ss:$8 sps:$4 sm:$0xff]  }
 0x2da   : > { %v10291_v35 = vld [vmem:[%s11480_s15 + $0xfb4] ss:$8 sps:$4 sm:$0xff]  }
 0x2dc   : > { %8151 = vmatpush1.bf16.msra.mxu1 %v10214_v36  ;;  %8575 = vmatpush1.bf16.msra.mxu0 %v10217_v37  ;;  %v10286_v36 = vld [vmem:[%s11480_s15 + $0x7b0] ss:$8 sps:$4 sm:$0xff]  }
 0x2dd   : > { %8173 = vmatprep.subr.bf16.mxu1 %v10222_v38  ;;  %8597 = vmatprep.subr.bf16.mxu0 %v10225_v39  ;;  %v10289_v37 = vld [vmem:[%s11480_s15 + $0xfb0] ss:$8 sps:$4 sm:$0xff]   ;;  %v10294_v38 = vld [vmem:[%s11480_s15 + $0x7c4] ss:$8 sps:$4 sm:$0xff]  }
 0x2de   : > { %v10297_v39 = vld [vmem:[%s11480_s15 + $0xfc4] ss:$8 sps:$4 sm:$0xff]  }
 0x2df   : > { %8153 = vmatmul.mubr.bf16.vlgmr.msra.gmra.mrb[0].mxu1 %v8817_v44  ;;  %8577 = vmatmul.mubr.bf16.vlgmr.msra.gmra.mrb[0].mxu0 %v8833_v50  ;;  %v10295_v44 = vld [vmem:[%s11480_s15 + $0xfc0] ss:$8 sps:$4 sm:$0xff]   ;;  %v10300_v50 = vld [vmem:[%s11480_s15 + $0x7d4] ss:$8 sps:$4 sm:$0xff]  }
 0x2e0   : > { %8174 = vmatpush1.bf16.msra.mxu1 %v10220_v40  ;;  %8598 = vmatpush1.bf16.msra.mxu0 %v10223_v45  ;;  %v10306_v40 = vld [vmem:[%s11480_s15 + $0x7e4] ss:$8 sps:$4 sm:$0xff]  }
 0x2e1   : > { %8175 = vmatprep.subr.bf16.mxu1 %v10228_v48  ;;  %8599 = vmatprep.subr.bf16.mxu0 %v10231_v49  ;;  %v10309_v45 = vld [vmem:[%s11480_s15 + $0xfe4] ss:$8 sps:$4 sm:$0xff]   ;;  %v10304_v48 = vld [vmem:[%s11480_s15 + $0x7e0] ss:$8 sps:$4 sm:$0xff]  }
 0x2e2   : > { %8162 = vmatprep.mubr.bf16.mxu1 %v8850_v43  ;;  %8586 = vmatprep.mubr.bf16.mxu0 %v8866_v46  ;;  %v10307_v49 = vld [vmem:[%s11480_s15 + $0xfe0] ss:$8 sps:$4 sm:$0xff]   ;;  %v10312_v43 = vld [vmem:[%s11480_s15 + $0x7f4] ss:$8 sps:$4 sm:$0xff]  }
 0x2e3   : > { %v10315_v46 = vld [vmem:[%s11480_s15 + $0xff4] ss:$8 sps:$4 sm:$0xff]  }
 0x2e4   : > { %8176 = vmatpush1.bf16.msra.mxu1 %v10226_v47  ;;  %8600 = vmatpush1.bf16.msra.mxu0 %v10229_v53  ;;  %v10310_v47 = vld [vmem:[%s11480_s15 + $0x7f0] ss:$8 sps:$4 sm:$0xff]  }
 0x2e5   : > { %8177 = vmatprep.subr.bf16.mxu1 %v10234_v54  ;;  %8601 = vmatprep.subr.bf16.mxu0 %v10237_v55  ;;  %v10313_v53 = vld [vmem:[%s11480_s15 + $0xff0] ss:$8 sps:$4 sm:$0xff]   ;;  %s8804_s15 = sshll.u32 %s4310_s27, 6 }
 0x2e6   : > { %v4385_v54 = vld [vmem:[%s12333_s0 + $0x138] sm:$0xff]  ;;  %s12294_s3 = scalar_lea.vmem [#allocation3], %s8804_s15 }
 0x2e7   : > { %8163 = vmatmul.mubr.bf16.gmra.mrb[4].mxu1 %v8849_v57  ;;  %8587 = vmatmul.mubr.bf16.gmra.mrb[4].mxu0 %v8865_v60  ;;  %v4401_v55 = vld [vmem:[%s12333_s0 + $0x1b8] sm:$0xff] }
 0x2e8   : > { %8178 = vmatpush1.bf16.msra.mxu1 %v10232_v8  ;;  %8602 = vmatpush1.bf16.msra.mxu0 %v10235_v9  ;;  %v4393_v57 = vld [vmem:[%s12333_s0 + $0x178] sm:$0xff]  ;;  %v8819_v8 = vcombine.low %v12201_v56, %v12206_v61  ;;  %v8835_v9 = vcombine.low %v12211_v4, %v12216_v7 }
 0x2e9   : > { %8179 = vmatprep.subr.bf16.mxu1 %v10240_v10  ;;  %8603 = vmatprep.subr.bf16.mxu0 %v10243_v58  ;;  %v4409_v60 = vld [vmem:[%s12333_s0 + $0x1f8] sm:$0xff]  ;;  %v8852_v10 = vcombine.high %v4385_v54, %v4401_v55 }
 0x2ea   : > { %8205 = vmatprep.mubr.bf16.mxu1 %v8820_v59  ;;  %8629 = vmatprep.mubr.bf16.mxu0 %v8836_v62  ;;  %v8868_v58 = vcombine.high %v4393_v57, %v4409_v60  ;;  %v8851_v59 = vcombine.low %v4385_v54, %v4401_v55  ;;  %v8867_v62 = vcombine.low %v4393_v57, %v4409_v60 }
 0x2ec   : > { %8180 = vmatpush1.bf16.msra.mxu1 %v10238_v63  ;;  %8604 = vmatpush1.bf16.msra.mxu0 %v10241_v11 }
 0x2ed   : > { %8181 = vmatprep.subr.bf16.mxu1 %v10246_v12  ;;  %8605 = vmatprep.subr.bf16.mxu0 %v10249_v13 }
 0x2f0   : > { %8182 = vmatpush1.bf16.msra.mxu1 %v10244_v14  ;;  %8606 = vmatpush1.bf16.msra.mxu0 %v10247_v15 }
 0x2f1   : > { %8183 = vmatprep.subr.bf16.mxu1 %v10252_v18  ;;  %8607 = vmatprep.subr.bf16.mxu0 %v10255_v19 }
 0x2f4   : > { %8184 = vmatpush1.bf16.msra.mxu1 %v10250_v22  ;;  %8608 = vmatpush1.bf16.msra.mxu0 %v10253_v23 }
 0x2f5   : > { %8185 = vmatprep.subr.bf16.mxu1 %v10258_v24  ;;  %8609 = vmatprep.subr.bf16.mxu0 %v10261_v25 }
 0x2f8   : > { %8186 = vmatpush1.bf16.msra.mxu1 %v10256_v26  ;;  %8610 = vmatpush1.bf16.msra.mxu0 %v10259_v27 }
 0x2f9   : > { %8187 = vmatprep.subr.bf16.mxu1 %v10264_v28  ;;  %8611 = vmatprep.subr.bf16.mxu0 %v10267_v29 }
 0x2fc   : > { %8188 = vmatpush1.bf16.msra.mxu1 %v10262_v0  ;;  %8612 = vmatpush1.bf16.msra.mxu0 %v10265_v1 }
 0x2fd   : > { %8189 = vmatprep.subr.bf16.mxu1 %v10270_v16  ;;  %8613 = vmatprep.subr.bf16.mxu0 %v10273_v17 }
 0x300   : > { %8190 = vmatpush1.bf16.msra.mxu1 %v10268_v5  ;;  %8614 = vmatpush1.bf16.msra.mxu0 %v10271_v6 }
 0x301   : > { %8191 = vmatprep.subr.bf16.mxu1 %v10276_v30  ;;  %8615 = vmatprep.subr.bf16.mxu0 %v10279_v31 }
 0x304   : > { %8192 = vmatpush1.bf16.msra.mxu1 %v10274_v32  ;;  %8616 = vmatpush1.bf16.msra.mxu0 %v10277_v33 }
 0x305   : > { %8193 = vmatprep.subr.bf16.mxu1 %v10282_v20  ;;  %8617 = vmatprep.subr.bf16.mxu0 %v10285_v21 }
 0x308   : > { %8194 = vmatpush1.bf16.msra.mxu1 %v10280_v3  ;;  %8618 = vmatpush1.bf16.msra.mxu0 %v10283_v2 }
 0x309   : > { %8195 = vmatprep.subr.bf16.mxu1 %v10288_v34  ;;  %8619 = vmatprep.subr.bf16.mxu0 %v10291_v35 }
 0x30c   : > { %8196 = vmatpush1.bf16.msra.mxu1 %v10286_v36  ;;  %8620 = vmatpush1.bf16.msra.mxu0 %v10289_v37 }
 0x30d   : > { %8197 = vmatprep.subr.bf16.mxu1 %v10294_v38  ;;  %8621 = vmatprep.subr.bf16.mxu0 %v10297_v39 }
 0x310   : > { %8198 = vmatpush1.bf16.msra.mxu1 %v10292_v41  ;;  %8622 = vmatpush1.bf16.msra.mxu0 %v10295_v44 }
 0x311   : > { %8199 = vmatprep.subr.bf16.mxu1 %v10300_v50  ;;  %8623 = vmatprep.subr.bf16.mxu0 %v10303_v51 }
 0x314   : > { %8200 = vmatpush1.bf16.msra.mxu1 %v10298_v52  ;;  %8624 = vmatpush1.bf16.msra.mxu0 %v10301_v42 }
 0x315   : > { %8201 = vmatprep.subr.bf16.mxu1 %v10306_v40  ;;  %8625 = vmatprep.subr.bf16.mxu0 %v10309_v45 }
 0x318   : > { %8202 = vmatpush1.bf16.msra.mxu1 %v10304_v48  ;;  %8626 = vmatpush1.bf16.msra.mxu0 %v10307_v49 }
 0x319   : > { %8203 = vmatprep.subr.bf16.mxu1 %v10312_v43  ;;  %8627 = vmatprep.subr.bf16.mxu0 %v10315_v46 }
 0x31c   : > { %8204 = vmatpush1.bf16.msra.mxu1 %v10310_v47  ;;  %8628 = vmatpush1.bf16.msra.mxu0 %v10313_v53 }
 0x31f   : > { %8206 = vmatmul.mubr.bf16.vlgmr.msra.gmra.mrb[0].mxu1 %v8819_v8  ;;  %8630 = vmatmul.mubr.bf16.vlgmr.msra.gmra.mrb[0].mxu0 %v8835_v9 }
 0x320   : > { %8215 = vmatprep.mubr.bf16.mxu1 %v8852_v10  ;;  %8639 = vmatprep.mubr.bf16.mxu0 %v8868_v58 }
 0x327   : > { %8216 = vmatmul.mubr.bf16.gmra.mrb[4].mxu1 %v8851_v59  ;;  %8640 = vmatmul.mubr.bf16.gmra.mrb[4].mxu0 %v8867_v62 }
 0x3f2   : > { %v8207_v63 = vpop.f32.mrb[0].mxu1  ;;  %v8631_v11 = vpop.f32.mrb[0].mxu0 }
 0x3f3   : > { %v9388_v56 = vadd.f32 %v8631_v11, %v8207_v63  ;;  %v8209_v61 = vpop.f32.mrb[1].mxu1  ;;  %v8633_v12 = vpop.f32.mrb[1].mxu0 }
 0x3f4   : > { %v9389_v4 = vadd.f32 %v8633_v12, %v8209_v61  ;;  %v8211_v7 = vpop.f32.mrb[2].mxu1  ;;  %v8635_v13 = vpop.f32.mrb[2].mxu0 }
 0x3f5   : > { %8650 = vst [vmem:[%s12294_s3] sm:$0xff] %v9388_v56  ;;  %v9390_v14 = vadd.f32 %v8635_v13, %v8211_v7  ;;  %v8213_v15 = vpop.f32.mrb[3].mxu1  ;;  %v8637_v18 = vpop.f32.mrb[3].mxu0 }
 0x3f6   : > { %8651 = vst [vmem:[%s12294_s3 + $0x8] sm:$0xff] %v9389_v4  ;;  %v9391_v19 = vadd.f32 %v8637_v18, %v8213_v15 }
 0x3f7   : > { %8652 = vst [vmem:[%s12294_s3 + $0x10] sm:$0xff] %v9390_v14 }
 0x3f8   : > { %8653 = vst [vmem:[%s12294_s3 + $0x18] sm:$0xff] %v9391_v19 }
 0x3fa   : > { %v8217_v22 = vpop.f32.mrb[4].mxu1  ;;  %v8641_v23 = vpop.f32.mrb[4].mxu0  ;;  %8664 = sbr.rel (!%p10406_p6) target bundleno = 1033 (0x409), region = 84 }
 0x3fb   : > { %v9392_v24 = vadd.f32 %v8641_v23, %v8217_v22  ;;  %v8219_v25 = vpop.f32.mrb[5].mxu1  ;;  %v8643_v26 = vpop.f32.mrb[5].mxu0 }
 0x3fc   : > { %v9393_v27 = vadd.f32 %v8643_v26, %v8219_v25  ;;  %v8221_v28 = vpop.f32.mrb[6].mxu1  ;;  %v8645_v29 = vpop.f32.mrb[6].mxu0  ;;  %v8683_v5 = vld [vmem:[%s12294_s3] sm:$0xff] (%p10406_p6) }
 0x3fd   : > { %8654 = vst [vmem:[%s12294_s3 + $0x20] sm:$0xff] %v9392_v24  ;;  %v9394_v0 = vadd.f32 %v8645_v29, %v8221_v28  ;;  %v8223_v1 = vpop.f32.mrb[7].mxu1  ;;  %v8647_v16 = vpop.f32.mrb[7].mxu0  ;;  %v8685_v6 = vld [vmem:[%s12294_s3 + $0x8] sm:$0xff] (%p10406_p6)  ;;  %8684 = vst [vmem:[%s8670_s5] sm:$0xff] (%p10406_p6), %v8683_v5 }
 0x3fe   : > { %8655 = vst [vmem:[%s12294_s3 + $0x28] sm:$0xff] %v9393_v27  ;;  %v9395_v17 = vadd.f32 %v8647_v16, %v8223_v1  ;;  %v8687_v30 = vld [vmem:[%s12294_s3 + $0x10] sm:$0xff] (%p10406_p6)  ;;  %8686 = vst [vmem:[%s8670_s5 + $0x8] sm:$0xff] (%p10406_p6), %v8685_v6 }
 0x3ff   : > { %8656 = vst [vmem:[%s12294_s3 + $0x30] sm:$0xff] %v9394_v0  ;;  %v8689_v31 = vld [vmem:[%s12294_s3 + $0x18] sm:$0xff] (%p10406_p6)  ;;  %8688 = vst [vmem:[%s8670_s5 + $0x20] sm:$0xff] (%p10406_p6), %v8687_v30 }
 0x400   : > { %8657 = vst [vmem:[%s12294_s3 + $0x38] sm:$0xff] %v9395_v17  ;;  %8690 = vst [vmem:[%s8670_s5 + $0x28] sm:$0xff] (%p10406_p6), %v8689_v31 }
 0x404   : > { %v8691_v32 = vld [vmem:[%s12294_s3 + $0x20] sm:$0xff] }
 0x405   : > { %v8693_v33 = vld [vmem:[%s12294_s3 + $0x28] sm:$0xff]  ;;  %8692 = vst [vmem:[%s8670_s5 + $0x40] sm:$0xff] %v8691_v32 }
 0x406   : > { %8694 = vst [vmem:[%s8670_s5 + $0x48] sm:$0xff] %v8693_v33  ;;  %v8695_v20 = vld [vmem:[%s12294_s3 + $0x30] sm:$0xff] }
 0x407   : > { %v8697_v21 = vld [vmem:[%s12294_s3 + $0x38] sm:$0xff]  ;;  %8696 = vst [vmem:[%s8670_s5 + $0x60] sm:$0xff] %v8695_v20 }
 0x408   : > { %8698 = vst [vmem:[%s8670_s5 + $0x68] sm:$0xff] %v8697_v21 }
 0x409 PF: > { %s12_s13 = sadd.s32 1, %s10354_s13   ;;  %s12337_s9 = smov %s10342_s10 }
 0x40a   : > { %p9_p11 = scmp.ge.s32.totalorder %s12_s13, 4   ;;  %s12338_s10 = smov %s10411_s19 }
 0x40b   : > { %s12339_s11 = smov %s10350_s12  ;;  %s12340_s12 = smov %s12342_s14 }
 0x40c   :  { %11 = sbr.rel (!%p9_p11) target bundleno = 3 (0x3), region = 147 }

// kernel: discriminator_forward.13
= control target key start
LH: loop header
LB: loop body
LE: loop exit
PB: predicated region body
PF: predicated region fallthrough
CT: control target
= control target key end

     0   :  { %v533_v3 = vmov 0.0   ;;  %vm343_vm14 = vcmask 261120   ;;  %s805_s0 = inlined_call_operand.vmem [shape: f32[32,512], index: 0, kind: input, shape index: {}]   ;;  %s806_s1 = inlined_call_operand.vmem [shape: f32[1,512], index: 1, kind: input, shape index: {}]   ;;  %s807_s2 = inlined_call_operand.vmem [shape: f32[1,512], index: 2, kind: input, shape index: {}]   ;;  %s808_s3 = inlined_call_operand.vmem [shape: f32[32,512], index: 3, kind: input, shape index: {}]   ;;  %s809_s4 = inlined_call_operand.vmem [shape: f32[2,32], index: 4, kind: input, shape index: {}]   ;;  %s810_s5 = inlined_call_operand.vmem [shape: f32[2,1], index: 5, kind: output, shape index: {}]  }
   0x1   :  { %v20_v0 = vld [vmem:[%s805_s0] sm:$0xff]  ;;  %v21_v1 = vld [vmem:[%s805_s0 + $0x8] sm:$0xff]  ;;  %v22_v2 = vld [vmem:[%s805_s0 + $0x10] sm:$0xff]  ;;  %411 = vmatprep.mubr.f32.mxu0 %v533_v3  ;;  %482 = vmatprep.mubr.f32.mxu1 %v533_v3 }
   0x2   :  { %v23_v4 = vld [vmem:[%s805_s0 + $0x18] sm:$0xff]  ;;  %v24_v5 = vld [vmem:[%s805_s0 + $0x20] sm:$0xff]  ;;  %v25_v6 = vld [vmem:[%s805_s0 + $0x28] sm:$0xff] }
   0x3   :  { %v26_v7 = vld [vmem:[%s805_s0 + $0x30] sm:$0xff]  ;;  %v27_v8 = vld [vmem:[%s805_s0 + $0x38] sm:$0xff]  ;;  %v28_v9 = vld [vmem:[%s805_s0 + $0x40] sm:$0xff]  ;;  %v36_v10 = vadd.f32 %v24_v5, %v20_v0  ;;  %v45_v11 = vadd.f32 %v25_v6, %v21_v1 }
   0x4   :  { %v29_v12 = vld [vmem:[%s805_s0 + $0x48] sm:$0xff]  ;;  %v30_v13 = vld [vmem:[%s805_s0 + $0x50] sm:$0xff]  ;;  %v31_v14 = vld [vmem:[%s805_s0 + $0x58] sm:$0xff]  ;;  %v54_v15 = vadd.f32 %v26_v7, %v22_v2  ;;  %v63_v16 = vadd.f32 %v27_v8, %v23_v4 }
   0x5   :  { %v32_v17 = vld [vmem:[%s805_s0 + $0x60] sm:$0xff]  ;;  %v33_v18 = vld [vmem:[%s805_s0 + $0x68] sm:$0xff]  ;;  %v34_v19 = vld [vmem:[%s805_s0 + $0x70] sm:$0xff]  ;;  %v37_v20 = vadd.f32 %v36_v10, %v28_v9  ;;  %v46_v21 = vadd.f32 %v45_v11, %v29_v12 }
   0x6   :  { %v35_v22 = vld [vmem:[%s805_s0 + $0x78] sm:$0xff]  ;;  %v55_v23 = vadd.f32 %v54_v15, %v30_v13  ;;  %v64_v24 = vadd.f32 %v63_v16, %v31_v14 }
   0x7   :  { %v38_v25 = vadd.f32 %v37_v20, %v32_v17  ;;  %v47_v26 = vadd.f32 %v46_v21, %v33_v18 }
   0x8   :  { %v56_v27 = vadd.f32 %v55_v23, %v34_v19  ;;  %v65_v28 = vadd.f32 %v64_v24, %v35_v22 }
   0x9   :  { %v39_v29 = vrot.slane %v38_v25, 4  ;;  %v48_v30 = vrot.slane %v47_v26, 4 }
   0xa   :  { %v57_v31 = vrot.slane %v56_v27, 4  ;;  %v66_v32 = vrot.slane %v65_v28, 4 }
   0xb   :  { %v40_v33 = vadd.f32 %v39_v29, %v38_v25  ;;  %v49_v34 = vadd.f32 %v48_v30, %v47_v26 }
   0xc   :  { %v58_v35 = vadd.f32 %v57_v31, %v56_v27  ;;  %v67_v36 = vadd.f32 %v66_v32, %v65_v28 }
   0xd   :  { %v41_v37 = vrot.slane %v40_v33, 2  ;;  %v50_v38 = vrot.slane %v49_v34, 2 }
   0xe   :  { %v59_v39 = vrot.slane %v58_v35, 2  ;;  %v68_v40 = vrot.slane %v67_v36, 2 }
   0xf   :  { %v42_v41 = vadd.f32 %v41_v37, %v40_v33  ;;  %v51_v42 = vadd.f32 %v50_v38, %v49_v34 }
  0x10   :  { %v60_v43 = vadd.f32 %v59_v39, %v58_v35  ;;  %v69_v44 = vadd.f32 %v68_v40, %v67_v36 }
  0x11   :  { %v43_v45 = vrot.slane %v42_v41, 1  ;;  %v52_v46 = vrot.slane %v51_v42, 1 }
  0x12   :  { %v61_v47 = vrot.slane %v60_v43, 1  ;;  %v70_v48 = vrot.slane %v69_v44, 1 }
  0x13   :  { %v44_v49 = vadd.f32 %v43_v45, %v42_v41  ;;  %v53_v50 = vadd.f32 %v52_v46, %v51_v42 }
  0x14   :  { %v62_v51 = vadd.f32 %v61_v47, %v60_v43  ;;  %v71_v52 = vadd.f32 %v70_v48, %v69_v44 }
  0x15   :  { %v72_v53 = vmul.f32 0.03125, %v44_v49  ;;  %v73_v54 = vmul.f32 0.03125, %v53_v50 }
  0x16   :  { %v74_v55 = vmul.f32 0.03125, %v62_v51  ;;  %v75_v56 = vmul.f32 0.03125, %v71_v52 }
  0x17   :  { %v613_v57 = vsub.f32 %v20_v0, %v72_v53  ;;  %v615_v58 = vsub.f32 %v21_v1, %v73_v54  ;;  %v617_v59 = vsub.f32 %v24_v5, %v72_v53  ;;  %v619_v60 = vsub.f32 %v25_v6, %v73_v54 }
  0x18   :  { %v621_v61 = vsub.f32 %v22_v2, %v74_v55  ;;  %v623_v62 = vsub.f32 %v23_v4, %v75_v56  ;;  %v625_v63 = vsub.f32 %v26_v7, %v74_v55  ;;  %v627_v3 = vsub.f32 %v27_v8, %v75_v56 }
  0x19   :  { %v629_v10 = vsub.f32 %v28_v9, %v72_v53  ;;  %v631_v11 = vsub.f32 %v29_v12, %v73_v54  ;;  %v633_v0 = vsub.f32 %v30_v13, %v74_v55  ;;  %v635_v1 = vsub.f32 %v31_v14, %v75_v56 }
  0x1a   :  { %v637_v5 = vsub.f32 %v32_v17, %v72_v53  ;;  %v639_v6 = vsub.f32 %v33_v18, %v73_v54  ;;  %v641_v2 = vsub.f32 %v34_v19, %v74_v55  ;;  %v643_v4 = vsub.f32 %v35_v22, %v75_v56 }
  0x1b   :  { %v92_v7 = vmul.f32 %v613_v57, %v613_v57  ;;  %v93_v8 = vmul.f32 %v615_v58, %v615_v58  ;;  %v94_v9 = vmul.f32 %v621_v61, %v621_v61  ;;  %v95_v12 = vmul.f32 %v623_v62, %v623_v62 }
  0x1c   :  { %v96_v13 = vmul.f32 %v617_v59, %v617_v59  ;;  %v97_v14 = vmul.f32 %v619_v60, %v619_v60  ;;  %v98_v15 = vmul.f32 %v625_v63, %v625_v63  ;;  %v99_v16 = vmul.f32 %v627_v3, %v627_v3 }
  0x1d   :  { %v100_v17 = vmul.f32 %v629_v10, %v629_v10  ;;  %v101_v18 = vmul.f32 %v631_v11, %v631_v11  ;;  %v102_v19 = vmul.f32 %v633_v0, %v633_v0  ;;  %v103_v20 = vmul.f32 %v635_v1, %v635_v1 }
  0x1e   :  { %v104_v21 = vmul.f32 %v637_v5, %v637_v5  ;;  %v105_v22 = vmul.f32 %v639_v6, %v639_v6  ;;  %v106_v23 = vmul.f32 %v641_v2, %v641_v2  ;;  %v107_v24 = vmul.f32 %v643_v4, %v643_v4 }
  0x1f   :  { %v108_v25 = vadd.f32 %v96_v13, %v92_v7  ;;  %v117_v26 = vadd.f32 %v97_v14, %v93_v8  ;;  %v126_v27 = vadd.f32 %v98_v15, %v94_v9  ;;  %v135_v28 = vadd.f32 %v99_v16, %v95_v12 }
  0x21   :  { %v109_v29 = vadd.f32 %v108_v25, %v100_v17  ;;  %v118_v30 = vadd.f32 %v117_v26, %v101_v18  ;;  %v127_v31 = vadd.f32 %v126_v27, %v102_v19  ;;  %v136_v32 = vadd.f32 %v135_v28, %v103_v20 }
  0x23   :  { %v110_v33 = vadd.f32 %v109_v29, %v104_v21  ;;  %v119_v34 = vadd.f32 %v118_v30, %v105_v22  ;;  %v128_v35 = vadd.f32 %v127_v31, %v106_v23  ;;  %v137_v36 = vadd.f32 %v136_v32, %v107_v24 }
  0x24   :  { %v534_v21 = vmov 1966171168   ;;  %v166_v23 = vlaneseq }
  0x25   :  { %v111_v37 = vrot.slane %v110_v33, 4  ;;  %v120_v38 = vrot.slane %v119_v34, 4  ;;  %v129_v39 = vrot.slane %v128_v35, 4  ;;  %v138_v40 = vrot.slane %v137_v36, 4 }
  0x26   :  { %v164_v22 = vunpack.c.l.s4 %v534_v21  ;;  %v167_v25 = vshrl.u32 %v166_v23, 7 }
  0x27   :  { %v112_v41 = vadd.f32 %v111_v37, %v110_v33  ;;  %v121_v42 = vadd.f32 %v120_v38, %v119_v34  ;;  %v130_v43 = vadd.f32 %v129_v39, %v128_v35  ;;  %v139_v44 = vadd.f32 %v138_v40, %v137_v36  ;;  %v148_v36 = vld [vmem:[%s806_s1] sm:$0xf] }
  0x28   :  { %v165_v24 = vunpack.c.0.s8 %v164_v22  ;;  %v194_v37 = vsub.s32 1, %v167_v25  ;;  %v224_v39 = vld [vmem:[%s807_s2] sm:$0xf]  ;;  %v190_v40 = vsub.s32 0, %v167_v25 }
  0x29   :  { %v113_v45 = vrot.slane %v112_v41, 2  ;;  %v122_v46 = vrot.slane %v121_v42, 2  ;;  %v131_v47 = vrot.slane %v130_v43, 2  ;;  %v140_v48 = vrot.slane %v139_v44, 2 }
  0x2a   :  { %v168_v27 = vsub.s32 %v165_v24, %v167_v25 }
  0x2b   :  { %v114_v49 = vadd.f32 %v113_v45, %v112_v41  ;;  %v123_v50 = vadd.f32 %v122_v46, %v121_v42  ;;  %v132_v51 = vadd.f32 %v131_v47, %v130_v43  ;;  %v141_v52 = vadd.f32 %v140_v48, %v139_v44 }
  0x2c   :  { %v202_v41 = vsub.s32 3, %v167_v25  ;;  %v198_v42 = vsub.s32 2, %v167_v25  ;;  %v683_v44 = vrot.slane %v224_v39, %v194_v37  ;;  %v685_v45 = vrot.slane %v224_v39, %v190_v40 }
  0x2d   :  { %v115_v53 = vrot.slane %v114_v49, 1  ;;  %v124_v54 = vrot.slane %v123_v50, 1  ;;  %v133_v55 = vrot.slane %v132_v51, 1  ;;  %v142_v56 = vrot.slane %v141_v52, 1 }
  0x2f   :  { %v116_v7 = vadd.f32 %v115_v53, %v114_v49  ;;  %v125_v8 = vadd.f32 %v124_v54, %v123_v50  ;;  %v134_v9 = vadd.f32 %v133_v55, %v132_v51  ;;  %v143_v12 = vadd.f32 %v142_v56, %v141_v52 }
  0x30   :  { %v695_v50 = vrot.slane %v224_v39, %v202_v41  ;;  %v697_v51 = vrot.slane %v224_v39, %v198_v42  ;;  %v316_v39 = vld [vmem:[%s808_s3 + $0x30] sm:$0xff] }
  0x31   :  { %v144_v13 = vmul.f32 0.03125, %v116_v7  ;;  %v145_v14 = vmul.f32 0.03125, %v125_v8  ;;  %v146_v15 = vmul.f32 0.03125, %v134_v9  ;;  %v147_v16 = vmul.f32 0.03125, %v143_v12 }
  0x33   :  { %v149_v17 = vadd.f32 1e-05, %v144_v13  ;;  %v150_v18 = vadd.f32 1e-05, %v145_v14  ;;  %v151_v19 = vadd.f32 1e-05, %v146_v15 }
  0x34   :  { %v152_v20 = vadd.f32 1e-05, %v147_v16 }
  0x35   :  { %525 = vrsqrt.f32 %v149_v17 }
  0x36   :  { %527 = vrsqrt.f32 %v150_v18 }
  0x37   :  { %529 = vrsqrt.f32 %v151_v19 }
  0x38   :  { %531 = vrsqrt.f32 %v152_v20 }
  0x3f   :  { %v526_v26 = vpop.eup %525 }
  0x40   :  { %v528_v28 = vpop.eup %527 }
  0x41   :  { %v530_v29 = vpop.eup %529  ;;  %v161_v30 = vcombine.low %v526_v26, %v528_v28 }
  0x42   :  { %v532_v31 = vpop.eup %531 }
  0x43   :  { %v162_v32 = vcombine.low %v530_v29, %v532_v31  ;;  %v169_v33 = vrot.slane %v161_v30, %v168_v27  ;;  %v313_v30 = vld [vmem:[%s808_s3 + $0x18] sm:$0xff] }
  0x44   :  { %v317_v31 = vld [vmem:[%s808_s3 + $0x38] sm:$0xff] }
  0x45   :  { %v176_v34 = vrot.slane %v162_v32, %v168_v27 }
  0x47   :  { %v177_v35 = vcombine.low %v169_v33, %v176_v34  ;;  %v312_v34 = vld [vmem:[%s808_s3 + $0x10] sm:$0xff] }
  0x49   :  { %v184_v38 = vrot.slane %v177_v35, %v168_v27 }
  0x4b   :  { %v186_v43 = vmul.f32 %v184_v38, %v148_v36 }
  0x4d   :  { %v687_v46 = vrot.slane %v186_v43, %v194_v37  ;;  %v689_v47 = vrot.slane %v186_v43, %v190_v40  ;;  %v691_v48 = vrot.slane %v186_v43, %v202_v41  ;;  %v693_v49 = vrot.slane %v186_v43, %v198_v42 }
  0x4f   :  { %v209_v52 = vmul.f32 %v687_v46, %v615_v58  ;;  %v213_v53 = vmul.f32 %v687_v46, %v619_v60  ;;  %v208_v54 = vmul.f32 %v689_v47, %v613_v57  ;;  %v212_v55 = vmul.f32 %v689_v47, %v617_v59  ;;  %v311_v57 = vld [vmem:[%s808_s3 + $0x8] sm:$0xff] }
  0x50   :  { %v211_v56 = vmul.f32 %v691_v48, %v623_v62  ;;  %v215_v7 = vmul.f32 %v691_v48, %v627_v3  ;;  %v210_v8 = vmul.f32 %v693_v49, %v621_v61  ;;  %v214_v58 = vmul.f32 %v693_v49, %v625_v63  ;;  %v315_v3 = vld [vmem:[%s808_s3 + $0x28] sm:$0xff]  ;;  %v310_v61 = vld [vmem:[%s808_s3] sm:$0xff] }
  0x51   :  { %v247_v60 = vadd.f32 %v683_v44, %v209_v52  ;;  %v251_v9 = vadd.f32 %v683_v44, %v213_v53  ;;  %v246_v59 = vadd.f32 %v685_v45, %v208_v54  ;;  %v250_v62 = vadd.f32 %v685_v45, %v212_v55  ;;  %v314_v63 = vld [vmem:[%s808_s3 + $0x20] sm:$0xff] }
  0x52   :  { %v249_v12 = vadd.f32 %v695_v50, %v211_v56  ;;  %v253_v13 = vadd.f32 %v695_v50, %v215_v7  ;;  %v248_v14 = vadd.f32 %v697_v51, %v210_v8  ;;  %v252_v15 = vadd.f32 %v697_v51, %v214_v58 }
  0x53   :  { %vm263_vm0 = vcmp.ge.f32.partialorder %v247_v60, 0.0  ;;  %vm267_vm1 = vcmp.ge.f32.partialorder %v251_v9, 0.0  ;;  %v279_v16 = vmul.f32 0.2, %v247_v60  ;;  %v283_v17 = vmul.f32 0.2, %v251_v9 }
  0x54   :  { %vm262_vm2 = vcmp.ge.f32.partialorder %v246_v59, 0.0  ;;  %vm266_vm3 = vcmp.ge.f32.partialorder %v250_v62, 0.0  ;;  %v278_v18 = vmul.f32 0.2, %v246_v59  ;;  %v282_v19 = vmul.f32 0.2, %v250_v62 }
  0x55   :  { %v295_v20 = vsel %vm263_vm0, %v247_v60, %v279_v16  ;;  %v299_v21 = vsel %vm267_vm1, %v251_v9, %v283_v17  ;;  %vm265_vm4 = vcmp.ge.f32.partialorder %v249_v12, 0.0  ;;  %vm269_vm5 = vcmp.ge.f32.partialorder %v253_v13, 0.0  ;;  %v321_v16 = vld [vmem:[%s808_s3 + $0x58] sm:$0xff] }
  0x56   :  { %v327_v22 = vmul.f32 %v311_v57, %v295_v20  ;;  %v331_v23 = vmul.f32 %v315_v3, %v299_v21  ;;  %v294_v24 = vsel %vm262_vm2, %v246_v59, %v278_v18  ;;  %v298_v25 = vsel %vm266_vm3, %v250_v62, %v282_v19  ;;  %v319_v57 = vld [vmem:[%s808_s3 + $0x48] sm:$0xff]  ;;  %v322_v62 = vld [vmem:[%s808_s3 + $0x60] sm:$0xff]  ;;  %v325_v20 = vld [vmem:[%s808_s3 + $0x78] sm:$0xff] }
  0x57   :  { %v326_v26 = vmul.f32 %v310_v61, %v294_v24  ;;  %v330_v27 = vmul.f32 %v314_v63, %v298_v25  ;;  %v281_v28 = vmul.f32 0.2, %v249_v12  ;;  %v285_v29 = vmul.f32 0.2, %v253_v13 }
  0x58   :  { %v507_v32 = vpack.c.bf16 %v331_v23, %v327_v22  ;;  %vm264_vm6 = vcmp.ge.f32.partialorder %v248_v14, 0.0  ;;  %vm268_vm7 = vcmp.ge.f32.partialorder %v252_v15, 0.0  ;;  %v280_v33 = vmul.f32 0.2, %v248_v14 }
  0x59   :  { %v509_v35 = vpack.c.bf16 %v330_v27, %v326_v26  ;;  %v297_v36 = vsel %vm265_vm4, %v249_v12, %v281_v28  ;;  %v301_v37 = vsel %vm269_vm5, %v253_v13, %v285_v29  ;;  %v284_v38 = vmul.f32 0.2, %v252_v15 }
  0x5a   :  { %508 = vmatprep.subr.bf16.mxu0 %v507_v32  ;;  %v329_v40 = vmul.f32 %v313_v30, %v297_v36  ;;  %v333_v41 = vmul.f32 %v317_v31, %v301_v37  ;;  %v296_v42 = vsel %vm264_vm6, %v248_v14, %v280_v33  ;;  %v217_v43 = vmul.f32 %v687_v46, %v631_v11  ;;  %v342_v30 = vld [vmem:[%s809_s4] sm:$0x3]  ;;  %v324_v32 = vld [vmem:[%s808_s3 + $0x70] sm:$0xff] }
  0x5b   :  { %510 = vmatpush1.bf16.msra.mxu0 %v509_v35  ;;  %v300_v52 = vsel %vm268_vm7, %v252_v15, %v284_v38  ;;  %v328_v53 = vmul.f32 %v312_v34, %v296_v42  ;;  %v221_v54 = vmul.f32 %v687_v46, %v639_v6  ;;  %v216_v55 = vmul.f32 %v689_v47, %v629_v10 }
  0x5c   :  { %v515_v56 = vpack.c.bf16 %v333_v41, %v329_v40  ;;  %v332_v7 = vmul.f32 %v316_v39, %v300_v52  ;;  %v255_v8 = vadd.f32 %v683_v44, %v217_v43  ;;  %v220_v58 = vmul.f32 %v689_v47, %v637_v5  ;;  %v323_v5 = vld [vmem:[%s808_s3 + $0x68] sm:$0xff] }
  0x5d   :  { %v259_v60 = vadd.f32 %v683_v44, %v221_v54  ;;  %v254_v11 = vadd.f32 %v685_v45, %v216_v55  ;;  %v219_v9 = vmul.f32 %v691_v48, %v635_v1  ;;  %v223_v6 = vmul.f32 %v691_v48, %v643_v4  ;;  %v318_v1 = vld [vmem:[%s808_s3 + $0x40] sm:$0xff] }
  0x5e   :  { %516 = vmatprep.subr.bf16.mxu1 %v515_v56  ;;  %v517_v46 = vpack.c.bf16 %v332_v7, %v328_v53  ;;  %vm271_vm8 = vcmp.ge.f32.partialorder %v255_v8, 0.0  ;;  %v287_v10 = vmul.f32 0.2, %v255_v8  ;;  %v258_v44 = vadd.f32 %v685_v45, %v220_v58 }
  0x5f   :  { %vm275_vm9 = vcmp.ge.f32.partialorder %v259_v60, 0.0  ;;  %v291_v4 = vmul.f32 0.2, %v259_v60  ;;  %vm270_vm10 = vcmp.ge.f32.partialorder %v254_v11, 0.0  ;;  %v286_v47 = vmul.f32 0.2, %v254_v11 }
  0x60   :  { %518 = vmatpush1.bf16.msra.mxu1 %v517_v46  ;;  %v303_v48 = vsel %vm271_vm8, %v255_v8, %v287_v10  ;;  %vm274_vm11 = vcmp.ge.f32.partialorder %v258_v44, 0.0  ;;  %v290_v59 = vmul.f32 0.2, %v258_v44  ;;  %v257_v3 = vadd.f32 %v695_v50, %v219_v9 }
  0x61   :  { %v307_v61 = vsel %vm275_vm9, %v259_v60, %v291_v4  ;;  %v335_v45 = vmul.f32 %v319_v57, %v303_v48  ;;  %v302_v63 = vsel %vm270_vm10, %v254_v11, %v286_v47  ;;  %v261_v12 = vadd.f32 %v695_v50, %v223_v6 }
  0x62   :  { %v339_v13 = vmul.f32 %v323_v5, %v307_v61  ;;  %v306_v14 = vsel %vm274_vm11, %v258_v44, %v290_v59  ;;  %v334_v15 = vmul.f32 %v318_v1, %v302_v63  ;;  %vm273_vm12 = vcmp.ge.f32.partialorder %v257_v3, 0.0 }
  0x63   :  { %v338_v17 = vmul.f32 %v322_v62, %v306_v14  ;;  %vm277_vm13 = vcmp.ge.f32.partialorder %v261_v12, 0.0  ;;  %v289_v18 = vmul.f32 0.2, %v257_v3  ;;  %v293_v19 = vmul.f32 0.2, %v261_v12 }
  0x64   :  { %v511_v21 = vpack.c.bf16 %v339_v13, %v335_v45  ;;  %v218_v50 = vmul.f32 %v693_v49, %v633_v0  ;;  %v222_v22 = vmul.f32 %v693_v49, %v641_v2  ;;  %v320_v49 = vld [vmem:[%s808_s3 + $0x50] sm:$0xff]  ;;  %vm489_vm1 = vcmask 1041408  }
  0x65   :  { %v513_v23 = vpack.c.bf16 %v338_v17, %v334_v15  ;;  %v305_v24 = vsel %vm273_vm12, %v257_v3, %v289_v18  ;;  %v309_v25 = vsel %vm277_vm13, %v261_v12, %v293_v19  ;;  %vm499_vm2 = vcmask 1024  }
  0x66   :  { %512 = vmatprep.subr.bf16.mxu0 %v511_v21  ;;  %v337_v26 = vmul.f32 %v321_v16, %v305_v24  ;;  %v341_v27 = vmul.f32 %v325_v20, %v309_v25  ;;  %v256_v28 = vadd.f32 %v697_v51, %v218_v50  ;;  %v260_v29 = vadd.f32 %v697_v51, %v222_v22 }
  0x67   :  { %514 = vmatpush1.bf16.msra.mxu0 %v513_v23 }
  0x68   :  { %v519_v0 = vpack.c.bf16 %v341_v27, %v337_v26  ;;  %vm272_vm15 = vcmp.ge.f32.partialorder %v256_v28, 0.0  ;;  %vm276_vm0 = vcmp.ge.f32.partialorder %v260_v29, 0.0  ;;  %v288_v2 = vmul.f32 0.2, %v256_v28 }
  0x69   :  { %v292_v31 = vmul.f32 0.2, %v260_v29 }
  0x6a   :  { %520 = vmatprep.subr.bf16.mxu1 %v519_v0  ;;  %v304_v51 = vsel %vm272_vm15, %v256_v28, %v288_v2  ;;  %505 = vmatmul.mubr.msk.f32.vlgmr.msra.gmra.mrb[0].mxu0 %vm343_vm14, %v342_v30 }
  0x6b   :  { %v308_v33 = vsel %vm276_vm0, %v260_v29, %v292_v31  ;;  %v336_v34 = vmul.f32 %v320_v49, %v304_v51 }
  0x6c   :  { %v340_v35 = vmul.f32 %v324_v32, %v308_v33 }
  0x6e   :  { %v521_v36 = vpack.c.bf16 %v340_v35, %v336_v34 }
  0x70   :  { %522 = vmatpush1.bf16.msra.mxu1 %v521_v36 }
  0x73   :  { %506 = vmatmul.mubr.msk.f32.vlgmr.msra.gmra.mrb[0].mxu1 %vm343_vm14, %v342_v30 }
 0x13d   :  { %v413_v37 = vpop.f32.mrb[0].mxu0 }
 0x13e   :  { %v490_v38 = vsel %vm489_vm1, %v413_v37, 0.0  ;;  %v415_v39 = vpop.f32.mrb[1].mxu0 }
 0x13f   :  { %v491_v40 = vsel %vm489_vm1, %v415_v39, 0.0 }
 0x140   :  { %v492_v41 = vadd.f32 %v491_v40, %v490_v38 }
 0x146   :  { %v484_v42 = vpop.f32.mrb[0].mxu1 }
 0x147   :  { %v493_v43 = vsel %vm489_vm1, %v484_v42, 0.0  ;;  %v486_v52 = vpop.f32.mrb[1].mxu1 }
 0x148   :  { %v494_v53 = vadd.f32 %v493_v43, %v492_v41  ;;  %v495_v54 = vsel %vm489_vm1, %v486_v52, 0.0 }
 0x14a   :  { %v496_v55 = vadd.f32 %v495_v54, %v494_v53 }
 0x14c   :  { %497 = vadd.xlane.f32.xlu0 %v496_v55 }
 0x1d9   :  { %v498_v56 = vpop.xlane.xlu0 %497 }
 0x1da   :  { %500 = vst.msk [vmem:[%s810_s5] sm:$0x3] %vm499_vm2, %v498_v56 }

</bundles_post_ra>
